<compile_context>
chip_gen: v5e
topology: v5e:2x2
jax: 0.10.0
libtpu: 0.0.40
codegen_flags: <defaults>
</compile_context>

<pallas_src>
import functools

import jax
import jax.numpy as jnp
from jax.experimental import pallas as pl
from jax.experimental.pallas import tpu as pltpu

LN_EPS = 1e-5


def _round_up(x, m):
    return ((x + m - 1) // m) * m


def _attn_pool_kernel(q_ref, x_ref, lnk_w_ref, lnk_b_ref, wkv_ref, wo_ref,
                      o_ref, acc_ref, *, n_head, dhp, compute_dtype,
                      exact_softmax):
    # q_ref:    (n_head, Nqp, dhp)  pre-LN'd, projected, scaled, head-padded queries
    # x_ref:    (Bb, N, C)          current batch block (streamed from HBM)
    # lnk_*:    (1, C)              LayerNorm(context_dim) affine params
    # wkv_ref:  (C, 2*inner_p)      fused, head-padded [Wk^T | Wv^T]
    # wo_ref:   (inner_p, Dp)       head/D-padded Wo^T
    # o_ref:    (Bb, Nqp, Dp)
    # acc_ref:  (Bb, Nqp, inner_p)  VMEM scratch for per-head outputs
    block_b, n_tok, c_dim = x_ref.shape
    nqp = q_ref.shape[1]
    inner_p = n_head * dhp

    # ---- LayerNorm of the key/value input (f32 statistics) ----
    x = x_ref[...]                                            # (Bb, N, C) f32
    mean = jnp.mean(x, axis=-1, keepdims=True)
    xc = x - mean
    var = jnp.mean(xc * xc, axis=-1, keepdims=True)
    xk = (xc * jax.lax.rsqrt(var + LN_EPS) * lnk_w_ref[...]
          + lnk_b_ref[...]).astype(compute_dtype)

    # ---- fused K/V projection: ONE MXU pass over all Bb*N rows ----
    kv2d = jnp.dot(xk.reshape(block_b * n_tok, c_dim), wkv_ref[...],
                   preferred_element_type=jnp.float32)        # (Bb*N, 2*inner_p) f32
    kv2d = kv2d.astype(compute_dtype)
    kv3 = kv2d.reshape(block_b, n_tok, 2 * inner_p)           # leading-dim split: cheap

    # ---- per-head attention (static unroll: n_head is small, the batch loop is
    #      gone so live ranges stay modest, and every slice below is a static,
    #      128-lane-aligned slice thanks to dh -> dhp padding) ----
    for h in range(n_head):
        qh = q_ref[h]                                         # (Nqp, dhp), already *scale
        kh2d = kv2d[:, h * dhp:(h + 1) * dhp]                 # (Bb*N, dhp)
        vh3 = kv3[:, :, inner_p + h * dhp: inner_p + (h + 1) * dhp]  # (Bb, N, dhp)

        # batched scores for the whole batch block: one MXU pass, no k transpose.
        sim = jnp.einsum("qd,kd->qk", qh, kh2d,
                         preferred_element_type=jnp.float32)  # (Nqp, Bb*N) f32
        sim = sim.reshape(nqp, block_b, n_tok)                # per-batch groups
        sim = sim - jnp.max(sim, axis=-1, keepdims=True)
        e = jnp.exp(sim)
        denom = jnp.sum(e, axis=-1, keepdims=True)
        if exact_softmax:
            attn = (e / denom).astype(compute_dtype)
        else:
            attn = (e * pl.reciprocal(denom, approx=True)).astype(compute_dtype)
        attn = jnp.transpose(attn, (1, 0, 2))                 # (Bb, Nqp, N)

        # per-batch PV (batched over Bb, contraction N, 128-lane output)
        out_h = jnp.einsum("bqn,bnd->bqd", attn, vh3,
                           preferred_element_type=jnp.float32)  # (Bb, Nqp, dhp)
        acc_ref[:, :, h * dhp:(h + 1) * dhp] = out_h.astype(acc_ref.dtype)

    # ---- ONE batched output projection + single lane-dense whole-block store ----
    acc2d = acc_ref[...].reshape(block_b * nqp, inner_p)
    out = jnp.dot(acc2d, wo_ref[...],
                  preferred_element_type=jnp.float32)         # (Bb*Nqp, Dp)
    o_ref[...] = out.reshape(block_b, nqp, -1).astype(o_ref.dtype)


def _vmem_capacity_bytes():
    """Generation-aware per-core VMEM (falls back to the smallest, v7x = 64 MiB)."""
    try:
        return int(pltpu.get_tpu_info().vmem_capacity_bytes)
    except Exception:
        return 64 << 20


def _pick_block_b(B, N, C, Nqp, Dp, n_head, dhp, compute_dtype, capacity):
    """Largest divisor of B whose per-step footprint (block + temporaries) fits a
    generation-aware budget, preferring grid >= 4 (>= 2 steps per TensorCore on
    v7x's two cores), then >= 2, so the x DMA double-buffers against compute."""
    cs = jnp.dtype(compute_dtype).itemsize
    inner_p = n_head * dhp
    per_b = (N * C * (2 * 4 + 4 + cs)              # x block (2x buffered) + f32 copy + xk
             + N * 2 * inner_p * (4 + cs)          # kv f32 result + compute-dtype copy
             + 3 * Nqp * N * 4                     # sim / exp / attn (one head at a time)
             + Nqp * inner_p * (4 + cs)            # per-head out + acc scratch
             + Nqp * Dp * (2 * 4 + 4))             # out block (2x buffered) + proj result
    budget = max(per_b, capacity // 8)
    max_b = max(1, budget // per_b)
    divisors = [d for d in range(1, B + 1) if B % d == 0 and d <= max_b]
    if not divisors:
        return 1
    for min_steps in (4, 2, 1):
        good = [d for d in divisors if B // d >= min_steps]
        if good:
            return max(good)
    return max(divisors)


def _vmem_limit_bytes(N, C, Nqp, Dp, n_head, dhp, block_b, compute_dtype, capacity):
    """Scoped-VMEM request covering refs, scratch and the in-kernel temporaries,
    capped at 3/4 of the physical per-core VMEM (64 MiB on v7x, 128 on v5e/v6e)."""
    cs = jnp.dtype(compute_dtype).itemsize
    inner_p = n_head * dhp
    resident = (n_head * Nqp * dhp * cs + 2 * C * 4
                + C * 2 * inner_p * cs + inner_p * Dp * cs)    # single-buffered weights
    pipelined = 2 * block_b * (N * C * 4 + Nqp * Dp * 4)       # double-buffered x + out
    scratch = block_b * Nqp * inner_p * cs
    temps = block_b * (N * C * (4 + cs)                        # f32 x copy + xk
                       + N * 2 * inner_p * (4 + cs)            # kv f32 + compute-dtype
                       + 3 * Nqp * N * 4                       # sim / exp / attn
                       + Nqp * dhp * 4                         # per-head out
                       + Nqp * Dp * 4)                         # projection result
    est = resident + pipelined + scratch + temps
    cap = (capacity * 3) // 4
    return int(min(max(2 * est, 32 << 20), cap))


def attentional_pooler(x, params, *, n_head, compute_dtype=jnp.bfloat16,
                       block_b=None):
    """x: (B, N, context_dim) f32 -> (B, n_queries, d_model) f32."""
    B, N, C = x.shape
    query = params["query"]                     # (Nq, D)
    Nq, D = query.shape
    wq_t = params["wq_t"]                       # (D, inner)
    inner = wq_t.shape[1]
    assert inner % n_head == 0
    dh = inner // n_head
    scale = dh ** (-0.5)

    dhp = _round_up(dh, 128)                    # lane-aligned per-head dim
    inner_p = n_head * dhp
    Dp = _round_up(D, 128)                      # lane-dense output store
    Nqp = _round_up(Nq, 8)                      # sublane-aligned query rows

    exact_softmax = jnp.dtype(compute_dtype) == jnp.dtype(jnp.float32)

    # ---- hoisted batch-invariant query path (done once, outside the grid) ----
    qm = jnp.mean(query, axis=-1, keepdims=True)
    qc = query - qm
    qv = jnp.mean(qc * qc, axis=-1, keepdims=True)
    qn = qc * jax.lax.rsqrt(qv + LN_EPS) * params["lnq_w"] + params["lnq_b"]
    q = (qn @ wq_t) * scale                                    # (Nq, inner) f32
    q = q.reshape(Nq, n_head, dh)
    q = jnp.pad(q, ((0, Nqp - Nq), (0, 0), (0, dhp - dh)))     # zero pad: exact
    q_heads = jnp.transpose(q, (1, 0, 2)).astype(compute_dtype)  # (H, Nqp, dhp)

    # ---- head-padded weights (zero padding keeps results exact) ----
    wkv = params["wkv_t"].reshape(C, 2, n_head, dh)
    wkv_p = jnp.pad(wkv, ((0, 0), (0, 0), (0, 0), (0, dhp - dh)))
    wkv_p = wkv_p.reshape(C, 2 * inner_p).astype(compute_dtype)  # (C, 2*inner_p)

    wo = params["wo_t"].reshape(n_head, dh, D)
    wo_p = jnp.pad(wo, ((0, 0), (0, dhp - dh), (0, Dp - D)))
    wo_p = wo_p.reshape(inner_p, Dp).astype(compute_dtype)       # (inner_p, Dp)

    capacity = _vmem_capacity_bytes()
    if block_b is None:
        block_b = _pick_block_b(B, N, C, Nqp, Dp, n_head, dhp, compute_dtype,
                                capacity)
    assert B % block_b == 0, (B, block_b)

    kernel = functools.partial(_attn_pool_kernel, n_head=n_head, dhp=dhp,
                               compute_dtype=compute_dtype,
                               exact_softmax=exact_softmax)
    vmem_limit = _vmem_limit_bytes(N, C, Nqp, Dp, n_head, dhp, block_b,
                                   compute_dtype, capacity)

    def build_call(single_buffer_weights):
        if single_buffer_weights:
            # Constant-index-map operands never change across grid steps; a single
            # pipeline buffer reclaims their (useless) second VMEM buffer.
            def resident(shape):
                return pl.BlockSpec(shape, lambda *_: (0,) * len(shape),
                                    pipeline_mode=pl.Buffered(1))
        else:
            def resident(shape):
                return pl.BlockSpec(shape, lambda *_: (0,) * len(shape))
        return pl.pallas_call(
            kernel,
            out_shape=jax.ShapeDtypeStruct((B, Nqp, Dp), jnp.float32),
            grid_spec=pltpu.PrefetchScalarGridSpec(
                num_scalar_prefetch=0,
                grid=(B // block_b,),
                in_specs=[
                    resident((n_head, Nqp, dhp)),                        # queries
                    pl.BlockSpec((block_b, N, C), lambda i: (i, 0, 0)),  # x block
                    resident((1, C)),                                    # ln_k weight
                    resident((1, C)),                                    # ln_k bias
                    resident((C, 2 * inner_p)),                          # [Wk|Wv]^T
                    resident((inner_p, Dp)),                             # Wo^T
                ],
                out_specs=pl.BlockSpec((block_b, Nqp, Dp), lambda i: (i, 0, 0)),
                scratch_shapes=[pltpu.VMEM((block_b, Nqp, inner_p), compute_dtype)],
            ),
            compiler_params=pltpu.CompilerParams(
                dimension_semantics=("parallel",),
                vmem_limit_bytes=vmem_limit),
        )

    args = (q_heads, x, params["lnk_w"], params["lnk_b"], wkv_p, wo_p)
    try:
        out_padded = build_call(True)(*args)
    except Exception:
        # Fallback if this jax/Mosaic build rejects pl.Buffered(1) single
        # buffering; numerics are identical, only VMEM footprint differs.
        out_padded = build_call(False)(*args)

    return out_padded[:, :Nq, :D]


def attentional_pooler_ref(x, params, *, n_head):
    """Pure-JAX f32 reference mirroring the PyTorch forward (t = 1)."""
    query = params["query"]
    Nq, D = query.shape
    wq_t = params["wq_t"]
    inner = wq_t.shape[1]
    dh = inner // n_head
    scale = dh ** (-0.5)
    wk_t = params["wkv_t"][:, :inner]
    wv_t = params["wkv_t"][:, inner:]

    def ln(t, w, b):
        mean = jnp.mean(t, axis=-1, keepdims=True)
        var = jnp.mean((t - mean) ** 2, axis=-1, keepdims=True)
        return (t - mean) / jnp.sqrt(var + LN_EPS) * w + b

    xk = ln(x, params["lnk_w"][0], params["lnk_b"][0])           # (B, N, C)
    qn = ln(query, params["lnq_w"][0], params["lnq_b"][0])       # (Nq, D)
    q = qn @ wq_t                                                # (Nq, inner)
    k = xk @ wk_t                                                # (B, N, inner)
    v = xk @ wv_t                                                # (B, N, inner)

    B, N, _ = x.shape
    qh = q.reshape(Nq, n_head, dh).transpose(1, 0, 2) * scale    # (h, Nq, dh)
    kh = k.reshape(B, N, n_head, dh).transpose(0, 2, 1, 3)       # (B, h, N, dh)
    vh = v.reshape(B, N, n_head, dh).transpose(0, 2, 1, 3)       # (B, h, N, dh)
    sim = jnp.einsum("hid,bhjd->bhij", qh, kh)
    sim = sim - jnp.max(sim, axis=-1, keepdims=True)
    attn = jax.nn.softmax(sim, axis=-1)
    out = jnp.einsum("bhij,bhjd->bhid", attn, vh)                # (B, h, Nq, dh)
    out = out.transpose(0, 2, 1, 3).reshape(B, Nq, inner)
    return out @ params["wo_t"]                                  # (B, Nq, D)


def make_params(key, d_model, context_dim, n_head, n_queries):
    dh = d_model // n_head
    inner = dh * n_head
    ks = jax.random.split(key, 8)
    # nn.Linear stores weight as (out, in); pre-transpose to (in, out).
    wq = jax.random.normal(ks[0], (inner, d_model), jnp.float32) * 0.05
    wkv = jax.random.normal(ks[1], (2 * inner, context_dim), jnp.float32) * 0.05
    wo = jax.random.normal(ks[2], (d_model, inner), jnp.float32) * 0.05
    return {
        "query": jax.random.normal(ks[3], (n_queries, d_model), jnp.float32),
        "lnk_w": 1.0 + 0.1 * jax.random.normal(ks[4], (1, context_dim), jnp.float32),
        "lnk_b": 0.1 * jax.random.normal(ks[5], (1, context_dim), jnp.float32),
        "lnq_w": 1.0 + 0.1 * jax.random.normal(ks[6], (1, d_model), jnp.float32),
        "lnq_b": 0.1 * jax.random.normal(ks[7], (1, d_model), jnp.float32),
        "wq_t": wq.T,                        # (d_model, inner)
        "wkv_t": wkv.T,                      # (context_dim, 2*inner)  [Wk^T | Wv^T]
        "wo_t": wo.T,                        # (inner, d_model)
    }


if __name__ == "__main__":
    d_model, context_dim, n_head, n_queries = 32, 32, 4, 16
    batch, seq = 2, 8

    key = jax.random.PRNGKey(0)
    kx, kp = jax.random.split(key)
    x = jax.random.normal(kx, (batch, seq, context_dim), jnp.float32)
    params = make_params(kp, d_model, context_dim, n_head, n_queries)

    ref = attentional_pooler_ref(x, params, n_head=n_head)

    # f32 MXU path with exact softmax normalization: near-exact parity.
    out_f32 = jax.block_until_ready(
        attentional_pooler(x, params, n_head=n_head, compute_dtype=jnp.float32))
    assert out_f32.shape == (batch, n_queries, d_model), out_f32.shape
    assert jnp.allclose(out_f32, ref, atol=5e-3, rtol=5e-3), \
        float(jnp.max(jnp.abs(out_f32 - ref)))

    # default bf16 MXU path (f32 accumulation, f32 softmax stats): looser check.
    out_bf16 = jax.block_until_ready(
        attentional_pooler(x, params, n_head=n_head))
    assert out_bf16.shape == (batch, n_queries, d_model), out_bf16.shape
    assert jnp.allclose(out_bf16, ref, atol=2e-2, rtol=2e-2), \
        float(jnp.max(jnp.abs(out_bf16 - ref)))

    print("KERNEL_OK")
</pallas_src>

<mosaic_0001>
module attributes {stable_mosaic.version = 11 : i64} {
  func.func @_attn_pool_kernel(%arg0: i32, %arg1: memref<4x16x128xf32, #tpu.memory_space<vmem>>, %arg2: memref<1x8x32xf32, #tpu.memory_space<vmem>>, %arg3: memref<1x32xf32, #tpu.memory_space<vmem>>, %arg4: memref<1x32xf32, #tpu.memory_space<vmem>>, %arg5: memref<32x1024xf32, #tpu.memory_space<vmem>>, %arg6: memref<512x128xf32, #tpu.memory_space<vmem>>, %arg7: memref<1x16x128xf32, #tpu.memory_space<vmem>>, %arg8: memref<1x16x512xf32, #tpu.memory_space<vmem>>) attributes {dimension_semantics = [#tpu.dimension_semantics<parallel>], iteration_bounds = array<i64: 2>, scalar_prefetch = 0 : i64, scratch_operands = 1 : i64, tpu.core_type = #tpu.core_type<tc>, window_params = [{pipeline_mode = #tpu.pipeline_mode<synchronous>, transform_indices = @transform_0, window_bounds = array<i64: 4, 16, 128>}, {transform_indices = @transform_1, window_bounds = array<i64: 1, 8, 32>}, {pipeline_mode = #tpu.pipeline_mode<synchronous>, transform_indices = @transform_2, window_bounds = array<i64: 1, 32>}, {pipeline_mode = #tpu.pipeline_mode<synchronous>, transform_indices = @transform_3, window_bounds = array<i64: 1, 32>}, {pipeline_mode = #tpu.pipeline_mode<synchronous>, transform_indices = @transform_4, window_bounds = array<i64: 32, 1024>}, {pipeline_mode = #tpu.pipeline_mode<synchronous>, transform_indices = @transform_5, window_bounds = array<i64: 512, 128>}, {transform_indices = @transform_6, window_bounds = array<i64: 1, 16, 128>}]} {
    %c0 = arith.constant 0 : index
    %c0_0 = arith.constant 0 : index
    %c0_1 = arith.constant 0 : index
    %0 = vector.load %arg2[%c0, %c0_0, %c0_1] : memref<1x8x32xf32, #tpu.memory_space<vmem>>, vector<1x8x32xf32>
    %cst = arith.constant dense<0.000000e+00> : vector<1x8xf32>
    %1 = vector.multi_reduction <add>, %0, %cst [2] : vector<1x8x32xf32> to vector<1x8xf32>
    %2 = vector.shape_cast %1 : vector<1x8xf32> to vector<1x8x1xf32>
    %cst_2 = arith.constant 3.200000e+01 : f32
    %3 = vector.broadcast %cst_2 : f32 to vector<1x8x1xf32>
    %4 = arith.divf %2, %3 : vector<1x8x1xf32>
    %5 = vector.broadcast %4 : vector<1x8x1xf32> to vector<1x8x32xf32>
    %6 = arith.subf %0, %5 : vector<1x8x32xf32>
    %7 = arith.mulf %6, %6 : vector<1x8x32xf32>
    %cst_3 = arith.constant dense<0.000000e+00> : vector<1x8xf32>
    %8 = vector.multi_reduction <add>, %7, %cst_3 [2] : vector<1x8x32xf32> to vector<1x8xf32>
    %9 = vector.shape_cast %8 : vector<1x8xf32> to vector<1x8x1xf32>
    %cst_4 = arith.constant 3.200000e+01 : f32
    %10 = vector.broadcast %cst_4 : f32 to vector<1x8x1xf32>
    %11 = arith.divf %9, %10 : vector<1x8x1xf32>
    %cst_5 = arith.constant 9.99999974E-6 : f32
    %12 = vector.broadcast %cst_5 : f32 to vector<1x8x1xf32>
    %13 = arith.addf %11, %12 : vector<1x8x1xf32>
    %14 = math.rsqrt %13 : vector<1x8x1xf32>
    %15 = vector.broadcast %14 : vector<1x8x1xf32> to vector<1x8x32xf32>
    %16 = arith.mulf %6, %15 : vector<1x8x32xf32>
    %c0_6 = arith.constant 0 : index
    %c0_7 = arith.constant 0 : index
    %17 = vector.load %arg3[%c0_6, %c0_7] : memref<1x32xf32, #tpu.memory_space<vmem>>, vector<1x32xf32>
    %18 = vector.shape_cast %17 : vector<1x32xf32> to vector<1x1x32xf32>
    %19 = vector.broadcast %18 : vector<1x1x32xf32> to vector<1x8x32xf32>
    %20 = arith.mulf %16, %19 : vector<1x8x32xf32>
    %c0_8 = arith.constant 0 : index
    %c0_9 = arith.constant 0 : index
    %21 = vector.load %arg4[%c0_8, %c0_9] : memref<1x32xf32, #tpu.memory_space<vmem>>, vector<1x32xf32>
    %22 = vector.shape_cast %21 : vector<1x32xf32> to vector<1x1x32xf32>
    %23 = vector.broadcast %22 : vector<1x1x32xf32> to vector<1x8x32xf32>
    %24 = arith.addf %20, %23 : vector<1x8x32xf32>
    %25 = vector.shape_cast %24 : vector<1x8x32xf32> to vector<8x32xf32>
    %c0_10 = arith.constant 0 : index
    %c0_11 = arith.constant 0 : index
    %26 = vector.load %arg5[%c0_10, %c0_11] : memref<32x1024xf32, #tpu.memory_space<vmem>>, vector<32x1024xf32>
    %cst_12 = arith.constant dense<0.000000e+00> : vector<8x1024xf32>
    %27 = tpu.matmul %25, %26, %cst_12 {dimension_numbers = #tpu.dot_dimension_numbers<[1], [0], [0], [1], [0, 0, 1, 1], [], []>} : vector<8x32xf32>, vector<32x1024xf32>, vector<8x1024xf32> -> vector<8x1024xf32>
    %28 = vector.shape_cast %27 : vector<8x1024xf32> to vector<1x8x1024xf32>
    %c0_13 = arith.constant 0 : index
    %c0_14 = arith.constant 0 : index
    %c0_15 = arith.constant 0 : index
    %29 = vector.load %arg1[%c0_13, %c0_14, %c0_15] : memref<4x16x128xf32, #tpu.memory_space<vmem>>, vector<1x16x128xf32>
    %30 = vector.shape_cast %29 : vector<1x16x128xf32> to vector<16x128xf32>
    %31 = vector.extract_strided_slice %27 {offsets = [0, 0], sizes = [8, 128], strides = [1, 1]} : vector<8x1024xf32> to vector<8x128xf32>
    %32 = vector.extract_strided_slice %28 {offsets = [0, 0, 512], sizes = [1, 8, 128], strides = [1, 1, 1]} : vector<1x8x1024xf32> to vector<1x8x128xf32>
    "tpu.trace_start"() <{level = 10 : i32, message = "qd,kd->qk"}> : () -> ()
    %cst_16 = arith.constant dense<0.000000e+00> : vector<16x8xf32>
    %33 = tpu.matmul %30, %31, %cst_16 {dimension_numbers = #tpu.dot_dimension_numbers<[1], [1], [0], [0], [0, 0, 1, 0], [], []>} : vector<16x128xf32>, vector<8x128xf32>, vector<16x8xf32> -> vector<16x8xf32>
    "tpu.trace_stop"() : () -> ()
    %34 = vector.shape_cast %33 : vector<16x8xf32> to vector<16x1x8xf32>
    %cst_17 = arith.constant dense<0xFF800000> : vector<16x1xf32>
    %35 = vector.multi_reduction <maximumf>, %34, %cst_17 [2] : vector<16x1x8xf32> to vector<16x1xf32>
    %36 = vector.shape_cast %35 : vector<16x1xf32> to vector<16x1x1xf32>
    %37 = vector.broadcast %36 : vector<16x1x1xf32> to vector<16x1x8xf32>
    %38 = arith.subf %34, %37 : vector<16x1x8xf32>
    %39 = math.exp %38 : vector<16x1x8xf32>
    %cst_18 = arith.constant dense<0.000000e+00> : vector<16x1xf32>
    %40 = vector.multi_reduction <add>, %39, %cst_18 [2] : vector<16x1x8xf32> to vector<16x1xf32>
    %41 = vector.shape_cast %40 : vector<16x1xf32> to vector<16x1x1xf32>
    %42 = vector.broadcast %41 : vector<16x1x1xf32> to vector<16x1x8xf32>
    %43 = arith.divf %39, %42 : vector<16x1x8xf32>
    %44 = tpu.transpose %43, [1, 0, 2] : vector<16x1x8xf32> -> vector<1x16x8xf32>
    "tpu.trace_start"() <{level = 10 : i32, message = "bqn,bnd->bqd"}> : () -> ()
    %cst_19 = arith.constant dense<0.000000e+00> : vector<1x16x128xf32>
    %45 = tpu.matmul %44, %32, %cst_19 {dimension_numbers = #tpu.dot_dimension_numbers<[2], [1], [1], [2], [0, 0, 0, 1, 1, 2], [0], [0]>} : vector<1x16x8xf32>, vector<1x8x128xf32>, vector<1x16x128xf32> -> vector<1x16x128xf32>
    "tpu.trace_stop"() : () -> ()
    %c0_20 = arith.constant 0 : index
    %c0_21 = arith.constant 0 : index
    %c0_22 = arith.constant 0 : index
    %46 = vector.load %arg8[%c0_20, %c0_21, %c0_22] : memref<1x16x512xf32, #tpu.memory_space<vmem>>, vector<1x16x128xf32>
    tpu.vector_store %arg8[%c0_20, %c0_21, %c0_22], %45 {strides = array<i32>} : memref<1x16x512xf32, #tpu.memory_space<vmem>>, vector<1x16x128xf32>,
    %c1 = arith.constant 1 : index
    %c0_23 = arith.constant 0 : index
    %c0_24 = arith.constant 0 : index
    %47 = vector.load %arg1[%c1, %c0_23, %c0_24] : memref<4x16x128xf32, #tpu.memory_space<vmem>>, vector<1x16x128xf32>
    %48 = vector.shape_cast %47 : vector<1x16x128xf32> to vector<16x128xf32>
    %49 = vector.extract_strided_slice %27 {offsets = [0, 128], sizes = [8, 128], strides = [1, 1]} : vector<8x1024xf32> to vector<8x128xf32>
    %50 = vector.extract_strided_slice %28 {offsets = [0, 0, 640], sizes = [1, 8, 128], strides = [1, 1, 1]} : vector<1x8x1024xf32> to vector<1x8x128xf32>
    "tpu.trace_start"() <{level = 10 : i32, message = "qd,kd->qk"}> : () -> ()
    %cst_25 = arith.constant dense<0.000000e+00> : vector<16x8xf32>
    %51 = tpu.matmul %48, %49, %cst_25 {dimension_numbers = #tpu.dot_dimension_numbers<[1], [1], [0], [0], [0, 0, 1, 0], [], []>} : vector<16x128xf32>, vector<8x128xf32>, vector<16x8xf32> -> vector<16x8xf32>
    "tpu.trace_stop"() : () -> ()
    %52 = vector.shape_cast %51 : vector<16x8xf32> to vector<16x1x8xf32>
    %cst_26 = arith.constant dense<0xFF800000> : vector<16x1xf32>
    %53 = vector.multi_reduction <maximumf>, %52, %cst_26 [2] : vector<16x1x8xf32> to vector<16x1xf32>
    %54 = vector.shape_cast %53 : vector<16x1xf32> to vector<16x1x1xf32>
    %55 = vector.broadcast %54 : vector<16x1x1xf32> to vector<16x1x8xf32>
    %56 = arith.subf %52, %55 : vector<16x1x8xf32>
    %57 = math.exp %56 : vector<16x1x8xf32>
    %cst_27 = arith.constant dense<0.000000e+00> : vector<16x1xf32>
    %58 = vector.multi_reduction <add>, %57, %cst_27 [2] : vector<16x1x8xf32> to vector<16x1xf32>
    %59 = vector.shape_cast %58 : vector<16x1xf32> to vector<16x1x1xf32>
    %60 = vector.broadcast %59 : vector<16x1x1xf32> to vector<16x1x8xf32>
    %61 = arith.divf %57, %60 : vector<16x1x8xf32>
    %62 = tpu.transpose %61, [1, 0, 2] : vector<16x1x8xf32> -> vector<1x16x8xf32>
    "tpu.trace_start"() <{level = 10 : i32, message = "bqn,bnd->bqd"}> : () -> ()
    %cst_28 = arith.constant dense<0.000000e+00> : vector<1x16x128xf32>
    %63 = tpu.matmul %62, %50, %cst_28 {dimension_numbers = #tpu.dot_dimension_numbers<[2], [1], [1], [2], [0, 0, 0, 1, 1, 2], [0], [0]>} : vector<1x16x8xf32>, vector<1x8x128xf32>, vector<1x16x128xf32> -> vector<1x16x128xf32>
    "tpu.trace_stop"() : () -> ()
    %c0_29 = arith.constant 0 : index
    %c0_30 = arith.constant 0 : index
    %c128 = arith.constant 128 : index
    %64 = vector.load %arg8[%c0_29, %c0_30, %c128] : memref<1x16x512xf32, #tpu.memory_space<vmem>>, vector<1x16x128xf32>
    tpu.vector_store %arg8[%c0_29, %c0_30, %c128], %63 {strides = array<i32>} : memref<1x16x512xf32, #tpu.memory_space<vmem>>, vector<1x16x128xf32>,
    %c2 = arith.constant 2 : index
    %c0_31 = arith.constant 0 : index
    %c0_32 = arith.constant 0 : index
    %65 = vector.load %arg1[%c2, %c0_31, %c0_32] : memref<4x16x128xf32, #tpu.memory_space<vmem>>, vector<1x16x128xf32>
    %66 = vector.shape_cast %65 : vector<1x16x128xf32> to vector<16x128xf32>
    %67 = vector.extract_strided_slice %27 {offsets = [0, 256], sizes = [8, 128], strides = [1, 1]} : vector<8x1024xf32> to vector<8x128xf32>
    %68 = vector.extract_strided_slice %28 {offsets = [0, 0, 768], sizes = [1, 8, 128], strides = [1, 1, 1]} : vector<1x8x1024xf32> to vector<1x8x128xf32>
    "tpu.trace_start"() <{level = 10 : i32, message = "qd,kd->qk"}> : () -> ()
    %cst_33 = arith.constant dense<0.000000e+00> : vector<16x8xf32>
    %69 = tpu.matmul %66, %67, %cst_33 {dimension_numbers = #tpu.dot_dimension_numbers<[1], [1], [0], [0], [0, 0, 1, 0], [], []>} : vector<16x128xf32>, vector<8x128xf32>, vector<16x8xf32> -> vector<16x8xf32>
    "tpu.trace_stop"() : () -> ()
    %70 = vector.shape_cast %69 : vector<16x8xf32> to vector<16x1x8xf32>
    %cst_34 = arith.constant dense<0xFF800000> : vector<16x1xf32>
    %71 = vector.multi_reduction <maximumf>, %70, %cst_34 [2] : vector<16x1x8xf32> to vector<16x1xf32>
    %72 = vector.shape_cast %71 : vector<16x1xf32> to vector<16x1x1xf32>
    %73 = vector.broadcast %72 : vector<16x1x1xf32> to vector<16x1x8xf32>
    %74 = arith.subf %70, %73 : vector<16x1x8xf32>
    %75 = math.exp %74 : vector<16x1x8xf32>
    %cst_35 = arith.constant dense<0.000000e+00> : vector<16x1xf32>
    %76 = vector.multi_reduction <add>, %75, %cst_35 [2] : vector<16x1x8xf32> to vector<16x1xf32>
    %77 = vector.shape_cast %76 : vector<16x1xf32> to vector<16x1x1xf32>
    %78 = vector.broadcast %77 : vector<16x1x1xf32> to vector<16x1x8xf32>
    %79 = arith.divf %75, %78 : vector<16x1x8xf32>
    %80 = tpu.transpose %79, [1, 0, 2] : vector<16x1x8xf32> -> vector<1x16x8xf32>
    "tpu.trace_start"() <{level = 10 : i32, message = "bqn,bnd->bqd"}> : () -> ()
    %cst_36 = arith.constant dense<0.000000e+00> : vector<1x16x128xf32>
    %81 = tpu.matmul %80, %68, %cst_36 {dimension_numbers = #tpu.dot_dimension_numbers<[2], [1], [1], [2], [0, 0, 0, 1, 1, 2], [0], [0]>} : vector<1x16x8xf32>, vector<1x8x128xf32>, vector<1x16x128xf32> -> vector<1x16x128xf32>
    "tpu.trace_stop"() : () -> ()
    %c0_37 = arith.constant 0 : index
    %c0_38 = arith.constant 0 : index
    %c256 = arith.constant 256 : index
    %82 = vector.load %arg8[%c0_37, %c0_38, %c256] : memref<1x16x512xf32, #tpu.memory_space<vmem>>, vector<1x16x128xf32>
    tpu.vector_store %arg8[%c0_37, %c0_38, %c256], %81 {strides = array<i32>} : memref<1x16x512xf32, #tpu.memory_space<vmem>>, vector<1x16x128xf32>,
    %c3 = arith.constant 3 : index
    %c0_39 = arith.constant 0 : index
    %c0_40 = arith.constant 0 : index
    %83 = vector.load %arg1[%c3, %c0_39, %c0_40] : memref<4x16x128xf32, #tpu.memory_space<vmem>>, vector<1x16x128xf32>
    %84 = vector.shape_cast %83 : vector<1x16x128xf32> to vector<16x128xf32>
    %85 = vector.extract_strided_slice %27 {offsets = [0, 384], sizes = [8, 128], strides = [1, 1]} : vector<8x1024xf32> to vector<8x128xf32>
    %86 = vector.extract_strided_slice %28 {offsets = [0, 0, 896], sizes = [1, 8, 128], strides = [1, 1, 1]} : vector<1x8x1024xf32> to vector<1x8x128xf32>
    "tpu.trace_start"() <{level = 10 : i32, message = "qd,kd->qk"}> : () -> ()
    %cst_41 = arith.constant dense<0.000000e+00> : vector<16x8xf32>
    %87 = tpu.matmul %84, %85, %cst_41 {dimension_numbers = #tpu.dot_dimension_numbers<[1], [1], [0], [0], [0, 0, 1, 0], [], []>} : vector<16x128xf32>, vector<8x128xf32>, vector<16x8xf32> -> vector<16x8xf32>
    "tpu.trace_stop"() : () -> ()
    %88 = vector.shape_cast %87 : vector<16x8xf32> to vector<16x1x8xf32>
    %cst_42 = arith.constant dense<0xFF800000> : vector<16x1xf32>
    %89 = vector.multi_reduction <maximumf>, %88, %cst_42 [2] : vector<16x1x8xf32> to vector<16x1xf32>
    %90 = vector.shape_cast %89 : vector<16x1xf32> to vector<16x1x1xf32>
    %91 = vector.broadcast %90 : vector<16x1x1xf32> to vector<16x1x8xf32>
    %92 = arith.subf %88, %91 : vector<16x1x8xf32>
    %93 = math.exp %92 : vector<16x1x8xf32>
    %cst_43 = arith.constant dense<0.000000e+00> : vector<16x1xf32>
    %94 = vector.multi_reduction <add>, %93, %cst_43 [2] : vector<16x1x8xf32> to vector<16x1xf32>
    %95 = vector.shape_cast %94 : vector<16x1xf32> to vector<16x1x1xf32>
    %96 = vector.broadcast %95 : vector<16x1x1xf32> to vector<16x1x8xf32>
    %97 = arith.divf %93, %96 : vector<16x1x8xf32>
    %98 = tpu.transpose %97, [1, 0, 2] : vector<16x1x8xf32> -> vector<1x16x8xf32>
    "tpu.trace_start"() <{level = 10 : i32, message = "bqn,bnd->bqd"}> : () -> ()
    %cst_44 = arith.constant dense<0.000000e+00> : vector<1x16x128xf32>
    %99 = tpu.matmul %98, %86, %cst_44 {dimension_numbers = #tpu.dot_dimension_numbers<[2], [1], [1], [2], [0, 0, 0, 1, 1, 2], [0], [0]>} : vector<1x16x8xf32>, vector<1x8x128xf32>, vector<1x16x128xf32> -> vector<1x16x128xf32>
    "tpu.trace_stop"() : () -> ()
    %c0_45 = arith.constant 0 : index
    %c0_46 = arith.constant 0 : index
    %c384 = arith.constant 384 : index
    %100 = vector.load %arg8[%c0_45, %c0_46, %c384] : memref<1x16x512xf32, #tpu.memory_space<vmem>>, vector<1x16x128xf32>
    tpu.vector_store %arg8[%c0_45, %c0_46, %c384], %99 {strides = array<i32>} : memref<1x16x512xf32, #tpu.memory_space<vmem>>, vector<1x16x128xf32>,
    %c0_47 = arith.constant 0 : index
    %c0_48 = arith.constant 0 : index
    %c0_49 = arith.constant 0 : index
    %101 = vector.load %arg8[%c0_47, %c0_48, %c0_49] : memref<1x16x512xf32, #tpu.memory_space<vmem>>, vector<1x16x512xf32>
    %102 = vector.shape_cast %101 : vector<1x16x512xf32> to vector<16x512xf32>
    %c0_50 = arith.constant 0 : index
    %c0_51 = arith.constant 0 : index
    %103 = vector.load %arg6[%c0_50, %c0_51] : memref<512x128xf32, #tpu.memory_space<vmem>>, vector<512x128xf32>
    %cst_52 = arith.constant dense<0.000000e+00> : vector<16x128xf32>
    %104 = tpu.matmul %102, %103, %cst_52 {dimension_numbers = #tpu.dot_dimension_numbers<[1], [0], [0], [1], [0, 0, 1, 1], [], []>} : vector<16x512xf32>, vector<512x128xf32>, vector<16x128xf32> -> vector<16x128xf32>
    %105 = vector.shape_cast %104 : vector<16x128xf32> to vector<1x16x128xf32>
    %c0_53 = arith.constant 0 : index
    %c0_54 = arith.constant 0 : index
    %c0_55 = arith.constant 0 : index
    %106 = vector.load %arg7[%c0_53, %c0_54, %c0_55] : memref<1x16x128xf32, #tpu.memory_space<vmem>>, vector<1x16x128xf32>
    tpu.vector_store %arg7[%c0_53, %c0_54, %c0_55], %105 {strides = array<i32>} : memref<1x16x128xf32, #tpu.memory_space<vmem>>, vector<1x16x128xf32>,
    return
  }
  func.func @transform_0(%arg0: i32) -> (i32, i32, i32) {
    %c0_i32 = arith.constant 0 : i32
    %c0_i32_0 = arith.constant 0 : i32
    %c0_i32_1 = arith.constant 0 : i32
    %c0_i32_2 = arith.constant 0 : i32
    return %c0_i32, %c0_i32_0, %c0_i32_1 : i32, i32, i32
  }
  func.func @transform_1(%arg0: i32) -> (i32, i32, i32) {
    %c0_i32 = arith.constant 0 : i32
    %c0_i32_0 = arith.constant 0 : i32
    %c0_i32_1 = arith.constant 0 : i32
    return %arg0, %c0_i32, %c0_i32_0 : i32, i32, i32
  }
  func.func @transform_2(%arg0: i32) -> (i32, i32) {
    %c0_i32 = arith.constant 0 : i32
    %c0_i32_0 = arith.constant 0 : i32
    %c0_i32_1 = arith.constant 0 : i32
    return %c0_i32, %c0_i32_0 : i32, i32
  }
  func.func @transform_3(%arg0: i32) -> (i32, i32) {
    %c0_i32 = arith.constant 0 : i32
    %c0_i32_0 = arith.constant 0 : i32
    %c0_i32_1 = arith.constant 0 : i32
    return %c0_i32, %c0_i32_0 : i32, i32
  }
  func.func @transform_4(%arg0: i32) -> (i32, i32) {
    %c0_i32 = arith.constant 0 : i32
    %c0_i32_0 = arith.constant 0 : i32
    %c0_i32_1 = arith.constant 0 : i32
    return %c0_i32, %c0_i32_0 : i32, i32
  }
  func.func @transform_5(%arg0: i32) -> (i32, i32) {
    %c0_i32 = arith.constant 0 : i32
    %c0_i32_0 = arith.constant 0 : i32
    %c0_i32_1 = arith.constant 0 : i32
    return %c0_i32, %c0_i32_0 : i32, i32
  }
  func.func @transform_6(%arg0: i32) -> (i32, i32, i32) {
    %c0_i32 = arith.constant 0 : i32
    %c0_i32_0 = arith.constant 0 : i32
    %c0_i32_1 = arith.constant 0 : i32
    return %arg0, %c0_i32, %c0_i32_0 : i32, i32, i32
  }
}

module attributes {stable_mosaic.version = 11 : i64} {
  func.func @_attn_pool_kernel(%arg0: i32, %arg1: memref<4x16x128xf32, #tpu.memory_space<vmem>>, %arg2: memref<1x8x32xf32, #tpu.memory_space<vmem>>, %arg3: memref<1x32xf32, #tpu.memory_space<vmem>>, %arg4: memref<1x32xf32, #tpu.memory_space<vmem>>, %arg5: memref<32x1024xf32, #tpu.memory_space<vmem>>, %arg6: memref<512x128xf32, #tpu.memory_space<vmem>>, %arg7: memref<1x16x128xf32, #tpu.memory_space<vmem>>, %arg8: memref<1x16x512xf32, #tpu.memory_space<vmem>>) attributes {dimension_semantics = [#tpu.dimension_semantics<parallel>], iteration_bounds = array<i64: 2>, scalar_prefetch = 0 : i64, scratch_operands = 1 : i64, tpu.core_type = #tpu.core_type<tc>, window_params = [{pipeline_mode = #tpu.pipeline_mode<synchronous>, transform_indices = @transform_0, window_bounds = array<i64: 4, 16, 128>}, {transform_indices = @transform_1, window_bounds = array<i64: 1, 8, 32>}, {pipeline_mode = #tpu.pipeline_mode<synchronous>, transform_indices = @transform_2, window_bounds = array<i64: 1, 32>}, {pipeline_mode = #tpu.pipeline_mode<synchronous>, transform_indices = @transform_3, window_bounds = array<i64: 1, 32>}, {pipeline_mode = #tpu.pipeline_mode<synchronous>, transform_indices = @transform_4, window_bounds = array<i64: 32, 1024>}, {pipeline_mode = #tpu.pipeline_mode<synchronous>, transform_indices = @transform_5, window_bounds = array<i64: 512, 128>}, {transform_indices = @transform_6, window_bounds = array<i64: 1, 16, 128>}]} {
    %c0 = arith.constant 0 : index
    %c0_0 = arith.constant 0 : index
    %c0_1 = arith.constant 0 : index
    %0 = vector.load %arg2[%c0, %c0_0, %c0_1] : memref<1x8x32xf32, #tpu.memory_space<vmem>>, vector<1x8x32xf32>
    %cst = arith.constant dense<0.000000e+00> : vector<1x8xf32>
    %1 = vector.multi_reduction <add>, %0, %cst [2] : vector<1x8x32xf32> to vector<1x8xf32>
    %2 = vector.shape_cast %1 : vector<1x8xf32> to vector<1x8x1xf32>
    %cst_2 = arith.constant 3.200000e+01 : f32
    %3 = vector.broadcast %cst_2 : f32 to vector<1x8x1xf32>
    %4 = arith.divf %2, %3 : vector<1x8x1xf32>
    %5 = vector.broadcast %4 : vector<1x8x1xf32> to vector<1x8x32xf32>
    %6 = arith.subf %0, %5 : vector<1x8x32xf32>
    %7 = arith.mulf %6, %6 : vector<1x8x32xf32>
    %cst_3 = arith.constant dense<0.000000e+00> : vector<1x8xf32>
    %8 = vector.multi_reduction <add>, %7, %cst_3 [2] : vector<1x8x32xf32> to vector<1x8xf32>
    %9 = vector.shape_cast %8 : vector<1x8xf32> to vector<1x8x1xf32>
    %cst_4 = arith.constant 3.200000e+01 : f32
    %10 = vector.broadcast %cst_4 : f32 to vector<1x8x1xf32>
    %11 = arith.divf %9, %10 : vector<1x8x1xf32>
    %cst_5 = arith.constant 9.99999974E-6 : f32
    %12 = vector.broadcast %cst_5 : f32 to vector<1x8x1xf32>
    %13 = arith.addf %11, %12 : vector<1x8x1xf32>
    %14 = math.rsqrt %13 : vector<1x8x1xf32>
    %15 = vector.broadcast %14 : vector<1x8x1xf32> to vector<1x8x32xf32>
    %16 = arith.mulf %6, %15 : vector<1x8x32xf32>
    %c0_6 = arith.constant 0 : index
    %c0_7 = arith.constant 0 : index
    %17 = vector.load %arg3[%c0_6, %c0_7] : memref<1x32xf32, #tpu.memory_space<vmem>>, vector<1x32xf32>
    %18 = vector.shape_cast %17 : vector<1x32xf32> to vector<1x1x32xf32>
    %19 = vector.broadcast %18 : vector<1x1x32xf32> to vector<1x8x32xf32>
    %20 = arith.mulf %16, %19 : vector<1x8x32xf32>
    %c0_8 = arith.constant 0 : index
    %c0_9 = arith.constant 0 : index
    %21 = vector.load %arg4[%c0_8, %c0_9] : memref<1x32xf32, #tpu.memory_space<vmem>>, vector<1x32xf32>
    %22 = vector.shape_cast %21 : vector<1x32xf32> to vector<1x1x32xf32>
    %23 = vector.broadcast %22 : vector<1x1x32xf32> to vector<1x8x32xf32>
    %24 = arith.addf %20, %23 : vector<1x8x32xf32>
    %25 = vector.shape_cast %24 : vector<1x8x32xf32> to vector<8x32xf32>
    %c0_10 = arith.constant 0 : index
    %c0_11 = arith.constant 0 : index
    %26 = vector.load %arg5[%c0_10, %c0_11] : memref<32x1024xf32, #tpu.memory_space<vmem>>, vector<32x1024xf32>
    %cst_12 = arith.constant dense<0.000000e+00> : vector<8x1024xf32>
    %27 = tpu.matmul %25, %26, %cst_12 {dimension_numbers = #tpu.dot_dimension_numbers<[1], [0], [0], [1], [0, 0, 1, 1], [], []>} : vector<8x32xf32>, vector<32x1024xf32>, vector<8x1024xf32> -> vector<8x1024xf32>
    %28 = vector.shape_cast %27 : vector<8x1024xf32> to vector<1x8x1024xf32>
    %c0_13 = arith.constant 0 : index
    %c0_14 = arith.constant 0 : index
    %c0_15 = arith.constant 0 : index
    %29 = vector.load %arg1[%c0_13, %c0_14, %c0_15] : memref<4x16x128xf32, #tpu.memory_space<vmem>>, vector<1x16x128xf32>
    %30 = vector.shape_cast %29 : vector<1x16x128xf32> to vector<16x128xf32>
    %31 = vector.extract_strided_slice %27 {offsets = [0, 0], sizes = [8, 128], strides = [1, 1]} : vector<8x1024xf32> to vector<8x128xf32>
    %32 = vector.extract_strided_slice %28 {offsets = [0, 0, 512], sizes = [1, 8, 128], strides = [1, 1, 1]} : vector<1x8x1024xf32> to vector<1x8x128xf32>
    "tpu.trace_start"() <{level = 10 : i32, message = "qd,kd->qk"}> : () -> ()
    %cst_16 = arith.constant dense<0.000000e+00> : vector<16x8xf32>
    %33 = tpu.matmul %30, %31, %cst_16 {dimension_numbers = #tpu.dot_dimension_numbers<[1], [1], [0], [0], [0, 0, 1, 0], [], []>} : vector<16x128xf32>, vector<8x128xf32>, vector<16x8xf32> -> vector<16x8xf32>
    "tpu.trace_stop"() : () -> ()
    %34 = vector.shape_cast %33 : vector<16x8xf32> to vector<16x1x8xf32>
    %cst_17 = arith.constant dense<0xFF800000> : vector<16x1xf32>
    %35 = vector.multi_reduction <maximumf>, %34, %cst_17 [2] : vector<16x1x8xf32> to vector<16x1xf32>
    %36 = vector.shape_cast %35 : vector<16x1xf32> to vector<16x1x1xf32>
    %37 = vector.broadcast %36 : vector<16x1x1xf32> to vector<16x1x8xf32>
    %38 = arith.subf %34, %37 : vector<16x1x8xf32>
    %39 = math.exp %38 : vector<16x1x8xf32>
    %cst_18 = arith.constant dense<0.000000e+00> : vector<16x1xf32>
    %40 = vector.multi_reduction <add>, %39, %cst_18 [2] : vector<16x1x8xf32> to vector<16x1xf32>
    %41 = vector.shape_cast %40 : vector<16x1xf32> to vector<16x1x1xf32>
    %42 = vector.broadcast %41 : vector<16x1x1xf32> to vector<16x1x8xf32>
    %43 = arith.divf %39, %42 : vector<16x1x8xf32>
    %44 = tpu.transpose %43, [1, 0, 2] : vector<16x1x8xf32> -> vector<1x16x8xf32>
    "tpu.trace_start"() <{level = 10 : i32, message = "bqn,bnd->bqd"}> : () -> ()
    %cst_19 = arith.constant dense<0.000000e+00> : vector<1x16x128xf32>
    %45 = tpu.matmul %44, %32, %cst_19 {dimension_numbers = #tpu.dot_dimension_numbers<[2], [1], [1], [2], [0, 0, 0, 1, 1, 2], [0], [0]>} : vector<1x16x8xf32>, vector<1x8x128xf32>, vector<1x16x128xf32> -> vector<1x16x128xf32>
    "tpu.trace_stop"() : () -> ()
    %c0_20 = arith.constant 0 : index
    %c0_21 = arith.constant 0 : index
    %c0_22 = arith.constant 0 : index
    %46 = vector.load %arg8[%c0_20, %c0_21, %c0_22] : memref<1x16x512xf32, #tpu.memory_space<vmem>>, vector<1x16x128xf32>
    tpu.vector_store %arg8[%c0_20, %c0_21, %c0_22], %45 {strides = array<i32>} : memref<1x16x512xf32, #tpu.memory_space<vmem>>, vector<1x16x128xf32>,
    %c1 = arith.constant 1 : index
    %c0_23 = arith.constant 0 : index
    %c0_24 = arith.constant 0 : index
    %47 = vector.load %arg1[%c1, %c0_23, %c0_24] : memref<4x16x128xf32, #tpu.memory_space<vmem>>, vector<1x16x128xf32>
    %48 = vector.shape_cast %47 : vector<1x16x128xf32> to vector<16x128xf32>
    %49 = vector.extract_strided_slice %27 {offsets = [0, 128], sizes = [8, 128], strides = [1, 1]} : vector<8x1024xf32> to vector<8x128xf32>
    %50 = vector.extract_strided_slice %28 {offsets = [0, 0, 640], sizes = [1, 8, 128], strides = [1, 1, 1]} : vector<1x8x1024xf32> to vector<1x8x128xf32>
    "tpu.trace_start"() <{level = 10 : i32, message = "qd,kd->qk"}> : () -> ()
    %cst_25 = arith.constant dense<0.000000e+00> : vector<16x8xf32>
    %51 = tpu.matmul %48, %49, %cst_25 {dimension_numbers = #tpu.dot_dimension_numbers<[1], [1], [0], [0], [0, 0, 1, 0], [], []>} : vector<16x128xf32>, vector<8x128xf32>, vector<16x8xf32> -> vector<16x8xf32>
    "tpu.trace_stop"() : () -> ()
    %52 = vector.shape_cast %51 : vector<16x8xf32> to vector<16x1x8xf32>
    %cst_26 = arith.constant dense<0xFF800000> : vector<16x1xf32>
    %53 = vector.multi_reduction <maximumf>, %52, %cst_26 [2] : vector<16x1x8xf32> to vector<16x1xf32>
    %54 = vector.shape_cast %53 : vector<16x1xf32> to vector<16x1x1xf32>
    %55 = vector.broadcast %54 : vector<16x1x1xf32> to vector<16x1x8xf32>
    %56 = arith.subf %52, %55 : vector<16x1x8xf32>
    %57 = math.exp %56 : vector<16x1x8xf32>
    %cst_27 = arith.constant dense<0.000000e+00> : vector<16x1xf32>
    %58 = vector.multi_reduction <add>, %57, %cst_27 [2] : vector<16x1x8xf32> to vector<16x1xf32>
    %59 = vector.shape_cast %58 : vector<16x1xf32> to vector<16x1x1xf32>
    %60 = vector.broadcast %59 : vector<16x1x1xf32> to vector<16x1x8xf32>
    %61 = arith.divf %57, %60 : vector<16x1x8xf32>
    %62 = tpu.transpose %61, [1, 0, 2] : vector<16x1x8xf32> -> vector<1x16x8xf32>
    "tpu.trace_start"() <{level = 10 : i32, message = "bqn,bnd->bqd"}> : () -> ()
    %cst_28 = arith.constant dense<0.000000e+00> : vector<1x16x128xf32>
    %63 = tpu.matmul %62, %50, %cst_28 {dimension_numbers = #tpu.dot_dimension_numbers<[2], [1], [1], [2], [0, 0, 0, 1, 1, 2], [0], [0]>} : vector<1x16x8xf32>, vector<1x8x128xf32>, vector<1x16x128xf32> -> vector<1x16x128xf32>
    "tpu.trace_stop"() : () -> ()
    %c0_29 = arith.constant 0 : index
    %c0_30 = arith.constant 0 : index
    %c128 = arith.constant 128 : index
    %64 = vector.load %arg8[%c0_29, %c0_30, %c128] : memref<1x16x512xf32, #tpu.memory_space<vmem>>, vector<1x16x128xf32>
    tpu.vector_store %arg8[%c0_29, %c0_30, %c128], %63 {strides = array<i32>} : memref<1x16x512xf32, #tpu.memory_space<vmem>>, vector<1x16x128xf32>,
    %c2 = arith.constant 2 : index
    %c0_31 = arith.constant 0 : index
    %c0_32 = arith.constant 0 : index
    %65 = vector.load %arg1[%c2, %c0_31, %c0_32] : memref<4x16x128xf32, #tpu.memory_space<vmem>>, vector<1x16x128xf32>
    %66 = vector.shape_cast %65 : vector<1x16x128xf32> to vector<16x128xf32>
    %67 = vector.extract_strided_slice %27 {offsets = [0, 256], sizes = [8, 128], strides = [1, 1]} : vector<8x1024xf32> to vector<8x128xf32>
    %68 = vector.extract_strided_slice %28 {offsets = [0, 0, 768], sizes = [1, 8, 128], strides = [1, 1, 1]} : vector<1x8x1024xf32> to vector<1x8x128xf32>
    "tpu.trace_start"() <{level = 10 : i32, message = "qd,kd->qk"}> : () -> ()
    %cst_33 = arith.constant dense<0.000000e+00> : vector<16x8xf32>
    %69 = tpu.matmul %66, %67, %cst_33 {dimension_numbers = #tpu.dot_dimension_numbers<[1], [1], [0], [0], [0, 0, 1, 0], [], []>} : vector<16x128xf32>, vector<8x128xf32>, vector<16x8xf32> -> vector<16x8xf32>
    "tpu.trace_stop"() : () -> ()
    %70 = vector.shape_cast %69 : vector<16x8xf32> to vector<16x1x8xf32>
    %cst_34 = arith.constant dense<0xFF800000> : vector<16x1xf32>
    %71 = vector.multi_reduction <maximumf>, %70, %cst_34 [2] : vector<16x1x8xf32> to vector<16x1xf32>
    %72 = vector.shape_cast %71 : vector<16x1xf32> to vector<16x1x1xf32>
    %73 = vector.broadcast %72 : vector<16x1x1xf32> to vector<16x1x8xf32>
    %74 = arith.subf %70, %73 : vector<16x1x8xf32>
    %75 = math.exp %74 : vector<16x1x8xf32>
    %cst_35 = arith.constant dense<0.000000e+00> : vector<16x1xf32>
    %76 = vector.multi_reduction <add>, %75, %cst_35 [2] : vector<16x1x8xf32> to vector<16x1xf32>
    %77 = vector.shape_cast %76 : vector<16x1xf32> to vector<16x1x1xf32>
    %78 = vector.broadcast %77 : vector<16x1x1xf32> to vector<16x1x8xf32>
    %79 = arith.divf %75, %78 : vector<16x1x8xf32>
    %80 = tpu.transpose %79, [1, 0, 2] : vector<16x1x8xf32> -> vector<1x16x8xf32>
    "tpu.trace_start"() <{level = 10 : i32, message = "bqn,bnd->bqd"}> : () -> ()
    %cst_36 = arith.constant dense<0.000000e+00> : vector<1x16x128xf32>
    %81 = tpu.matmul %80, %68, %cst_36 {dimension_numbers = #tpu.dot_dimension_numbers<[2], [1], [1], [2], [0, 0, 0, 1, 1, 2], [0], [0]>} : vector<1x16x8xf32>, vector<1x8x128xf32>, vector<1x16x128xf32> -> vector<1x16x128xf32>
    "tpu.trace_stop"() : () -> ()
    %c0_37 = arith.constant 0 : index
    %c0_38 = arith.constant 0 : index
    %c256 = arith.constant 256 : index
    %82 = vector.load %arg8[%c0_37, %c0_38, %c256] : memref<1x16x512xf32, #tpu.memory_space<vmem>>, vector<1x16x128xf32>
    tpu.vector_store %arg8[%c0_37, %c0_38, %c256], %81 {strides = array<i32>} : memref<1x16x512xf32, #tpu.memory_space<vmem>>, vector<1x16x128xf32>,
    %c3 = arith.constant 3 : index
    %c0_39 = arith.constant 0 : index
    %c0_40 = arith.constant 0 : index
    %83 = vector.load %arg1[%c3, %c0_39, %c0_40] : memref<4x16x128xf32, #tpu.memory_space<vmem>>, vector<1x16x128xf32>
    %84 = vector.shape_cast %83 : vector<1x16x128xf32> to vector<16x128xf32>
    %85 = vector.extract_strided_slice %27 {offsets = [0, 384], sizes = [8, 128], strides = [1, 1]} : vector<8x1024xf32> to vector<8x128xf32>
    %86 = vector.extract_strided_slice %28 {offsets = [0, 0, 896], sizes = [1, 8, 128], strides = [1, 1, 1]} : vector<1x8x1024xf32> to vector<1x8x128xf32>
    "tpu.trace_start"() <{level = 10 : i32, message = "qd,kd->qk"}> : () -> ()
    %cst_41 = arith.constant dense<0.000000e+00> : vector<16x8xf32>
    %87 = tpu.matmul %84, %85, %cst_41 {dimension_numbers = #tpu.dot_dimension_numbers<[1], [1], [0], [0], [0, 0, 1, 0], [], []>} : vector<16x128xf32>, vector<8x128xf32>, vector<16x8xf32> -> vector<16x8xf32>
    "tpu.trace_stop"() : () -> ()
    %88 = vector.shape_cast %87 : vector<16x8xf32> to vector<16x1x8xf32>
    %cst_42 = arith.constant dense<0xFF800000> : vector<16x1xf32>
    %89 = vector.multi_reduction <maximumf>, %88, %cst_42 [2] : vector<16x1x8xf32> to vector<16x1xf32>
    %90 = vector.shape_cast %89 : vector<16x1xf32> to vector<16x1x1xf32>
    %91 = vector.broadcast %90 : vector<16x1x1xf32> to vector<16x1x8xf32>
    %92 = arith.subf %88, %91 : vector<16x1x8xf32>
    %93 = math.exp %92 : vector<16x1x8xf32>
    %cst_43 = arith.constant dense<0.000000e+00> : vector<16x1xf32>
    %94 = vector.multi_reduction <add>, %93, %cst_43 [2] : vector<16x1x8xf32> to vector<16x1xf32>
    %95 = vector.shape_cast %94 : vector<16x1xf32> to vector<16x1x1xf32>
    %96 = vector.broadcast %95 : vector<16x1x1xf32> to vector<16x1x8xf32>
    %97 = arith.divf %93, %96 : vector<16x1x8xf32>
    %98 = tpu.transpose %97, [1, 0, 2] : vector<16x1x8xf32> -> vector<1x16x8xf32>
    "tpu.trace_start"() <{level = 10 : i32, message = "bqn,bnd->bqd"}> : () -> ()
    %cst_44 = arith.constant dense<0.000000e+00> : vector<1x16x128xf32>
    %99 = tpu.matmul %98, %86, %cst_44 {dimension_numbers = #tpu.dot_dimension_numbers<[2], [1], [1], [2], [0, 0, 0, 1, 1, 2], [0], [0]>} : vector<1x16x8xf32>, vector<1x8x128xf32>, vector<1x16x128xf32> -> vector<1x16x128xf32>
    "tpu.trace_stop"() : () -> ()
    %c0_45 = arith.constant 0 : index
    %c0_46 = arith.constant 0 : index
    %c384 = arith.constant 384 : index
    %100 = vector.load %arg8[%c0_45, %c0_46, %c384] : memref<1x16x512xf32, #tpu.memory_space<vmem>>, vector<1x16x128xf32>
    tpu.vector_store %arg8[%c0_45, %c0_46, %c384], %99 {strides = array<i32>} : memref<1x16x512xf32, #tpu.memory_space<vmem>>, vector<1x16x128xf32>,
    %c0_47 = arith.constant 0 : index
    %c0_48 = arith.constant 0 : index
    %c0_49 = arith.constant 0 : index
    %101 = vector.load %arg8[%c0_47, %c0_48, %c0_49] : memref<1x16x512xf32, #tpu.memory_space<vmem>>, vector<1x16x512xf32>
    %102 = vector.shape_cast %101 : vector<1x16x512xf32> to vector<16x512xf32>
    %c0_50 = arith.constant 0 : index
    %c0_51 = arith.constant 0 : index
    %103 = vector.load %arg6[%c0_50, %c0_51] : memref<512x128xf32, #tpu.memory_space<vmem>>, vector<512x128xf32>
    %cst_52 = arith.constant dense<0.000000e+00> : vector<16x128xf32>
    %104 = tpu.matmul %102, %103, %cst_52 {dimension_numbers = #tpu.dot_dimension_numbers<[1], [0], [0], [1], [0, 0, 1, 1], [], []>} : vector<16x512xf32>, vector<512x128xf32>, vector<16x128xf32> -> vector<16x128xf32>
    %105 = vector.shape_cast %104 : vector<16x128xf32> to vector<1x16x128xf32>
    %c0_53 = arith.constant 0 : index
    %c0_54 = arith.constant 0 : index
    %c0_55 = arith.constant 0 : index
    %106 = vector.load %arg7[%c0_53, %c0_54, %c0_55] : memref<1x16x128xf32, #tpu.memory_space<vmem>>, vector<1x16x128xf32>
    tpu.vector_store %arg7[%c0_53, %c0_54, %c0_55], %105 {strides = array<i32>} : memref<1x16x128xf32, #tpu.memory_space<vmem>>, vector<1x16x128xf32>,
    return
  }
  func.func @transform_0(%arg0: i32) -> (i32, i32, i32) {
    %c0_i32 = arith.constant 0 : i32
    %c0_i32_0 = arith.constant 0 : i32
    %c0_i32_1 = arith.constant 0 : i32
    %c0_i32_2 = arith.constant 0 : i32
    return %c0_i32, %c0_i32_0, %c0_i32_1 : i32, i32, i32
  }
  func.func @transform_1(%arg0: i32) -> (i32, i32, i32) {
    %c0_i32 = arith.constant 0 : i32
    %c0_i32_0 = arith.constant 0 : i32
    %c0_i32_1 = arith.constant 0 : i32
    return %arg0, %c0_i32, %c0_i32_0 : i32, i32, i32
  }
  func.func @transform_2(%arg0: i32) -> (i32, i32) {
    %c0_i32 = arith.constant 0 : i32
    %c0_i32_0 = arith.constant 0 : i32
    %c0_i32_1 = arith.constant 0 : i32
    return %c0_i32, %c0_i32_0 : i32, i32
  }
  func.func @transform_3(%arg0: i32) -> (i32, i32) {
    %c0_i32 = arith.constant 0 : i32
    %c0_i32_0 = arith.constant 0 : i32
    %c0_i32_1 = arith.constant 0 : i32
    return %c0_i32, %c0_i32_0 : i32, i32
  }
  func.func @transform_4(%arg0: i32) -> (i32, i32) {
    %c0_i32 = arith.constant 0 : i32
    %c0_i32_0 = arith.constant 0 : i32
    %c0_i32_1 = arith.constant 0 : i32
    return %c0_i32, %c0_i32_0 : i32, i32
  }
  func.func @transform_5(%arg0: i32) -> (i32, i32) {
    %c0_i32 = arith.constant 0 : i32
    %c0_i32_0 = arith.constant 0 : i32
    %c0_i32_1 = arith.constant 0 : i32
    return %c0_i32, %c0_i32_0 : i32, i32
  }
  func.func @transform_6(%arg0: i32) -> (i32, i32, i32) {
    %c0_i32 = arith.constant 0 : i32
    %c0_i32_0 = arith.constant 0 : i32
    %c0_i32_1 = arith.constant 0 : i32
    return %arg0, %c0_i32, %c0_i32_0 : i32, i32, i32
  }
}

</mosaic_0001>

<bundles_post_ra>
// kernel: tpu_custom_call.1
= control target key start
LH: loop header
LB: loop body
LE: loop exit
PB: predicated region body
PF: predicated region fallthrough
CT: control target
= control target key end

     0   :  { %s6063_s0 = inlined_call_operand.hbm [shape: f32[4,16,128], index: 0, kind: input, shape index: {}]   ;;  %s6064_s1 = inlined_call_operand.hbm [shape: f32[2,8,32], index: 1, kind: input, shape index: {}]   ;;  %s6065_s2 = inlined_call_operand.vmem [shape: f32[1,32], index: 2, kind: input, shape index: {}]   ;;  %s6066_s3 = inlined_call_operand.vmem [shape: f32[1,32], index: 3, kind: input, shape index: {}]   ;;  %s6067_s4 = inlined_call_operand.hbm [shape: f32[32,1024], index: 4, kind: input, shape index: {}]   ;;  %s6068_s5 = inlined_call_operand.hbm [shape: f32[512,128], index: 5, kind: input, shape index: {}]   ;;  %s6069_s6 = inlined_call_operand.hbm [shape: f32[2,16,128], index: 6, kind: output, shape index: {}]  }
   0x1   :  { %6129 = sst [smem:[#allocation50_spill]] %s6063_s0 }
   0x2   :  { %6130 = sst [smem:[#allocation51_spill]] %s6067_s4 }
   0x3   :  { %11 = vsyncpa [#allocation4], 0 }
   0x4   :  { %12 = vsyncpa [#allocation7], 0 }
   0x5   :  { %14 = vsyncpa [#allocation7 + $0x1], 0 }
   0x6   :  { %15 = vsyncpa [#allocation10], 0 }
   0x7   :  { %16 = vsyncpa [#allocation5], 0 }
   0x8   :  { %18 = vsyncpa [#allocation5 + $0x1], 0  ;;  %s3509_s21 = smov 0   ;;  %s3511_s22 = smov 0  }
   0x9   :  { %s3513_s23 = smov 0   ;;  %s3515_s24 = smov 0  }
   0xa LB: > { %s6131_s4 = sld [smem:[#allocation51_spill]]  ;;  %s3533_s28 = sadd.s32 4294967295, %s3462_s24   ;;  %s3462_s24 = sphi %s3515_s24, %s6390_s24   ;;  %s3458_s23 = sphi %s3513_s23, %s6389_s23   ;;  %s3454_s22 = sphi %s3511_s22, %s6388_s22   ;;  %s3450_s21 = sphi %s3509_s21, %s6387_s21  }
   0xb   : > { %p2883_p0 = scmp.ge.s32.totalorder %s3462_s24, 1  ;;  %p66_p1 = scmp.eq.s32.totalorder %s3533_s28, 0 }
   0xc   : > { %p173_p2 = scmp.eq.s32.totalorder %s3533_s28, 1  ;;  %p186_p3 = scmp.lt.s32.totalorder %s3462_s24, 3 }
   0xd   : > { %s3464_s30 = smov [#allocation8]   ;;  %s6133_s0 = sld [smem:[#allocation50_spill]] }
   0xe   : > { %p3539_p4 = pnand %p2883_p0, %p186_p3  ;;  %s219_s7 = sshll.u32 %s3464_s30, 4  ;;  %s220_s7 = int_to_ptr.vmem [resolvable:$true] %s219_s7 }
   0xf   : > { %s3465_s12 = smov [#allocation3]   ;;  %s3466_s14 = smov 1024  }
  0x10   : > { %s217_s27 = sshll.u32 %s6131_s4, 4  ;;  %p2934_p5 = pneg %p3539_p4  ;;  %s218_s27 = int_to_ptr.hbm [resolvable:$true] %s217_s27 }
  0x11   : > { %s199_s13 = sshll.u32 %s3465_s12, 4  ;;  %s3467_s15 = smov 64   ;;  %s200_s13 = int_to_ptr.vmem [resolvable:$true] %s199_s13 }
  0x12   : > { %p3551_p7 = pnand %p2934_p5, %p66_p1  ;;  %s231_s18 = sshll.u32 %s6068_s5, 4  ;;  %s232_s18 = int_to_ptr.hbm [resolvable:$true] %s231_s18 }
  0x13   : > { %s197_s10 = sshll.u32 %s6133_s0, 4  ;;  %s3468_s19 = smov 128   ;;  %s198_s10 = int_to_ptr.hbm [resolvable:$true] %s197_s10 }
  0x14   : > { %2940 = dma.hbm_to_vmem [thread:$0]  (!%p3551_p7), %s218_s27, 4096, %s220_s7, [#allocation7], %s3466_s14, %s3466_s14, %s3467_s15  }
  0x15   : > { %s3469_s20 = smov 8   ;;  %s3470_s25 = smov [#allocation9]  }
  0x16   : > { %2937 = dma.hbm_to_vmem [thread:$0]  (!%p3551_p7), %s198_s10, 1024, %s200_s13, [#allocation4], %s3468_s19, %s3468_s19, %s3469_s20  }
  0x17   : > { %s233_s26 = sshll.u32 %s3470_s25, 4  ;;  %s2882_s27 = sadd.s32 4294967294, %s3462_s24   ;;  %s234_s26 = int_to_ptr.vmem [resolvable:$true] %s233_s26 }
  0x18   : > { %2943 = dma.hbm_to_vmem [thread:$0]  (!%p3551_p7), %s232_s18, 8192, %s234_s26, [#allocation10], %s3468_s19, %s3468_s19, %s3469_s20  }
  0x19   : > { %s3566_s30 = sadd.s32 1, %s3462_s24   ;;  %s52_s8 = sadd.s32 1, %s3458_s23 }
  0x1a   : > { %s49_s7 = ssub.s32 %s3462_s24, %s3566_s30  ;;  %p59_p9 = scmp.ne.s32.totalorder %s3458_s23, %s3454_s22 }
  0x1b   : > { %p50_p8 = scmp.eq.s32.totalorder %s49_s7, 0  ;;  %p60_p10 = scmp.eq.s32.totalorder %s3462_s24, 0 }
  0x1c   : > { %p65_p11 = scmp.ne.s32.totalorder %s3454_s22, %s3450_s21  ;;  %p3591_p0 = por %p173_p2, %p59_p9 }
  0x1d   : > { %s3577_s9 = scalar_select %p50_p8, %s3458_s23, %s52_s8  }
  0x1e   : > { %p3579_p12 = por %p60_p10, %p59_p9  ;;  %p3585_p13 = por %p66_p1, %p65_p11 }
  0x1f   : > { %p179_p3 = scmp.eq.s32.totalorder %s2882_s27, 1  ;;  %p2955_p5 = scmp.lt.s32.totalorder %s3462_s24, 2 }
  0x20   : > { %s247_s13 = sand.u32 1, %s3462_s24   ;;  %s249_s15 = sand.u32 1, %s3458_s23  }
  0x21   : > { %p3597_p7 = por %p179_p3, %p65_p11  ;;  %s2889_s16 = sshll.u32 %s3462_s24, 3 }
  0x22   : > { %s2888_s17 = sshll.u32 %s249_s15, 3  ;;  %s255_s20 = scalar_lea.hbm %s6064_s1, %s2889_s16 }
  0x23   : > { %s257_s25 = sshll.u32 %s255_s20, 4  ;;  %s251_s26 = scalar_lea.vmem [#allocation6], %s2888_s17  ;;  %s258_s25 = int_to_ptr.hbm [resolvable:$true] %s257_s25 }
  0x24   : > { %s259_s7 = sshll.u32 %s251_s26, 4  ;;  %p3608_p2 = pnand %p2955_p5, %p3579_p12  ;;  %s260_s7 = int_to_ptr.vmem [resolvable:$true] %s259_s7 }
  0x25   : > { %s248_s8 = scalar_lea.sflag [#allocation7], %s247_s13  ;;  %s3354_s0 = sshra.s32 %s258_s25, 4  ;;  %s3355_s0 = int_to_ptr.hbm [resolvable:$true] %s3354_s0 }
  0x26   : > { %s3356_s4 = scalar_lea.hbm %s3355_s0, 8  ;;  %p3358_p9 = pneg %p3608_p2 }
  0x27   : > { %p3357_p8 = scmp.ne.s32.totalorder %s3355_s0, %s3356_s4  ;;  %s3361_s17 = scalar_lea.hbm %s6064_s1, 16 }
  0x28   : > { %p3362_p12 = scmp.lt.s32.totalorder %s3355_s0, %s6064_s1  ;;  %p3363_p3 = scmp.lt.s32.totalorder %s3361_s17, %s3356_s4 }
  0x29   : > { %p3359_p10 = pnand %p3358_p9, %p3357_p8 }
  0x2a   : > { %p3364_p5 = por %p3363_p3, %p3362_p12 }
  0x2b   : > { %p3360_p11 = pneg %p3359_p10 }
  0x2d   : > { %p3365_p6 = pnand %p3364_p5, %p3360_p11 }
  0x2f   : > { %3368 = shalt.err (!%p3365_p6)
}
  0x30   : > { %2947 = dma.hbm_to_vmem [thread:$0]  (!%p3608_p2), %s258_s25, 128, %s260_s7, %s248_s8  }
  0x31   : > { %268 = sbr.rel (%p3539_p4) target bundleno = 1388 (0x56c), region = 44 }
  0x36   : > { %3429 = dma.done.wait (%p66_p1), [#allocation4], 1024  }
  0x37   : > { %3431 = vsyncadd (%p66_p1), [#allocation4], 4294966272  ;;  %s275_s0 = sand.u32 1, %s3533_s28   ;;  %s3630_s4 = sand.u32 1, %s3454_s22  }
  0x38   : > { %s2892_s13 = sshll.u32 %s3630_s4, 3  ;;  %s276_s19 = scalar_lea.sflag [#allocation7], %s275_s0 }
  0x39   : > { %s279_s20 = scalar_lea.vmem [#allocation6], %s2892_s13 }
  0x3a   : > { %3433 = dma.done.wait (%p3585_p13), %s276_s19, 128  }
  0x3b   : > { %3435 = vsyncadd (%p3585_p13), %s276_s19, 4294967168 }
  0x3c   : > { %3437 = dma.done.wait (%p66_p1), [#allocation7], 4096  }
  0x3d   : > { %3439 = vsyncadd (%p66_p1), [#allocation7], 4294963200 }
  0x3e   : > { %3441 = dma.done.wait (%p66_p1), [#allocation10], 8192  }
  0x3f   : > { %3443 = vsyncadd (%p66_p1), [#allocation10], 4294959104  ;;  %vm320_vm0 = vcmask 261120   ;;  %v319_v0 = vld [vmem:[%s279_s20] sm:$0xff]  ;;  %v3471_v2 = vmov 32.0   ;;  %v384_v14 = vld [vmem:[#allocation8 + $0xc0] sm:$0xff] }
  0x40   : > { %v321_v1 = vsel %vm320_vm0, %v319_v0, 0.0  ;;  %3004 = vrcp.f32 %v3471_v2  ;;  %v385_v15 = vld [vmem:[#allocation8 + $0xc8] sm:$0xff]  ;;  %v386_v16 = vld [vmem:[#allocation8 + $0xd0] sm:$0xff]  ;;  %407 = vmatpush.msra.mxu0 %v384_v14  ;;  %v387_v17 = vld [vmem:[#allocation8 + $0xd8] sm:$0xff]  ;;  %vm610_vm5 = vcmask 57344   ;;  %s2895_s7 = sshll.u32 %s3630_s4, 4 }
  0x41   : > { %322 = vadd.xlane.f32.xlu0 %v321_v1  ;;  %427 = vmatpush.msra.mxu1 %v385_v15  ;;  %v376_v18 = vld [vmem:[#allocation8 + $0x80] sm:$0xff]  ;;  %v377_v19 = vld [vmem:[#allocation8 + $0x88] sm:$0xff]  ;;  %v378_v20 = vld [vmem:[#allocation8 + $0x90] sm:$0xff]  ;;  %s318_s27 = scalar_lea.vmem [#allocation11], %s2895_s7  ;;  %s2917_s8 = sshll.u32 %s3533_s28, 4 }
  0x42   : > { %447 = vmatpush.msra.mxu2 %v386_v16  ;;  %467 = vmatpush.msra.mxu3 %v387_v17  ;;  %v379_v21 = vld [vmem:[#allocation8 + $0x98] sm:$0xff]  ;;  %v368_v22 = vld [vmem:[#allocation8 + $0x40] sm:$0xff]  ;;  %v369_v23 = vld [vmem:[#allocation8 + $0x48] sm:$0xff]  ;;  %s2774_s17 = scalar_lea.hbm %s6069_s6, %s2917_s8  ;;  %s2775_s18 = sshll.u32 %s318_s27, 4  ;;  %s2776_s18 = int_to_ptr.vmem [resolvable:$true] %s2775_s18 }
  0x43   : > { %408 = vmatpush.msra.mxu0 %v376_v18  ;;  %428 = vmatpush.msra.mxu1 %v377_v19  ;;  %v370_v24 = vld [vmem:[#allocation8 + $0x50] sm:$0xff]  ;;  %v371_v25 = vld [vmem:[#allocation8 + $0x58] sm:$0xff]  ;;  %v360_v26 = vld [vmem:[#allocation8] sm:$0xff]  ;;  %s2777_s10 = sshll.u32 %s2774_s17, 4  ;;  %s2763_s0 = scalar_lea.sflag [#allocation5], %s3630_s4  ;;  %s2778_s10 = int_to_ptr.hbm [resolvable:$true] %s2777_s10 }
  0x44   : > { %448 = vmatpush.msra.mxu2 %v378_v20  ;;  %468 = vmatpush.msra.mxu3 %v379_v21  ;;  %v361_v27 = vld [vmem:[#allocation8 + $0x8] sm:$0xff]  ;;  %v362_v28 = vld [vmem:[#allocation8 + $0x10] sm:$0xff]  ;;  %v363_v29 = vld [vmem:[#allocation8 + $0x18] sm:$0xff]  ;;  %s3398_s13 = sshra.s32 %s2778_s10, 4  ;;  %s3404_s29 = scalar_lea.hbm %s6069_s6, 32  ;;  %s3399_s13 = int_to_ptr.hbm [resolvable:$true] %s3398_s13 }
  0x45   : > { %409 = vmatpush.msra.mxu0 %v368_v22  ;;  %429 = vmatpush.msra.mxu1 %v369_v23  ;;  %v388_v30 = vld [vmem:[#allocation8 + $0xe0] sm:$0xff]  ;;  %v389_v31 = vld [vmem:[#allocation8 + $0xe8] sm:$0xff]  ;;  %v390_v32 = vld [vmem:[#allocation8 + $0xf0] sm:$0xff]  ;;  %s3400_s28 = scalar_lea.hbm %s3399_s13, 16  ;;  %p3405_p13 = scmp.lt.s32.totalorder %s3399_s13, %s6069_s6 }
  0x46   : > { %v3005_v3 = vpop.eup %3004  ;;  %449 = vmatpush.msra.mxu2 %v370_v24  ;;  %469 = vmatpush.msra.mxu3 %v371_v25  ;;  %v391_v33 = vld [vmem:[#allocation8 + $0xf8] sm:$0xff]  ;;  %v380_v34 = vld [vmem:[#allocation8 + $0xa0] sm:$0xff]  ;;  %v381_v35 = vld [vmem:[#allocation8 + $0xa8] sm:$0xff]  ;;  %p3401_p1 = scmp.ne.s32.totalorder %s3399_s13, %s3400_s28  ;;  %p3406_p2 = scmp.lt.s32.totalorder %s3404_s29, %s3400_s28 }
  0x47   : > { %v325_v4 = vmul.f32 32.0, %v3005_v3  ;;  %vm329_vm1 = vweird.f32 %v3005_v3  ;;  %410 = vmatpush.msra.mxu0 %v360_v26  ;;  %430 = vmatpush.msra.mxu1 %v361_v27  ;;  %v382_v37 = vld [vmem:[#allocation8 + $0xb0] sm:$0xff]  ;;  %v383_v38 = vld [vmem:[#allocation8 + $0xb8] sm:$0xff]  ;;  %v372_v39 = vld [vmem:[#allocation8 + $0x60] sm:$0xff] }
  0x48   : > { %450 = vmatpush.msra.mxu2 %v362_v28  ;;  %470 = vmatpush.msra.mxu3 %v363_v29  ;;  %v373_v41 = vld [vmem:[#allocation8 + $0x68] sm:$0xff]  ;;  %v374_v42 = vld [vmem:[#allocation8 + $0x70] sm:$0xff]  ;;  %v375_v43 = vld [vmem:[#allocation8 + $0x78] sm:$0xff]  ;;  %p3402_p4 = pnand %p3401_p1, %p3591_p0  ;;  %p3407_p8 = por %p3406_p2, %p3405_p13 }
  0x49   : > { %v326_v5 = vsub.f32 1.0, %v325_v4  ;;  %487 = vmatpush.msrb.mxu0 %v388_v30  ;;  %507 = vmatpush.msrb.mxu1 %v389_v31  ;;  %v364_v44 = vld [vmem:[#allocation8 + $0x20] sm:$0xff]  ;;  %v365_v45 = vld [vmem:[#allocation8 + $0x28] sm:$0xff]  ;;  %v366_v47 = vld [vmem:[#allocation8 + $0x30] sm:$0xff] }
  0x4a   : > { %527 = vmatpush.msrb.mxu2 %v390_v32  ;;  %547 = vmatpush.msrb.mxu3 %v391_v33  ;;  %v367_v48 = vld [vmem:[#allocation8 + $0x38] sm:$0xff]  ;;  %v3002_v55 = vld [vmem:[%s6065_s2] ss:$0 sm:$0xff]  ;;  %v555_v63 = vld [vmem:[#allocation3] sm:$0xff]  ;;  %p3403_p6 = pneg %p3402_p4 }
  0x4b   : > { %v327_v6 = vmul.f32 %v3005_v3, %v326_v5  ;;  %488 = vmatpush.msrb.mxu0 %v380_v34  ;;  %508 = vmatpush.msrb.mxu1 %v381_v35  ;;  %v3003_v57 = vld [vmem:[%s6066_s3] ss:$0 sm:$0xff]  ;;  %v556_v5 = vld [vmem:[#allocation3 + $0x8] sm:$0xff] }
  0x4c   : > { %528 = vmatpush.msrb.mxu2 %v382_v37  ;;  %548 = vmatpush.msrb.mxu3 %v383_v38  ;;  %p3408_p9 = pnand %p3407_p8, %p3403_p6 }
  0x4d   : > { %v328_v7 = vadd.f32 %v3005_v3, %v327_v6  ;;  %489 = vmatpush.msrb.mxu0 %v372_v39  ;;  %509 = vmatpush.msrb.mxu1 %v373_v41  ;;  %v1068_v6 = vld [vmem:[#allocation3 + $0x18] sm:$0xff] }
  0x4e   : > { %529 = vmatpush.msrb.mxu2 %v374_v42  ;;  %549 = vmatpush.msrb.mxu3 %v375_v43 }
  0x4f   : > { %v330_v8 = vsel %vm329_vm1, %v3005_v3, %v328_v7  ;;  %490 = vmatpush.msrb.mxu0 %v364_v44  ;;  %510 = vmatpush.msrb.mxu1 %v365_v45 }
  0x50   : > { %530 = vmatpush.msrb.mxu2 %v366_v47  ;;  %550 = vmatpush.msrb.mxu3 %v367_v48 }
  0xb4   : > { %v323_v9 = vpop.xlane.xlu0 %322 }
  0xb5   : > { %v331_v10 = vmul.f32 %v330_v8, %v323_v9  ;;  %v1577_v9 = vld [vmem:[#allocation3 + $0x20] sm:$0xff] }
  0xb7   : > { %v3646_v11 = vsub.f32 %v319_v0, %v331_v10  ;;  %v1067_v0 = vld [vmem:[#allocation3 + $0x10] sm:$0xff] }
  0xb8   : > { %v2087_v10 = vld [vmem:[#allocation3 + $0x30] sm:$0xff] }
  0xb9   : > { %v333_v12 = vmul.f32 %v3646_v11, %v3646_v11 }
  0xbb   : > { %v334_v13 = vsel %vm320_vm0, %v333_v12, 0.0  ;;  %v2088_v12 = vld [vmem:[#allocation3 + $0x38] sm:$0xff] }
  0xbc   : > { %335 = vadd.xlane.f32.xlu0 %v334_v13 }
 0x12f   : > { %v336_v36 = vpop.xlane.xlu0 %335 }
 0x130   : > { %v337_v40 = vmul.f32 %v336_v36, %v330_v8 }
 0x132   : > { %v338_v46 = vadd.f32 1e-05, %v337_v40 }
 0x134   : > { %3006 = vrsqrt.f32 %v338_v46  ;;  %vm345_vm3 = vweird.f32 %v338_v46 }
 0x13a   : > { %v3007_v49 = vpop.eup %3006 }
 0x13b   : > { %v340_v50 = vmul.f32 %v3007_v49, %v338_v46  ;;  %vm346_vm2 = vweird.f32 %v3007_v49 }
 0x13c   : > { %vm347_vm4 = vmor %vm345_vm3, %vm346_vm2 }
 0x13d   : > { %v341_v51 = vmul.f32 %v3007_v49, %v340_v50 }
 0x13f   : > { %v342_v52 = vmul.f32 0.5, %v341_v51 }
 0x141   : > { %v343_v53 = vsub.f32 1.5, %v342_v52 }
 0x143   : > { %v344_v54 = vmul.f32 %v3007_v49, %v343_v53 }
 0x145   : > { %v348_v56 = vsel %vm347_vm4, %v3007_v49, %v344_v54 }
 0x146   : > { %v349_v58 = vmul.f32 %v348_v56, %v3646_v11  ;;  %v1578_v11 = vld [vmem:[#allocation3 + $0x28] sm:$0xff] }
 0x148   : > { %v354_v59 = vmul.f32 %v3002_v55, %v349_v58 }
 0x14a   : > { %v359_v60 = vadd.f32 %v3003_v57, %v354_v59 }
 0x14c   : > { %2896 = vmatmul.msk.f32.vlgmr.msra.gmra.mxu0 %vm320_vm0, %v359_v60  ;;  %2897 = vmatmul.msk.f32.vlgmr.msra.gmra.mxu1 %vm320_vm0, %v359_v60 }
 0x14d   : > { %2898 = vmatmul.msk.f32.vlgmr.msra.gmra.mxu2 %vm320_vm0, %v359_v60  ;;  %2899 = vmatmul.msk.f32.vlgmr.msra.gmra.mxu3 %vm320_vm0, %v359_v60 }
 0x154   : > { %2900 = vmatmul.msk.f32.vlgmr.msrb.gmra.mxu0 %vm320_vm0, %v359_v60  ;;  %2901 = vmatmul.msk.f32.vlgmr.msrb.gmra.mxu1 %vm320_vm0, %v359_v60 }
 0x155   : > { %2902 = vmatmul.msk.f32.vlgmr.msrb.gmra.mxu2 %vm320_vm0, %v359_v60  ;;  %2903 = vmatmul.msk.f32.vlgmr.msrb.gmra.mxu3 %vm320_vm0, %v359_v60 }
 0x1c9   : > { %v412_v61 = vpop.f32.mrf.mxu0  ;;  %v432_v62 = vpop.f32.mrf.mxu1 }
 0x1ca   : > { %572 = vmatpush.xpose.msra.mxu0 %v412_v61  ;;  %1084 = vmatpush.xpose.msra.mxu2 %v432_v62 }
 0x1cd   : > { %573 = vmatmul.f32.vlgmr.msra.gmra.mxu0 %v555_v63  ;;  %1085 = vmatmul.f32.vlgmr.msra.gmra.mxu2 %v1067_v0 }
 0x1d0   : > { %v452_v1 = vpop.f32.mrf.mxu2  ;;  %v472_v2 = vpop.f32.mrf.mxu3 }
 0x1d1   : > { %1594 = vmatpush.xpose.msrb.mxu0 %v452_v1  ;;  %2104 = vmatpush.xpose.msrb.mxu2 %v472_v2  ;;  %v492_v3 = vpop.f32.mrf.mxu0  ;;  %v512_v4 = vpop.f32.mrf.mxu1 }
 0x1d2   : > { %1056 = vmatpush.msra.mxu1 %v492_v3  ;;  %1566 = vmatpush.msra.mxu3 %v512_v4 }
 0x1d5   : > { %576 = vmatmul.f32.gmra.mxu0 %v556_v5  ;;  %1088 = vmatmul.f32.gmra.mxu2 %v1068_v6 }
 0x1d8   : > { %v532_v7 = vpop.f32.mrf.mxu2  ;;  %v552_v8 = vpop.f32.mrf.mxu3 }
 0x1d9   : > { %2076 = vmatpush.msrb.mxu1 %v532_v7  ;;  %2586 = vmatpush.msrb.mxu3 %v552_v8 }
 0x1dd   : > { %1595 = vmatmul.f32.vlgmr.msrb.gmra.mxu0 %v1577_v9  ;;  %2105 = vmatmul.f32.vlgmr.msrb.gmra.mxu2 %v2087_v10 }
 0x1e5   : > { %1598 = vmatmul.f32.gmra.mxu0 %v1578_v11  ;;  %2108 = vmatmul.f32.gmra.mxu2 %v2088_v12 }
 0x24a   : > { %v3666_v13 = vpop.f32.mrf.mxu0 }
 0x24b   : > { %v611_v14 = vsel %vm610_vm5, %v3666_v13, -inf  ;;  %v585_v15 = vrot.slane %v3666_v13, 4  ;;  %v583_v16 = vrot.slane %v3666_v13, 2  ;;  %v582_v19 = vrot.slane %v3666_v13, 1 }
 0x24c   : > { %612 = vmax.xlane.f32.xlu1 %v611_v14  ;;  %v588_v20 = vrot.slane %v3666_v13, 7  ;;  %v584_v21 = vrot.slane %v3666_v13, 3  ;;  %v586_v25 = vrot.slane %v3666_v13, 5  ;;  %v587_v27 = vrot.slane %v3666_v13, 6 }
 0x24d   : > { %v623_v17 = vsel %vm610_vm5, %v585_v15, -inf  ;;  %v617_v18 = vsel %vm610_vm5, %v583_v16, -inf  ;;  %v614_v22 = vsel %vm610_vm5, %v582_v19, -inf }
 0x24e   : > { %624 = vmax.xlane.f32.xlu0 %v623_v17  ;;  %618 = vmax.xlane.f32.xlu2 %v617_v18  ;;  %v632_v23 = vsel %vm610_vm5, %v588_v20, -inf  ;;  %v620_v24 = vsel %vm610_vm5, %v584_v21, -inf  ;;  %v626_v28 = vsel %vm610_vm5, %v586_v25, -inf  ;;  %v629_v30 = vsel %vm610_vm5, %v587_v27, -inf }
 0x250   : > { %v3691_v26 = vpop.f32.mrf.mxu2 }
 0x251   : > { %v1122_v29 = vsel %vm610_vm5, %v3691_v26, -inf  ;;  %v1096_v32 = vrot.slane %v3691_v26, 3  ;;  %v1095_v33 = vrot.slane %v3691_v26, 2  ;;  %v1094_v37 = vrot.slane %v3691_v26, 1 }
 0x252   : > { %v3702_v31 = vpop.f32.mrf.mxu0  ;;  %v1099_v38 = vrot.slane %v3691_v26, 6  ;;  %v1098_v39 = vrot.slane %v3691_v26, 5  ;;  %v1097_v43 = vrot.slane %v3691_v26, 4  ;;  %v1100_v49 = vrot.slane %v3691_v26, 7 }
 0x253   : > { %v635_v34 = vsel %vm610_vm5, %v3702_v31, -inf  ;;  %v1131_v35 = vsel %vm610_vm5, %v1096_v32, -inf  ;;  %v1128_v36 = vsel %vm610_vm5, %v1095_v33, -inf  ;;  %v1125_v40 = vsel %vm610_vm5, %v1094_v37, -inf }
 0x254   : > { %615 = vmax.xlane.f32.xlu1 %v614_v22  ;;  %v1140_v41 = vsel %vm610_vm5, %v1099_v38, -inf  ;;  %v1137_v42 = vsel %vm610_vm5, %v1098_v39, -inf  ;;  %v590_v44 = vrot.slane %v3702_v31, 2  ;;  %v589_v45 = vrot.slane %v3702_v31, 1 }
 0x255   : > { %v1134_v46 = vsel %vm610_vm5, %v1097_v43, -inf  ;;  %v593_v50 = vrot.slane %v3702_v31, 5  ;;  %v592_v51 = vrot.slane %v3702_v31, 4  ;;  %v1143_v52 = vsel %vm610_vm5, %v1100_v49, -inf }
 0x256   : > { %633 = vmax.xlane.f32.xlu0 %v632_v23  ;;  %621 = vmax.xlane.f32.xlu2 %v620_v24  ;;  %v641_v47 = vsel %vm610_vm5, %v590_v44, -inf  ;;  %v638_v48 = vsel %vm610_vm5, %v589_v45, -inf  ;;  %v591_v56 = vrot.slane %v3702_v31, 3  ;;  %v595_v58 = vrot.slane %v3702_v31, 7 }
 0x257   : > { %v650_v54 = vsel %vm610_vm5, %v593_v50, -inf  ;;  %v647_v55 = vsel %vm610_vm5, %v592_v51, -inf  ;;  %v594_v62 = vrot.slane %v3702_v31, 6 }
 0x258   : > { %v3744_v53 = vpop.f32.mrf.mxu2  ;;  %v644_v59 = vsel %vm610_vm5, %v591_v56, -inf  ;;  %v656_v61 = vsel %vm610_vm5, %v595_v58, -inf }
 0x259   : > { %v1101_v57 = vrot.slane %v3744_v53, 1  ;;  %v1104_v63 = vrot.slane %v3744_v53, 4  ;;  %v653_v0 = vsel %vm610_vm5, %v594_v62, -inf  ;;  %v1146_v2 = vsel %vm610_vm5, %v3744_v53, -inf }
 0x25a   : > { %v1102_v3 = vrot.slane %v3744_v53, 2  ;;  %v1107_v4 = vrot.slane %v3744_v53, 7  ;;  %v1103_v5 = vrot.slane %v3744_v53, 3  ;;  %v3780_v7 = vpop.f32.mrf.mxu0  ;;  %v1105_v10 = vrot.slane %v3744_v53, 5 }
 0x25b   : > { %v1149_v60 = vsel %vm610_vm5, %v1101_v57, -inf  ;;  %v1158_v1 = vsel %vm610_vm5, %v1104_v63, -inf  ;;  %v6089_v11 = vrot.slane %v3780_v7, 2  ;;  %v1106_v12 = vrot.slane %v3744_v53, 6 }
 0x25c   : > { %627 = vmax.xlane.f32.xlu1 %v626_v28  ;;  %v1152_v6 = vsel %vm610_vm5, %v1102_v3, -inf  ;;  %v1167_v8 = vsel %vm610_vm5, %v1107_v4, -inf  ;;  %v1155_v9 = vsel %vm610_vm5, %v1103_v5, -inf  ;;  %v1161_v14 = vsel %vm610_vm5, %v1105_v10, -inf }
 0x25d   : > { %v1638_v17 = vsel %vm610_vm5, %v6089_v11, -inf  ;;  %v1164_v18 = vsel %vm610_vm5, %v1106_v12, -inf  ;;  %v6085_v22 = vrot.slane %v3780_v7, 5  ;;  %v1604_v23 = vrot.slane %v3780_v7, 1 }
 0x25e   : > { %1123 = vmax.xlane.f32.xlu0 %v1122_v29  ;;  %630 = vmax.xlane.f32.xlu2 %v629_v30  ;;  %v1632_v24 = vsel %vm610_vm5, %v3780_v7, -inf  ;;  %v6087_v30 = vrot.slane %v3780_v7, 3 }
 0x25f   : > { %v1647_v28 = vsel %vm610_vm5, %v6085_v22, -inf  ;;  %v1635_v29 = vsel %vm610_vm5, %v1604_v23, -inf }
 0x264   : > { %636 = vmax.xlane.f32.xlu1 %v635_v34  ;;  %v3811_v34 = vpop.f32.mrf.mxu0 }
 0x266   : > { %1132 = vmax.xlane.f32.xlu0 %v1131_v35  ;;  %1129 = vmax.xlane.f32.xlu2 %v1128_v36  ;;  %v1607_v35 = vrot.slane %v3780_v7, 4  ;;  %v1641_v36 = vsel %vm610_vm5, %v6087_v30, -inf }
 0x26c   : > { %1126 = vmax.xlane.f32.xlu1 %v1125_v40  ;;  %v1656_v40 = vsel %vm610_vm5, %v3811_v34, -inf }
 0x26e   : > { %1141 = vmax.xlane.f32.xlu0 %v1140_v41  ;;  %1138 = vmax.xlane.f32.xlu2 %v1137_v42  ;;  %v3819_v41 = vpop.f32.mrf.mxu2  ;;  %v1644_v42 = vsel %vm610_vm5, %v1607_v35, -inf }
 0x274   : > { %1135 = vmax.xlane.f32.xlu1 %v1134_v46  ;;  %v6082_v46 = vrot.slane %v3780_v7, 6 }
 0x276   : > { %642 = vmax.xlane.f32.xlu0 %v641_v47  ;;  %639 = vmax.xlane.f32.xlu2 %v638_v48  ;;  %v6081_v47 = vrot.slane %v3819_v41, 1  ;;  %v6086_v48 = vrot.slane %v3780_v7, 7 }
 0x27c   : > { %1144 = vmax.xlane.f32.xlu1 %v1143_v52  ;;  %v1650_v52 = vsel %vm610_vm5, %v6082_v46, -inf }
 0x27e   : > { %651 = vmax.xlane.f32.xlu0 %v650_v54  ;;  %648 = vmax.xlane.f32.xlu2 %v647_v55  ;;  %v2145_v54 = vsel %vm610_vm5, %v6081_v47, -inf  ;;  %v1653_v55 = vsel %vm610_vm5, %v6086_v48, -inf }
 0x284   : > { %645 = vmax.xlane.f32.xlu1 %v644_v59  ;;  %v6080_v59 = vrot.slane %v3819_v41, 2 }
 0x286   : > { %1150 = vmax.xlane.f32.xlu0 %v1149_v60  ;;  %657 = vmax.xlane.f32.xlu2 %v656_v61  ;;  %v6075_v60 = vrot.slane %v3819_v41, 4  ;;  %v2148_v61 = vsel %vm610_vm5, %v6080_v59, -inf }
 0x28c   : > { %654 = vmax.xlane.f32.xlu1 %v653_v0  ;;  %v2154_v0 = vsel %vm610_vm5, %v6075_v60, -inf }
 0x28e   : > { %1159 = vmax.xlane.f32.xlu0 %v1158_v1  ;;  %1147 = vmax.xlane.f32.xlu2 %v1146_v2  ;;  %v2142_v1 = vsel %vm610_vm5, %v3819_v41, -inf }
 0x294   : > { %1153 = vmax.xlane.f32.xlu1 %v1152_v6  ;;  %v6074_v6 = vrot.slane %v3819_v41, 5 }
 0x296   : > { %1168 = vmax.xlane.f32.xlu0 %v1167_v8  ;;  %1156 = vmax.xlane.f32.xlu2 %v1155_v9 }
 0x29c   : > { %1162 = vmax.xlane.f32.xlu1 %v1161_v14  ;;  %v6073_v14 = vrot.slane %v3819_v41, 7 }
 0x29e   : > { %1639 = vmax.xlane.f32.xlu0 %v1638_v17  ;;  %1165 = vmax.xlane.f32.xlu2 %v1164_v18  ;;  %v6079_v17 = vrot.slane %v3819_v41, 3  ;;  %v2157_v18 = vsel %vm610_vm5, %v6074_v6, -inf  ;;  %v3897_v6 = vpop.f32.mrf.mxu2 }
 0x29f   : > { %v6090_v59 = vrot.slane %v3897_v6, 3  ;;  %v6091_v47 = vrot.slane %v3897_v6, 2 }
 0x2a4   : > { %1633 = vmax.xlane.f32.xlu1 %v1632_v24  ;;  %v2163_v24 = vsel %vm610_vm5, %v6073_v14, -inf  ;;  %v6083_v14 = vrot.slane %v3811_v34, 7 }
 0x2a6   : > { %1648 = vmax.xlane.f32.xlu0 %v1647_v28  ;;  %1636 = vmax.xlane.f32.xlu2 %v1635_v29  ;;  %v2151_v28 = vsel %vm610_vm5, %v6079_v17, -inf }
 0x2ac   : > { %1642 = vmax.xlane.f32.xlu1 %v1641_v36  ;;  %v6070_v36 = vrot.slane %v3811_v34, 1 }
 0x2ae   : > { %1657 = vmax.xlane.f32.xlu0 %v1656_v40  ;;  %1645 = vmax.xlane.f32.xlu2 %v1644_v42 }
 0x2b4   : > { %1651 = vmax.xlane.f32.xlu1 %v1650_v52  ;;  %v6071_v52 = vrot.slane %v3811_v34, 3 }
 0x2b6   : > { %2146 = vmax.xlane.f32.xlu0 %v2145_v54  ;;  %1654 = vmax.xlane.f32.xlu2 %v1653_v55  ;;  %v6072_v54 = vrot.slane %v3819_v41, 6  ;;  %v1659_v55 = vsel %vm610_vm5, %v6070_v36, -inf  ;;  %v6077_v36 = vrot.slane %v3811_v34, 6 }
 0x2bc   : > { %2149 = vmax.xlane.f32.xlu1 %v2148_v61  ;;  %v1665_v61 = vsel %vm610_vm5, %v6071_v52, -inf }
 0x2be   : > { %2155 = vmax.xlane.f32.xlu0 %v2154_v0  ;;  %2143 = vmax.xlane.f32.xlu2 %v2142_v1  ;;  %v2160_v0 = vsel %vm610_vm5, %v6072_v54, -inf }
 0x2bf   : > { %v3846_v2 = vpop.xlane.xlu1 %612 }
 0x2c1   : > { %v3849_v8 = vpop.xlane.xlu0 %624  ;;  %v619_v9 = vpop.xlane.xlu2 %618 }
 0x2c4   : > { %2158 = vmax.xlane.f32.xlu1 %v2157_v18  ;;  %v6076_v18 = vrot.slane %v3811_v34, 4 }
 0x2c6   : > { %2164 = vmax.xlane.f32.xlu0 %v2163_v24  ;;  %2152 = vmax.xlane.f32.xlu2 %v2151_v28  ;;  %v1668_v52 = vsel %vm610_vm5, %v6076_v18, -inf }
 0x2c7   : > { %v616_v29 = vpop.xlane.xlu1 %615 }
 0x2c8   : > { %v660_v22 = vsub.f32 %v582_v19, %v616_v29  ;;  %v659_v19 = vsub.f32 %v3666_v13, %v3846_v2  ;;  %v663_v29 = vsub.f32 %v585_v15, %v3849_v8  ;;  %v6092_v8 = vrot.slane %v3897_v6, 7 }
 0x2c9   : > { %v3863_v40 = vpop.xlane.xlu0 %633  ;;  %v3865_v42 = vpop.xlane.xlu2 %621 }
 0x2ca   : > { %v683_v15 = vmul.f32 1.442695, %v663_v29  ;;  %v666_v29 = vsub.f32 %v588_v20, %v3863_v40 }
 0x2cc   : > { %1660 = vmax.xlane.f32.xlu1 %v1659_v55  ;;  %v6078_v55 = vrot.slane %v3811_v34, 2 }
 0x2ce   : > { %1666 = vmax.xlane.f32.xlu0 %v1665_v61  ;;  %2161 = vmax.xlane.f32.xlu2 %v2160_v0  ;;  %v1674_v61 = vsel %vm610_vm5, %v6077_v36, -inf  ;;  %v1662_v0 = vsel %vm610_vm5, %v6078_v55, -inf  ;;  %v1677_v36 = vsel %vm610_vm5, %v6083_v14, -inf  ;;  %v2166_v55 = vsel %vm610_vm5, %v3897_v6, -inf }
 0x2cf   : > { %v628_v1 = vpop.xlane.xlu1 %627 }
 0x2d1   : > { %v3879_v24 = vpop.xlane.xlu0 %1123  ;;  %v3881_v28 = vpop.xlane.xlu2 %630 }
 0x2d4   : > { %1669 = vmax.xlane.f32.xlu1 %v1668_v52  ;;  %v6084_v52 = vrot.slane %v3811_v34, 5 }
 0x2d6   : > { %1675 = vmax.xlane.f32.xlu0 %v1674_v61  ;;  %1663 = vmax.xlane.f32.xlu2 %v1662_v0  ;;  %v1671_v61 = vsel %vm610_vm5, %v6084_v52, -inf  ;;  %v6088_v0 = vrot.slane %v3897_v6, 1  ;;  %v661_v52 = vsub.f32 %v583_v16, %v619_v9  ;;  %v677_v16 = vmul.f32 1.442695, %v660_v22 }
 0x2d7   : > { %v3894_v54 = vpop.xlane.xlu1 %636 }
 0x2d8   : > { %v679_v48 = vmul.f32 1.442695, %v661_v52  ;;  %v664_v52 = vsub.f32 %v586_v25, %v628_v1 }
 0x2d9   : > { %v3899_v60 = vpop.xlane.xlu0 %1132  ;;  %v1130_v18 = vpop.xlane.xlu2 %1129 }
 0x2da   : > { %3008 = vpow2.f32 %v679_v48 }
 0x2db   : > { %3010 = vpow2.f32 %v677_v16 }
 0x2dc   : > { %1678 = vmax.xlane.f32.xlu1 %v1677_v36  ;;  %v2169_v36 = vsel %vm610_vm5, %v6088_v0, -inf  ;;  %v6095_v0 = vrot.slane %v3897_v6, 4 }
 0x2de   : > { %2167 = vmax.xlane.f32.xlu0 %v2166_v55  ;;  %1672 = vmax.xlane.f32.xlu2 %v1671_v61  ;;  %v2175_v55 = vsel %vm610_vm5, %v6090_v59, -inf  ;;  %v2172_v61 = vsel %vm610_vm5, %v6091_v47, -inf  ;;  %v6094_v59 = vrot.slane %v3897_v6, 6  ;;  %v6093_v47 = vrot.slane %v3897_v6, 5 }
 0x2df   : > { %v3911_v17 = vpop.xlane.xlu1 %1126  ;;  %v2178_v22 = vsel %vm610_vm5, %v6095_v0, -inf }
 0x2e0   : > { %v2181_v2 = vsel %vm610_vm5, %v6093_v47, -inf  ;;  %v3960_v16 = vpop.eup %3008 }
 0x2e1   : > { %v3915_v46 = vpop.xlane.xlu0 %1141  ;;  %v3917_v14 = vpop.xlane.xlu2 %1138 }
 0x2e4   : > { %2170 = vmax.xlane.f32.xlu1 %v2169_v36  ;;  %v2184_v36 = vsel %vm610_vm5, %v6094_v59, -inf }
 0x2e6   : > { %2176 = vmax.xlane.f32.xlu0 %v2175_v55  ;;  %2173 = vmax.xlane.f32.xlu2 %v2172_v61  ;;  %v675_v55 = vmul.f32 1.442695, %v659_v19  ;;  %v685_v61 = vmul.f32 1.442695, %v664_v52  ;;  %v662_v19 = vsub.f32 %v584_v21, %v3865_v42  ;;  %v2187_v52 = vsel %vm610_vm5, %v6092_v8, -inf }
 0x2e7   : > { %v3932_v30 = vpop.xlane.xlu1 %1135 }
 0x2e8   : > { %3012 = vpow2.f32 %v675_v55  ;;  %v681_v42 = vmul.f32 1.442695, %v662_v19  ;;  %v689_v55 = vmul.f32 1.442695, %v666_v29  ;;  %v665_v19 = vsub.f32 %v587_v27, %v3881_v28 }
 0x2e9   : > { %v3935_v9 = vpop.xlane.xlu0 %642  ;;  %v3937_v11 = vpop.xlane.xlu2 %639  ;;  %3014 = vpow2.f32 %v683_v15  ;;  %v667_v29 = vsub.f32 %v3702_v31, %v3894_v54 }
 0x2ea   : > { %3016 = vpow2.f32 %v685_v61  ;;  %v687_v27 = vmul.f32 1.442695, %v665_v19  ;;  %v1171_v19 = vsub.f32 %v1094_v37, %v3911_v17 }
 0x2eb   : > { %3018 = vpow2.f32 %v681_v42  ;;  %v691_v28 = vmul.f32 1.442695, %v667_v29 }
 0x2ec   : > { %2179 = vmax.xlane.f32.xlu1 %v2178_v22  ;;  %v3966_v22 = vpop.eup %3010  ;;  %3020 = vpow2.f32 %v689_v55 }
 0x2ed   : > { %v710_v21 = vsel %vm610_vm5, %v3966_v22, 0.0 }
 0x2ee   : > { %2185 = vmax.xlane.f32.xlu0 %v2184_v36  ;;  %2182 = vmax.xlane.f32.xlu2 %v2181_v2  ;;  %v1172_v36 = vsub.f32 %v1095_v33, %v1130_v18  ;;  %v713_v2 = vsel %vm610_vm5, %v3960_v16, 0.0  ;;  %v3985_v40 = vpop.eup %3012 }
 0x2ef   : > { %v3957_v48 = vpop.xlane.xlu1 %1144  ;;  %v3987_v61 = vpop.eup %3014 }
 0x2f0   : > { %v1190_v15 = vmul.f32 1.442695, %v1172_v36  ;;  %v3993_v18 = vpop.eup %3016  ;;  %v1175_v36 = vsub.f32 %v1098_v39, %v3917_v14  ;;  %v719_v13 = vsel %vm610_vm5, %v3987_v61, 0.0 }
 0x2f1   : > { %v3962_v25 = vpop.xlane.xlu0 %651  ;;  %v3964_v1 = vpop.xlane.xlu2 %648 }
 0x2f2   : > { %3022 = vpow2.f32 %v1190_v15  ;;  %v1196_v42 = vmul.f32 1.442695, %v1175_v36  ;;  %v668_v36 = vsub.f32 %v589_v45, %v3937_v11 }
 0x2f3   : > { %3024 = vpow2.f32 %v687_v27  ;;  %v1188_v27 = vmul.f32 1.442695, %v1171_v19  ;;  %v1174_v19 = vsub.f32 %v1097_v43, %v3932_v30 }
 0x2f4   : > { %2188 = vmax.xlane.f32.xlu1 %v2187_v52  ;;  %v707_v52 = vsel %vm610_vm5, %v3985_v40, 0.0  ;;  %3026 = vpow2.f32 %v691_v28  ;;  %v693_v28 = vmul.f32 1.442695, %v668_v36  ;;  %v671_v36 = vsub.f32 %v592_v51, %v3964_v1 }
 0x2f5   : > { %3028 = vpow2.f32 %v1196_v42 }
 0x2f6   : > { %714 = vadd.xlane.f32.xlu0 %v713_v2  ;;  %711 = vadd.xlane.f32.xlu2 %v710_v21  ;;  %v722_v2 = vsel %vm610_vm5, %v3993_v18, 0.0  ;;  %v4011_v21 = vpop.eup %3018 }
 0x2f7   : > { %v3983_v20 = vpop.xlane.xlu1 %645  ;;  %v4013_v55 = vpop.eup %3020  ;;  %v716_v29 = vsel %vm610_vm5, %v4011_v21, 0.0 }
 0x2f8   : > { %v4019_v14 = vpop.eup %3022 }
 0x2f9   : > { %v3989_v8 = vpop.xlane.xlu0 %1150  ;;  %v3991_v33 = vpop.xlane.xlu2 %657 }
 0x2fa   : > { %v4037_v17 = vpop.eup %3024 }
 0x2fb   : > { %v4039_v42 = vpop.eup %3026 }
 0x2fc   : > { %708 = vadd.xlane.f32.xlu1 %v707_v52  ;;  %v1170_v52 = vsub.f32 %v3691_v26, %v3879_v24  ;;  %v728_v24 = vsel %vm610_vm5, %v4013_v55, 0.0  ;;  %v4045_v11 = vpop.eup %3028 }
 0x2fe   : > { %723 = vadd.xlane.f32.xlu0 %v722_v2  ;;  %720 = vadd.xlane.f32.xlu2 %v719_v13  ;;  %v1224_v2 = vsel %vm610_vm5, %v4019_v14, 0.0  ;;  %v1186_v13 = vmul.f32 1.442695, %v1170_v52  ;;  %v1173_v52 = vsub.f32 %v1096_v32, %v3899_v60  ;;  %v731_v32 = vsel %vm610_vm5, %v4039_v42, 0.0 }
 0x2ff   : > { %v4009_v54 = vpop.xlane.xlu1 %654 }
 0x300   : > { %3030 = vpow2.f32 %v1186_v13  ;;  %v1192_v60 = vmul.f32 1.442695, %v1173_v52  ;;  %v699_v13 = vmul.f32 1.442695, %v671_v36  ;;  %v1176_v52 = vsub.f32 %v1099_v38, %v3915_v46 }
 0x301   : > { %v4015_v15 = vpop.xlane.xlu0 %1159  ;;  %v4017_v39 = vpop.xlane.xlu2 %1147  ;;  %3032 = vpow2.f32 %v1188_v27  ;;  %v674_v36 = vsub.f32 %v595_v58, %v3991_v33 }
 0x302   : > { %3034 = vpow2.f32 %v693_v28  ;;  %v1198_v46 = vmul.f32 1.442695, %v1176_v52  ;;  %v670_v52 = vsub.f32 %v591_v56, %v3983_v20 }
 0x303   : > { %3036 = vpow2.f32 %v1192_v60 }
 0x304   : > { %717 = vadd.xlane.f32.xlu1 %v716_v29  ;;  %v725_v29 = vsel %vm610_vm5, %v4037_v17, 0.0 }
 0x306   : > { %1225 = vadd.xlane.f32.xlu0 %v1224_v2  ;;  %729 = vadd.xlane.f32.xlu2 %v728_v24  ;;  %v1233_v2 = vsel %vm610_vm5, %v4045_v11, 0.0  ;;  %v1194_v24 = vmul.f32 1.442695, %v1174_v19  ;;  %v4064_v30 = vpop.eup %3030  ;;  %v1177_v19 = vsub.f32 %v1100_v49, %v3957_v48 }
 0x307   : > { %v4035_v37 = vpop.xlane.xlu1 %1153  ;;  %v4066_v27 = vpop.eup %3032 }
 0x308   : > { %v4072_v1 = vpop.eup %3034  ;;  %3038 = vpow2.f32 %v1194_v24  ;;  %v1200_v26 = vmul.f32 1.442695, %v1177_v19 }
 0x309   : > { %v4041_v47 = vpop.xlane.xlu0 %1168  ;;  %v4043_v45 = vpop.xlane.xlu2 %1156  ;;  %3040 = vpow2.f32 %v699_v13  ;;  %v734_v38 = vsel %vm610_vm5, %v4072_v1, 0.0  ;;  %v669_v13 = vsub.f32 %v590_v44, %v3935_v9  ;;  %v697_v9 = vmul.f32 1.442695, %v670_v52 }
 0x30a   : > { %v4091_v48 = vpop.eup %3036  ;;  %3042 = vpow2.f32 %v1198_v46  ;;  %v673_v52 = vsub.f32 %v594_v62, %v4009_v54 }
 0x30b   : > { %3044 = vpow2.f32 %v1200_v26  ;;  %v1227_v19 = vsel %vm610_vm5, %v4091_v48, 0.0  ;;  %v695_v44 = vmul.f32 1.442695, %v669_v13  ;;  %v672_v13 = vsub.f32 %v593_v50, %v3962_v25 }
 0x30c   : > { %726 = vadd.xlane.f32.xlu1 %v725_v29  ;;  %v1218_v29 = vsel %vm610_vm5, %v4064_v30, 0.0  ;;  %v703_v31 = vmul.f32 1.442695, %v673_v52 }
 0x30d   : > { %v701_v25 = vmul.f32 1.442695, %v672_v13  ;;  %v1180_v13 = vsub.f32 %v1102_v3, %v4035_v37 }
 0x30e   : > { %1234 = vadd.xlane.f32.xlu0 %v1233_v2  ;;  %732 = vadd.xlane.f32.xlu2 %v731_v32  ;;  %v1221_v2 = vsel %vm610_vm5, %v4066_v27, 0.0  ;;  %v705_v32 = vmul.f32 1.442695, %v674_v36  ;;  %v4093_v60 = vpop.eup %3038 }
 0x30f   : > { %v4062_v43 = vpop.xlane.xlu1 %1162  ;;  %v4099_v33 = vpop.eup %3040  ;;  %v1230_v36 = vsel %vm610_vm5, %v4093_v60, 0.0 }
 0x310   : > { %3046 = vpow2.f32 %v705_v32  ;;  %v4117_v56 = vpop.eup %3042 }
 0x311   : > { %v4068_v28 = vpop.xlane.xlu0 %1639  ;;  %v4070_v51 = vpop.xlane.xlu2 %1165  ;;  %3048 = vpow2.f32 %v695_v44 }
 0x312   : > { %v4119_v46 = vpop.eup %3044  ;;  %3050 = vpow2.f32 %v697_v9 }
 0x314   : > { %1219 = vadd.xlane.f32.xlu1 %v1218_v29  ;;  %v1178_v29 = vsub.f32 %v3744_v53, %v4017_v39 }
 0x316   : > { %1222 = vadd.xlane.f32.xlu2 %v1221_v2  ;;  %735 = vadd.xlane.f32.xlu0 %v734_v38  ;;  %v743_v2 = vsel %vm610_vm5, %v4099_v33, 0.0  ;;  %v1202_v20 = vmul.f32 1.442695, %v1178_v29  ;;  %v4125_v32 = vpop.eup %3046  ;;  %v1181_v29 = vsub.f32 %v1103_v5, %v4043_v45 }
 0x317   : > { %v4089_v49 = vpop.xlane.xlu1 %1633  ;;  %v752_v50 = vsel %vm610_vm5, %v4125_v32, 0.0  ;;  %v4144_v54 = vpop.eup %3048 }
 0x318   : > { %3052 = vpow2.f32 %v1202_v20  ;;  %v4146_v44 = vpop.eup %3050  ;;  %v1179_v20 = vsub.f32 %v1101_v57, %v3989_v8  ;;  %v737_v52 = vsel %vm610_vm5, %v4144_v54, 0.0 }
 0x319   : > { %v4095_v24 = vpop.xlane.xlu0 %1648  ;;  %v4097_v58 = vpop.xlane.xlu2 %1636  ;;  %6140 = vst [vmem:[#allocation17_spill] sm:$0xff] %v4146_v44  ;;  %3054 = vpow2.f32 %v701_v25 }
 0x31a   : > { %3056 = vpow2.f32 %v703_v31  ;;  %v1204_v8 = vmul.f32 1.442695, %v1179_v20  ;;  %v1183_v20 = vsub.f32 %v1105_v10, %v4062_v43 }
 0x31c   : > { %1228 = vadd.xlane.f32.xlu1 %v1227_v19  ;;  %v1236_v19 = vsel %vm610_vm5, %v4117_v56, 0.0 }
 0x31e   : > { %1231 = vadd.xlane.f32.xlu2 %v1230_v36  ;;  %744 = vadd.xlane.f32.xlu0 %v743_v2  ;;  %v1239_v36 = vsel %vm610_vm5, %v4119_v46, 0.0  ;;  %v1208_v2 = vmul.f32 1.442695, %v1181_v29  ;;  %v4152_v45 = vpop.eup %3052  ;;  %v740_v29 = vsel %vm610_vm5, %v4146_v44, 0.0 }
 0x31f   : > { %v4115_v38 = vpop.xlane.xlu1 %1642  ;;  %6141 = vst [vmem:[#allocation18_spill] sm:$0xff] %v4152_v45  ;;  %v1242_v57 = vsel %vm610_vm5, %v4152_v45, 0.0  ;;  %v4171_v37 = vpop.eup %3054 }
 0x320   : > { %3058 = vpow2.f32 %v1208_v2  ;;  %6142 = vst [vmem:[#allocation19_spill] sm:$0xff] %v4171_v37  ;;  %v4173_v25 = vpop.eup %3056  ;;  %v1182_v2 = vsub.f32 %v1104_v63, %v4015_v15 }
 0x321   : > { %v4121_v26 = vpop.xlane.xlu0 %1657  ;;  %v4123_v39 = vpop.xlane.xlu2 %1645  ;;  %6143 = vst [vmem:[#allocation20_spill] sm:$0xff] %v4173_v25  ;;  %3060 = vpow2.f32 %v1204_v8 }
 0x322   : > { %v1210_v15 = vmul.f32 1.442695, %v1182_v2  ;;  %v1680_v2 = vsub.f32 %v3780_v7, %v4089_v49 }
 0x324   : > { %1237 = vadd.xlane.f32.xlu1 %v1236_v19  ;;  %v1184_v19 = vsub.f32 %v1106_v12, %v4070_v51 }
 0x326   : > { %1240 = vadd.xlane.f32.xlu2 %v1239_v36  ;;  %753 = vadd.xlane.f32.xlu0 %v752_v50  ;;  %v1206_v36 = vmul.f32 1.442695, %v1180_v13  ;;  %v1214_v50 = vmul.f32 1.442695, %v1184_v19  ;;  %v4179_v51 = vpop.eup %3058  ;;  %v746_v13 = vsel %vm610_vm5, %v4171_v37, 0.0  ;;  %v749_v19 = vsel %vm610_vm5, %v4173_v25, 0.0 }
 0x327   : > { %v4142_v62 = vpop.xlane.xlu1 %1651  ;;  %6144 = vst [vmem:[#allocation21_spill] sm:$0xff] %v4179_v51  ;;  %v1251_v63 = vsel %vm610_vm5, %v4179_v51, 0.0  ;;  %v4198_v43 = vpop.eup %3060 }
 0x328   : > { %3062 = vpow2.f32 %v1206_v36  ;;  %6145 = vst [vmem:[#allocation22_spill] sm:$0xff] %v4198_v43 }
 0x329   : > { %v4148_v9 = vpop.xlane.xlu0 %2146  ;;  %v4150_v5 = vpop.xlane.xlu2 %1654  ;;  %3064 = vpow2.f32 %v1214_v50  ;;  %v1185_v50 = vsub.f32 %v1107_v4, %v4041_v47  ;;  %v1696_v47 = vmul.f32 1.442695, %v1680_v2  ;;  %v6152_v2 = vrot.slane %v3780_v7, 3 }
 0x32a   : > { %3066 = vpow2.f32 %v1210_v15 }
 0x32b   : > { %v1216_v4 = vmul.f32 1.442695, %v1185_v50 }
 0x32c   : > { %738 = vadd.xlane.f32.xlu1 %v737_v52  ;;  %v1681_v52 = vsub.f32 %v1604_v23, %v4097_v58 }
 0x32e   : > { %741 = vadd.xlane.f32.xlu2 %v740_v29  ;;  %1243 = vadd.xlane.f32.xlu0 %v1242_v57  ;;  %v1212_v29 = vmul.f32 1.442695, %v1183_v20  ;;  %v1698_v57 = vmul.f32 1.442695, %v1681_v52  ;;  %v4200_v8 = vpop.eup %3062  ;;  %v1245_v20 = vsel %vm610_vm5, %v4198_v43, 0.0 }
 0x32f   : > { %v4169_v3 = vpop.xlane.xlu1 %2149  ;;  %6146 = vst [vmem:[#allocation23_spill] sm:$0xff] %v4200_v8  ;;  %v4206_v58 = vpop.eup %3064  ;;  %v1248_v52 = vsel %vm610_vm5, %v4200_v8, 0.0 }
 0x330   : > { %6147 = vst [vmem:[#allocation24_spill] sm:$0xff] %v4206_v58  ;;  %3068 = vpow2.f32 %v1212_v29  ;;  %v1260_v53 = vsel %vm610_vm5, %v4206_v58, 0.0 }
 0x331   : > { %v4175_v31 = vpop.xlane.xlu0 %2155  ;;  %v4177_v12 = vpop.xlane.xlu2 %2143  ;;  %3070 = vpow2.f32 %v1698_v57  ;;  %v6151_v57 = vrot.slane %v3780_v7, 2 }
 0x332   : > { %3072 = vpow2.f32 %v1216_v4 }
 0x333   : > { %v1682_v50 = vsub.f32 %v6151_v57, %v4068_v28  ;;  %3074 = vpow2.f32 %v1696_v47 }
 0x334   : > { %747 = vadd.xlane.f32.xlu1 %v746_v13  ;;  %v1684_v13 = vsub.f32 %v1607_v35, %v4123_v39 }
 0x335   : > { %v1700_v47 = vmul.f32 1.442695, %v1682_v50  ;;  %v6157_v50 = vrot.slane %v3780_v7, 5 }
 0x336   : > { %750 = vadd.xlane.f32.xlu2 %v749_v19  ;;  %1252 = vadd.xlane.f32.xlu0 %v1251_v63  ;;  %v4224_v19 = vpop.eup %3066  ;;  %v1704_v63 = vmul.f32 1.442695, %v1684_v13 }
 0x337   : > { %v4196_v10 = vpop.xlane.xlu1 %2158  ;;  %6148 = vst [vmem:[#allocation25_spill] sm:$0xff] %v4224_v19  ;;  %v4226_v15 = vpop.eup %3068  ;;  %v1254_v13 = vsel %vm610_vm5, %v4224_v19, 0.0 }
 0x338   : > { %6149 = vst [vmem:[#allocation26_spill] sm:$0xff] %v4226_v15  ;;  %v4232_v39 = vpop.eup %3070  ;;  %3076 = vpow2.f32 %v1704_v63  ;;  %v1257_v4 = vsel %vm610_vm5, %v4226_v15, 0.0 }
 0x339   : > { %v4202_v36 = vpop.xlane.xlu0 %2164  ;;  %v4204_v23 = vpop.xlane.xlu2 %2152  ;;  %6150 = vst [vmem:[#allocation27_spill] sm:$0xff] %v4232_v39  ;;  %v1731_v28 = vsel %vm610_vm5, %v4232_v39, 0.0  ;;  %3078 = vpow2.f32 %v1700_v47 }
 0x33c   : > { %1246 = vadd.xlane.f32.xlu1 %v1245_v20  ;;  %v1683_v20 = vsub.f32 %v6152_v2, %v4115_v38  ;;  %v4251_v2 = vpop.eup %3072 }
 0x33d   : > { %6154 = vst [vmem:[#allocation28_spill] sm:$0xff] %v4251_v2  ;;  %v4253_v59 = vpop.eup %3074 }
 0x33e   : > { %1249 = vadd.xlane.f32.xlu2 %v1248_v52  ;;  %1261 = vadd.xlane.f32.xlu0 %v1260_v53  ;;  %v6153_v52 = vrot.slane %v3780_v7, 7  ;;  %v1702_v57 = vmul.f32 1.442695, %v1683_v20  ;;  %6155 = vst [vmem:[#allocation29_spill] sm:$0xff] %v4253_v59  ;;  %v6158_v20 = vrot.slane %v3780_v7, 6  ;;  %v1728_v47 = vsel %vm610_vm5, %v4253_v59, 0.0 }
 0x33f   : > { %v4222_v49 = vpop.xlane.xlu1 %1660 }
 0x340   : > { %v1687_v53 = vsub.f32 %v6153_v52, %v4150_v5  ;;  %v1685_v52 = vsub.f32 %v6157_v50, %v4095_v24  ;;  %3080 = vpow2.f32 %v1702_v57 }
 0x341   : > { %v4228_v29 = vpop.xlane.xlu0 %1666  ;;  %v4230_v35 = vpop.xlane.xlu2 %2161 }
 0x342   : > { %v1710_v63 = vmul.f32 1.442695, %v1687_v53  ;;  %v1263_v53 = vsel %vm610_vm5, %v4251_v2, 0.0  ;;  %v1706_v24 = vmul.f32 1.442695, %v1685_v52  ;;  %v6162_v52 = vrot.slane %v3819_v41, 1 }
 0x344   : > { %1255 = vadd.xlane.f32.xlu1 %v1254_v13  ;;  %v4259_v13 = vpop.eup %3076  ;;  %3082 = vpow2.f32 %v1710_v63 }
 0x345   : > { %6156 = vst [vmem:[#allocation30_spill] sm:$0xff] %v4259_v13  ;;  %v1740_v15 = vsel %vm610_vm5, %v4259_v13, 0.0  ;;  %3084 = vpow2.f32 %v1706_v24  ;;  %v6165_v24 = vrot.slane %v3819_v41, 4 }
 0x346   : > { %1258 = vadd.xlane.f32.xlu2 %v1257_v4  ;;  %1732 = vadd.xlane.f32.xlu0 %v1731_v28  ;;  %v1686_v4 = vsub.f32 %v6158_v20, %v4142_v62  ;;  %v2190_v28 = vsub.f32 %v3819_v41, %v4177_v12  ;;  %v4275_v62 = vpop.eup %3078  ;;  %v1688_v12 = vsub.f32 %v3811_v34, %v4121_v26  ;;  %v6164_v26 = vrot.slane %v3819_v41, 3 }
 0x347   : > { %v4249_v38 = vpop.xlane.xlu1 %1669  ;;  %6159 = vst [vmem:[#allocation31_spill] sm:$0xff] %v4275_v62  ;;  %v4277_v20 = vpop.eup %3080  ;;  %v2194_v39 = vsub.f32 %v6165_v24, %v4175_v31  ;;  %v6169_v24 = vrot.slane %v3811_v34, 1 }
 0x348   : > { %v1708_v57 = vmul.f32 1.442695, %v1686_v4  ;;  %v2206_v50 = vmul.f32 1.442695, %v2190_v28  ;;  %6160 = vst [vmem:[#allocation32_spill] sm:$0xff] %v4277_v20  ;;  %v6163_v4 = vrot.slane %v3819_v41, 2  ;;  %v2193_v13 = vsub.f32 %v6164_v26, %v4204_v23 }
 0x349   : > { %v4255_v0 = vpop.xlane.xlu0 %1675  ;;  %v4257_v5 = vpop.xlane.xlu2 %1663  ;;  %v1712_v2 = vmul.f32 1.442695, %v1688_v12  ;;  %v6167_v12 = vrot.slane %v3819_v41, 7 }
 0x34a   : > { %v4283_v59 = vpop.eup %3082  ;;  %3086 = vpow2.f32 %v1708_v57  ;;  %v2192_v28 = vsub.f32 %v6163_v4, %v4169_v3  ;;  %v2212_v26 = vmul.f32 1.442695, %v2193_v13  ;;  %v6173_v13 = vrot.slane %v3819_v41, 6 }
 0x34b   : > { %6161 = vst [vmem:[#allocation33_spill] sm:$0xff] %v4283_v59  ;;  %3088 = vpow2.f32 %v2206_v50  ;;  %v1749_v3 = vsel %vm610_vm5, %v4283_v59, 0.0  ;;  %v6166_v50 = vrot.slane %v3819_v41, 5  ;;  %v2197_v4 = vsub.f32 %v6167_v12, %v4202_v36  ;;  %v4309_v31 = vpop.eup %3084 }
 0x34c   : > { %1264 = vadd.xlane.f32.xlu1 %v1263_v53  ;;  %v2210_v23 = vmul.f32 1.442695, %v2192_v28  ;;  %6168 = vst [vmem:[#allocation34_spill] sm:$0xff] %v4309_v31  ;;  %3090 = vpow2.f32 %v1712_v2  ;;  %v2214_v59 = vmul.f32 1.442695, %v2194_v39  ;;  %v2196_v12 = vsub.f32 %v6173_v13, %v4230_v35 }
 0x34d   : > { %v6174_v2 = vrot.slane %v3811_v34, 4 }
 0x34e   : > { %1729 = vadd.xlane.f32.xlu2 %v1728_v47  ;;  %1741 = vadd.xlane.f32.xlu0 %v1740_v15  ;;  %v2191_v15 = vsub.f32 %v6162_v52, %v4148_v9  ;;  %v1734_v47 = vsel %vm610_vm5, %v4275_v62, 0.0  ;;  %v1737_v9 = vsel %vm610_vm5, %v4277_v20, 0.0  ;;  %v2195_v52 = vsub.f32 %v6166_v50, %v4196_v10 }
 0x34f   : > { %v1679_v7 = vpop.xlane.xlu1 %1678  ;;  %v1689_v20 = vsub.f32 %v6169_v24, %v4222_v49  ;;  %v6171_v10 = vrot.slane %v3811_v34, 3  ;;  %v2220_v49 = vmul.f32 1.442695, %v2197_v4  ;;  %v1692_v39 = vsub.f32 %v6174_v2, %v4249_v38 }
 0x350   : > { %v2208_v57 = vmul.f32 1.442695, %v2191_v15  ;;  %v4314_v15 = vpop.eup %3086  ;;  %v2216_v36 = vmul.f32 1.442695, %v2195_v52  ;;  %v1743_v24 = vsel %vm610_vm5, %v4309_v31, 0.0  ;;  %v6176_v52 = vrot.slane %v3811_v34, 2 }
 0x351   : > { %v4281_v63 = vpop.xlane.xlu0 %2167  ;;  %v1673_v53 = vpop.xlane.xlu2 %1672  ;;  %6170 = vst [vmem:[#allocation35_spill] sm:$0xff] %v4314_v15  ;;  %v1691_v28 = vsub.f32 %v6171_v10, %v4228_v29  ;;  %v1714_v29 = vmul.f32 1.442695, %v1689_v20  ;;  %v6175_v10 = vrot.slane %v3811_v34, 6  ;;  %v1746_v41 = vsel %vm610_vm5, %v4314_v15, 0.0 }
 0x352   : > { %v4319_v50 = vpop.eup %3088  ;;  %3092 = vpow2.f32 %v2208_v57  ;;  %v2218_v4 = vmul.f32 1.442695, %v2196_v12  ;;  %v6177_v20 = vrot.slane %v3811_v34, 7  ;;  %v1720_v13 = vmul.f32 1.442695, %v1692_v39 }
 0x353   : > { %6172 = vst [vmem:[#allocation36_spill] sm:$0xff] %v4319_v50  ;;  %3094 = vpow2.f32 %v2210_v23  ;;  %v1694_v57 = vsub.f32 %v6175_v10, %v4255_v0  ;;  %v1718_v35 = vmul.f32 1.442695, %v1691_v28  ;;  %v1690_v23 = vsub.f32 %v6176_v52, %v4257_v5  ;;  %v4341_v0 = vpop.eup %3090 }
 0x354   : > { %1735 = vadd.xlane.f32.xlu1 %v1734_v47  ;;  %3096 = vpow2.f32 %v2212_v26  ;;  %v2238_v38 = vsel %vm610_vm5, %v4319_v50, 0.0  ;;  %v1695_v26 = vsub.f32 %v6177_v20, %v1679_v7  ;;  %6178 = vst [vmem:[#allocation37_spill] sm:$0xff] %v4341_v0  ;;  %v6182_v10 = vrot.slane %v3897_v6, 1 }
 0x355   : > { %3098 = vpow2.f32 %v2214_v59  ;;  %v6179_v59 = vrot.slane %v3811_v34, 5  ;;  %v1724_v5 = vmul.f32 1.442695, %v1694_v57  ;;  %v1716_v7 = vmul.f32 1.442695, %v1690_v23 }
 0x356   : > { %1738 = vadd.xlane.f32.xlu2 %v1737_v9  ;;  %1750 = vadd.xlane.f32.xlu0 %v1749_v3  ;;  %3100 = vpow2.f32 %v2216_v36  ;;  %v2198_v36 = vsub.f32 %v3897_v6, %v4281_v63  ;;  %v1726_v34 = vmul.f32 1.442695, %v1695_v26  ;;  %v1752_v63 = vsel %vm610_vm5, %v4341_v0, 0.0 }
 0x357   : > { %v2171_v47 = vpop.xlane.xlu1 %2170  ;;  %3102 = vpow2.f32 %v2220_v49  ;;  %v1693_v28 = vsub.f32 %v6179_v59, %v1673_v53  ;;  %v6186_v23 = vrot.slane %v3897_v6, 3  ;;  %v6188_v26 = vrot.slane %v3897_v6, 2 }
 0x358   : > { %3104 = vpow2.f32 %v1714_v29 }
 0x359   : > { %v2177_v9 = vpop.xlane.xlu0 %2176  ;;  %v2174_v3 = vpop.xlane.xlu2 %2173  ;;  %3106 = vpow2.f32 %v1718_v35  ;;  %v1722_v29 = vmul.f32 1.442695, %v1693_v28  ;;  %v2222_v35 = vmul.f32 1.442695, %v2198_v36 }
 0x35a   : > { %3108 = vpow2.f32 %v2218_v4 }
 0x35b   : > { %3110 = vpow2.f32 %v1720_v13  ;;  %v2200_v13 = vsub.f32 %v6188_v26, %v2174_v3  ;;  %v6195_v26 = vrot.slane %v3897_v6, 5 }
 0x35c   : > { %1744 = vadd.xlane.f32.xlu1 %v1743_v24  ;;  %v4345_v24 = vpop.eup %3092  ;;  %3112 = vpow2.f32 %v1724_v5  ;;  %v6190_v5 = vrot.slane %v3897_v6, 4 }
 0x35d   : > { %6180 = vst [vmem:[#allocation38_spill] sm:$0xff] %v4345_v24  ;;  %v4349_v12 = vpop.eup %3094  ;;  %3114 = vpow2.f32 %v1716_v7  ;;  %v6192_v7 = vrot.slane %v3897_v6, 6 }
 0x35e   : > { %1747 = vadd.xlane.f32.xlu2 %v1746_v41  ;;  %2239 = vadd.xlane.f32.xlu0 %v2238_v38  ;;  %6181 = vst [vmem:[#allocation39_spill] sm:$0xff] %v4349_v12  ;;  %v2199_v41 = vsub.f32 %v6182_v10, %v2171_v47  ;;  %v4353_v52 = vpop.eup %3096  ;;  %v2201_v47 = vsub.f32 %v6186_v23, %v2177_v9  ;;  %v2244_v38 = vsel %vm610_vm5, %v4349_v12, 0.0  ;;  %3116 = vpow2.f32 %v1726_v34 }
 0x35f   : > { %v2180_v2 = vpop.xlane.xlu1 %2179  ;;  %6183 = vst [vmem:[#allocation40_spill] sm:$0xff] %v4353_v52  ;;  %v4355_v53 = vpop.eup %3098  ;;  %v2247_v59 = vsel %vm610_vm5, %v4353_v52, 0.0  ;;  %3118 = vpow2.f32 %v1722_v29  ;;  %v2226_v34 = vmul.f32 1.442695, %v2200_v13 }
 0x360   : > { %6184 = vst [vmem:[#allocation41_spill] sm:$0xff] %v4355_v53  ;;  %v4359_v57 = vpop.eup %3100  ;;  %v2224_v20 = vmul.f32 1.442695, %v2199_v41  ;;  %v2202_v9 = vsub.f32 %v6190_v5, %v2180_v2  ;;  %3120 = vpow2.f32 %v2222_v35  ;;  %v2228_v3 = vmul.f32 1.442695, %v2201_v47 }
 0x361   : > { %v2186_v49 = vpop.xlane.xlu0 %2185  ;;  %v2183_v39 = vpop.xlane.xlu2 %2182  ;;  %6185 = vst [vmem:[#allocation42_spill] sm:$0xff] %v4359_v57 }
 0x362   : > { %v4365_v4 = vpop.eup %3102  ;;  %v2204_v10 = vsub.f32 %v6192_v7, %v2186_v49  ;;  %3122 = vpow2.f32 %v2224_v20  ;;  %v2203_v2 = vsub.f32 %v6195_v26, %v2183_v39  ;;  %v2230_v5 = vmul.f32 1.442695, %v2202_v9 }
 0x363   : > { %6187 = vst [vmem:[#allocation43_spill] sm:$0xff] %v4365_v4  ;;  %v4371_v28 = vpop.eup %3104  ;;  %v6196_v49 = vrot.slane %v3897_v6, 7  ;;  %v2241_v39 = vsel %vm610_vm5, %v4345_v24, 0.0  ;;  %v2253_v6 = vsel %vm610_vm5, %v4359_v57, 0.0 }
 0x364   : > { %1753 = vadd.xlane.f32.xlu1 %v1752_v63  ;;  %6189 = vst [vmem:[#allocation44_spill] sm:$0xff] %v4371_v28  ;;  %v4375_v36 = vpop.eup %3106  ;;  %v2234_v47 = vmul.f32 1.442695, %v2204_v10  ;;  %v2232_v9 = vmul.f32 1.442695, %v2203_v2  ;;  %v1755_v2 = vsel %vm610_vm5, %v4371_v28, 0.0 }
 0x365   : > { %6191 = vst [vmem:[#allocation45_spill] sm:$0xff] %v4375_v36  ;;  %v4379_v63 = vpop.eup %3108 }
 0x366   : > { %2245 = vadd.xlane.f32.xlu2 %v2244_v38  ;;  %2248 = vadd.xlane.f32.xlu0 %v2247_v59  ;;  %6193 = vst [vmem:[#allocation46_spill] sm:$0xff] %v4379_v63  ;;  %v4381_v23 = vpop.eup %3110 }
 0x367   : > { %v2189_v41 = vpop.xlane.xlu1 %2188  ;;  %6194 = vst [vmem:[#allocation47_spill] sm:$0xff] %v4381_v23  ;;  %v4389_v29 = vpop.eup %3112 }
 0x368   : > { %v2205_v7 = vsub.f32 %v6196_v49, %v2189_v41  ;;  %v4394_v35 = vpop.eup %3114  ;;  %v2256_v41 = vsel %vm610_vm5, %v4379_v63, 0.0 }
 0x369   : > { %v4385_v38 = vpop.xlane.xlu0 %714  ;;  %v4387_v59 = vpop.xlane.xlu2 %711  ;;  %6197 = vst [vmem:[#allocation48_spill] sm:$0xff] %v4394_v35 }
 0x36a   : > { %3124 = vrcp.f32 %v4385_v38  ;;  %v4399_v20 = vpop.eup %3116  ;;  %v2236_v26 = vmul.f32 1.442695, %v2205_v7  ;;  %v794_v57 = vand.u32 2147483647, %v4385_v38  ;;  %v796_v63 = vand.u32 2147483648, %v4385_v38 }
 0x36b   : > { %3126 = vrcp.f32 %v4387_v59  ;;  %v4401_v13 = vpop.eup %3118  ;;  %v781_v28 = vand.u32 2147483648, %v4387_v59  ;;  %vm790_vm6 = vweird.f32 %v4385_v38  ;;  %vm775_vm7 = vweird.f32 %v4387_v59 }
 0x36c   : > { %3128 = vpow2.f32 %v2228_v3  ;;  %2242 = vadd.xlane.f32.xlu1 %v2241_v39  ;;  %6198 = vst [vmem:[#allocation49_spill] sm:$0xff] %v4401_v13  ;;  %v4407_v10 = vpop.eup %3120  ;;  %v2250_v3 = vsel %vm610_vm5, %v4355_v53, 0.0  ;;  %v4419_v39 = vsel %vm610_vm5, %v4365_v4, 0.0  ;;  %vm4460_vm9 = vcmp.eq.f32.partialorder %v794_v57, 8.507059e+37 }
 0x36d   : > { %3130 = vpow2.f32 %v2226_v34  ;;  %v4411_v49 = vpop.eup %3122  ;;  %v797_v62 = vor.u32 1.1754944e-38, %v796_v63  ;;  %v782_v58 = vor.u32 1.1754944e-38, %v781_v28 }
 0x36e   : > { %3132 = vpow2.f32 %v2230_v5  ;;  %2254 = vadd.xlane.f32.xlu2 %v2253_v6  ;;  %2257 = vadd.xlane.f32.xlu0 %v2256_v41  ;;  %v4423_v5 = vsel %vm610_vm5, %v4375_v36, 0.0  ;;  %v1758_v6 = vsel %vm610_vm5, %v4394_v35, 0.0  ;;  %v4434_v41 = vsel %vm610_vm5, %v4401_v13, 0.0 }
 0x36f   : > { %3134 = vpow2.f32 %v2234_v47  ;;  %v4413_v34 = vpop.xlane.xlu1 %708  ;;  %v4430_v47 = vsel %vm610_vm5, %v4381_v23, 0.0  ;;  %v779_v13 = vand.u32 2147483647, %v4387_v59 }
 0x370   : > { %v3125_v7 = vpop.eup %3124  ;;  %3136 = vrcp.f32 %v4413_v34  ;;  %v764_v52 = vand.u32 2147483647, %v4413_v34  ;;  %vm760_vm12 = vweird.f32 %v4413_v34 }
 0x371   : > { %v3127_v4 = vpop.eup %3126  ;;  %3138 = vpow2.f32 %v2232_v9  ;;  %v786_v53 = vmul.f32 %v3125_v7, %v4385_v38  ;;  %v4439_v24 = vpop.xlane.xlu0 %723  ;;  %vm791_vm8 = vweird.f32 %v3125_v7  ;;  %vm4464_vm11 = vcmp.eq.f32.partialorder %v779_v13, 8.507059e+37 }
 0x372   : > { %v4441_v12 = vpop.xlane.xlu2 %720  ;;  %v4443_v36 = vpop.eup %3128  ;;  %3140 = vpow2.f32 %v2236_v26  ;;  %v771_v23 = vmul.f32 %v3127_v4, %v4387_v59  ;;  %v766_v26 = vand.u32 2147483648, %v4413_v34  ;;  %vm776_vm10 = vweird.f32 %v3127_v4  ;;  %vm792_vm14 = vmor %vm790_vm6, %vm791_vm8 }
 0x373   : > { %v4448_v9 = vpop.eup %3130  ;;  %v787_v35 = vsub.f32 1.0, %v786_v53  ;;  %3142 = vrcp.f32 %v4439_v24  ;;  %vm4472_vm13 = vcmp.eq.f32.partialorder %v764_v52, 8.507059e+37  ;;  %vm835_vm15 = vweird.f32 %v4439_v24  ;;  %vm777_vm0 = vmor %vm775_vm7, %vm776_vm10 }
 0x374   : > { %v4453_v50 = vpop.eup %3132  ;;  %v772_v0 = vsub.f32 1.0, %v771_v23  ;;  %3144 = vrcp.f32 %v4441_v12  ;;  %2251 = vadd.xlane.f32.xlu1 %v2250_v3  ;;  %v767_v13 = vor.u32 1.1754944e-38, %v766_v26  ;;  %v841_v51 = vand.u32 2147483648, %v4439_v24 }
 0x375   : > { %v4458_v15 = vpop.eup %3134  ;;  %v788_v31 = vmul.f32 %v3125_v7, %v787_v35  ;;  %v824_v53 = vand.u32 2147483647, %v4441_v12  ;;  %vm820_vm2 = vweird.f32 %v4441_v12 }
 0x376   : > { %v3137_v19 = vpop.eup %3136  ;;  %v773_v8 = vmul.f32 %v3127_v4, %v772_v0  ;;  %1756 = vadd.xlane.f32.xlu2 %v1755_v2  ;;  %1759 = vadd.xlane.f32.xlu0 %v1758_v6  ;;  %v839_v6 = vand.u32 2147483647, %v4439_v24 }
 0x377   : > { %v4468_v3 = vpop.eup %3138  ;;  %v789_v43 = vadd.f32 %v3125_v7, %v788_v31  ;;  %v756_v35 = vmul.f32 %v3137_v19, %v4413_v34  ;;  %v4476_v0 = vpop.xlane.xlu1 %717  ;;  %vm761_vm1 = vweird.f32 %v3137_v19  ;;  %vm4519_vm8 = vcmp.eq.f32.partialorder %v824_v53, 8.507059e+37 }
 0x378   : > { %v4478_v63 = vpop.eup %3140  ;;  %v774_v28 = vadd.f32 %v3127_v4, %v773_v8  ;;  %3146 = vrcp.f32 %v4476_v0  ;;  %vm762_vm3 = vmor %vm760_vm12, %vm761_vm1  ;;  %vm4508_vm6 = vcmp.eq.f32.partialorder %v839_v6, 8.507059e+37  ;;  %vm805_vm12 = vweird.f32 %v4476_v0 }
 0x379   : > { %v3143_v31 = vpop.eup %3142  ;;  %v793_v2 = vsel %vm792_vm14, %v3125_v7, %v789_v43  ;;  %v757_v52 = vsub.f32 1.0, %v756_v35  ;;  %v4493_v45 = vpop.xlane.xlu0 %1225  ;;  %v4579_v6 = vsel %vm610_vm5, %v4458_v15, 0.0 }
 0x37a   : > { %v3145_v25 = vpop.eup %3144  ;;  %v798_v8 = vsel %vm4460_vm9, %v797_v62, %v793_v2  ;;  %v778_v38 = vsel %vm777_vm0, %v3127_v4, %v774_v28  ;;  %v831_v26 = vmul.f32 %v3143_v31, %v4439_v24  ;;  %v826_v62 = vand.u32 2147483648, %v4441_v12  ;;  %v4512_v23 = vpop.xlane.xlu2 %729 }
 0x37b   : > { %v799_v43 = vmul.f32 %v3960_v16, %v798_v8  ;;  %v783_v59 = vsel %vm4464_vm11, %v782_v58, %v778_v38  ;;  %v758_v7 = vmul.f32 %v3137_v19, %v757_v52  ;;  %v816_v35 = vmul.f32 %v3145_v25, %v4441_v12 }
 0x37c   : > { %v784_v37 = vmul.f32 %v3966_v22, %v783_v59  ;;  %v832_v44 = vsub.f32 1.0, %v831_v26  ;;  %2260 = vadd.xlane.f32.xlu1 %v4419_v39  ;;  %3148 = vrcp.f32 %v4493_v45  ;;  %vm836_vm4 = vweird.f32 %v3143_v31 }
 0x37d   : > { %1015 = vst [vmem:[#allocation1 + $0x2] ss:$9 sm:$0xff] %v799_v43  ;;  %v759_v4 = vadd.f32 %v3137_v19, %v758_v7  ;;  %v817_v28 = vsub.f32 1.0, %v816_v35  ;;  %v842_v39 = vor.u32 1.1754944e-38, %v841_v51  ;;  %vm821_vm7 = vweird.f32 %v3145_v25  ;;  %vm837_vm9 = vmor %vm835_vm15, %vm836_vm4 }
 0x37e   : > { %v3147_v16 = vpop.eup %3146  ;;  %1013 = vst [vmem:[#allocation1 + $0x1] ss:$9 sm:$0xff] %v784_v37  ;;  %v833_v22 = vmul.f32 %v3143_v31, %v832_v44  ;;  %1765 = vadd.xlane.f32.xlu2 %v4430_v47  ;;  %1768 = vadd.xlane.f32.xlu0 %v4434_v41  ;;  %v827_v51 = vor.u32 1.1754944e-38, %v826_v62  ;;  %3150 = vrcp.f32 %v4512_v23  ;;  %vm822_vm10 = vmor %vm820_vm2, %vm821_vm7  ;;  %v811_v38 = vand.u32 2147483648, %v4476_v0 }
 0x37f   : > { %v763_v2 = vsel %vm762_vm3, %v3137_v19, %v759_v4  ;;  %v818_v52 = vmul.f32 %v3145_v25, %v817_v28  ;;  %v801_v37 = vmul.f32 %v3147_v16, %v4476_v0  ;;  %v4523_v8 = vpop.xlane.xlu1 %726  ;;  %vm806_vm11 = vweird.f32 %v3147_v16 }
 0x380   : > { %v768_v44 = vsel %vm4472_vm13, %v767_v13, %v763_v2  ;;  %v834_v34 = vadd.f32 %v3143_v31, %v833_v22  ;;  %v809_v13 = vand.u32 2147483647, %v4476_v0  ;;  %3152 = vrcp.f32 %v4523_v8  ;;  %vm807_vm13 = vmor %vm805_vm12, %vm806_vm11 }
 0x381   : > { %v769_v47 = vmul.f32 %v3985_v40, %v768_v44  ;;  %v819_v19 = vadd.f32 %v3145_v25, %v818_v52  ;;  %v802_v41 = vsub.f32 1.0, %v801_v37  ;;  %v4544_v7 = vpop.xlane.xlu0 %1234  ;;  %v1773_v35 = vsel %vm610_vm5, %v4399_v20, 0.0 }
 0x382   : > { %v838_v57 = vsel %vm837_vm9, %v3143_v31, %v834_v34  ;;  %v4534_v26 = vpop.eup %3148  ;;  %v812_v62 = vor.u32 1.1754944e-38, %v811_v38  ;;  %v2262_v4 = vsel %vm610_vm5, %v4407_v10, 0.0  ;;  %vm810_vm14 = vcmp.eq.f32.partialorder %v809_v13, 8.507059e+37  ;;  %v4564_v2 = vpop.xlane.xlu2 %732 }
 0x383   : > { %1011 = vst [vmem:[#allocation1] ss:$9 sm:$0xff] %v769_v47  ;;  %v843_v40 = vsel %vm4508_vm6, %v842_v39, %v838_v57  ;;  %v823_v24 = vsel %vm822_vm10, %v3145_v25, %v819_v19  ;;  %v803_v43 = vmul.f32 %v3147_v16, %v802_v41  ;;  %v1297_v59 = vmul.f32 %v4534_v26, %v4493_v45 }
 0x384   : > { %v844_v31 = vmul.f32 %v3993_v18, %v843_v40  ;;  %v828_v12 = vsel %vm4519_vm8, %v827_v51, %v823_v24  ;;  %1762 = vadd.xlane.f32.xlu1 %v4423_v5  ;;  %v2265_v18 = vsel %vm610_vm5, %v4411_v49, 0.0  ;;  %v1770_v5 = vsel %vm610_vm5, %v4389_v29, 0.0  ;;  %v3151_v28 = vpop.eup %3150 }
 0x385   : > { %v829_v25 = vmul.f32 %v3987_v61, %v828_v12  ;;  %v804_v53 = vadd.f32 %v3147_v16, %v803_v43  ;;  %3154 = vrcp.f32 %v4544_v7  ;;  %v4561_v0 = vsel %vm610_vm5, %v4443_v36, 0.0 }
 0x386   : > { %1021 = vst [vmem:[#allocation1 + $0x5] ss:$9 sm:$0xff] %v844_v31  ;;  %1774 = vadd.xlane.f32.xlu2 %v1773_v35  ;;  %2266 = vadd.xlane.f32.xlu0 %v2265_v18  ;;  %v1298_v58 = vsub.f32 1.0, %v1297_v59  ;;  %v861_v39 = vmul.f32 %v3151_v28, %v4512_v23  ;;  %v4568_v52 = vsel %vm610_vm5, %v4448_v9, 0.0  ;;  %v3153_v37 = vpop.eup %3152  ;;  %v2274_v44 = vsel %vm610_vm5, %v4453_v50, 0.0 }
 0x387   : > { %1019 = vst [vmem:[#allocation1 + $0x4] ss:$9 sm:$0xff] %v829_v25  ;;  %v808_v61 = vsel %vm807_vm13, %v3147_v16, %v804_v53  ;;  %v4575_v34 = vsel %vm610_vm5, %v4468_v3, 0.0  ;;  %v1305_v51 = vand.u32 2147483647, %v4493_v45  ;;  %v846_v19 = vmul.f32 %v3153_v37, %v4523_v8  ;;  %v4583_v41 = vpop.xlane.xlu1 %1219 }
 0x388   : > { %v813_v22 = vsel %vm810_vm14, %v812_v62, %v808_v61  ;;  %v862_v47 = vsub.f32 1.0, %v861_v39  ;;  %vm1301_vm15 = vweird.f32 %v4493_v45  ;;  %v869_v57 = vand.u32 2147483647, %v4512_v23 }
 0x389   : > { %v814_v16 = vmul.f32 %v4011_v21, %v813_v22  ;;  %v4587_v21 = vsel %vm610_vm5, %v4478_v63, 0.0  ;;  %v871_v13 = vand.u32 2147483648, %v4512_v23  ;;  %3156 = vrcp.f32 %v4564_v2  ;;  %v4602_v53 = vpop.xlane.xlu0 %735 }
 0x38a   : > { %v1299_v38 = vmul.f32 %v4534_v26, %v1298_v58  ;;  %v863_v40 = vmul.f32 %v3151_v28, %v862_v47  ;;  %vm866_vm0 = vweird.f32 %v3151_v28  ;;  %v847_v24 = vsub.f32 1.0, %v846_v19  ;;  %v4613_v19 = vpop.xlane.xlu2 %1222 }
 0x38b   : > { %1017 = vst [vmem:[#allocation1 + $0x3] ss:$9 sm:$0xff] %v814_v16  ;;  %v4594_v43 = vpop.eup %3154  ;;  %vm865_vm5 = vweird.f32 %v4512_v23  ;;  %v854_v31 = vand.u32 2147483647, %v4523_v8  ;;  %v856_v12 = vand.u32 2147483648, %v4523_v8  ;;  %3158 = vrcp.f32 %v4583_v41 }
 0x38c   : > { %1771 = vadd.xlane.f32.xlu1 %v1770_v5  ;;  %v864_v59 = vadd.f32 %v3151_v28, %v863_v40  ;;  %v848_v35 = vmul.f32 %v3153_v37, %v847_v24  ;;  %vm851_vm1 = vweird.f32 %v3153_v37  ;;  %v1342_v25 = vmul.f32 %v4594_v43, %v4544_v7  ;;  %vm867_vm3 = vmor %vm865_vm5, %vm866_vm0 }
 0x38d   : > { %vm1302_vm2 = vweird.f32 %v4534_v26  ;;  %v1307_v18 = vand.u32 2147483648, %v4493_v45  ;;  %vm870_vm4 = vcmp.eq.f32.partialorder %v869_v57, 8.507059e+37  ;;  %v872_v23 = vor.u32 1.1754944e-38, %v871_v13 }
 0x38e   : > { %2263 = vadd.xlane.f32.xlu2 %v2262_v4  ;;  %2275 = vadd.xlane.f32.xlu0 %v2274_v44  ;;  %v1300_v62 = vadd.f32 %v4534_v26, %v1299_v38  ;;  %v868_v5 = vsel %vm867_vm3, %v3151_v28, %v864_v59  ;;  %v849_v61 = vadd.f32 %v3153_v37, %v848_v35  ;;  %vm850_vm6 = vweird.f32 %v4523_v8  ;;  %vm4621_vm9 = vmor %vm1301_vm15, %vm1302_vm2 }
 0x38f   : > { %v3157_v22 = vpop.eup %3156  ;;  %v873_v58 = vsel %vm870_vm4, %v872_v23, %v868_v5  ;;  %vm852_vm7 = vmor %vm850_vm6, %vm851_vm1  ;;  %v857_v4 = vor.u32 1.1754944e-38, %v856_v12  ;;  %v1343_v39 = vsub.f32 1.0, %v1342_v25  ;;  %3160 = vrcp.f32 %v4602_v53  ;;  %v4638_v25 = vpop.xlane.xlu1 %1228 }
 0x390   : > { %v874_v16 = vmul.f32 %v4013_v55, %v873_v58  ;;  %v853_v47 = vsel %vm852_vm7, %v3153_v37, %v849_v61  ;;  %vm855_vm8 = vcmp.eq.f32.partialorder %v854_v31, 8.507059e+37  ;;  %v876_v44 = vmul.f32 %v3157_v22, %v4564_v2 }
 0x391   : > { %v4615_v28 = vpop.eup %3158  ;;  %v858_v57 = vsel %vm855_vm8, %v857_v4, %v853_v47  ;;  %v1350_v13 = vand.u32 2147483647, %v4544_v7  ;;  %v1352_v55 = vand.u32 2147483648, %v4544_v7  ;;  %v884_v37 = vand.u32 2147483647, %v4564_v2  ;;  %v4649_v5 = vpop.xlane.xlu0 %744 }
 0x392   : > { %v1304_v38 = vsel %vm4621_vm9, %v4534_v26, %v1300_v62  ;;  %1025 = vst [vmem:[#allocation1 + $0x7] ss:$9 sm:$0xff] %v874_v16  ;;  %v859_v40 = vmul.f32 %v4037_v17, %v858_v57  ;;  %v877_v24 = vsub.f32 1.0, %v876_v44  ;;  %v1267_v45 = vmul.f32 %v4615_v28, %v4583_v41 }
 0x393   : > { %v1308_v31 = vor.u32 1.1754944e-38, %v1307_v18  ;;  %v1344_v12 = vmul.f32 %v4594_v43, %v1343_v39  ;;  %v886_v59 = vand.u32 2147483648, %v4564_v2  ;;  %3162 = vrcp.f32 %v4613_v19 }
 0x394   : > { %2269 = vadd.xlane.f32.xlu1 %v4568_v52  ;;  %vm1306_vm10 = vcmp.eq.f32.partialorder %v1305_v51, 8.507059e+37  ;;  %1023 = vst [vmem:[#allocation1 + $0x6] ss:$9 sm:$0xff] %v859_v40  ;;  %v878_v35 = vmul.f32 %v3157_v22, %v877_v24  ;;  %vm881_vm11 = vweird.f32 %v3157_v22  ;;  %v1268_v26 = vsub.f32 1.0, %v1267_v45 }
 0x395   : > { %v3161_v17 = vpop.eup %3160  ;;  %v1309_v23 = vsel %vm1306_vm10, %v1308_v31, %v1304_v38  ;;  %vm1346_vm12 = vweird.f32 %v4544_v7  ;;  %vm4642_vm13 = vcmp.eq.f32.partialorder %v1350_v13, 8.507059e+37  ;;  %vm880_vm14 = vweird.f32 %v4564_v2  ;;  %v4673_v13 = vpop.xlane.xlu2 %1231 }
 0x396   : > { %2272 = vadd.xlane.f32.xlu2 %v4561_v0  ;;  %2284 = vadd.xlane.f32.xlu0 %v4587_v21  ;;  %v1353_v51 = vor.u32 1.1754944e-38, %v1352_v55  ;;  %v879_v18 = vadd.f32 %v3157_v22, %v878_v35  ;;  %vm885_vm15 = vcmp.eq.f32.partialorder %v884_v37, 8.507059e+37  ;;  %v891_v62 = vmul.f32 %v3161_v17, %v4602_v53  ;;  %vm882_vm5 = vmor %vm880_vm14, %vm881_vm11 }
 0x397   : > { %v1345_v0 = vadd.f32 %v4594_v43, %v1344_v12  ;;  %vm1347_vm0 = vweird.f32 %v4594_v43  ;;  %v887_v61 = vor.u32 1.1754944e-38, %v886_v59  ;;  %3164 = vrcp.f32 %v4638_v25  ;;  %v4697_v59 = vpop.xlane.xlu1 %1237 }
 0x398   : > { %v4656_v2 = vmul.f32 %v4019_v14, %v1309_v23  ;;  %v883_v21 = vsel %vm882_vm5, %v3157_v22, %v879_v18  ;;  %v1269_v58 = vmul.f32 %v4615_v28, %v1268_v26  ;;  %v892_v4 = vsub.f32 1.0, %v891_v62  ;;  %vm4666_vm1 = vmor %vm1346_vm12, %vm1347_vm0 }
 0x399   : > { %v4659_v39 = vpop.eup %3162  ;;  %v888_v16 = vsel %vm885_vm15, %v887_v61, %v883_v21  ;;  %v899_v47 = vand.u32 2147483647, %v4602_v53  ;;  %v901_v44 = vand.u32 2147483648, %v4602_v53  ;;  %3166 = vrcp.f32 %v4649_v5 }
 0x39a   : > { %v889_v14 = vmul.f32 %v4039_v42, %v888_v16  ;;  %v893_v22 = vmul.f32 %v3161_v17, %v892_v4  ;;  %vm896_vm2 = vweird.f32 %v3161_v17  ;;  %v1282_v57 = vmul.f32 %v4659_v39, %v4613_v19 }
 0x39b   : > { %v4676_v55 = vld [vmem:[#allocation1] sm:$0xff]  ;;  %v1349_v7 = vsel %vm4666_vm1, %v4594_v43, %v1345_v0  ;;  %vm1271_vm3 = vweird.f32 %v4583_v41  ;;  %v1275_v37 = vand.u32 2147483647, %v4583_v41  ;;  %v1277_v42 = vand.u32 2147483648, %v4583_v41 }
 0x39c   : > { %2278 = vadd.xlane.f32.xlu1 %v4575_v34  ;;  %1027 = vst [vmem:[#allocation1] ss:$9 sm:$0xff] %v889_v14  ;;  %v1270_v38 = vadd.f32 %v4615_v28, %v1269_v58  ;;  %vm1272_vm4 = vweird.f32 %v4615_v28  ;;  %v894_v40 = vadd.f32 %v3161_v17, %v893_v22  ;;  %vm895_vm6 = vweird.f32 %v4602_v53 }
 0x39d   : > { %v4688_v34 = vpop.eup %3164  ;;  %vm897_vm7 = vmor %vm895_vm6, %vm896_vm2  ;;  %vm900_vm8 = vcmp.eq.f32.partialorder %v899_v47, 8.507059e+37  ;;  %v902_v43 = vor.u32 1.1754944e-38, %v901_v44  ;;  %v1283_v24 = vsub.f32 1.0, %v1282_v57  ;;  %3168 = vrcp.f32 %v4673_v13 }
 0x39e   : > { %2281 = vadd.xlane.f32.xlu2 %v4579_v6  ;;  %v1354_v45 = vsel %vm4642_vm13, %v1353_v51, %v1349_v7  ;;  %v898_v31 = vsel %vm897_vm7, %v3161_v17, %v894_v40  ;;  %v1292_v12 = vand.u32 2147483648, %v4613_v19  ;;  %v1312_v53 = vmul.f32 %v4688_v34, %v4638_v25  ;;  %vm4703_vm9 = vmor %vm1271_vm3, %vm1272_vm4  ;;  %v4741_v7 = vpop.xlane.xlu2 %1240 }
 0x39f   : > { %v3167_v6 = vpop.eup %3166  ;;  %vm4707_vm10 = vcmp.eq.f32.partialorder %v1275_v37, 8.507059e+37  ;;  %v1278_v17 = vor.u32 1.1754944e-38, %v1277_v42  ;;  %v903_v23 = vsel %vm900_vm8, %v902_v43, %v898_v31  ;;  %v1290_v52 = vand.u32 2147483647, %v4613_v19  ;;  %v4765_v26 = vpop.xlane.xlu1 %738 }
 0x3a0   : > { %v1274_v51 = vsel %vm4703_vm9, %v4615_v28, %v1270_v38  ;;  %v904_v18 = vmul.f32 %v4072_v1, %v903_v23  ;;  %v1313_v62 = vsub.f32 1.0, %v1312_v53  ;;  %v936_v41 = vmul.f32 %v3167_v6, %v4649_v5  ;;  %v4725_v1 = vpop.xlane.xlu0 %753 }
 0x3a1   : > { %v4718_v0 = vmul.f32 %v4045_v11, %v1354_v45  ;;  %v1284_v61 = vmul.f32 %v4659_v39, %v1283_v24  ;;  %vm1286_vm11 = vweird.f32 %v4613_v19  ;;  %3170 = vrcp.f32 %v4697_v59 }
 0x3a2   : > { %1028 = vst [vmem:[#allocation1 + $0x1] ss:$9 sm:$0xff] %v904_v18  ;;  %v1293_v21 = vor.u32 1.1754944e-38, %v1292_v12  ;;  %v1314_v58 = vmul.f32 %v4688_v34, %v1313_v62  ;;  %vm1316_vm12 = vweird.f32 %v4638_v25  ;;  %v937_v28 = vsub.f32 1.0, %v936_v41 }
 0x3a3   : > { %v4727_v4 = vpop.eup %3168  ;;  %v1279_v11 = vsel %vm4707_vm10, %v1278_v17, %v1274_v51  ;;  %vm4731_vm13 = vcmp.eq.f32.partialorder %v1290_v52, 8.507059e+37  ;;  %v1320_v47 = vand.u32 2147483647, %v4638_v25  ;;  %v1322_v44 = vand.u32 2147483648, %v4638_v25 }
 0x3a4   : > { %v946_v8 = vand.u32 2147483648, %v4649_v5  ;;  %v938_v14 = vmul.f32 %v3167_v6, %v937_v28  ;;  %vm941_vm14 = vweird.f32 %v3167_v6  ;;  %v944_v22 = vand.u32 2147483647, %v4649_v5 }
 0x3a5   : > { %v1327_v57 = vmul.f32 %v4727_v4, %v4673_v13  ;;  %v1285_v37 = vadd.f32 %v4659_v39, %v1284_v61  ;;  %vm1287_vm15 = vweird.f32 %v4659_v39  ;;  %vm940_vm0 = vweird.f32 %v4649_v5 }
 0x3a6   : > { %3172 = vrcp.f32 %v4725_v1  ;;  %v1315_v42 = vadd.f32 %v4688_v34, %v1314_v58  ;;  %vm1317_vm5 = vweird.f32 %v4688_v34  ;;  %v939_v38 = vadd.f32 %v3167_v6, %v938_v14  ;;  %vm942_vm2 = vmor %vm940_vm0, %vm941_vm14 }
 0x3a7   : > { %v1328_v40 = vsub.f32 1.0, %v1327_v57  ;;  %v4749_v43 = vpop.eup %3170  ;;  %vm4751_vm1 = vcmp.eq.f32.partialorder %v1320_v47, 8.507059e+37  ;;  %v947_v45 = vor.u32 1.1754944e-38, %v946_v8  ;;  %v1335_v31 = vand.u32 2147483647, %v4673_v13  ;;  %vm4759_vm3 = vmor %vm1286_vm11, %vm1287_vm15 }
 0x3a8   : > { %3174 = vrcp.f32 %v4741_v7  ;;  %v1323_v12 = vor.u32 1.1754944e-38, %v1322_v44  ;;  %v943_v53 = vsel %vm942_vm2, %v3167_v6, %v939_v38  ;;  %vm945_vm4 = vcmp.eq.f32.partialorder %v944_v22, 8.507059e+37  ;;  %vm4777_vm6 = vmor %vm1316_vm12, %vm1317_vm5  ;;  %v4801_v58 = vpop.xlane.xlu0 %1243 }
 0x3a9   : > { %v1357_v35 = vmul.f32 %v4749_v43, %v4697_v59  ;;  %v4768_v17 = vmul.f32 %v4064_v30, %v1279_v11  ;;  %v1289_v23 = vsel %vm4759_vm3, %v4659_v39, %v1285_v37  ;;  %v948_v6 = vsel %vm945_vm4, %v947_v45, %v943_v53 }
 0x3aa   : > { %v1329_v52 = vmul.f32 %v4727_v4, %v1328_v40  ;;  %v1319_v30 = vsel %vm4777_vm6, %v4688_v34, %v1315_v42  ;;  %v949_v51 = vmul.f32 %v4099_v33, %v948_v6  ;;  %vm1331_vm7 = vweird.f32 %v4673_v13  ;;  %v4829_v40 = vpop.xlane.xlu2 %741 }
 0x3ab   : > { %v1358_v39 = vsub.f32 1.0, %v1357_v35  ;;  %vm4787_vm8 = vcmp.eq.f32.partialorder %v1335_v31, 8.507059e+37  ;;  %v1337_v25 = vand.u32 2147483648, %v4673_v13  ;;  %v1367_v41 = vand.u32 2147483648, %v4697_v59 }
 0x3ac   : > { %v3173_v18 = vpop.eup %3172  ;;  %vm1036_vm9 = vcmask 64512   ;;  %3176 = vrcp.f32 %v4765_v26  ;;  %v1294_v34 = vsel %vm4731_vm13, %v1293_v21, %v1289_v23  ;;  %1031 = vst [vmem:[#allocation1 + $0x4] ss:$9 sm:$0xff] %v949_v51  ;;  %vm1361_vm10 = vweird.f32 %v4697_v59 }
 0x3ad   : > { %v1365_v33 = vand.u32 2147483647, %v4697_v59  ;;  %v981_v61 = vmul.f32 %v3173_v18, %v4725_v1  ;;  %2904 = vmatmul.msk.f32.vlgmr.msra.gmra.mxu1 %vm1036_vm9, %v4676_v55  ;;  %v1324_v11 = vsel %vm4751_vm1, %v1323_v12, %v1319_v30  ;;  %v1330_v16 = vadd.f32 %v4727_v4, %v1329_v52  ;;  %v4857_v30 = vpop.xlane.xlu1 %747 }
 0x3ae   : > { %v4803_v28 = vpop.eup %3174  ;;  %vm1332_vm11 = vweird.f32 %v4727_v4  ;;  %v1359_v21 = vmul.f32 %v4749_v43, %v1358_v39  ;;  %v989_v44 = vand.u32 2147483647, %v4725_v1  ;;  %v991_v8 = vand.u32 2147483648, %v4725_v1 }
 0x3af   : > { %v982_v47 = vsub.f32 1.0, %v981_v61  ;;  %v1372_v55 = vmul.f32 %v4803_v28, %v4741_v7  ;;  %v4815_v14 = vmul.f32 %v4066_v27, %v1294_v34  ;;  %v1338_v22 = vor.u32 1.1754944e-38, %v1337_v25  ;;  %vm4820_vm12 = vmor %vm1331_vm7, %vm1332_vm11 }
 0x3b0   : > { %v1368_v57 = vor.u32 1.1754944e-38, %v1367_v41  ;;  %3178 = vrcp.f32 %v4801_v58  ;;  %vm4824_vm13 = vcmp.eq.f32.partialorder %v1365_v33, 8.507059e+37  ;;  %vm985_vm14 = vweird.f32 %v4725_v1  ;;  %v4871_v33 = vpop.xlane.xlu0 %1252 }
 0x3b1   : > { %v983_v38 = vmul.f32 %v3173_v18, %v982_v47  ;;  %vm986_vm15 = vweird.f32 %v3173_v18  ;;  %v1373_v27 = vsub.f32 1.0, %v1372_v55  ;;  %v4832_v45 = vmul.f32 %v4091_v48, %v1324_v11 }
 0x3b2   : > { %v3177_v24 = vpop.eup %3176  ;;  %v1334_v13 = vsel %vm4820_vm12, %v4727_v4, %v1330_v16  ;;  %v1360_v31 = vadd.f32 %v4749_v43, %v1359_v21  ;;  %vm1362_vm0 = vweird.f32 %v4749_v43  ;;  %vm4839_vm5 = vcmp.eq.f32.partialorder %v989_v44, 8.507059e+37  ;;  %vm987_vm1 = vmor %vm985_vm14, %vm986_vm15  ;;  %v4896_v37 = vpop.xlane.xlu2 %750 }
 0x3b3   : > { %v984_v5 = vadd.f32 %v3173_v18, %v983_v38  ;;  %v992_v1 = vor.u32 1.1754944e-38, %v991_v8  ;;  %v906_v53 = vmul.f32 %v3177_v24, %v4765_v26  ;;  %v1374_v48 = vmul.f32 %v4803_v28, %v1373_v27  ;;  %vm4852_vm2 = vmor %vm1361_vm10, %vm1362_vm0 }
 0x3b4   : > { %v1380_v35 = vand.u32 2147483647, %v4741_v7  ;;  %v1382_v23 = vand.u32 2147483648, %v4741_v7  ;;  %3180 = vrcp.f32 %v4829_v40  ;;  %v1339_v4 = vsel %vm4787_vm8, %v1338_v22, %v1334_v13 }
 0x3b5   : > { %v988_v6 = vsel %vm987_vm1, %v3173_v18, %v984_v5  ;;  %vm1376_vm3 = vweird.f32 %v4741_v7  ;;  %v907_v52 = vsub.f32 1.0, %v906_v53  ;;  %v1364_v39 = vsel %vm4852_vm2, %v4749_v43, %v1360_v31  ;;  %v4919_v53 = vpop.xlane.xlu1 %1246 }
 0x3b6   : > { %v4859_v51 = vpop.eup %3178  ;;  %v993_v62 = vsel %vm4839_vm5, %v992_v1, %v988_v6  ;;  %v914_v59 = vand.u32 2147483647, %v4765_v26  ;;  %v916_v25 = vand.u32 2147483648, %v4765_v26  ;;  %vm911_vm4 = vweird.f32 %v3177_v24 }
 0x3b7   : > { %v994_v18 = vmul.f32 %v4125_v32, %v993_v62  ;;  %v908_v41 = vmul.f32 %v3177_v24, %v907_v52  ;;  %v1387_v34 = vmul.f32 %v4859_v51, %v4801_v58  ;;  %v1375_v61 = vadd.f32 %v4803_v28, %v1374_v48 }
 0x3b8   : > { %vm1377_vm6 = vweird.f32 %v4803_v28  ;;  %vm4875_vm7 = vcmp.eq.f32.partialorder %v1380_v35, 8.507059e+37  ;;  %v1383_v11 = vor.u32 1.1754944e-38, %v1382_v23  ;;  %vm910_vm8 = vweird.f32 %v4765_v26  ;;  %v4933_v62 = vpop.xlane.xlu0 %1261 }
 0x3b9   : > { %1034 = vst [vmem:[#allocation1 + $0x7] ss:$9 sm:$0xff] %v994_v18  ;;  %v909_v16 = vadd.f32 %v3177_v24, %v908_v41  ;;  %v1388_v32 = vsub.f32 1.0, %v1387_v34  ;;  %3182 = vrcp.f32 %v4857_v30  ;;  %v4882_v47 = vmul.f32 %v4093_v60, %v1339_v4  ;;  %vm912_vm10 = vmor %vm910_vm8, %vm911_vm4 }
 0x3ba   : > { %v3181_v21 = vpop.eup %3180  ;;  %v1369_v44 = vsel %vm4824_vm13, %v1368_v57, %v1364_v39  ;;  %v917_v8 = vor.u32 1.1754944e-38, %v916_v25  ;;  %3184 = vrcp.f32 %v4871_v33  ;;  %vm4890_vm11 = vmor %vm1376_vm3, %vm1377_vm6  ;;  %vm915_vm12 = vcmp.eq.f32.partialorder %v914_v59, 8.507059e+37 }
 0x3bb   : > { %v913_v26 = vsel %vm912_vm10, %v3177_v24, %v909_v16  ;;  %v1395_v22 = vand.u32 2147483647, %v4801_v58  ;;  %v921_v60 = vmul.f32 %v3181_v21, %v4829_v40  ;;  %v1379_v57 = vsel %vm4890_vm11, %v4803_v28, %v1375_v61 }
 0x3bc   : > { %v918_v42 = vsel %vm915_vm12, %v917_v8, %v913_v26  ;;  %v1397_v38 = vand.u32 2147483648, %v4801_v58  ;;  %v929_v7 = vand.u32 2147483647, %v4829_v40  ;;  %v1389_v24 = vmul.f32 %v4859_v51, %v1388_v32  ;;  %v6249_v32 = vld [vmem:[#allocation17_spill] sm:$0xff]  ;;  %v4962_v8 = vpop.xlane.xlu2 %1249 }
 0x3bd   : > { %v919_v27 = vmul.f32 %v4144_v54, %v918_v42  ;;  %vm1391_vm13 = vweird.f32 %v4801_v58  ;;  %v922_v13 = vsub.f32 1.0, %v921_v60  ;;  %v4907_v31 = vmul.f32 %v4117_v56, %v1369_v44 }
 0x3be   : > { %vm925_vm14 = vweird.f32 %v4829_v40  ;;  %v931_v5 = vand.u32 2147483648, %v4829_v40  ;;  %3186 = vrcp.f32 %v4896_v37  ;;  %v1384_v12 = vsel %vm4875_vm7, %v1383_v11, %v1379_v57 }
 0x3bf   : > { %v3183_v28 = vpop.eup %3182  ;;  %1029 = vst [vmem:[#allocation1 + $0x2] ss:$9 sm:$0xff] %v919_v27  ;;  %vm4914_vm15 = vcmp.eq.f32.partialorder %v1395_v22, 8.507059e+37  ;;  %v923_v1 = vmul.f32 %v3181_v21, %v922_v13  ;;  %vm926_vm0 = vweird.f32 %v3181_v21  ;;  %v959_v56 = vand.u32 2147483647, %v4857_v30 }
 0x3c0   : > { %v4921_v48 = vpop.eup %3184  ;;  %vm1392_vm5 = vweird.f32 %v4859_v51  ;;  %v1398_v35 = vor.u32 1.1754944e-38, %v1397_v38  ;;  %vm4924_vm1 = vcmp.eq.f32.partialorder %v929_v7, 8.507059e+37  ;;  %v951_v4 = vmul.f32 %v3183_v28, %v4857_v30  ;;  %vm927_vm2 = vmor %vm925_vm14, %vm926_vm0 }
 0x3c1   : > { %v1390_v19 = vadd.f32 %v4859_v51, %v1389_v24  ;;  %v924_v6 = vadd.f32 %v3181_v21, %v923_v1  ;;  %v961_v52 = vand.u32 2147483648, %v4857_v30  ;;  %v1432_v39 = vmul.f32 %v4921_v48, %v4871_v33  ;;  %vm4950_vm6 = vmor %vm1391_vm13, %vm1392_vm5  ;;  %v6250_v1 = vld [vmem:[#allocation19_spill] sm:$0xff] }
 0x3c2   : > { %v4936_v59 = vmul.f32 %v4119_v46, %v1384_v12  ;;  %v932_v25 = vor.u32 1.1754944e-38, %v931_v5  ;;  %v952_v18 = vsub.f32 1.0, %v951_v4  ;;  %3188 = vrcp.f32 %v4919_v53  ;;  %v4982_v5 = vpop.xlane.xlu1 %1255 }
 0x3c3   : > { %v928_v41 = vsel %vm927_vm2, %v3181_v21, %v924_v6  ;;  %vm955_vm3 = vweird.f32 %v4857_v30  ;;  %vm4942_vm4 = vcmp.eq.f32.partialorder %v959_v56, 8.507059e+37  ;;  %v1433_v61 = vsub.f32 1.0, %v1432_v39  ;;  %v6253_v6 = vld [vmem:[#allocation18_spill] sm:$0xff] }
 0x3c4   : > { %v3187_v43 = vpop.eup %3186  ;;  %v933_v40 = vsel %vm4924_vm1, %v932_v25, %v928_v41  ;;  %v953_v11 = vmul.f32 %v3183_v28, %v952_v18  ;;  %vm956_vm7 = vweird.f32 %v3183_v28  ;;  %3190 = vrcp.f32 %v4933_v62 }
 0x3c5   : > { %v1394_v16 = vsel %vm4950_vm6, %v4859_v51, %v1390_v19  ;;  %v934_v21 = vmul.f32 %v6249_v32, %v933_v40  ;;  %v962_v44 = vor.u32 1.1754944e-38, %v961_v52  ;;  %v966_v58 = vmul.f32 %v3187_v43, %v4896_v37  ;;  %vm957_vm10 = vmor %vm955_vm3, %vm956_vm7 }
 0x3c6   : > { %v954_v55 = vadd.f32 %v3183_v28, %v953_v11  ;;  %v1434_v26 = vmul.f32 %v4921_v48, %v1433_v61  ;;  %vm1436_vm8 = vweird.f32 %v4871_v33  ;;  %v1440_v22 = vand.u32 2147483647, %v4871_v33  ;;  %v5009_v61 = vpop.xlane.xlu0 %1732 }
 0x3c7   : > { %1030 = vst [vmem:[#allocation1 + $0x3] ss:$9 sm:$0xff] %v934_v21  ;;  %v1442_v51 = vand.u32 2147483648, %v4871_v33  ;;  %v967_v60 = vsub.f32 1.0, %v966_v58  ;;  %vm970_vm11 = vweird.f32 %v4896_v37  ;;  %v974_v57 = vand.u32 2147483647, %v4896_v37 }
 0x3c8   : > { %v4972_v42 = vpop.eup %3188  ;;  %v1399_v38 = vsel %vm4914_vm15, %v1398_v35, %v1394_v16  ;;  %v958_v7 = vsel %vm957_vm10, %v3183_v28, %v954_v55  ;;  %v976_v27 = vand.u32 2147483648, %v4896_v37  ;;  %3192 = vrcp.f32 %v4962_v8  ;;  %v6256_v16 = vld [vmem:[#allocation20_spill] sm:$0xff]  ;;  %v5027_v55 = vpop.xlane.xlu2 %1258 }
 0x3c9   : > { %v963_v30 = vsel %vm4942_vm4, %v962_v44, %v958_v7  ;;  %v968_v24 = vmul.f32 %v3187_v43, %v967_v60  ;;  %vm971_vm12 = vweird.f32 %v3187_v43  ;;  %v1402_v13 = vmul.f32 %v4972_v42, %v4919_v53 }
 0x3ca   : > { %v4984_v12 = vpop.eup %3190  ;;  %v964_v54 = vmul.f32 %v6250_v1, %v963_v30  ;;  %v1435_v28 = vadd.f32 %v4921_v48, %v1434_v26  ;;  %vm1437_vm13 = vweird.f32 %v4921_v48  ;;  %vm4989_vm14 = vcmp.eq.f32.partialorder %v1440_v22, 8.507059e+37  ;;  %vm972_vm15 = vmor %vm970_vm11, %vm971_vm12  ;;  %v6261_v1 = vld [vmem:[#allocation21_spill] sm:$0xff] }
 0x3cb   : > { %v1443_v35 = vor.u32 1.1754944e-38, %v1442_v51  ;;  %v969_v23 = vadd.f32 %v3187_v43, %v968_v24  ;;  %v1403_v4 = vsub.f32 1.0, %v1402_v13  ;;  %v1477_v19 = vmul.f32 %v4984_v12, %v4933_v62  ;;  %vm5003_vm1 = vmor %vm1436_vm8, %vm1437_vm13  ;;  %v5051_v13 = vpop.xlane.xlu1 %1264 }
 0x3cc   : > { %v4996_v52 = vmul.f32 %v6253_v6, %v1399_v38  ;;  %1032 = vst [vmem:[#allocation1 + $0x5] ss:$9 sm:$0xff] %v964_v54  ;;  %vm975_vm0 = vcmp.eq.f32.partialorder %v974_v57, 8.507059e+37  ;;  %v977_v39 = vor.u32 1.1754944e-38, %v976_v27  ;;  %vm1406_vm5 = vweird.f32 %v4919_v53 }
 0x3cd   : > { %v973_v18 = vsel %vm972_vm15, %v3187_v43, %v969_v23  ;;  %v1404_v41 = vmul.f32 %v4972_v42, %v1403_v4  ;;  %v1478_v34 = vsub.f32 1.0, %v1477_v19  ;;  %3194 = vrcp.f32 %v4982_v5 }
 0x3ce   : > { %v5011_v37 = vpop.eup %3192  ;;  %v1439_v46 = vsel %vm5003_vm1, %v4921_v48, %v1435_v28  ;;  %v978_v40 = vsel %vm975_vm0, %v977_v39, %v973_v18  ;;  %v1410_v33 = vand.u32 2147483647, %v4919_v53  ;;  %v1412_v11 = vand.u32 2147483648, %v4919_v53 }
 0x3cf   : > { %v979_v43 = vmul.f32 %v6256_v16, %v978_v40  ;;  %v1479_v32 = vmul.f32 %v4984_v12, %v1478_v34  ;;  %v1485_v21 = vand.u32 2147483647, %v4933_v62  ;;  %v1417_v44 = vmul.f32 %v5011_v37, %v4962_v8 }
 0x3d0   : > { %v1405_v58 = vadd.f32 %v4972_v42, %v1404_v41  ;;  %vm1407_vm2 = vweird.f32 %v4972_v42  ;;  %v1487_v48 = vand.u32 2147483648, %v4933_v62  ;;  %3196 = vrcp.f32 %v5009_v61 }
 0x3d1   : > { %v1444_v26 = vsel %vm4989_vm14, %v1443_v35, %v1439_v46  ;;  %1033 = vst [vmem:[#allocation1 + $0x6] ss:$9 sm:$0xff] %v979_v43  ;;  %v1418_v22 = vsub.f32 1.0, %v1417_v44  ;;  %v1425_v51 = vand.u32 2147483647, %v4962_v8  ;;  %v1427_v60 = vand.u32 2147483648, %v4962_v8  ;;  %vm5043_vm6 = vmor %vm1406_vm5, %vm1407_vm2  ;;  %v5087_v46 = vpop.xlane.xlu0 %1741 }
 0x3d2   : > { %vm5033_vm3 = vcmp.eq.f32.partialorder %v1410_v33, 8.507059e+37  ;;  %v1413_v38 = vor.u32 1.1754944e-38, %v1412_v11  ;;  %v1480_v7 = vadd.f32 %v4984_v12, %v1479_v32  ;;  %vm1482_vm4 = vweird.f32 %v4984_v12  ;;  %v6268_v44 = vld [vmem:[#allocation22_spill] sm:$0xff] }
 0x3d3   : > { %v5039_v27 = vpop.eup %3194  ;;  %vm1481_vm7 = vweird.f32 %v4933_v62  ;;  %v1419_v24 = vmul.f32 %v5011_v37, %v1418_v22  ;;  %vm1421_vm8 = vweird.f32 %v4962_v8  ;;  %3198 = vrcp.f32 %v5027_v55 }
 0x3d4   : > { %v5054_v54 = vmul.f32 %v6261_v1, %v1444_v26  ;;  %v1409_v53 = vsel %vm5043_vm6, %v4972_v42, %v1405_v58  ;;  %vm5059_vm10 = vcmp.eq.f32.partialorder %v1485_v21, 8.507059e+37  ;;  %v1447_v62 = vmul.f32 %v5039_v27, %v4982_v5  ;;  %vm5065_vm11 = vmor %vm1481_vm7, %vm1482_vm4 }
 0x3d5   : > { %v1488_v35 = vor.u32 1.1754944e-38, %v1487_v48  ;;  %vm5069_vm12 = vcmp.eq.f32.partialorder %v1425_v51, 8.507059e+37  ;;  %v1428_v4 = vor.u32 1.1754944e-38, %v1427_v60  ;;  %v1457_v19 = vand.u32 2147483648, %v4982_v5  ;;  %v5127_v60 = vpop.xlane.xlu2 %1729 }
 0x3d6   : > { %v5074_v42 = vpop.eup %3196  ;;  %v1484_v6 = vsel %vm5065_vm11, %v4984_v12, %v1480_v7  ;;  %v1448_v39 = vsub.f32 1.0, %v1447_v62  ;;  %v1455_v25 = vand.u32 2147483647, %v4982_v5  ;;  %3200 = vrcp.f32 %v5051_v13 }
 0x3d7   : > { %v1414_v18 = vsel %vm5033_vm3, %v1413_v38, %v1409_v53  ;;  %v1420_v41 = vadd.f32 %v5011_v37, %v1419_v24  ;;  %vm1422_vm13 = vweird.f32 %v5011_v37  ;;  %v1792_v34 = vmul.f32 %v5074_v42, %v5009_v61  ;;  %v6273_v38 = vld [vmem:[#allocation24_spill] sm:$0xff] }
 0x3d8   : > { %v1035_v40 = vld [vmem:[#allocation1] sm:$0xff]  ;;  %v1449_v12 = vmul.f32 %v5039_v27, %v1448_v39  ;;  %vm1451_vm14 = vweird.f32 %v4982_v5  ;;  %vm1796_vm15 = vweird.f32 %v5009_v61  ;;  %v1800_v33 = vand.u32 2147483647, %v5009_v61  ;;  %vm5108_vm0 = vmor %vm1421_vm8, %vm1422_vm13  ;;  %v6282_v39 = vld [vmem:[#allocation23_spill] sm:$0xff] }
 0x3d9   : > { %v5093_v11 = vpop.eup %3198  ;;  %1522 = vst [vmem:[#allocation1] ss:$9 sm:$0xff] %v4768_v17  ;;  %v1489_v16 = vsel %vm5059_vm10, %v1488_v35, %v1484_v6  ;;  %v1458_v43 = vor.u32 1.1754944e-38, %v1457_v19  ;;  %v1793_v32 = vsub.f32 1.0, %v1792_v34  ;;  %v1802_v21 = vand.u32 2147483648, %v5009_v61  ;;  %2905 = vmatmul.msk.f32.gmra.mxu1 %vm1036_vm9, %v1035_v40  ;;  %v5165_v35 = vpop.xlane.xlu1 %1735 }
 0x3da   : > { %1524 = vst [vmem:[#allocation1 + $0x1] ss:$9 sm:$0xff] %v4815_v14  ;;  %v5102_v58 = vmul.f32 %v6268_v44, %v1414_v18  ;;  %vm1452_vm5 = vweird.f32 %v5039_v27  ;;  %vm5113_vm1 = vcmp.eq.f32.partialorder %v1455_v25, 8.507059e+37  ;;  %v1462_v14 = vmul.f32 %v5093_v11, %v5027_v55  ;;  %v5191_v6 = vpop.xlane.xlu0 %1750 }
 0x3db   : > { %3202 = vrcp.f32 %v5087_v46  ;;  %1526 = vst [vmem:[#allocation1 + $0x2] ss:$9 sm:$0xff] %v4656_v2  ;;  %v1424_v8 = vsel %vm5108_vm0, %v5011_v37, %v1420_v41  ;;  %v1794_v26 = vmul.f32 %v5074_v42, %v1793_v32  ;;  %v1470_v22 = vand.u32 2147483647, %v5027_v55  ;;  %vm5156_vm7 = vmor %vm1451_vm14, %vm1452_vm5 }
 0x3dc   : > { %v1472_v51 = vand.u32 2147483648, %v5027_v55  ;;  %v5129_v57 = vpop.eup %3200  ;;  %1528 = vst [vmem:[#allocation1 + $0x3] ss:$9 sm:$0xff] %v4832_v45  ;;  %v5133_v7 = vmul.f32 %v6273_v38, %v1489_v16  ;;  %v1450_v2 = vadd.f32 %v5039_v27, %v1449_v12  ;;  %vm5136_vm2 = vcmp.eq.f32.partialorder %v1800_v33, 8.507059e+37  ;;  %v6290_v38 = vld [vmem:[#allocation27_spill] sm:$0xff] }
 0x3dd   : > { %v1463_v37 = vsub.f32 1.0, %v1462_v14  ;;  %1530 = vst [vmem:[#allocation1 + $0x4] ss:$9 sm:$0xff] %v4882_v47  ;;  %v1795_v24 = vadd.f32 %v5074_v42, %v1794_v26  ;;  %vm1797_vm3 = vweird.f32 %v5074_v42  ;;  %v1803_v1 = vor.u32 1.1754944e-38, %v1802_v21  ;;  %v5231_v48 = vpop.xlane.xlu2 %1738  ;;  %v6289_v14 = vld [vmem:[#allocation25_spill] sm:$0xff] }
 0x3de   : > { %v1492_v45 = vmul.f32 %v5129_v57, %v5051_v13  ;;  %1532 = vst [vmem:[#allocation1 + $0x5] ss:$9 sm:$0xff] %v4718_v0  ;;  %v1429_v53 = vsel %vm5069_vm12, %v1428_v4, %v1424_v8  ;;  %vm1466_vm4 = vweird.f32 %v5027_v55  ;;  %vm1496_vm6 = vweird.f32 %v5051_v13  ;;  %vm5177_vm10 = vmor %vm1796_vm15, %vm1797_vm3 }
 0x3df   : > { %v1464_v28 = vmul.f32 %v5093_v11, %v1463_v37  ;;  %1534 = vst [vmem:[#allocation1 + $0x6] ss:$9 sm:$0xff] %v4907_v31  ;;  %vm5160_vm8 = vcmp.eq.f32.partialorder %v1470_v22, 8.507059e+37  ;;  %v1473_v62 = vor.u32 1.1754944e-38, %v1472_v51  ;;  %3204 = vrcp.f32 %v5127_v60 }
 0x3e0   : > { %v1493_v56 = vsub.f32 1.0, %v1492_v45  ;;  %1536 = vst [vmem:[#allocation1 + $0x7] ss:$9 sm:$0xff] %v4936_v59  ;;  %v1454_v31 = vsel %vm5156_vm7, %v5039_v27, %v1450_v2  ;;  %vm1467_vm11 = vweird.f32 %v5093_v11  ;;  %v1500_v19 = vand.u32 2147483647, %v5051_v13 }
 0x3e1   : > { %v5167_v23 = vpop.eup %3202  ;;  %v1465_v4 = vadd.f32 %v5093_v11, %v1464_v28  ;;  %v1799_v59 = vsel %vm5177_vm10, %v5074_v42, %v1795_v24  ;;  %vm1497_vm12 = vweird.f32 %v5129_v57  ;;  %v1430_v25 = vmul.f32 %v6282_v39, %v1429_v53  ;;  %vm5201_vm13 = vmor %vm1466_vm4, %vm1467_vm11  ;;  %v5264_v0 = vpop.xlane.xlu1 %1744 }
 0x3e2   : > { %v1494_v27 = vmul.f32 %v5129_v57, %v1493_v56  ;;  %v1837_v61 = vmul.f32 %v5167_v23, %v5087_v46  ;;  %v1502_v18 = vand.u32 2147483648, %v5051_v13  ;;  %v1845_v41 = vand.u32 2147483647, %v5087_v46  ;;  %vm5214_vm14 = vmor %vm1496_vm6, %vm1497_vm12  ;;  %v6295_v56 = vld [vmem:[#allocation26_spill] sm:$0xff] }
 0x3e3   : > { %3206 = vrcp.f32 %v5165_v35  ;;  %v1459_v42 = vsel %vm5113_vm1, %v1458_v43, %v1454_v31  ;;  %v1847_v33 = vand.u32 2147483648, %v5087_v46  ;;  %v1804_v16 = vsel %vm5136_vm2, %v1803_v1, %v1799_v59 }
 0x3e4   : > { %v1495_v40 = vadd.f32 %v5129_v57, %v1494_v27  ;;  %v1838_v12 = vsub.f32 1.0, %v1837_v61  ;;  %v1469_v32 = vsel %vm5201_vm13, %v5093_v11, %v1465_v4  ;;  %vm5218_vm15 = vcmp.eq.f32.partialorder %v1500_v19, 8.507059e+37  ;;  %v6296_v19 = vld [vmem:[#allocation28_spill] sm:$0xff] }
 0x3e5   : > { %3208 = vrcp.f32 %v5191_v6  ;;  %v5223_v21 = vpop.eup %3204  ;;  %v1785_v13 = vand.u32 2147483647, %v5127_v60  ;;  %v1787_v17 = vand.u32 2147483648, %v5127_v60  ;;  %v1460_v8 = vmul.f32 %v6289_v14, %v1459_v42  ;;  %v5312_v55 = vpop.xlane.xlu2 %1747 }
 0x3e6   : > { %v1499_v44 = vsel %vm5214_vm14, %v5129_v57, %v1495_v40  ;;  %v1839_v11 = vmul.f32 %v5167_v23, %v1838_v12  ;;  %v1503_v26 = vor.u32 1.1754944e-38, %v1502_v18  ;;  %vm1841_vm0 = vweird.f32 %v5087_v46 }
 0x3e7   : > { %v1777_v22 = vmul.f32 %v5223_v21, %v5127_v60  ;;  %v1537_v51 = vld [vmem:[#allocation1] sm:$0xff]  ;;  %v5238_v2 = vmul.f32 %v6290_v38, %v1804_v16  ;;  %v1474_v57 = vsel %vm5160_vm8, %v1473_v62, %v1469_v32  ;;  %vm5242_vm5 = vcmp.eq.f32.partialorder %v1845_v41, 8.507059e+37  ;;  %v5292_v41 = vpop.xlane.xlu0 %2239 }
 0x3e8   : > { %v1848_v37 = vor.u32 1.1754944e-38, %v1847_v33  ;;  %vm1781_vm1 = vweird.f32 %v5127_v60  ;;  %1538 = vst [vmem:[#allocation1] ss:$9 sm:$0xff] %v4996_v52  ;;  %v1504_v1 = vsel %vm5218_vm15, %v1503_v26, %v1499_v44  ;;  %vm1842_vm2 = vweird.f32 %v5167_v23  ;;  %2906 = vmatmul.msk.f32.vlgmr.msra.gmra.mxu3 %vm1036_vm9, %v1537_v51 }
 0x3e9   : > { %v5247_v24 = vpop.eup %3206  ;;  %v1778_v45 = vsub.f32 1.0, %v1777_v22  ;;  %3210 = vrcp.f32 %v5231_v48  ;;  %1541 = vst [vmem:[#allocation1 + $0x3] ss:$9 sm:$0xff] %v5054_v54  ;;  %v1840_v53 = vadd.f32 %v5167_v23, %v1839_v11  ;;  %vm5257_vm3 = vcmp.eq.f32.partialorder %v1785_v13, 8.507059e+37  ;;  %vm5279_vm7 = vmor %vm1841_vm0, %vm1842_vm2  ;;  %v5337_v30 = vpop.xlane.xlu1 %1753 }
 0x3ea   : > { %v1788_v47 = vor.u32 1.1754944e-38, %v1787_v17  ;;  %v1807_v52 = vmul.f32 %v5247_v24, %v5165_v35  ;;  %vm1811_vm4 = vweird.f32 %v5165_v35  ;;  %1539 = vst [vmem:[#allocation1 + $0x1] ss:$9 sm:$0xff] %v5102_v58  ;;  %v1475_v31 = vmul.f32 %v6295_v56, %v1474_v57 }
 0x3eb   : > { %v3209_v62 = vpop.eup %3208  ;;  %v1779_v54 = vmul.f32 %v5223_v21, %v1778_v45  ;;  %v1815_v5 = vand.u32 2147483647, %v5165_v35  ;;  %v1817_v4 = vand.u32 2147483648, %v5165_v35  ;;  %1544 = vst [vmem:[#allocation1 + $0x6] ss:$9 sm:$0xff] %v5133_v7  ;;  %v1505_v59 = vmul.f32 %v6296_v19, %v1504_v1 }
 0x3ec   : > { %vm1782_vm6 = vweird.f32 %v5223_v21  ;;  %v1808_v27 = vsub.f32 1.0, %v1807_v52  ;;  %v1882_v61 = vmul.f32 %v3209_v62, %v5191_v6  ;;  %1540 = vst [vmem:[#allocation1 + $0x2] ss:$9 sm:$0xff] %v1430_v25  ;;  %vm1886_vm8 = vweird.f32 %v5191_v6 }
 0x3ed   : > { %v1780_v39 = vadd.f32 %v5223_v21, %v1779_v54  ;;  %v1890_v7 = vand.u32 2147483647, %v5191_v6  ;;  %3212 = vrcp.f32 %v5264_v0  ;;  %1542 = vst [vmem:[#allocation1 + $0x4] ss:$9 sm:$0xff] %v1460_v8  ;;  %v1844_v25 = vsel %vm5279_vm7, %v5167_v23, %v1840_v53  ;;  %vm5298_vm11 = vmor %vm1781_vm1, %vm1782_vm6  ;;  %v5366_v40 = vpop.xlane.xlu2 %2245 }
 0x3ee   : > { %v1809_v18 = vmul.f32 %v5247_v24, %v1808_v27  ;;  %vm1812_vm10 = vweird.f32 %v5247_v24  ;;  %v1883_v46 = vsub.f32 1.0, %v1882_v61  ;;  %1543 = vst [vmem:[#allocation1 + $0x5] ss:$9 sm:$0xff] %v1475_v31  ;;  %vm5302_vm12 = vcmp.eq.f32.partialorder %v1815_v5, 8.507059e+37  ;;  %v6309_v31 = vld [vmem:[#allocation31_spill] sm:$0xff] }
 0x3ef   : > { %v3211_v42 = vpop.eup %3210  ;;  %v1818_v23 = vor.u32 1.1754944e-38, %v1817_v4  ;;  %vm1887_vm13 = vweird.f32 %v3209_v62  ;;  %v1892_v12 = vand.u32 2147483648, %v5191_v6  ;;  %1545 = vst [vmem:[#allocation1 + $0x7] ss:$9 sm:$0xff] %v1505_v59  ;;  %v1784_v33 = vsel %vm5298_vm11, %v5223_v21, %v1780_v39  ;;  %vm1813_vm14 = vmor %vm1811_vm4, %vm1812_vm10  ;;  %v6310_v4 = vld [vmem:[#allocation33_spill] sm:$0xff]  ;;  %v5357_v61 = vpop.xlane.xlu0 %2248 }
 0x3f0   : > { %v1810_v16 = vadd.f32 %v5247_v24, %v1809_v18  ;;  %v1884_v60 = vmul.f32 %v3209_v62, %v1883_v46  ;;  %v1822_v32 = vmul.f32 %v3211_v42, %v5231_v48  ;;  %v1849_v43 = vsel %vm5242_vm5, %v1848_v37, %v1844_v25  ;;  %vm1888_vm0 = vmor %vm1886_vm8, %vm1887_vm13  ;;  %v6305_v37 = vld [vmem:[#allocation30_spill] sm:$0xff] }
 0x3f1   : > { %vm5320_vm15 = vcmp.eq.f32.partialorder %v1890_v7, 8.507059e+37  ;;  %v1830_v21 = vand.u32 2147483647, %v5231_v48  ;;  %v1832_v11 = vand.u32 2147483648, %v5231_v48  ;;  %3214 = vrcp.f32 %v5292_v41  ;;  %v6311_v7 = vld [vmem:[#allocation32_spill] sm:$0xff] }
 0x3f2   : > { %v1814_v13 = vsel %vm1813_vm14, %v5247_v24, %v1810_v16  ;;  %v1885_v17 = vadd.f32 %v3209_v62, %v1884_v60  ;;  %v1823_v14 = vsub.f32 1.0, %v1822_v32  ;;  %v1789_v26 = vsel %vm5257_vm3, %v1788_v47, %v1784_v33  ;;  %v6312_v60 = vld [vmem:[#allocation34_spill] sm:$0xff] }
 0x3f3   : > { %v3213_v8 = vpop.eup %3212  ;;  %v1893_v35 = vor.u32 1.1754944e-38, %v1892_v12  ;;  %vm1827_vm5 = vweird.f32 %v3211_v42  ;;  %3216 = vrcp.f32 %v5312_v55  ;;  %v1819_v22 = vsel %vm5302_vm12, %v1818_v23, %v1814_v13  ;;  %v5375_v13 = vpop.xlane.xlu1 %2242 }
 0x3f4   : > { %v1889_v51 = vsel %vm1888_vm0, %v3209_v62, %v1885_v17  ;;  %v1824_v38 = vmul.f32 %v3211_v42, %v1823_v14  ;;  %v1852_v57 = vmul.f32 %v3213_v8, %v5264_v0  ;;  %v1850_v24 = vmul.f32 %v6305_v37, %v1849_v43  ;;  %v6308_v62 = vld [vmem:[#allocation29_spill] sm:$0xff] }
 0x3f5   : > { %v1894_v1 = vsel %vm5320_vm15, %v1893_v35, %v1889_v51  ;;  %vm1826_vm1 = vweird.f32 %v5231_v48  ;;  %vm5343_vm2 = vcmp.eq.f32.partialorder %v1830_v21, 8.507059e+37  ;;  %v1833_v53 = vor.u32 1.1754944e-38, %v1832_v11 }
 0x3f6   : > { %v1825_v45 = vadd.f32 %v3211_v42, %v1824_v38  ;;  %v1853_v28 = vsub.f32 1.0, %v1852_v57  ;;  %v1860_v47 = vand.u32 2147483647, %v5264_v0  ;;  %v1546_v52 = vld [vmem:[#allocation1] sm:$0xff]  ;;  %v1790_v56 = vmul.f32 %v6308_v62, %v1789_v26  ;;  %vm1828_vm3 = vmor %vm1826_vm1, %vm1827_vm5  ;;  %v6313_v57 = vld [vmem:[#allocation35_spill] sm:$0xff] }
 0x3f7   : > { %v1820_v54 = vmul.f32 %v6309_v31, %v1819_v22  ;;  %v1862_v5 = vand.u32 2147483648, %v5264_v0  ;;  %3218 = vrcp.f32 %v5337_v30  ;;  %v5353_v48 = vpop.eup %3214  ;;  %2034 = vst [vmem:[#allocation1 + $0x1] ss:$9 sm:$0xff] %v5238_v2  ;;  %v1895_v19 = vmul.f32 %v6310_v4, %v1894_v1  ;;  %2907 = vmatmul.msk.f32.gmra.mxu3 %vm1036_vm9, %v1546_v52  ;;  %v5379_v22 = vpop.xlane.xlu0 %2257 }
 0x3f8   : > { %v1829_v59 = vsel %vm1828_vm3, %v3211_v42, %v1825_v45  ;;  %v1854_v27 = vmul.f32 %v3213_v8, %v1853_v28  ;;  %vm1857_vm4 = vweird.f32 %v3213_v8  ;;  %2040 = vst [vmem:[#allocation1 + $0x4] ss:$9 sm:$0xff] %v1850_v24  ;;  %vm1856_vm6 = vweird.f32 %v5264_v0 }
 0x3f9   : > { %v3217_v58 = vpop.eup %3216  ;;  %v1834_v39 = vsel %vm5343_vm2, %v1833_v53, %v1829_v59  ;;  %2032 = vst [vmem:[#allocation1] ss:$9 sm:$0xff] %v1790_v56  ;;  %vm1858_vm7 = vmor %vm1856_vm6, %vm1857_vm4  ;;  %v1863_v46 = vor.u32 1.1754944e-38, %v1862_v5  ;;  %3220 = vrcp.f32 %v5357_v61  ;;  %vm1861_vm8 = vcmp.eq.f32.partialorder %v1860_v47, 8.507059e+37  ;;  %v5390_v53 = vpop.xlane.xlu2 %2254  ;;  %v2619_v5 = vld [vmem:[#allocation9 + $0x78] sm:$0xff]  ;;  %v6314_v59 = vld [vmem:[#allocation37_spill] sm:$0xff] }
 0x3fa   : > { %v1835_v25 = vmul.f32 %v6311_v7, %v1834_v39  ;;  %v1855_v18 = vadd.f32 %v3213_v8, %v1854_v27  ;;  %v1867_v2 = vmul.f32 %v3217_v58, %v5312_v55  ;;  %2036 = vst [vmem:[#allocation1 + $0x2] ss:$9 sm:$0xff] %v1820_v54  ;;  %v2287_v33 = vmul.f32 %v5353_v48, %v5292_v41 }
 0x3fb   : > { %2046 = vst [vmem:[#allocation1 + $0x7] ss:$9 sm:$0xff] %v1895_v19  ;;  %v1875_v0 = vand.u32 2147483647, %v5312_v55  ;;  %v1877_v16 = vand.u32 2147483648, %v5312_v55  ;;  %vm1872_vm10 = vweird.f32 %v3217_v58  ;;  %vm1871_vm11 = vweird.f32 %v5312_v55  ;;  %v5398_v31 = vpop.xlane.xlu1 %2251  ;;  %2668 = vmatpush.msra.mxu0 %v2619_v5 }
 0x3fc   : > { %v1859_v42 = vsel %vm1858_vm7, %v3213_v8, %v1855_v18  ;;  %v1868_v34 = vsub.f32 1.0, %v1867_v2  ;;  %2038 = vst [vmem:[#allocation1 + $0x3] ss:$9 sm:$0xff] %v1835_v25  ;;  %v2288_v14 = vsub.f32 1.0, %v2287_v33  ;;  %vm1873_vm12 = vmor %vm1871_vm11, %vm1872_vm10  ;;  %v1907_v38 = vand.u32 2147483648, %v5337_v30  ;;  %v2618_v2 = vld [vmem:[#allocation9 + $0x70] sm:$0xff] }
 0x3fd   : > { %v3219_v23 = vpop.eup %3218  ;;  %v1864_v12 = vsel %vm1861_vm8, %v1863_v46, %v1859_v42  ;;  %v1878_v8 = vor.u32 1.1754944e-38, %v1877_v16  ;;  %vm1876_vm13 = vcmp.eq.f32.partialorder %v1875_v0, 8.507059e+37  ;;  %3222 = vrcp.f32 %v5366_v40  ;;  %2669 = vmatpush.msra.mxu0 %v2618_v2  ;;  %v2617_v33 = vld [vmem:[#allocation9 + $0x68] sm:$0xff]  ;;  %v6324_v2 = vld [vmem:[#allocation40_spill] sm:$0xff] }
 0x3fe   : > { %v1865_v32 = vmul.f32 %v6312_v60, %v1864_v12  ;;  %v1869_v43 = vmul.f32 %v3217_v58, %v1868_v34  ;;  %v1897_v44 = vmul.f32 %v3219_v23, %v5337_v30  ;;  %vm1902_vm14 = vweird.f32 %v3219_v23 }
 0x3ff   : > { %v5377_v17 = vpop.eup %3220  ;;  %vm1901_vm15 = vweird.f32 %v5337_v30  ;;  %v1905_v1 = vand.u32 2147483647, %v5337_v30  ;;  %v2289_v6 = vmul.f32 %v5353_v48, %v2288_v14  ;;  %3224 = vrcp.f32 %v5375_v13  ;;  %v5408_v39 = vpop.xlane.xlu0 %1759  ;;  %2670 = vmatpush.msra.mxu0 %v2617_v33 }
 0x400   : > { %2042 = vst [vmem:[#allocation1 + $0x5] ss:$9 sm:$0xff] %v1865_v32  ;;  %v1870_v21 = vadd.f32 %v3217_v58, %v1869_v43  ;;  %v1898_v11 = vsub.f32 1.0, %v1897_v44  ;;  %v2332_v55 = vmul.f32 %v5377_v17, %v5357_v61  ;;  %vm1903_vm0 = vmor %vm1901_vm15, %vm1902_vm14  ;;  %v1908_v28 = vor.u32 1.1754944e-38, %v1907_v38  ;;  %v2616_v43 = vld [vmem:[#allocation9 + $0x60] sm:$0xff] }
 0x401   : > { %vm1906_vm5 = vcmp.eq.f32.partialorder %v1905_v1, 8.507059e+37  ;;  %3226 = vrcp.f32 %v5379_v22  ;;  %v2290_v56 = vadd.f32 %v5353_v48, %v2289_v6  ;;  %vm2292_vm1 = vweird.f32 %v5353_v48  ;;  %v5427_v0 = vpop.xlane.xlu2 %1756  ;;  %2671 = vmatpush.msra.mxu0 %v2616_v43 }
 0x402   : > { %v1874_v26 = vsel %vm1873_vm12, %v3217_v58, %v1870_v21  ;;  %v1899_v35 = vmul.f32 %v3219_v23, %v1898_v11  ;;  %v2333_v47 = vsub.f32 1.0, %v2332_v55  ;;  %v2297_v30 = vand.u32 2147483648, %v5292_v41 }
 0x403   : > { %v1879_v51 = vsel %vm1876_vm13, %v1878_v8, %v1874_v26  ;;  %v5392_v52 = vpop.eup %3222  ;;  %vm2291_vm2 = vweird.f32 %v5292_v41  ;;  %v2295_v19 = vand.u32 2147483647, %v5292_v41  ;;  %v2340_v18 = vand.u32 2147483647, %v5357_v61 }
 0x404   : > { %v1880_v37 = vmul.f32 %v6313_v57, %v1879_v51  ;;  %v1900_v24 = vadd.f32 %v3219_v23, %v1899_v35  ;;  %v2334_v54 = vmul.f32 %v5377_v17, %v2333_v47  ;;  %v2317_v58 = vmul.f32 %v5392_v52, %v5366_v40  ;;  %vm5410_vm3 = vmor %vm2291_vm2, %vm2292_vm1  ;;  %v6321_v51 = vld [vmem:[#allocation36_spill] sm:$0xff]  ;;  %v5454_v57 = vpop.xlane.xlu1 %2260 }
 0x405   : > { %v5401_v4 = vpop.eup %3224  ;;  %v2294_v41 = vsel %vm5410_vm3, %v5353_v48, %v2290_v56  ;;  %v2298_v46 = vor.u32 1.1754944e-38, %v2297_v30  ;;  %v2342_v42 = vand.u32 2147483648, %v5357_v61  ;;  %vm2337_vm4 = vweird.f32 %v5377_v17  ;;  %v2614_v56 = vld [vmem:[#allocation9 + $0x50] sm:$0xff] }
 0x406   : > { %2044 = vst [vmem:[#allocation1 + $0x6] ss:$9 sm:$0xff] %v1880_v37  ;;  %v1904_v45 = vsel %vm1903_vm0, %v3219_v23, %v1900_v24  ;;  %v2335_v23 = vadd.f32 %v5377_v17, %v2334_v54  ;;  %v2302_v12 = vmul.f32 %v5401_v4, %v5375_v13  ;;  %3228 = vrcp.f32 %v5408_v39  ;;  %v2615_v37 = vld [vmem:[#allocation9 + $0x58] sm:$0xff] }
 0x407   : > { %v1909_v62 = vsel %vm1906_vm5, %v1908_v28, %v1904_v45  ;;  %v5420_v34 = vpop.eup %3226  ;;  %vm2296_vm6 = vcmp.eq.f32.partialorder %v2295_v19, 8.507059e+37  ;;  %v2318_v48 = vsub.f32 1.0, %v2317_v58  ;;  %vm2336_vm7 = vweird.f32 %v5357_v61  ;;  %2672 = vmatpush.msra.mxu0 %v2615_v37 }
 0x408   : > { %v1910_v27 = vmul.f32 %v6314_v59, %v1909_v62  ;;  %v2299_v16 = vsel %vm2296_vm6, %v2298_v46, %v2294_v41  ;;  %vm5430_vm8 = vcmp.eq.f32.partialorder %v2340_v18, 8.507059e+37  ;;  %v2327_v32 = vand.u32 2147483648, %v5366_v40  ;;  %vm5435_vm10 = vmor %vm2336_vm7, %vm2337_vm4  ;;  %v5476_v59 = vpop.xlane.xlu0 %1768 }
 0x409   : > { %v2343_v21 = vor.u32 1.1754944e-38, %v2342_v42  ;;  %v2325_v11 = vand.u32 2147483647, %v5366_v40  ;;  %v2312_v14 = vand.u32 2147483648, %v5375_v13  ;;  %v2377_v8 = vmul.f32 %v5420_v34, %v5379_v22  ;;  %2673 = vmatpush.msra.mxu0 %v2614_v56 }
 0x40a   : > { %v2339_v61 = vsel %vm5435_vm10, %v5377_v17, %v2335_v23  ;;  %v2303_v26 = vsub.f32 1.0, %v2302_v12  ;;  %v2387_v35 = vand.u32 2147483648, %v5379_v22  ;;  %3230 = vrcp.f32 %v5390_v53 }
 0x40b   : > { %v5449_v38 = vmul.f32 %v6321_v51, %v2299_v16  ;;  %v2319_v55 = vmul.f32 %v5392_v52, %v2318_v48  ;;  %vm2321_vm11 = vweird.f32 %v5366_v40  ;;  %3232 = vrcp.f32 %v5427_v0  ;;  %v5492_v48 = vpop.xlane.xlu2 %1765  ;;  %v2612_v16 = vld [vmem:[#allocation9 + $0x40] sm:$0xff] }
 0x40c   : > { %v3229_v24 = vpop.eup %3228  ;;  %vm2322_vm12 = vweird.f32 %v5392_v52  ;;  %v5457_v17 = vor.u32 1.1754944e-38, %v2327_v32  ;;  %v2310_v1 = vand.u32 2147483647, %v5375_v13  ;;  %v2385_v6 = vand.u32 2147483647, %v5379_v22 }
 0x40d   : > { %v2047_v25 = vld [vmem:[#allocation1] sm:$0xff]  ;;  %v2344_v45 = vsel %vm5430_vm8, %v2343_v21, %v2339_v61  ;;  %vm2306_vm13 = vweird.f32 %v5375_v13  ;;  %v5464_v28 = vor.u32 1.1754944e-38, %v2312_v14  ;;  %v2378_v47 = vsub.f32 1.0, %v2377_v8  ;;  %vm5498_vm2 = vmor %vm2321_vm11, %vm2322_vm12 }
 0x40e   : > { %2048 = vst [vmem:[#allocation1] ss:$9 sm:$0xff] %v1910_v27  ;;  %2908 = vmatmul.msk.f32.vlgmr.msrb.gmra.mxu1 %vm1036_vm9, %v2047_v25  ;;  %v1927_v62 = vmul.f32 %v3229_v24, %v5408_v39  ;;  %vm5467_vm14 = vcmp.eq.f32.partialorder %v2325_v11, 8.507059e+37  ;;  %v2304_v54 = vmul.f32 %v5401_v4, %v2303_v26  ;;  %vm2307_vm15 = vweird.f32 %v5401_v4  ;;  %v2613_v25 = vld [vmem:[#allocation9 + $0x48] sm:$0xff] }
 0x40f   : > { %v5473_v5 = vor.u32 1.1754944e-38, %v2387_v35  ;;  %v2372_v19 = vand.u32 2147483648, %v5390_v53  ;;  %v2320_v27 = vadd.f32 %v5392_v52, %v2319_v55  ;;  %vm2381_vm0 = vweird.f32 %v5379_v22  ;;  %2674 = vmatpush.msra.mxu0 %v2613_v25  ;;  %v5524_v55 = vpop.xlane.xlu1 %1762  ;;  %vm5530_vm7 = vmor %vm2306_vm13, %vm2307_vm15 }
 0x410   : > { %v2370_v58 = vand.u32 2147483647, %v5390_v53  ;;  %3234 = vrcp.f32 %v5398_v31  ;;  %v1928_v7 = vsub.f32 1.0, %v1927_v62  ;;  %v5482_v18 = vpop.eup %3230  ;;  %v5485_v41 = vmul.f32 %v6324_v2, %v2344_v45 }
 0x411   : > { %vm2382_vm5 = vweird.f32 %v5420_v34  ;;  %v1935_v46 = vand.u32 2147483647, %v5408_v39  ;;  %v1937_v42 = vand.u32 2147483648, %v5408_v39  ;;  %v3233_v23 = vpop.eup %3232  ;;  %v2379_v12 = vmul.f32 %v5420_v34, %v2378_v47  ;;  %2675 = vmatpush.msra.mxu0 %v2612_v16 }
 0x412   : > { %v1929_v33 = vmul.f32 %v3229_v24, %v1928_v7  ;;  %vm1932_vm1 = vweird.f32 %v3229_v24  ;;  %3236 = vrcp.f32 %v5476_v59  ;;  %v5503_v32 = vadd.f32 %v5401_v4, %v2304_v54  ;;  %v2611_v7 = vld [vmem:[#allocation9 + $0x38] sm:$0xff]  ;;  %vm5554_vm10 = vmor %vm2381_vm0, %vm2382_vm5 }
 0x413   : > { %v5505_v43 = vor.u32 1.1754944e-38, %v2372_v19  ;;  %v1912_v44 = vmul.f32 %v3233_v23, %v5427_v0  ;;  %3238 = vrcp.f32 %v5454_v57  ;;  %v2324_v21 = vsel %vm5498_vm2, %v5392_v52, %v2320_v27  ;;  %v6329_v19 = vld [vmem:[#allocation48_spill] sm:$0xff]  ;;  %2676 = vmatpush.msra.mxu0 %v2611_v7 }
 0x414   : > { %v2355_v40 = vand.u32 2147483647, %v5398_v31  ;;  %v1930_v11 = vadd.f32 %v3229_v24, %v1929_v33  ;;  %vm1931_vm3 = vweird.f32 %v5408_v39  ;;  %v2362_v14 = vmul.f32 %v5482_v18, %v5390_v53  ;;  %v2610_v33 = vld [vmem:[#allocation9 + $0x30] sm:$0xff] }
 0x415   : > { %vm1933_vm4 = vmor %vm1931_vm3, %vm1932_vm1  ;;  %v1938_v8 = vor.u32 1.1754944e-38, %v1937_v42  ;;  %v1913_v61 = vsub.f32 1.0, %v1912_v44  ;;  %3240 = vrcp.f32 %v5492_v48  ;;  %v5521_v35 = vadd.f32 %v5420_v34, %v2379_v12  ;;  %2677 = vmatpush.msra.mxu0 %v2610_v33 }
 0x416   : > { %v5518_v26 = vpop.eup %3234  ;;  %v1934_v52 = vsel %vm1933_vm4, %v3229_v24, %v1930_v11  ;;  %vm1936_vm6 = vcmp.eq.f32.partialorder %v1935_v46, 8.507059e+37  ;;  %v1922_v51 = vand.u32 2147483648, %v5427_v0  ;;  %vm1917_vm8 = vweird.f32 %v3233_v23 }
 0x417   : > { %v1939_v37 = vsel %vm1936_vm6, %v1938_v8, %v1934_v52  ;;  %v1914_v45 = vmul.f32 %v3233_v23, %v1913_v61  ;;  %v1920_v47 = vand.u32 2147483647, %v5427_v0  ;;  %v5540_v24 = vsel %vm5467_vm14, %v5457_v17, %v2324_v21  ;;  %v5581_v52 = vpop.xlane.xlu0 %2266 }
 0x418   : > { %v5535_v62 = vpop.eup %3236  ;;  %v2309_v56 = vsel %vm5530_vm7, %v5401_v4, %v5503_v32  ;;  %v2357_v54 = vand.u32 2147483648, %v5398_v31  ;;  %v1940_v27 = vmul.f32 %v6329_v19, %v1939_v37  ;;  %vm1916_vm11 = vweird.f32 %v5427_v0  ;;  %v6334_v37 = vld [vmem:[#allocation44_spill] sm:$0xff] }
 0x419   : > { %v5548_v25 = vpop.eup %3238  ;;  %v1915_v17 = vadd.f32 %v3233_v23, %v1914_v45  ;;  %v1972_v2 = vmul.f32 %v5535_v62, %v5476_v59  ;;  %3242 = vrcp.f32 %v5524_v55  ;;  %v2384_v46 = vsel %vm5554_vm10, %v5420_v34, %v5521_v35  ;;  %vm1918_vm12 = vmor %vm1916_vm11, %vm1917_vm8 }
 0x41a   : > { %v2363_v42 = vsub.f32 1.0, %v2362_v14  ;;  %v5568_v12 = vmul.f32 %v5518_v26, %v5398_v31  ;;  %2050 = vst [vmem:[#allocation1 + $0x2] ss:$9 sm:$0xff] %v1940_v27  ;;  %v1923_v0 = vor.u32 1.1754944e-38, %v1922_v51  ;;  %vm1921_vm13 = vcmp.eq.f32.partialorder %v1920_v47, 8.507059e+37  ;;  %v2609_v51 = vld [vmem:[#allocation9 + $0x28] sm:$0xff]  ;;  %v5593_v27 = vpop.xlane.xlu2 %1774 }
 0x41b   : > { %v5571_v16 = vpop.eup %3240  ;;  %v1919_v60 = vsel %vm1918_vm12, %v3233_v23, %v1915_v17  ;;  %v1973_v44 = vsub.f32 1.0, %v1972_v2  ;;  %v1980_v21 = vand.u32 2147483647, %v5476_v59  ;;  %v5576_v14 = vmul.f32 %v5548_v25, %v5454_v57  ;;  %2678 = vmatpush.msra.mxu0 %v2609_v51  ;;  %v2608_v2 = vld [vmem:[#allocation9 + $0x20] sm:$0xff] }
 0x41c   : > { %v1924_v11 = vsel %vm1921_vm13, %v1923_v0, %v1919_v60  ;;  %v1982_v8 = vand.u32 2147483648, %v5476_v59  ;;  %v1957_v61 = vmul.f32 %v5571_v16, %v5492_v48  ;;  %vm5585_vm14 = vcmp.eq.f32.partialorder %v2310_v1, 8.507059e+37 }
 0x41d   : > { %v1925_v45 = vmul.f32 %v6334_v37, %v1924_v11  ;;  %v1974_v47 = vmul.f32 %v5535_v62, %v1973_v44  ;;  %vm1977_vm15 = vweird.f32 %v5535_v62  ;;  %v1965_v19 = vand.u32 2147483647, %v5492_v48  ;;  %2679 = vmatpush.msra.mxu0 %v2608_v2  ;;  %v2607_v44 = vld [vmem:[#allocation9 + $0x18] sm:$0xff] }
 0x41e   : > { %v2364_v7 = vmul.f32 %v5482_v18, %v2363_v42  ;;  %v2348_v17 = vsub.f32 1.0, %v5568_v12  ;;  %v1958_v13 = vsub.f32 1.0, %v1957_v61  ;;  %v1967_v1 = vand.u32 2147483648, %v5492_v48  ;;  %v5616_v12 = vpop.xlane.xlu1 %1771 }
 0x41f   : > { %v5598_v0 = vpop.eup %3242  ;;  %vm5602_vm0 = vcmp.eq.f32.partialorder %v2385_v6, 8.507059e+37  ;;  %vm2366_vm5 = vweird.f32 %v5390_v53  ;;  %2049 = vst [vmem:[#allocation1 + $0x1] ss:$9 sm:$0xff] %v1925_v45  ;;  %v1975_v60 = vadd.f32 %v5535_v62, %v1974_v47  ;;  %vm1976_vm1 = vweird.f32 %v5476_v59  ;;  %2680 = vmatpush.msra.mxu0 %v2607_v44  ;;  %v2606_v45 = vld [vmem:[#allocation9 + $0x10] sm:$0xff]  ;;  %v6339_v47 = vld [vmem:[#allocation49_spill] sm:$0xff]  ;;  %v5665_v44 = vpop.xlane.xlu0 %2275 }
 0x420   : > { %vm1981_vm2 = vcmp.eq.f32.partialorder %v1980_v21, 8.507059e+37  ;;  %vm1961_vm3 = vweird.f32 %v5492_v48  ;;  %vm1978_vm4 = vmor %vm1976_vm1, %vm1977_vm15  ;;  %v1983_v42 = vor.u32 1.1754944e-38, %v1982_v8  ;;  %v1959_v22 = vmul.f32 %v5571_v16, %v1958_v13  ;;  %v2605_v48 = vld [vmem:[#allocation9 + $0x8] sm:$0xff] }
 0x421   : > { %vm1962_vm6 = vweird.f32 %v5571_v16  ;;  %v1942_v6 = vmul.f32 %v5598_v0, %v5524_v55  ;;  %v2393_v59 = vsub.f32 1.0, %v5576_v14  ;;  %v1979_v21 = vsel %vm1978_vm4, %v5535_v62, %v1975_v60  ;;  %2681 = vmatpush.msra.mxu0 %v2606_v45 }
 0x422   : > { %vm5620_vm8 = vcmp.eq.f32.partialorder %v1965_v19, 8.507059e+37  ;;  %3244 = vrcp.f32 %v5593_v27  ;;  %v1984_v8 = vsel %vm1981_vm2, %v1983_v42, %v1979_v21  ;;  %v1960_v61 = vadd.f32 %v5571_v16, %v1959_v22  ;;  %vm5631_vm11 = vmor %vm1961_vm3, %vm1962_vm6  ;;  %v6342_v22 = vld [vmem:[#allocation47_spill] sm:$0xff]  ;;  %v2604_v21 = vld [vmem:[#allocation9] sm:$0xff]  ;;  %v5681_v39 = vpop.xlane.xlu2 %2263 }
 0x423   : > { %v1968_v51 = vor.u32 1.1754944e-38, %v1967_v1  ;;  %v1943_v37 = vsub.f32 1.0, %v1942_v6  ;;  %v1985_v13 = vmul.f32 %v6339_v47, %v1984_v8  ;;  %v1950_v14 = vand.u32 2147483647, %v5524_v55  ;;  %2682 = vmatpush.msra.mxu0 %v2605_v48 }
 0x424   : > { %v1952_v19 = vand.u32 2147483648, %v5524_v55  ;;  %3246 = vrcp.f32 %v5616_v12  ;;  %v1964_v1 = vsel %vm5631_vm11, %v5571_v16, %v1960_v61  ;;  %vm1947_vm12 = vweird.f32 %v5598_v0 }
 0x425   : > { %v1944_v2 = vmul.f32 %v5598_v0, %v1943_v37  ;;  %3248 = vrcp.f32 %v5581_v52  ;;  %v5645_v60 = vadd.f32 %v5482_v18, %v2364_v7  ;;  %vm2367_vm13 = vweird.f32 %v5482_v18  ;;  %2053 = vst [vmem:[#allocation1 + $0x5] ss:$9 sm:$0xff] %v1985_v13  ;;  %2683 = vmatpush.msra.mxu0 %v2604_v21 }
 0x426   : > { %v2349_v42 = vmul.f32 %v5518_v26, %v2348_v17  ;;  %vm2351_vm15 = vweird.f32 %v5398_v31  ;;  %v1969_v16 = vsel %vm5620_vm8, %v1968_v51, %v1964_v1  ;;  %v5660_v7 = vsel %vm5585_vm14, %v5464_v28, %v2309_v56  ;;  %vm5697_vm14 = vmor %vm2366_vm5, %vm2367_vm13  ;;  %v5733_v13 = vpop.xlane.xlu1 %2269 }
 0x427   : > { %v1970_v6 = vmul.f32 %v6342_v22, %v1969_v16  ;;  %v1945_v17 = vadd.f32 %v5598_v0, %v1944_v2  ;;  %vm1946_vm1 = vweird.f32 %v5524_v55  ;;  %vm2352_vm2 = vweird.f32 %v5518_v26 }
 0x428   : > { %v5667_v11 = vpop.eup %3244  ;;  %v5672_v4 = vor.u32 1.1754944e-38, %v2357_v54  ;;  %v2394_v28 = vmul.f32 %v5548_v25, %v2393_v59  ;;  %vm5677_vm7 = vmor %vm1946_vm1, %vm1947_vm12  ;;  %v1953_v55 = vor.u32 1.1754944e-38, %v1952_v19  ;;  %v5691_v54 = vsel %vm5602_vm0, %v5473_v5, %v2384_v46 }
 0x429   : > { %2052 = vst [vmem:[#allocation1 + $0x4] ss:$9 sm:$0xff] %v1970_v6  ;;  %v1949_v30 = vsel %vm5677_vm7, %v5598_v0, %v1945_v17  ;;  %vm1951_vm3 = vcmp.eq.f32.partialorder %v1950_v14, 8.507059e+37  ;;  %v2002_v34 = vmul.f32 %v5667_v11, %v5593_v27  ;;  %v2369_v35 = vsel %vm5697_vm14, %v5482_v18, %v5645_v60  ;;  %v6347_v0 = vld [vmem:[#allocation45_spill] sm:$0xff]  ;;  %vm5747_vm11 = vmor %vm2351_vm15, %vm2352_vm2  ;;  %v5772_v17 = vpop.xlane.xlu0 %2284 }
 0x42a   : > { %v1058_v56 = vpop.f32.mrf.mxu1  ;;  %v3247_v5 = vpop.eup %3246  ;;  %v2350_v46 = vadd.f32 %v5518_v26, %v2349_v42  ;;  %v1954_v33 = vsel %vm1951_vm3, %v1953_v55, %v1949_v30  ;;  %3250 = vrcp.f32 %v5665_v44  ;;  %vm2396_vm10 = vweird.f32 %v5454_v57 }
 0x42b   : > { %2684 = vmatmul.f32.vlgmr.msra.gmra.mxu0 %v1058_v56  ;;  %v5712_v59 = vpop.eup %3248  ;;  %v1955_v8 = vmul.f32 %v6347_v0, %v1954_v33  ;;  %v2003_v61 = vsub.f32 1.0, %v2002_v34  ;;  %v1987_v51 = vmul.f32 %v3247_v5, %v5616_v12  ;;  %vm5719_vm0 = vcmp.eq.f32.partialorder %v2370_v58, 8.507059e+37  ;;  %v5780_v56 = vpop.xlane.xlu2 %2272 }
 0x42c   : > { %vm5725_vm5 = vcmp.eq.f32.partialorder %v2355_v40, 8.507059e+37  ;;  %v2395_v45 = vadd.f32 %v5548_v25, %v2394_v28  ;;  %vm2397_vm4 = vweird.f32 %v5548_v25  ;;  %v2012_v47 = vand.u32 2147483648, %v5593_v27 }
 0x42d   : > { %3252 = vrcp.f32 %v5681_v39  ;;  %2051 = vst [vmem:[#allocation1 + $0x3] ss:$9 sm:$0xff] %v1955_v8  ;;  %v2004_v53 = vmul.f32 %v5667_v11, %v2003_v61  ;;  %vm2007_vm6 = vweird.f32 %v5667_v11  ;;  %v2010_v58 = vand.u32 2147483647, %v5593_v27  ;;  %vm5766_vm15 = vmor %vm2396_vm10, %vm2397_vm4 }
 0x42e   : > { %v1988_v40 = vsub.f32 1.0, %v1987_v51  ;;  %v2422_v62 = vmul.f32 %v5712_v59, %v5581_v52  ;;  %vm2006_vm8 = vweird.f32 %v5593_v27  ;;  %v1995_v14 = vand.u32 2147483647, %v5616_v12  ;;  %v6356_v51 = vld [vmem:[#allocation39_spill] sm:$0xff]  ;;  %v5805_v18 = vpop.xlane.xlu1 %2278 }
 0x42f   : > { %v1997_v19 = vand.u32 2147483648, %v5616_v12  ;;  %v2005_v2 = vadd.f32 %v5667_v11, %v2004_v53  ;;  %vm1992_vm12 = vweird.f32 %v3247_v5  ;;  %3254 = vrcp.f32 %v5733_v13  ;;  %vm2008_vm13 = vmor %vm2006_vm8, %vm2007_vm6 }
 0x430   : > { %v1989_v48 = vmul.f32 %v3247_v5, %v1988_v40  ;;  %v5753_v60 = vpop.eup %3250  ;;  %v2354_v27 = vsel %vm5747_vm11, %v5518_v26, %v2350_v46  ;;  %v2400_v42 = vand.u32 2147483647, %v5454_v57  ;;  %v2402_v31 = vand.u32 2147483648, %v5454_v57 }
 0x431   : > { %v2013_v16 = vor.u32 1.1754944e-38, %v2012_v47  ;;  %v2009_v6 = vsel %vm2008_vm13, %v5667_v11, %v2005_v2  ;;  %vm2011_vm1 = vcmp.eq.f32.partialorder %v2010_v58, 8.507059e+37  ;;  %vm1991_vm2 = vweird.f32 %v5616_v12 }
 0x432   : > { %v1990_v26 = vadd.f32 %v3247_v5, %v1989_v48  ;;  %v2399_v28 = vsel %vm5766_vm15, %v5548_v25, %v2395_v45  ;;  %v2423_v32 = vsub.f32 1.0, %v2422_v62  ;;  %vm1993_vm7 = vmor %vm1991_vm2, %vm1992_vm12  ;;  %v1998_v55 = vor.u32 1.1754944e-38, %v1997_v19  ;;  %v6361_v19 = vld [vmem:[#allocation43_spill] sm:$0xff] }
 0x433   : > { %v5774_v21 = vpop.eup %3252  ;;  %v2014_v57 = vsel %vm2011_vm1, %v2013_v16, %v2009_v6  ;;  %vm1996_vm14 = vcmp.eq.f32.partialorder %v1995_v14, 8.507059e+37  ;;  %v2467_v12 = vmul.f32 %v5753_v60, %v5665_v44  ;;  %v2403_v30 = vor.u32 1.1754944e-38, %v2402_v31 }
 0x434   : > { %v2015_v11 = vmul.f32 %v4399_v20, %v2014_v57  ;;  %v1994_v23 = vsel %vm1993_vm7, %v3247_v5, %v1990_v26  ;;  %v2407_v46 = vmul.f32 %v5774_v21, %v5681_v39  ;;  %3256 = vrcp.f32 %v5772_v17  ;;  %v2649_v57 = vld [vmem:[#allocation9 + $0x168] sm:$0xff] }
 0x435   : > { %v1999_v34 = vsel %vm1996_vm14, %v1998_v55, %v1994_v23  ;;  %v5788_v25 = vpop.eup %3254  ;;  %v2374_v33 = vsel %vm5719_vm0, %v5505_v43, %v2369_v35  ;;  %v2359_v20 = vsel %vm5725_vm5, %v5672_v4, %v2354_v27  ;;  %vm2401_vm3 = vcmp.eq.f32.partialorder %v2400_v42, 8.507059e+37  ;;  %v6357_v43 = vld [vmem:[#allocation38_spill] sm:$0xff] }
 0x436   : > { %2055 = vst [vmem:[#allocation1 + $0x7] ss:$9 sm:$0xff] %v2015_v11  ;;  %v2000_v5 = vmul.f32 %v4389_v29, %v1999_v34  ;;  %v2404_v0 = vsel %vm2401_vm3, %v2403_v30, %v2399_v28  ;;  %v2424_v8 = vmul.f32 %v5712_v59, %v2423_v32  ;;  %v2430_v61 = vand.u32 2147483647, %v5581_v52  ;;  %v6358_v29 = vld [vmem:[#allocation46_spill] sm:$0xff]  ;;  %v5842_v32 = vpop.xlane.xlu2 %2281  ;;  %v2634_v30 = vld [vmem:[#allocation9 + $0xf0] sm:$0xff] }
 0x437   : > { %3258 = vrcp.f32 %v5780_v56  ;;  %v2330_v45 = vmul.f32 %v6356_v51, %v5540_v24  ;;  %v2315_v35 = vmul.f32 %v6357_v43, %v5660_v7  ;;  %v2432_v37 = vand.u32 2147483648, %v5581_v52  ;;  %v6359_v24 = vld [vmem:[#allocation42_spill] sm:$0xff]  ;;  %v6360_v7 = vld [vmem:[#allocation41_spill] sm:$0xff] }
 0x438   : > { %2054 = vst [vmem:[#allocation1 + $0x6] ss:$9 sm:$0xff] %v2000_v5  ;;  %v2468_v4 = vsub.f32 1.0, %v2467_v12  ;;  %v5809_v47 = vmul.f32 %v6358_v29, %v5691_v54  ;;  %v2477_v53 = vand.u32 2147483648, %v5665_v44  ;;  %v2408_v58 = vsub.f32 1.0, %v2407_v46  ;;  %v2635_v12 = vld [vmem:[#allocation9 + $0xf8] sm:$0xff] }
 0x439   : > { %v2437_v40 = vmul.f32 %v5788_v25, %v5733_v13  ;;  %v5815_v62 = vmul.f32 %v6359_v24, %v2374_v33  ;;  %v5818_v14 = vmul.f32 %v6360_v7, %v2359_v20  ;;  %v5821_v1 = vmul.f32 %v6361_v19, %v2404_v0  ;;  %2691 = vmatpush.msra.mxu1 %v2635_v12  ;;  %v2632_v29 = vld [vmem:[#allocation9 + $0xe0] sm:$0xff]  ;;  %v2631_v19 = vld [vmem:[#allocation9 + $0xd8] sm:$0xff]  ;;  %v2629_v12 = vld [vmem:[#allocation9 + $0xc8] sm:$0xff] }
 0x43a   : > { %vm2426_vm10 = vweird.f32 %v5581_v52  ;;  %v5824_v2 = vpop.eup %3256  ;;  %v2425_v54 = vadd.f32 %v5712_v59, %v2424_v8  ;;  %vm2427_vm0 = vweird.f32 %v5712_v59  ;;  %vm5828_vm5 = vcmp.eq.f32.partialorder %v2430_v61, 8.507059e+37  ;;  %v2647_v61 = vld [vmem:[#allocation9 + $0x158] sm:$0xff] }
 0x43b   : > { %3260 = vrcp.f32 %v5805_v18  ;;  %v2433_v27 = vor.u32 1.1754944e-38, %v2432_v37  ;;  %v2469_v42 = vmul.f32 %v5753_v60, %v2468_v4  ;;  %vm2471_vm4 = vweird.f32 %v5665_v44  ;;  %vm5846_vm6 = vmor %vm2426_vm10, %vm2427_vm0  ;;  %2692 = vmatpush.msra.mxu1 %v2634_v30  ;;  %v2648_v30 = vld [vmem:[#allocation9 + $0x160] sm:$0xff] }
 0x43c   : > { %v2475_v31 = vand.u32 2147483647, %v5665_v44  ;;  %v5838_v22 = vor.u32 1.1754944e-38, %v2477_v53  ;;  %v2409_v6 = vmul.f32 %v5774_v21, %v2408_v58  ;;  %v2415_v26 = vand.u32 2147483647, %v5681_v39 }
 0x43d   : > { %v5836_v16 = vpop.eup %3258  ;;  %v2438_v28 = vsub.f32 1.0, %v2437_v40  ;;  %vm2411_vm8 = vweird.f32 %v5681_v39  ;;  %v2417_v55 = vand.u32 2147483648, %v5681_v39  ;;  %v2512_v11 = vmul.f32 %v5824_v2, %v5772_v17 }
 0x43e   : > { %v2452_v23 = vmul.f32 %v5836_v16, %v5780_v56  ;;  %v2429_v52 = vsel %vm5846_vm6, %v5712_v59, %v2425_v54  ;;  %vm2441_vm11 = vweird.f32 %v5733_v13  ;;  %v2445_v34 = vand.u32 2147483647, %v5733_v13  ;;  %v2633_v59 = vld [vmem:[#allocation9 + $0xe8] sm:$0xff]  ;;  %v2651_v54 = vld [vmem:[#allocation9 + $0x178] sm:$0xff] }
 0x43f   : > { %v2447_v46 = vand.u32 2147483648, %v5733_v13  ;;  %v2056_v33 = vld [vmem:[#allocation1] sm:$0xff]  ;;  %v5863_v20 = vadd.f32 %v5753_v60, %v2469_v42  ;;  %vm2472_vm12 = vweird.f32 %v5753_v60  ;;  %3262 = vrcp.f32 %v5842_v32  ;;  %2693 = vmatpush.msra.mxu1 %v2633_v59  ;;  %2714 = vmatpush.msra.mxu2 %v2651_v54  ;;  %v2666_v13 = vld [vmem:[#allocation9 + $0x1f0] sm:$0xff] }
 0x440   : > { %v2453_v5 = vsub.f32 1.0, %v2452_v23  ;;  %2909 = vmatmul.msk.f32.gmra.mxu1 %vm1036_vm9, %v2056_v33  ;;  %2542 = vst [vmem:[#allocation1] ss:$9 sm:$0xff] %v5449_v38  ;;  %v2410_v8 = vadd.f32 %v5774_v21, %v2409_v6  ;;  %vm2412_vm13 = vweird.f32 %v5774_v21  ;;  %vm5873_vm15 = vcmp.eq.f32.partialorder %v2415_v26, 8.507059e+37  ;;  %vm5889_vm1 = vmor %vm2471_vm4, %vm2472_vm12 }
 0x441   : > { %v5869_v0 = vpop.eup %3260  ;;  %v2439_v51 = vmul.f32 %v5788_v25, %v2438_v28  ;;  %2544 = vst [vmem:[#allocation1 + $0x1] ss:$9 sm:$0xff] %v2315_v35  ;;  %v2418_v43 = vor.u32 1.1754944e-38, %v2417_v55  ;;  %v2513_v37 = vsub.f32 1.0, %v2512_v11  ;;  %v5883_v53 = vsel %vm5828_vm5, %v2433_v27, %v2429_v52  ;;  %vm5909_vm7 = vmor %vm2411_vm8, %vm2412_vm13  ;;  %2694 = vmatpush.msra.mxu1 %v2632_v29  ;;  %v2626_v35 = vld [vmem:[#allocation9 + $0xb0] sm:$0xff] }
 0x442   : > { %v2454_v4 = vmul.f32 %v5836_v16, %v2453_v5  ;;  %v2482_v38 = vmul.f32 %v5869_v0, %v5805_v18  ;;  %2546 = vst [vmem:[#allocation1 + $0x2] ss:$9 sm:$0xff] %v2330_v45  ;;  %vm5893_vm2 = vcmp.eq.f32.partialorder %v2445_v34, 8.507059e+37  ;;  %v5897_v40 = vor.u32 1.1754944e-38, %v2447_v46  ;;  %v2660_v46 = vld [vmem:[#allocation9 + $0x1c0] sm:$0xff] }
 0x443   : > { %v2520_v45 = vand.u32 2147483647, %v5772_v17  ;;  %2548 = vst [vmem:[#allocation1 + $0x3] ss:$9 sm:$0xff] %v5485_v41  ;;  %v2474_v44 = vsel %vm5889_vm1, %v5753_v60, %v5863_v20  ;;  %vm2442_vm14 = vweird.f32 %v5788_v25  ;;  %vm2516_vm3 = vweird.f32 %v5772_v17  ;;  %2695 = vmatpush.msra.mxu1 %v2631_v19 }
 0x444   : > { %v2522_v41 = vand.u32 2147483648, %v5772_v17  ;;  %v2483_v7 = vsub.f32 1.0, %v2482_v38  ;;  %2550 = vst [vmem:[#allocation1 + $0x4] ss:$9 sm:$0xff] %v5818_v14  ;;  %vm5917_vm10 = vcmp.eq.f32.partialorder %v2475_v31, 8.507059e+37  ;;  %v2414_v39 = vsel %vm5909_vm7, %v5774_v21, %v2410_v8  ;;  %v2650_v14 = vld [vmem:[#allocation9 + $0x170] sm:$0xff]  ;;  %vm5939_vm4 = vmor %vm2441_vm11, %vm2442_vm14 }
 0x445   : > { %v2440_v27 = vadd.f32 %v5788_v25, %v2439_v51  ;;  %vm2457_vm0 = vweird.f32 %v5836_v16  ;;  %v2462_v42 = vand.u32 2147483648, %v5780_v56  ;;  %2552 = vst [vmem:[#allocation1 + $0x5] ss:$9 sm:$0xff] %v5815_v62  ;;  %v5928_v6 = vpop.eup %3262  ;;  %v2514_v31 = vmul.f32 %v5824_v2, %v2513_v37  ;;  %v2630_v21 = vld [vmem:[#allocation9 + $0xd0] sm:$0xff]  ;;  %2715 = vmatpush.msra.mxu2 %v2650_v14  ;;  %v2628_v8 = vld [vmem:[#allocation9 + $0xc0] sm:$0xff]  ;;  %v2637_v62 = vld [vmem:[#allocation9 + $0x108] sm:$0xff] }
 0x446   : > { %v2455_v26 = vadd.f32 %v5836_v16, %v2454_v4  ;;  %v2484_v28 = vmul.f32 %v5869_v0, %v2483_v7  ;;  %vm2487_vm5 = vweird.f32 %v5869_v0  ;;  %2554 = vst [vmem:[#allocation1 + $0x6] ss:$9 sm:$0xff] %v5809_v47  ;;  %vm2456_vm6 = vweird.f32 %v5780_v56  ;;  %2696 = vmatpush.msra.mxu1 %v2630_v21  ;;  %v2644_v14 = vld [vmem:[#allocation9 + $0x140] sm:$0xff]  ;;  %v2639_v21 = vld [vmem:[#allocation9 + $0x118] sm:$0xff] }
 0x447   : > { %v2460_v55 = vand.u32 2147483647, %v5780_v56  ;;  %v2492_v11 = vand.u32 2147483648, %v5805_v18  ;;  %v2497_v23 = vmul.f32 %v5928_v6, %v5842_v32  ;;  %2556 = vst [vmem:[#allocation1 + $0x7] ss:$9 sm:$0xff] %v5821_v1  ;;  %vm2517_vm8 = vweird.f32 %v5824_v2  ;;  %vm5952_vm11 = vmor %vm2456_vm6, %vm2457_vm0  ;;  %2716 = vmatpush.msra.mxu2 %v2649_v57  ;;  %v2624_v17 = vld [vmem:[#allocation9 + $0xa0] sm:$0xff] }
 0x448   : > { %v2485_v47 = vadd.f32 %v5869_v0, %v2484_v28  ;;  %vm2486_vm12 = vweird.f32 %v5805_v18  ;;  %v2490_v56 = vand.u32 2147483647, %v5805_v18  ;;  %v2419_v1 = vsel %vm5873_vm15, %v2418_v43, %v2414_v39  ;;  %2697 = vmatpush.msra.mxu1 %v2629_v12  ;;  %vm5989_vm0 = vmor %vm2516_vm3, %vm2517_vm8  ;;  %v2620_v28 = vld [vmem:[#allocation9 + $0x80] sm:$0xff]  ;;  %v2638_v57 = vld [vmem:[#allocation9 + $0x110] sm:$0xff] }
 0x449   : > { %v2444_v52 = vsel %vm5939_vm4, %v5788_v25, %v2440_v27  ;;  %v2463_v34 = vor.u32 1.1754944e-38, %v2462_v42  ;;  %vm5966_vm13 = vmor %vm2486_vm12, %vm2487_vm5  ;;  %v2498_v33 = vsub.f32 1.0, %v2497_v23  ;;  %v2515_v18 = vadd.f32 %v5824_v2, %v2514_v31  ;;  %2717 = vmatpush.msra.mxu2 %v2648_v30  ;;  %v2621_v31 = vld [vmem:[#allocation9 + $0x88] sm:$0xff]  ;;  %v2667_v23 = vld [vmem:[#allocation9 + $0x1f8] sm:$0xff] }
 0x44a   : > { %v2459_v5 = vsel %vm5952_vm11, %v5836_v16, %v2455_v26  ;;  %v2489_v25 = vsel %vm5966_vm13, %v5869_v0, %v2485_v47  ;;  %v2507_v59 = vand.u32 2147483648, %v5842_v32  ;;  %v2493_v51 = vor.u32 1.1754944e-38, %v2492_v11  ;;  %v2627_v0 = vld [vmem:[#allocation9 + $0xb8] sm:$0xff]  ;;  %2698 = vmatpush.msra.mxu1 %v2628_v8  ;;  %v2640_v26 = vld [vmem:[#allocation9 + $0x120] sm:$0xff]  ;;  %2737 = vmatpush.msra.mxu3 %v2667_v23  ;;  %v2665_v47 = vld [vmem:[#allocation9 + $0x1e8] sm:$0xff] }
 0x44b   : > { %v2499_v43 = vmul.f32 %v5928_v6, %v2498_v33  ;;  %vm2502_vm15 = vweird.f32 %v5928_v6  ;;  %v2505_v37 = vand.u32 2147483647, %v5842_v32  ;;  %v2420_v4 = vmul.f32 %v4407_v10, %v2419_v1  ;;  %2718 = vmatpush.msra.mxu2 %v2647_v61  ;;  %v2646_v10 = vld [vmem:[#allocation9 + $0x150] sm:$0xff]  ;;  %v2663_v12 = vld [vmem:[#allocation9 + $0x1d8] sm:$0xff]  ;;  %v2661_v1 = vld [vmem:[#allocation9 + $0x1c8] sm:$0xff] }
 0x44c   : > { %v2449_v16 = vsel %vm5893_vm2, %v5897_v40, %v2444_v52  ;;  %vm2461_vm7 = vcmp.eq.f32.partialorder %v2460_v55, 8.507059e+37  ;;  %vm2491_vm14 = vcmp.eq.f32.partialorder %v2490_v56, 8.507059e+37  ;;  %vm2501_vm5 = vweird.f32 %v5842_v32  ;;  %2699 = vmatpush.msra.mxu1 %v2627_v0  ;;  %v2636_v55 = vld [vmem:[#allocation9 + $0x100] sm:$0xff]  ;;  %2738 = vmatpush.msra.mxu3 %v2666_v13  ;;  %v2662_v30 = vld [vmem:[#allocation9 + $0x1d0] sm:$0xff]  ;;  %v2659_v33 = vld [vmem:[#allocation9 + $0x1b8] sm:$0xff] }
 0x44d   : > { %v2464_v29 = vsel %vm2461_vm7, %v2463_v34, %v2459_v5  ;;  %v2494_v24 = vsel %vm2491_vm14, %v2493_v51, %v2489_v25  ;;  %v2500_v7 = vadd.f32 %v5928_v6, %v2499_v43  ;;  %v2435_v58 = vmul.f32 %v4411_v49, %v5883_v53  ;;  %vm6010_vm2 = vmor %vm2501_vm5, %vm2502_vm15  ;;  %2719 = vmatpush.msra.mxu2 %v2646_v10  ;;  %v2664_v56 = vld [vmem:[#allocation9 + $0x1e0] sm:$0xff]  ;;  %v2657_v5 = vld [vmem:[#allocation9 + $0x1a8] sm:$0xff] }
 0x44e   : > { %v2479_v40 = vsel %vm5917_vm10, %v5838_v22, %v2474_v44  ;;  %v2519_v19 = vsel %vm5989_vm0, %v5824_v2, %v2515_v18  ;;  %v2508_v49 = vor.u32 1.1754944e-38, %v2507_v59  ;;  %v2557_v53 = vld [vmem:[#allocation1] sm:$0xff]  ;;  %v2450_v54 = vmul.f32 %v4448_v9, %v2449_v16  ;;  %2700 = vmatpush.msra.mxu1 %v2626_v35  ;;  %2739 = vmatpush.msra.mxu3 %v2665_v47  ;;  %v2658_v18 = vld [vmem:[#allocation9 + $0x1b0] sm:$0xff]  ;;  %v2656_v25 = vld [vmem:[#allocation9 + $0x1a0] sm:$0xff] }
 0x44f   : > { %v2523_v60 = vor.u32 1.1754944e-38, %v2522_v41  ;;  %v2504_v22 = vsel %vm6010_vm2, %v5928_v6, %v2500_v7  ;;  %vm2506_vm1 = vcmp.eq.f32.partialorder %v2505_v37, 8.507059e+37  ;;  %2910 = vmatmul.msk.f32.vlgmr.msrb.gmra.mxu3 %vm1036_vm9, %v2557_v53  ;;  %2558 = vst [vmem:[#allocation1] ss:$9 sm:$0xff] %v2420_v4  ;;  %v2645_v2 = vld [vmem:[#allocation9 + $0x148] sm:$0xff]  ;;  %vm2521_vm3 = vcmp.eq.f32.partialorder %v2520_v45, 8.507059e+37 }
 0x450   : > { %v2465_v20 = vmul.f32 %v4443_v36, %v2464_v29  ;;  %v2495_v9 = vmul.f32 %v4468_v3, %v2494_v24  ;;  %v2509_v44 = vsel %vm2506_vm1, %v2508_v49, %v2504_v22  ;;  %2559 = vst [vmem:[#allocation1 + $0x1] ss:$9 sm:$0xff] %v2435_v58  ;;  %v2625_v41 = vld [vmem:[#allocation9 + $0xa8] sm:$0xff]  ;;  %v2480_v48 = vmul.f32 %v4453_v50, %v2479_v40  ;;  %v2643_v36 = vld [vmem:[#allocation9 + $0x138] sm:$0xff]  ;;  %v2642_v50 = vld [vmem:[#allocation9 + $0x130] sm:$0xff] }
 0x451   : > { %v2524_v39 = vsel %vm2521_vm3, %v2523_v60, %v2519_v19  ;;  %v2510_v27 = vmul.f32 %v4458_v15, %v2509_v44  ;;  %2560 = vst [vmem:[#allocation1 + $0x2] ss:$9 sm:$0xff] %v2450_v54  ;;  %2720 = vmatpush.msra.mxu2 %v2645_v2  ;;  %2701 = vmatpush.msra.mxu1 %v2625_v41  ;;  %v2623_v45 = vld [vmem:[#allocation9 + $0x98] sm:$0xff]  ;;  %v2622_v15 = vld [vmem:[#allocation9 + $0x90] sm:$0xff]  ;;  %v2641_v6 = vld [vmem:[#allocation9 + $0x128] sm:$0xff] }
 0x452   : > { %2561 = vst [vmem:[#allocation1 + $0x3] ss:$9 sm:$0xff] %v2465_v20  ;;  %v2525_v3 = vmul.f32 %v4478_v63, %v2524_v39  ;;  %2740 = vmatpush.msra.mxu3 %v2664_v56  ;;  %v2655_v59 = vld [vmem:[#allocation9 + $0x198] sm:$0xff]  ;;  %v2654_v8 = vld [vmem:[#allocation9 + $0x190] sm:$0xff]  ;;  %v2653_v61 = vld [vmem:[#allocation9 + $0x188] sm:$0xff] }
 0x453   : > { %2562 = vst [vmem:[#allocation1 + $0x4] ss:$9 sm:$0xff] %v2480_v48  ;;  %2721 = vmatpush.msra.mxu2 %v2644_v14  ;;  %2702 = vmatpush.msra.mxu1 %v2624_v17  ;;  %v2652_v51 = vld [vmem:[#allocation9 + $0x180] sm:$0xff] }
 0x454   : > { %2563 = vst [vmem:[#allocation1 + $0x5] ss:$9 sm:$0xff] %v2495_v9  ;;  %2741 = vmatpush.msra.mxu3 %v2663_v12 }
 0x455   : > { %2564 = vst [vmem:[#allocation1 + $0x6] ss:$9 sm:$0xff] %v2510_v27  ;;  %2722 = vmatpush.msra.mxu2 %v2643_v36  ;;  %2703 = vmatpush.msra.mxu1 %v2623_v45 }
 0x456   : > { %v1061_v42 = vpop.f32.mrf.mxu1  ;;  %2565 = vst [vmem:[#allocation1 + $0x7] ss:$9 sm:$0xff] %v2525_v3  ;;  %2742 = vmatpush.msra.mxu3 %v2662_v30 }
 0x457   : > { %2687 = vmatmul.f32.gmra.mxu0 %v1061_v42  ;;  %2723 = vmatpush.msra.mxu2 %v2642_v50 }
 0x458   : > { %2704 = vmatpush.msra.mxu1 %v2622_v15  ;;  %2743 = vmatpush.msra.mxu3 %v2661_v1 }
 0x459   : > { %2724 = vmatpush.msra.mxu2 %v2641_v6 }
 0x45a   : > { %2705 = vmatpush.msra.mxu1 %v2621_v31  ;;  %2744 = vmatpush.msra.mxu3 %v2660_v46 }
 0x45b   : > { %2725 = vmatpush.msra.mxu2 %v2640_v26 }
 0x45c   : > { %2706 = vmatpush.msra.mxu1 %v2620_v28  ;;  %2745 = vmatpush.msra.mxu3 %v2659_v33 }
 0x45d   : > { %v2566_v63 = vld [vmem:[#allocation1] sm:$0xff]  ;;  %2726 = vmatpush.msra.mxu2 %v2639_v21 }
 0x45e   : > { %2911 = vmatmul.msk.f32.gmra.mxu3 %vm1036_vm9, %v2566_v63 }
 0x45f   : > { %2727 = vmatpush.msra.mxu2 %v2638_v57  ;;  %2746 = vmatpush.msra.mxu3 %v2658_v18 }
 0x461   : > { %2728 = vmatpush.msra.mxu2 %v2637_v62  ;;  %2747 = vmatpush.msra.mxu3 %v2657_v5 }
 0x463   : > { %2729 = vmatpush.msra.mxu2 %v2636_v55  ;;  %2748 = vmatpush.msra.mxu3 %v2656_v25 }
 0x465   : > { %2749 = vmatpush.msra.mxu3 %v2655_v59 }
 0x467   : > { %2750 = vmatpush.msra.mxu3 %v2654_v8 }
 0x469   : > { %2751 = vmatpush.msra.mxu3 %v2653_v61 }
 0x46b   : > { %v1568_v11 = vpop.f32.mrf.mxu3  ;;  %2752 = vmatpush.msra.mxu3 %v2652_v51 }
 0x46c   : > { %2707 = vmatmul.f32.vlgmr.msra.gmra.mxu1 %v1568_v11 }
 0x47a   : > { %v1571_v52 = vpop.f32.mrf.mxu3 }
 0x47b   : > { %2710 = vmatmul.f32.gmra.mxu1 %v1571_v52 }
 0x48b   : > { %v2078_v34 = vpop.f32.mrf.mxu1 }
 0x48c   : > { %2730 = vmatmul.f32.vlgmr.msra.gmra.mxu2 %v2078_v34 }
 0x4a8   : > { %v2685_v0 = vpop.f32.mrf.mxu0 }
 0x4bd   : > { %v2081_v43 = vpop.f32.mrf.mxu1 }
 0x4be   : > { %2733 = vmatmul.f32.gmra.mxu2 %v2081_v43 }
 0x4d2   : > { %v2588_v37 = vpop.f32.mrf.mxu3 }
 0x4d3   : > { %2753 = vmatmul.f32.vlgmr.msra.gmra.mxu3 %v2588_v37 }
 0x4d4   : > { %v2688_v40 = vpop.f32.mrf.mxu0 }
 0x4e1   : > { %v2591_v4 = vpop.f32.mrf.mxu3 }
 0x4e2   : > { %2756 = vmatmul.f32.gmra.mxu3 %v2591_v4 }
 0x4e9   : > { %v2708_v16 = vpop.f32.mrf.mxu1 }
 0x4ea   : > { %v2709_v29 = vadd.f32 %v2708_v16, %v2685_v0 }
 0x4f8   : > { %v2711_v58 = vpop.f32.mrf.mxu1 }
 0x4f9   : > { %v2712_v32 = vadd.f32 %v2711_v58, %v2688_v40 }
 0x50f   : > { %v2731_v38 = vpop.f32.mrf.mxu2 }
 0x510   : > { %v2732_v24 = vadd.f32 %v2731_v38, %v2709_v29 }
 0x541   : > { %v2734_v19 = vpop.f32.mrf.mxu2 }
 0x542   : > { %v2735_v49 = vadd.f32 %v2734_v19, %v2712_v32 }
 0x556   : > { %v2754_v7 = vpop.f32.mrf.mxu3 }
 0x557   : > { %v2755_v10 = vadd.f32 %v2754_v7, %v2732_v24 }
 0x559   : > { %2760 = vst [vmem:[%s318_s27] sm:$0xff] %v2755_v10 }
 0x565   : > { %v2757_v53 = vpop.f32.mrf.mxu3 }
 0x566   : > { %v2758_v35 = vadd.f32 %v2757_v53, %v2735_v49 }
 0x568   : > { %2761 = vst [vmem:[%s318_s27 + $0x8] sm:$0xff] %v2758_v35 }
 0x569   : > { %3411 = shalt.err (!%p3408_p9)
}
 0x56a   : > { %s3472_s4 = smov 128   ;;  %s3473_s26 = smov 8  }
 0x56b   : > { %2932 = dma.vmem_to_hbm [thread:$0]  (%p3591_p0), %s2776_s18, 256, %s2778_s10, %s2763_s0, %s3472_s4, %s3472_s4, %s3473_s26  }
 0x56c PF: > { %s2792_s7 = sand.u32 1, %s3450_s21   ;;  %p6386_p10 = scmp.ge.s32.totalorder %s3462_s24, 2 }
 0x56d   : > { %s2793_s27 = scalar_lea.sflag [#allocation5], %s2792_s7 }
 0x56e   : > { %p2949_p11 = pnand %p6386_p10, %p3597_p7 }
 0x570   : > { %p2950_p12 = pneg %p2949_p11 }
 0x572   : > { %3445 = dma.done.wait (%p2950_p12), %s2793_s27, 256  }
 0x573   : > { %3447 = vsyncadd (%p2950_p12), %s2793_s27, 4294967040  ;;  %p21_p3 = scmp.ge.s32.totalorder %s3566_s30, 4   ;;  %s6387_s21 = smov %s3454_s22 }
 0x574   : > { %s6388_s22 = smov %s3458_s23  ;;  %s6389_s23 = smov %s3577_s9 }
 0x575   : > { %s6390_s24 = smov %s3566_s30  ;;  %23 = sbr.rel (!%p21_p3) target bundleno = 10 (0xa), region = 133 }
 0x57a   :  { %2799 = vsyncpa [#allocation4], 1 }
 0x57b   :  { %2801 = vsyncpa [#allocation4 + $0x1], 1 }
 0x57c   :  { %2802 = vsyncpa [#allocation7], 1 }
 0x57d   :  { %2804 = vsyncpa [#allocation7 + $0x1], 1 }
 0x57e   :  { %2805 = vsyncpa [#allocation10], 1 }
 0x57f   :  { %2806 = vsyncpa [#allocation5], 1 }
 0x580   :  { %2808 = vsyncpa [#allocation5 + $0x1], 1 }

// kernel: tpu_custom_call.1
= control target key start
LH: loop header
LB: loop body
LE: loop exit
PB: predicated region body
PF: predicated region fallthrough
CT: control target
= control target key end

     0   :  { %s6063_s0 = inlined_call_operand.hbm [shape: f32[4,16,128], index: 0, kind: input, shape index: {}]   ;;  %s6064_s1 = inlined_call_operand.hbm [shape: f32[2,8,32], index: 1, kind: input, shape index: {}]   ;;  %s6065_s2 = inlined_call_operand.vmem [shape: f32[1,32], index: 2, kind: input, shape index: {}]   ;;  %s6066_s3 = inlined_call_operand.vmem [shape: f32[1,32], index: 3, kind: input, shape index: {}]   ;;  %s6067_s4 = inlined_call_operand.hbm [shape: f32[32,1024], index: 4, kind: input, shape index: {}]   ;;  %s6068_s5 = inlined_call_operand.hbm [shape: f32[512,128], index: 5, kind: input, shape index: {}]   ;;  %s6069_s6 = inlined_call_operand.hbm [shape: f32[2,16,128], index: 6, kind: output, shape index: {}]  }
   0x1   :  { %6129 = sst [smem:[#allocation50_spill]] %s6063_s0 }
   0x2   :  { %6130 = sst [smem:[#allocation51_spill]] %s6067_s4 }
   0x3   :  { %11 = vsyncpa [#allocation4], 0 }
   0x4   :  { %12 = vsyncpa [#allocation7], 0 }
   0x5   :  { %14 = vsyncpa [#allocation7 + $0x1], 0 }
   0x6   :  { %15 = vsyncpa [#allocation10], 0 }
   0x7   :  { %16 = vsyncpa [#allocation5], 0 }
   0x8   :  { %18 = vsyncpa [#allocation5 + $0x1], 0  ;;  %s3509_s21 = smov 0   ;;  %s3511_s22 = smov 0  }
   0x9   :  { %s3513_s23 = smov 0   ;;  %s3515_s24 = smov 0  }
   0xa LB: > { %s6131_s4 = sld [smem:[#allocation51_spill]]  ;;  %s3533_s28 = sadd.s32 4294967295, %s3462_s24   ;;  %s3462_s24 = sphi %s3515_s24, %s6390_s24   ;;  %s3458_s23 = sphi %s3513_s23, %s6389_s23   ;;  %s3454_s22 = sphi %s3511_s22, %s6388_s22   ;;  %s3450_s21 = sphi %s3509_s21, %s6387_s21  }
   0xb   : > { %p2883_p0 = scmp.ge.s32.totalorder %s3462_s24, 1  ;;  %p66_p1 = scmp.eq.s32.totalorder %s3533_s28, 0 }
   0xc   : > { %p173_p2 = scmp.eq.s32.totalorder %s3533_s28, 1  ;;  %p186_p3 = scmp.lt.s32.totalorder %s3462_s24, 3 }
   0xd   : > { %s3464_s30 = smov [#allocation8]   ;;  %s6133_s0 = sld [smem:[#allocation50_spill]] }
   0xe   : > { %p3539_p4 = pnand %p2883_p0, %p186_p3  ;;  %s219_s7 = sshll.u32 %s3464_s30, 4  ;;  %s220_s7 = int_to_ptr.vmem [resolvable:$true] %s219_s7 }
   0xf   : > { %s3465_s12 = smov [#allocation3]   ;;  %s3466_s14 = smov 1024  }
  0x10   : > { %s217_s27 = sshll.u32 %s6131_s4, 4  ;;  %p2934_p5 = pneg %p3539_p4  ;;  %s218_s27 = int_to_ptr.hbm [resolvable:$true] %s217_s27 }
  0x11   : > { %s199_s13 = sshll.u32 %s3465_s12, 4  ;;  %s3467_s15 = smov 64   ;;  %s200_s13 = int_to_ptr.vmem [resolvable:$true] %s199_s13 }
  0x12   : > { %p3551_p7 = pnand %p2934_p5, %p66_p1  ;;  %s231_s18 = sshll.u32 %s6068_s5, 4  ;;  %s232_s18 = int_to_ptr.hbm [resolvable:$true] %s231_s18 }
  0x13   : > { %s197_s10 = sshll.u32 %s6133_s0, 4  ;;  %s3468_s19 = smov 128   ;;  %s198_s10 = int_to_ptr.hbm [resolvable:$true] %s197_s10 }
  0x14   : > { %2940 = dma.hbm_to_vmem [thread:$0]  (!%p3551_p7), %s218_s27, 4096, %s220_s7, [#allocation7], %s3466_s14, %s3466_s14, %s3467_s15  }
  0x15   : > { %s3469_s20 = smov 8   ;;  %s3470_s25 = smov [#allocation9]  }
  0x16   : > { %2937 = dma.hbm_to_vmem [thread:$0]  (!%p3551_p7), %s198_s10, 1024, %s200_s13, [#allocation4], %s3468_s19, %s3468_s19, %s3469_s20  }
  0x17   : > { %s233_s26 = sshll.u32 %s3470_s25, 4  ;;  %s2882_s27 = sadd.s32 4294967294, %s3462_s24   ;;  %s234_s26 = int_to_ptr.vmem [resolvable:$true] %s233_s26 }
  0x18   : > { %2943 = dma.hbm_to_vmem [thread:$0]  (!%p3551_p7), %s232_s18, 8192, %s234_s26, [#allocation10], %s3468_s19, %s3468_s19, %s3469_s20  }
  0x19   : > { %s3566_s30 = sadd.s32 1, %s3462_s24   ;;  %s52_s8 = sadd.s32 1, %s3458_s23 }
  0x1a   : > { %s49_s7 = ssub.s32 %s3462_s24, %s3566_s30  ;;  %p59_p9 = scmp.ne.s32.totalorder %s3458_s23, %s3454_s22 }
  0x1b   : > { %p50_p8 = scmp.eq.s32.totalorder %s49_s7, 0  ;;  %p60_p10 = scmp.eq.s32.totalorder %s3462_s24, 0 }
  0x1c   : > { %p65_p11 = scmp.ne.s32.totalorder %s3454_s22, %s3450_s21  ;;  %p3591_p0 = por %p173_p2, %p59_p9 }
  0x1d   : > { %s3577_s9 = scalar_select %p50_p8, %s3458_s23, %s52_s8  }
  0x1e   : > { %p3579_p12 = por %p60_p10, %p59_p9  ;;  %p3585_p13 = por %p66_p1, %p65_p11 }
  0x1f   : > { %p179_p3 = scmp.eq.s32.totalorder %s2882_s27, 1  ;;  %p2955_p5 = scmp.lt.s32.totalorder %s3462_s24, 2 }
  0x20   : > { %s247_s13 = sand.u32 1, %s3462_s24   ;;  %s249_s15 = sand.u32 1, %s3458_s23  }
  0x21   : > { %p3597_p7 = por %p179_p3, %p65_p11  ;;  %s2889_s16 = sshll.u32 %s3462_s24, 3 }
  0x22   : > { %s2888_s17 = sshll.u32 %s249_s15, 3  ;;  %s255_s20 = scalar_lea.hbm %s6064_s1, %s2889_s16 }
  0x23   : > { %s257_s25 = sshll.u32 %s255_s20, 4  ;;  %s251_s26 = scalar_lea.vmem [#allocation6], %s2888_s17  ;;  %s258_s25 = int_to_ptr.hbm [resolvable:$true] %s257_s25 }
  0x24   : > { %s259_s7 = sshll.u32 %s251_s26, 4  ;;  %p3608_p2 = pnand %p2955_p5, %p3579_p12  ;;  %s260_s7 = int_to_ptr.vmem [resolvable:$true] %s259_s7 }
  0x25   : > { %s248_s8 = scalar_lea.sflag [#allocation7], %s247_s13  ;;  %s3354_s0 = sshra.s32 %s258_s25, 4  ;;  %s3355_s0 = int_to_ptr.hbm [resolvable:$true] %s3354_s0 }
  0x26   : > { %s3356_s4 = scalar_lea.hbm %s3355_s0, 8  ;;  %p3358_p9 = pneg %p3608_p2 }
  0x27   : > { %p3357_p8 = scmp.ne.s32.totalorder %s3355_s0, %s3356_s4  ;;  %s3361_s17 = scalar_lea.hbm %s6064_s1, 16 }
  0x28   : > { %p3362_p12 = scmp.lt.s32.totalorder %s3355_s0, %s6064_s1  ;;  %p3363_p3 = scmp.lt.s32.totalorder %s3361_s17, %s3356_s4 }
  0x29   : > { %p3359_p10 = pnand %p3358_p9, %p3357_p8 }
  0x2a   : > { %p3364_p5 = por %p3363_p3, %p3362_p12 }
  0x2b   : > { %p3360_p11 = pneg %p3359_p10 }
  0x2d   : > { %p3365_p6 = pnand %p3364_p5, %p3360_p11 }
  0x2f   : > { %3368 = shalt.err (!%p3365_p6)
}
  0x30   : > { %2947 = dma.hbm_to_vmem [thread:$0]  (!%p3608_p2), %s258_s25, 128, %s260_s7, %s248_s8  }
  0x31   : > { %268 = sbr.rel (%p3539_p4) target bundleno = 1388 (0x56c), region = 44 }
  0x36   : > { %3429 = dma.done.wait (%p66_p1), [#allocation4], 1024  }
  0x37   : > { %3431 = vsyncadd (%p66_p1), [#allocation4], 4294966272  ;;  %s275_s0 = sand.u32 1, %s3533_s28   ;;  %s3630_s4 = sand.u32 1, %s3454_s22  }
  0x38   : > { %s2892_s13 = sshll.u32 %s3630_s4, 3  ;;  %s276_s19 = scalar_lea.sflag [#allocation7], %s275_s0 }
  0x39   : > { %s279_s20 = scalar_lea.vmem [#allocation6], %s2892_s13 }
  0x3a   : > { %3433 = dma.done.wait (%p3585_p13), %s276_s19, 128  }
  0x3b   : > { %3435 = vsyncadd (%p3585_p13), %s276_s19, 4294967168 }
  0x3c   : > { %3437 = dma.done.wait (%p66_p1), [#allocation7], 4096  }
  0x3d   : > { %3439 = vsyncadd (%p66_p1), [#allocation7], 4294963200 }
  0x3e   : > { %3441 = dma.done.wait (%p66_p1), [#allocation10], 8192  }
  0x3f   : > { %3443 = vsyncadd (%p66_p1), [#allocation10], 4294959104  ;;  %vm320_vm0 = vcmask 261120   ;;  %v319_v0 = vld [vmem:[%s279_s20] sm:$0xff]  ;;  %v3471_v2 = vmov 32.0   ;;  %v384_v14 = vld [vmem:[#allocation8 + $0xc0] sm:$0xff] }
  0x40   : > { %v321_v1 = vsel %vm320_vm0, %v319_v0, 0.0  ;;  %3004 = vrcp.f32 %v3471_v2  ;;  %v385_v15 = vld [vmem:[#allocation8 + $0xc8] sm:$0xff]  ;;  %v386_v16 = vld [vmem:[#allocation8 + $0xd0] sm:$0xff]  ;;  %407 = vmatpush.msra.mxu0 %v384_v14  ;;  %v387_v17 = vld [vmem:[#allocation8 + $0xd8] sm:$0xff]  ;;  %vm610_vm5 = vcmask 57344   ;;  %s2895_s7 = sshll.u32 %s3630_s4, 4 }
  0x41   : > { %322 = vadd.xlane.f32.xlu0 %v321_v1  ;;  %427 = vmatpush.msra.mxu1 %v385_v15  ;;  %v376_v18 = vld [vmem:[#allocation8 + $0x80] sm:$0xff]  ;;  %v377_v19 = vld [vmem:[#allocation8 + $0x88] sm:$0xff]  ;;  %v378_v20 = vld [vmem:[#allocation8 + $0x90] sm:$0xff]  ;;  %s318_s27 = scalar_lea.vmem [#allocation11], %s2895_s7  ;;  %s2917_s8 = sshll.u32 %s3533_s28, 4 }
  0x42   : > { %447 = vmatpush.msra.mxu2 %v386_v16  ;;  %467 = vmatpush.msra.mxu3 %v387_v17  ;;  %v379_v21 = vld [vmem:[#allocation8 + $0x98] sm:$0xff]  ;;  %v368_v22 = vld [vmem:[#allocation8 + $0x40] sm:$0xff]  ;;  %v369_v23 = vld [vmem:[#allocation8 + $0x48] sm:$0xff]  ;;  %s2774_s17 = scalar_lea.hbm %s6069_s6, %s2917_s8  ;;  %s2775_s18 = sshll.u32 %s318_s27, 4  ;;  %s2776_s18 = int_to_ptr.vmem [resolvable:$true] %s2775_s18 }
  0x43   : > { %408 = vmatpush.msra.mxu0 %v376_v18  ;;  %428 = vmatpush.msra.mxu1 %v377_v19  ;;  %v370_v24 = vld [vmem:[#allocation8 + $0x50] sm:$0xff]  ;;  %v371_v25 = vld [vmem:[#allocation8 + $0x58] sm:$0xff]  ;;  %v360_v26 = vld [vmem:[#allocation8] sm:$0xff]  ;;  %s2777_s10 = sshll.u32 %s2774_s17, 4  ;;  %s2763_s0 = scalar_lea.sflag [#allocation5], %s3630_s4  ;;  %s2778_s10 = int_to_ptr.hbm [resolvable:$true] %s2777_s10 }
  0x44   : > { %448 = vmatpush.msra.mxu2 %v378_v20  ;;  %468 = vmatpush.msra.mxu3 %v379_v21  ;;  %v361_v27 = vld [vmem:[#allocation8 + $0x8] sm:$0xff]  ;;  %v362_v28 = vld [vmem:[#allocation8 + $0x10] sm:$0xff]  ;;  %v363_v29 = vld [vmem:[#allocation8 + $0x18] sm:$0xff]  ;;  %s3398_s13 = sshra.s32 %s2778_s10, 4  ;;  %s3404_s29 = scalar_lea.hbm %s6069_s6, 32  ;;  %s3399_s13 = int_to_ptr.hbm [resolvable:$true] %s3398_s13 }
  0x45   : > { %409 = vmatpush.msra.mxu0 %v368_v22  ;;  %429 = vmatpush.msra.mxu1 %v369_v23  ;;  %v388_v30 = vld [vmem:[#allocation8 + $0xe0] sm:$0xff]  ;;  %v389_v31 = vld [vmem:[#allocation8 + $0xe8] sm:$0xff]  ;;  %v390_v32 = vld [vmem:[#allocation8 + $0xf0] sm:$0xff]  ;;  %s3400_s28 = scalar_lea.hbm %s3399_s13, 16  ;;  %p3405_p13 = scmp.lt.s32.totalorder %s3399_s13, %s6069_s6 }
  0x46   : > { %v3005_v3 = vpop.eup %3004  ;;  %449 = vmatpush.msra.mxu2 %v370_v24  ;;  %469 = vmatpush.msra.mxu3 %v371_v25  ;;  %v391_v33 = vld [vmem:[#allocation8 + $0xf8] sm:$0xff]  ;;  %v380_v34 = vld [vmem:[#allocation8 + $0xa0] sm:$0xff]  ;;  %v381_v35 = vld [vmem:[#allocation8 + $0xa8] sm:$0xff]  ;;  %p3401_p1 = scmp.ne.s32.totalorder %s3399_s13, %s3400_s28  ;;  %p3406_p2 = scmp.lt.s32.totalorder %s3404_s29, %s3400_s28 }
  0x47   : > { %v325_v4 = vmul.f32 32.0, %v3005_v3  ;;  %vm329_vm1 = vweird.f32 %v3005_v3  ;;  %410 = vmatpush.msra.mxu0 %v360_v26  ;;  %430 = vmatpush.msra.mxu1 %v361_v27  ;;  %v382_v37 = vld [vmem:[#allocation8 + $0xb0] sm:$0xff]  ;;  %v383_v38 = vld [vmem:[#allocation8 + $0xb8] sm:$0xff]  ;;  %v372_v39 = vld [vmem:[#allocation8 + $0x60] sm:$0xff] }
  0x48   : > { %450 = vmatpush.msra.mxu2 %v362_v28  ;;  %470 = vmatpush.msra.mxu3 %v363_v29  ;;  %v373_v41 = vld [vmem:[#allocation8 + $0x68] sm:$0xff]  ;;  %v374_v42 = vld [vmem:[#allocation8 + $0x70] sm:$0xff]  ;;  %v375_v43 = vld [vmem:[#allocation8 + $0x78] sm:$0xff]  ;;  %p3402_p4 = pnand %p3401_p1, %p3591_p0  ;;  %p3407_p8 = por %p3406_p2, %p3405_p13 }
  0x49   : > { %v326_v5 = vsub.f32 1.0, %v325_v4  ;;  %487 = vmatpush.msrb.mxu0 %v388_v30  ;;  %507 = vmatpush.msrb.mxu1 %v389_v31  ;;  %v364_v44 = vld [vmem:[#allocation8 + $0x20] sm:$0xff]  ;;  %v365_v45 = vld [vmem:[#allocation8 + $0x28] sm:$0xff]  ;;  %v366_v47 = vld [vmem:[#allocation8 + $0x30] sm:$0xff] }
  0x4a   : > { %527 = vmatpush.msrb.mxu2 %v390_v32  ;;  %547 = vmatpush.msrb.mxu3 %v391_v33  ;;  %v367_v48 = vld [vmem:[#allocation8 + $0x38] sm:$0xff]  ;;  %v3002_v55 = vld [vmem:[%s6065_s2] ss:$0 sm:$0xff]  ;;  %v555_v63 = vld [vmem:[#allocation3] sm:$0xff]  ;;  %p3403_p6 = pneg %p3402_p4 }
  0x4b   : > { %v327_v6 = vmul.f32 %v3005_v3, %v326_v5  ;;  %488 = vmatpush.msrb.mxu0 %v380_v34  ;;  %508 = vmatpush.msrb.mxu1 %v381_v35  ;;  %v3003_v57 = vld [vmem:[%s6066_s3] ss:$0 sm:$0xff]  ;;  %v556_v5 = vld [vmem:[#allocation3 + $0x8] sm:$0xff] }
  0x4c   : > { %528 = vmatpush.msrb.mxu2 %v382_v37  ;;  %548 = vmatpush.msrb.mxu3 %v383_v38  ;;  %p3408_p9 = pnand %p3407_p8, %p3403_p6 }
  0x4d   : > { %v328_v7 = vadd.f32 %v3005_v3, %v327_v6  ;;  %489 = vmatpush.msrb.mxu0 %v372_v39  ;;  %509 = vmatpush.msrb.mxu1 %v373_v41  ;;  %v1068_v6 = vld [vmem:[#allocation3 + $0x18] sm:$0xff] }
  0x4e   : > { %529 = vmatpush.msrb.mxu2 %v374_v42  ;;  %549 = vmatpush.msrb.mxu3 %v375_v43 }
  0x4f   : > { %v330_v8 = vsel %vm329_vm1, %v3005_v3, %v328_v7  ;;  %490 = vmatpush.msrb.mxu0 %v364_v44  ;;  %510 = vmatpush.msrb.mxu1 %v365_v45 }
  0x50   : > { %530 = vmatpush.msrb.mxu2 %v366_v47  ;;  %550 = vmatpush.msrb.mxu3 %v367_v48 }
  0xb4   : > { %v323_v9 = vpop.xlane.xlu0 %322 }
  0xb5   : > { %v331_v10 = vmul.f32 %v330_v8, %v323_v9  ;;  %v1577_v9 = vld [vmem:[#allocation3 + $0x20] sm:$0xff] }
  0xb7   : > { %v3646_v11 = vsub.f32 %v319_v0, %v331_v10  ;;  %v1067_v0 = vld [vmem:[#allocation3 + $0x10] sm:$0xff] }
  0xb8   : > { %v2087_v10 = vld [vmem:[#allocation3 + $0x30] sm:$0xff] }
  0xb9   : > { %v333_v12 = vmul.f32 %v3646_v11, %v3646_v11 }
  0xbb   : > { %v334_v13 = vsel %vm320_vm0, %v333_v12, 0.0  ;;  %v2088_v12 = vld [vmem:[#allocation3 + $0x38] sm:$0xff] }
  0xbc   : > { %335 = vadd.xlane.f32.xlu0 %v334_v13 }
 0x12f   : > { %v336_v36 = vpop.xlane.xlu0 %335 }
 0x130   : > { %v337_v40 = vmul.f32 %v336_v36, %v330_v8 }
 0x132   : > { %v338_v46 = vadd.f32 1e-05, %v337_v40 }
 0x134   : > { %3006 = vrsqrt.f32 %v338_v46  ;;  %vm345_vm3 = vweird.f32 %v338_v46 }
 0x13a   : > { %v3007_v49 = vpop.eup %3006 }
 0x13b   : > { %v340_v50 = vmul.f32 %v3007_v49, %v338_v46  ;;  %vm346_vm2 = vweird.f32 %v3007_v49 }
 0x13c   : > { %vm347_vm4 = vmor %vm345_vm3, %vm346_vm2 }
 0x13d   : > { %v341_v51 = vmul.f32 %v3007_v49, %v340_v50 }
 0x13f   : > { %v342_v52 = vmul.f32 0.5, %v341_v51 }
 0x141   : > { %v343_v53 = vsub.f32 1.5, %v342_v52 }
 0x143   : > { %v344_v54 = vmul.f32 %v3007_v49, %v343_v53 }
 0x145   : > { %v348_v56 = vsel %vm347_vm4, %v3007_v49, %v344_v54 }
 0x146   : > { %v349_v58 = vmul.f32 %v348_v56, %v3646_v11  ;;  %v1578_v11 = vld [vmem:[#allocation3 + $0x28] sm:$0xff] }
 0x148   : > { %v354_v59 = vmul.f32 %v3002_v55, %v349_v58 }
 0x14a   : > { %v359_v60 = vadd.f32 %v3003_v57, %v354_v59 }
 0x14c   : > { %2896 = vmatmul.msk.f32.vlgmr.msra.gmra.mxu0 %vm320_vm0, %v359_v60  ;;  %2897 = vmatmul.msk.f32.vlgmr.msra.gmra.mxu1 %vm320_vm0, %v359_v60 }
 0x14d   : > { %2898 = vmatmul.msk.f32.vlgmr.msra.gmra.mxu2 %vm320_vm0, %v359_v60  ;;  %2899 = vmatmul.msk.f32.vlgmr.msra.gmra.mxu3 %vm320_vm0, %v359_v60 }
 0x154   : > { %2900 = vmatmul.msk.f32.vlgmr.msrb.gmra.mxu0 %vm320_vm0, %v359_v60  ;;  %2901 = vmatmul.msk.f32.vlgmr.msrb.gmra.mxu1 %vm320_vm0, %v359_v60 }
 0x155   : > { %2902 = vmatmul.msk.f32.vlgmr.msrb.gmra.mxu2 %vm320_vm0, %v359_v60  ;;  %2903 = vmatmul.msk.f32.vlgmr.msrb.gmra.mxu3 %vm320_vm0, %v359_v60 }
 0x1c9   : > { %v412_v61 = vpop.f32.mrf.mxu0  ;;  %v432_v62 = vpop.f32.mrf.mxu1 }
 0x1ca   : > { %572 = vmatpush.xpose.msra.mxu0 %v412_v61  ;;  %1084 = vmatpush.xpose.msra.mxu2 %v432_v62 }
 0x1cd   : > { %573 = vmatmul.f32.vlgmr.msra.gmra.mxu0 %v555_v63  ;;  %1085 = vmatmul.f32.vlgmr.msra.gmra.mxu2 %v1067_v0 }
 0x1d0   : > { %v452_v1 = vpop.f32.mrf.mxu2  ;;  %v472_v2 = vpop.f32.mrf.mxu3 }
 0x1d1   : > { %1594 = vmatpush.xpose.msrb.mxu0 %v452_v1  ;;  %2104 = vmatpush.xpose.msrb.mxu2 %v472_v2  ;;  %v492_v3 = vpop.f32.mrf.mxu0  ;;  %v512_v4 = vpop.f32.mrf.mxu1 }
 0x1d2   : > { %1056 = vmatpush.msra.mxu1 %v492_v3  ;;  %1566 = vmatpush.msra.mxu3 %v512_v4 }
 0x1d5   : > { %576 = vmatmul.f32.gmra.mxu0 %v556_v5  ;;  %1088 = vmatmul.f32.gmra.mxu2 %v1068_v6 }
 0x1d8   : > { %v532_v7 = vpop.f32.mrf.mxu2  ;;  %v552_v8 = vpop.f32.mrf.mxu3 }
 0x1d9   : > { %2076 = vmatpush.msrb.mxu1 %v532_v7  ;;  %2586 = vmatpush.msrb.mxu3 %v552_v8 }
 0x1dd   : > { %1595 = vmatmul.f32.vlgmr.msrb.gmra.mxu0 %v1577_v9  ;;  %2105 = vmatmul.f32.vlgmr.msrb.gmra.mxu2 %v2087_v10 }
 0x1e5   : > { %1598 = vmatmul.f32.gmra.mxu0 %v1578_v11  ;;  %2108 = vmatmul.f32.gmra.mxu2 %v2088_v12 }
 0x24a   : > { %v3666_v13 = vpop.f32.mrf.mxu0 }
 0x24b   : > { %v611_v14 = vsel %vm610_vm5, %v3666_v13, -inf  ;;  %v585_v15 = vrot.slane %v3666_v13, 4  ;;  %v583_v16 = vrot.slane %v3666_v13, 2  ;;  %v582_v19 = vrot.slane %v3666_v13, 1 }
 0x24c   : > { %612 = vmax.xlane.f32.xlu1 %v611_v14  ;;  %v588_v20 = vrot.slane %v3666_v13, 7  ;;  %v584_v21 = vrot.slane %v3666_v13, 3  ;;  %v586_v25 = vrot.slane %v3666_v13, 5  ;;  %v587_v27 = vrot.slane %v3666_v13, 6 }
 0x24d   : > { %v623_v17 = vsel %vm610_vm5, %v585_v15, -inf  ;;  %v617_v18 = vsel %vm610_vm5, %v583_v16, -inf  ;;  %v614_v22 = vsel %vm610_vm5, %v582_v19, -inf }
 0x24e   : > { %624 = vmax.xlane.f32.xlu0 %v623_v17  ;;  %618 = vmax.xlane.f32.xlu2 %v617_v18  ;;  %v632_v23 = vsel %vm610_vm5, %v588_v20, -inf  ;;  %v620_v24 = vsel %vm610_vm5, %v584_v21, -inf  ;;  %v626_v28 = vsel %vm610_vm5, %v586_v25, -inf  ;;  %v629_v30 = vsel %vm610_vm5, %v587_v27, -inf }
 0x250   : > { %v3691_v26 = vpop.f32.mrf.mxu2 }
 0x251   : > { %v1122_v29 = vsel %vm610_vm5, %v3691_v26, -inf  ;;  %v1096_v32 = vrot.slane %v3691_v26, 3  ;;  %v1095_v33 = vrot.slane %v3691_v26, 2  ;;  %v1094_v37 = vrot.slane %v3691_v26, 1 }
 0x252   : > { %v3702_v31 = vpop.f32.mrf.mxu0  ;;  %v1099_v38 = vrot.slane %v3691_v26, 6  ;;  %v1098_v39 = vrot.slane %v3691_v26, 5  ;;  %v1097_v43 = vrot.slane %v3691_v26, 4  ;;  %v1100_v49 = vrot.slane %v3691_v26, 7 }
 0x253   : > { %v635_v34 = vsel %vm610_vm5, %v3702_v31, -inf  ;;  %v1131_v35 = vsel %vm610_vm5, %v1096_v32, -inf  ;;  %v1128_v36 = vsel %vm610_vm5, %v1095_v33, -inf  ;;  %v1125_v40 = vsel %vm610_vm5, %v1094_v37, -inf }
 0x254   : > { %615 = vmax.xlane.f32.xlu1 %v614_v22  ;;  %v1140_v41 = vsel %vm610_vm5, %v1099_v38, -inf  ;;  %v1137_v42 = vsel %vm610_vm5, %v1098_v39, -inf  ;;  %v590_v44 = vrot.slane %v3702_v31, 2  ;;  %v589_v45 = vrot.slane %v3702_v31, 1 }
 0x255   : > { %v1134_v46 = vsel %vm610_vm5, %v1097_v43, -inf  ;;  %v593_v50 = vrot.slane %v3702_v31, 5  ;;  %v592_v51 = vrot.slane %v3702_v31, 4  ;;  %v1143_v52 = vsel %vm610_vm5, %v1100_v49, -inf }
 0x256   : > { %633 = vmax.xlane.f32.xlu0 %v632_v23  ;;  %621 = vmax.xlane.f32.xlu2 %v620_v24  ;;  %v641_v47 = vsel %vm610_vm5, %v590_v44, -inf  ;;  %v638_v48 = vsel %vm610_vm5, %v589_v45, -inf  ;;  %v591_v56 = vrot.slane %v3702_v31, 3  ;;  %v595_v58 = vrot.slane %v3702_v31, 7 }
 0x257   : > { %v650_v54 = vsel %vm610_vm5, %v593_v50, -inf  ;;  %v647_v55 = vsel %vm610_vm5, %v592_v51, -inf  ;;  %v594_v62 = vrot.slane %v3702_v31, 6 }
 0x258   : > { %v3744_v53 = vpop.f32.mrf.mxu2  ;;  %v644_v59 = vsel %vm610_vm5, %v591_v56, -inf  ;;  %v656_v61 = vsel %vm610_vm5, %v595_v58, -inf }
 0x259   : > { %v1101_v57 = vrot.slane %v3744_v53, 1  ;;  %v1104_v63 = vrot.slane %v3744_v53, 4  ;;  %v653_v0 = vsel %vm610_vm5, %v594_v62, -inf  ;;  %v1146_v2 = vsel %vm610_vm5, %v3744_v53, -inf }
 0x25a   : > { %v1102_v3 = vrot.slane %v3744_v53, 2  ;;  %v1107_v4 = vrot.slane %v3744_v53, 7  ;;  %v1103_v5 = vrot.slane %v3744_v53, 3  ;;  %v3780_v7 = vpop.f32.mrf.mxu0  ;;  %v1105_v10 = vrot.slane %v3744_v53, 5 }
 0x25b   : > { %v1149_v60 = vsel %vm610_vm5, %v1101_v57, -inf  ;;  %v1158_v1 = vsel %vm610_vm5, %v1104_v63, -inf  ;;  %v6089_v11 = vrot.slane %v3780_v7, 2  ;;  %v1106_v12 = vrot.slane %v3744_v53, 6 }
 0x25c   : > { %627 = vmax.xlane.f32.xlu1 %v626_v28  ;;  %v1152_v6 = vsel %vm610_vm5, %v1102_v3, -inf  ;;  %v1167_v8 = vsel %vm610_vm5, %v1107_v4, -inf  ;;  %v1155_v9 = vsel %vm610_vm5, %v1103_v5, -inf  ;;  %v1161_v14 = vsel %vm610_vm5, %v1105_v10, -inf }
 0x25d   : > { %v1638_v17 = vsel %vm610_vm5, %v6089_v11, -inf  ;;  %v1164_v18 = vsel %vm610_vm5, %v1106_v12, -inf  ;;  %v6085_v22 = vrot.slane %v3780_v7, 5  ;;  %v1604_v23 = vrot.slane %v3780_v7, 1 }
 0x25e   : > { %1123 = vmax.xlane.f32.xlu0 %v1122_v29  ;;  %630 = vmax.xlane.f32.xlu2 %v629_v30  ;;  %v1632_v24 = vsel %vm610_vm5, %v3780_v7, -inf  ;;  %v6087_v30 = vrot.slane %v3780_v7, 3 }
 0x25f   : > { %v1647_v28 = vsel %vm610_vm5, %v6085_v22, -inf  ;;  %v1635_v29 = vsel %vm610_vm5, %v1604_v23, -inf }
 0x264   : > { %636 = vmax.xlane.f32.xlu1 %v635_v34  ;;  %v3811_v34 = vpop.f32.mrf.mxu0 }
 0x266   : > { %1132 = vmax.xlane.f32.xlu0 %v1131_v35  ;;  %1129 = vmax.xlane.f32.xlu2 %v1128_v36  ;;  %v1607_v35 = vrot.slane %v3780_v7, 4  ;;  %v1641_v36 = vsel %vm610_vm5, %v6087_v30, -inf }
 0x26c   : > { %1126 = vmax.xlane.f32.xlu1 %v1125_v40  ;;  %v1656_v40 = vsel %vm610_vm5, %v3811_v34, -inf }
 0x26e   : > { %1141 = vmax.xlane.f32.xlu0 %v1140_v41  ;;  %1138 = vmax.xlane.f32.xlu2 %v1137_v42  ;;  %v3819_v41 = vpop.f32.mrf.mxu2  ;;  %v1644_v42 = vsel %vm610_vm5, %v1607_v35, -inf }
 0x274   : > { %1135 = vmax.xlane.f32.xlu1 %v1134_v46  ;;  %v6082_v46 = vrot.slane %v3780_v7, 6 }
 0x276   : > { %642 = vmax.xlane.f32.xlu0 %v641_v47  ;;  %639 = vmax.xlane.f32.xlu2 %v638_v48  ;;  %v6081_v47 = vrot.slane %v3819_v41, 1  ;;  %v6086_v48 = vrot.slane %v3780_v7, 7 }
 0x27c   : > { %1144 = vmax.xlane.f32.xlu1 %v1143_v52  ;;  %v1650_v52 = vsel %vm610_vm5, %v6082_v46, -inf }
 0x27e   : > { %651 = vmax.xlane.f32.xlu0 %v650_v54  ;;  %648 = vmax.xlane.f32.xlu2 %v647_v55  ;;  %v2145_v54 = vsel %vm610_vm5, %v6081_v47, -inf  ;;  %v1653_v55 = vsel %vm610_vm5, %v6086_v48, -inf }
 0x284   : > { %645 = vmax.xlane.f32.xlu1 %v644_v59  ;;  %v6080_v59 = vrot.slane %v3819_v41, 2 }
 0x286   : > { %1150 = vmax.xlane.f32.xlu0 %v1149_v60  ;;  %657 = vmax.xlane.f32.xlu2 %v656_v61  ;;  %v6075_v60 = vrot.slane %v3819_v41, 4  ;;  %v2148_v61 = vsel %vm610_vm5, %v6080_v59, -inf }
 0x28c   : > { %654 = vmax.xlane.f32.xlu1 %v653_v0  ;;  %v2154_v0 = vsel %vm610_vm5, %v6075_v60, -inf }
 0x28e   : > { %1159 = vmax.xlane.f32.xlu0 %v1158_v1  ;;  %1147 = vmax.xlane.f32.xlu2 %v1146_v2  ;;  %v2142_v1 = vsel %vm610_vm5, %v3819_v41, -inf }
 0x294   : > { %1153 = vmax.xlane.f32.xlu1 %v1152_v6  ;;  %v6074_v6 = vrot.slane %v3819_v41, 5 }
 0x296   : > { %1168 = vmax.xlane.f32.xlu0 %v1167_v8  ;;  %1156 = vmax.xlane.f32.xlu2 %v1155_v9 }
 0x29c   : > { %1162 = vmax.xlane.f32.xlu1 %v1161_v14  ;;  %v6073_v14 = vrot.slane %v3819_v41, 7 }
 0x29e   : > { %1639 = vmax.xlane.f32.xlu0 %v1638_v17  ;;  %1165 = vmax.xlane.f32.xlu2 %v1164_v18  ;;  %v6079_v17 = vrot.slane %v3819_v41, 3  ;;  %v2157_v18 = vsel %vm610_vm5, %v6074_v6, -inf  ;;  %v3897_v6 = vpop.f32.mrf.mxu2 }
 0x29f   : > { %v6090_v59 = vrot.slane %v3897_v6, 3  ;;  %v6091_v47 = vrot.slane %v3897_v6, 2 }
 0x2a4   : > { %1633 = vmax.xlane.f32.xlu1 %v1632_v24  ;;  %v2163_v24 = vsel %vm610_vm5, %v6073_v14, -inf  ;;  %v6083_v14 = vrot.slane %v3811_v34, 7 }
 0x2a6   : > { %1648 = vmax.xlane.f32.xlu0 %v1647_v28  ;;  %1636 = vmax.xlane.f32.xlu2 %v1635_v29  ;;  %v2151_v28 = vsel %vm610_vm5, %v6079_v17, -inf }
 0x2ac   : > { %1642 = vmax.xlane.f32.xlu1 %v1641_v36  ;;  %v6070_v36 = vrot.slane %v3811_v34, 1 }
 0x2ae   : > { %1657 = vmax.xlane.f32.xlu0 %v1656_v40  ;;  %1645 = vmax.xlane.f32.xlu2 %v1644_v42 }
 0x2b4   : > { %1651 = vmax.xlane.f32.xlu1 %v1650_v52  ;;  %v6071_v52 = vrot.slane %v3811_v34, 3 }
 0x2b6   : > { %2146 = vmax.xlane.f32.xlu0 %v2145_v54  ;;  %1654 = vmax.xlane.f32.xlu2 %v1653_v55  ;;  %v6072_v54 = vrot.slane %v3819_v41, 6  ;;  %v1659_v55 = vsel %vm610_vm5, %v6070_v36, -inf  ;;  %v6077_v36 = vrot.slane %v3811_v34, 6 }
 0x2bc   : > { %2149 = vmax.xlane.f32.xlu1 %v2148_v61  ;;  %v1665_v61 = vsel %vm610_vm5, %v6071_v52, -inf }
 0x2be   : > { %2155 = vmax.xlane.f32.xlu0 %v2154_v0  ;;  %2143 = vmax.xlane.f32.xlu2 %v2142_v1  ;;  %v2160_v0 = vsel %vm610_vm5, %v6072_v54, -inf }
 0x2bf   : > { %v3846_v2 = vpop.xlane.xlu1 %612 }
 0x2c1   : > { %v3849_v8 = vpop.xlane.xlu0 %624  ;;  %v619_v9 = vpop.xlane.xlu2 %618 }
 0x2c4   : > { %2158 = vmax.xlane.f32.xlu1 %v2157_v18  ;;  %v6076_v18 = vrot.slane %v3811_v34, 4 }
 0x2c6   : > { %2164 = vmax.xlane.f32.xlu0 %v2163_v24  ;;  %2152 = vmax.xlane.f32.xlu2 %v2151_v28  ;;  %v1668_v52 = vsel %vm610_vm5, %v6076_v18, -inf }
 0x2c7   : > { %v616_v29 = vpop.xlane.xlu1 %615 }
 0x2c8   : > { %v660_v22 = vsub.f32 %v582_v19, %v616_v29  ;;  %v659_v19 = vsub.f32 %v3666_v13, %v3846_v2  ;;  %v663_v29 = vsub.f32 %v585_v15, %v3849_v8  ;;  %v6092_v8 = vrot.slane %v3897_v6, 7 }
 0x2c9   : > { %v3863_v40 = vpop.xlane.xlu0 %633  ;;  %v3865_v42 = vpop.xlane.xlu2 %621 }
 0x2ca   : > { %v683_v15 = vmul.f32 1.442695, %v663_v29  ;;  %v666_v29 = vsub.f32 %v588_v20, %v3863_v40 }
 0x2cc   : > { %1660 = vmax.xlane.f32.xlu1 %v1659_v55  ;;  %v6078_v55 = vrot.slane %v3811_v34, 2 }
 0x2ce   : > { %1666 = vmax.xlane.f32.xlu0 %v1665_v61  ;;  %2161 = vmax.xlane.f32.xlu2 %v2160_v0  ;;  %v1674_v61 = vsel %vm610_vm5, %v6077_v36, -inf  ;;  %v1662_v0 = vsel %vm610_vm5, %v6078_v55, -inf  ;;  %v1677_v36 = vsel %vm610_vm5, %v6083_v14, -inf  ;;  %v2166_v55 = vsel %vm610_vm5, %v3897_v6, -inf }
 0x2cf   : > { %v628_v1 = vpop.xlane.xlu1 %627 }
 0x2d1   : > { %v3879_v24 = vpop.xlane.xlu0 %1123  ;;  %v3881_v28 = vpop.xlane.xlu2 %630 }
 0x2d4   : > { %1669 = vmax.xlane.f32.xlu1 %v1668_v52  ;;  %v6084_v52 = vrot.slane %v3811_v34, 5 }
 0x2d6   : > { %1675 = vmax.xlane.f32.xlu0 %v1674_v61  ;;  %1663 = vmax.xlane.f32.xlu2 %v1662_v0  ;;  %v1671_v61 = vsel %vm610_vm5, %v6084_v52, -inf  ;;  %v6088_v0 = vrot.slane %v3897_v6, 1  ;;  %v661_v52 = vsub.f32 %v583_v16, %v619_v9  ;;  %v677_v16 = vmul.f32 1.442695, %v660_v22 }
 0x2d7   : > { %v3894_v54 = vpop.xlane.xlu1 %636 }
 0x2d8   : > { %v679_v48 = vmul.f32 1.442695, %v661_v52  ;;  %v664_v52 = vsub.f32 %v586_v25, %v628_v1 }
 0x2d9   : > { %v3899_v60 = vpop.xlane.xlu0 %1132  ;;  %v1130_v18 = vpop.xlane.xlu2 %1129 }
 0x2da   : > { %3008 = vpow2.f32 %v679_v48 }
 0x2db   : > { %3010 = vpow2.f32 %v677_v16 }
 0x2dc   : > { %1678 = vmax.xlane.f32.xlu1 %v1677_v36  ;;  %v2169_v36 = vsel %vm610_vm5, %v6088_v0, -inf  ;;  %v6095_v0 = vrot.slane %v3897_v6, 4 }
 0x2de   : > { %2167 = vmax.xlane.f32.xlu0 %v2166_v55  ;;  %1672 = vmax.xlane.f32.xlu2 %v1671_v61  ;;  %v2175_v55 = vsel %vm610_vm5, %v6090_v59, -inf  ;;  %v2172_v61 = vsel %vm610_vm5, %v6091_v47, -inf  ;;  %v6094_v59 = vrot.slane %v3897_v6, 6  ;;  %v6093_v47 = vrot.slane %v3897_v6, 5 }
 0x2df   : > { %v3911_v17 = vpop.xlane.xlu1 %1126  ;;  %v2178_v22 = vsel %vm610_vm5, %v6095_v0, -inf }
 0x2e0   : > { %v2181_v2 = vsel %vm610_vm5, %v6093_v47, -inf  ;;  %v3960_v16 = vpop.eup %3008 }
 0x2e1   : > { %v3915_v46 = vpop.xlane.xlu0 %1141  ;;  %v3917_v14 = vpop.xlane.xlu2 %1138 }
 0x2e4   : > { %2170 = vmax.xlane.f32.xlu1 %v2169_v36  ;;  %v2184_v36 = vsel %vm610_vm5, %v6094_v59, -inf }
 0x2e6   : > { %2176 = vmax.xlane.f32.xlu0 %v2175_v55  ;;  %2173 = vmax.xlane.f32.xlu2 %v2172_v61  ;;  %v675_v55 = vmul.f32 1.442695, %v659_v19  ;;  %v685_v61 = vmul.f32 1.442695, %v664_v52  ;;  %v662_v19 = vsub.f32 %v584_v21, %v3865_v42  ;;  %v2187_v52 = vsel %vm610_vm5, %v6092_v8, -inf }
 0x2e7   : > { %v3932_v30 = vpop.xlane.xlu1 %1135 }
 0x2e8   : > { %3012 = vpow2.f32 %v675_v55  ;;  %v681_v42 = vmul.f32 1.442695, %v662_v19  ;;  %v689_v55 = vmul.f32 1.442695, %v666_v29  ;;  %v665_v19 = vsub.f32 %v587_v27, %v3881_v28 }
 0x2e9   : > { %v3935_v9 = vpop.xlane.xlu0 %642  ;;  %v3937_v11 = vpop.xlane.xlu2 %639  ;;  %3014 = vpow2.f32 %v683_v15  ;;  %v667_v29 = vsub.f32 %v3702_v31, %v3894_v54 }
 0x2ea   : > { %3016 = vpow2.f32 %v685_v61  ;;  %v687_v27 = vmul.f32 1.442695, %v665_v19  ;;  %v1171_v19 = vsub.f32 %v1094_v37, %v3911_v17 }
 0x2eb   : > { %3018 = vpow2.f32 %v681_v42  ;;  %v691_v28 = vmul.f32 1.442695, %v667_v29 }
 0x2ec   : > { %2179 = vmax.xlane.f32.xlu1 %v2178_v22  ;;  %v3966_v22 = vpop.eup %3010  ;;  %3020 = vpow2.f32 %v689_v55 }
 0x2ed   : > { %v710_v21 = vsel %vm610_vm5, %v3966_v22, 0.0 }
 0x2ee   : > { %2185 = vmax.xlane.f32.xlu0 %v2184_v36  ;;  %2182 = vmax.xlane.f32.xlu2 %v2181_v2  ;;  %v1172_v36 = vsub.f32 %v1095_v33, %v1130_v18  ;;  %v713_v2 = vsel %vm610_vm5, %v3960_v16, 0.0  ;;  %v3985_v40 = vpop.eup %3012 }
 0x2ef   : > { %v3957_v48 = vpop.xlane.xlu1 %1144  ;;  %v3987_v61 = vpop.eup %3014 }
 0x2f0   : > { %v1190_v15 = vmul.f32 1.442695, %v1172_v36  ;;  %v3993_v18 = vpop.eup %3016  ;;  %v1175_v36 = vsub.f32 %v1098_v39, %v3917_v14  ;;  %v719_v13 = vsel %vm610_vm5, %v3987_v61, 0.0 }
 0x2f1   : > { %v3962_v25 = vpop.xlane.xlu0 %651  ;;  %v3964_v1 = vpop.xlane.xlu2 %648 }
 0x2f2   : > { %3022 = vpow2.f32 %v1190_v15  ;;  %v1196_v42 = vmul.f32 1.442695, %v1175_v36  ;;  %v668_v36 = vsub.f32 %v589_v45, %v3937_v11 }
 0x2f3   : > { %3024 = vpow2.f32 %v687_v27  ;;  %v1188_v27 = vmul.f32 1.442695, %v1171_v19  ;;  %v1174_v19 = vsub.f32 %v1097_v43, %v3932_v30 }
 0x2f4   : > { %2188 = vmax.xlane.f32.xlu1 %v2187_v52  ;;  %v707_v52 = vsel %vm610_vm5, %v3985_v40, 0.0  ;;  %3026 = vpow2.f32 %v691_v28  ;;  %v693_v28 = vmul.f32 1.442695, %v668_v36  ;;  %v671_v36 = vsub.f32 %v592_v51, %v3964_v1 }
 0x2f5   : > { %3028 = vpow2.f32 %v1196_v42 }
 0x2f6   : > { %714 = vadd.xlane.f32.xlu0 %v713_v2  ;;  %711 = vadd.xlane.f32.xlu2 %v710_v21  ;;  %v722_v2 = vsel %vm610_vm5, %v3993_v18, 0.0  ;;  %v4011_v21 = vpop.eup %3018 }
 0x2f7   : > { %v3983_v20 = vpop.xlane.xlu1 %645  ;;  %v4013_v55 = vpop.eup %3020  ;;  %v716_v29 = vsel %vm610_vm5, %v4011_v21, 0.0 }
 0x2f8   : > { %v4019_v14 = vpop.eup %3022 }
 0x2f9   : > { %v3989_v8 = vpop.xlane.xlu0 %1150  ;;  %v3991_v33 = vpop.xlane.xlu2 %657 }
 0x2fa   : > { %v4037_v17 = vpop.eup %3024 }
 0x2fb   : > { %v4039_v42 = vpop.eup %3026 }
 0x2fc   : > { %708 = vadd.xlane.f32.xlu1 %v707_v52  ;;  %v1170_v52 = vsub.f32 %v3691_v26, %v3879_v24  ;;  %v728_v24 = vsel %vm610_vm5, %v4013_v55, 0.0  ;;  %v4045_v11 = vpop.eup %3028 }
 0x2fe   : > { %723 = vadd.xlane.f32.xlu0 %v722_v2  ;;  %720 = vadd.xlane.f32.xlu2 %v719_v13  ;;  %v1224_v2 = vsel %vm610_vm5, %v4019_v14, 0.0  ;;  %v1186_v13 = vmul.f32 1.442695, %v1170_v52  ;;  %v1173_v52 = vsub.f32 %v1096_v32, %v3899_v60  ;;  %v731_v32 = vsel %vm610_vm5, %v4039_v42, 0.0 }
 0x2ff   : > { %v4009_v54 = vpop.xlane.xlu1 %654 }
 0x300   : > { %3030 = vpow2.f32 %v1186_v13  ;;  %v1192_v60 = vmul.f32 1.442695, %v1173_v52  ;;  %v699_v13 = vmul.f32 1.442695, %v671_v36  ;;  %v1176_v52 = vsub.f32 %v1099_v38, %v3915_v46 }
 0x301   : > { %v4015_v15 = vpop.xlane.xlu0 %1159  ;;  %v4017_v39 = vpop.xlane.xlu2 %1147  ;;  %3032 = vpow2.f32 %v1188_v27  ;;  %v674_v36 = vsub.f32 %v595_v58, %v3991_v33 }
 0x302   : > { %3034 = vpow2.f32 %v693_v28  ;;  %v1198_v46 = vmul.f32 1.442695, %v1176_v52  ;;  %v670_v52 = vsub.f32 %v591_v56, %v3983_v20 }
 0x303   : > { %3036 = vpow2.f32 %v1192_v60 }
 0x304   : > { %717 = vadd.xlane.f32.xlu1 %v716_v29  ;;  %v725_v29 = vsel %vm610_vm5, %v4037_v17, 0.0 }
 0x306   : > { %1225 = vadd.xlane.f32.xlu0 %v1224_v2  ;;  %729 = vadd.xlane.f32.xlu2 %v728_v24  ;;  %v1233_v2 = vsel %vm610_vm5, %v4045_v11, 0.0  ;;  %v1194_v24 = vmul.f32 1.442695, %v1174_v19  ;;  %v4064_v30 = vpop.eup %3030  ;;  %v1177_v19 = vsub.f32 %v1100_v49, %v3957_v48 }
 0x307   : > { %v4035_v37 = vpop.xlane.xlu1 %1153  ;;  %v4066_v27 = vpop.eup %3032 }
 0x308   : > { %v4072_v1 = vpop.eup %3034  ;;  %3038 = vpow2.f32 %v1194_v24  ;;  %v1200_v26 = vmul.f32 1.442695, %v1177_v19 }
 0x309   : > { %v4041_v47 = vpop.xlane.xlu0 %1168  ;;  %v4043_v45 = vpop.xlane.xlu2 %1156  ;;  %3040 = vpow2.f32 %v699_v13  ;;  %v734_v38 = vsel %vm610_vm5, %v4072_v1, 0.0  ;;  %v669_v13 = vsub.f32 %v590_v44, %v3935_v9  ;;  %v697_v9 = vmul.f32 1.442695, %v670_v52 }
 0x30a   : > { %v4091_v48 = vpop.eup %3036  ;;  %3042 = vpow2.f32 %v1198_v46  ;;  %v673_v52 = vsub.f32 %v594_v62, %v4009_v54 }
 0x30b   : > { %3044 = vpow2.f32 %v1200_v26  ;;  %v1227_v19 = vsel %vm610_vm5, %v4091_v48, 0.0  ;;  %v695_v44 = vmul.f32 1.442695, %v669_v13  ;;  %v672_v13 = vsub.f32 %v593_v50, %v3962_v25 }
 0x30c   : > { %726 = vadd.xlane.f32.xlu1 %v725_v29  ;;  %v1218_v29 = vsel %vm610_vm5, %v4064_v30, 0.0  ;;  %v703_v31 = vmul.f32 1.442695, %v673_v52 }
 0x30d   : > { %v701_v25 = vmul.f32 1.442695, %v672_v13  ;;  %v1180_v13 = vsub.f32 %v1102_v3, %v4035_v37 }
 0x30e   : > { %1234 = vadd.xlane.f32.xlu0 %v1233_v2  ;;  %732 = vadd.xlane.f32.xlu2 %v731_v32  ;;  %v1221_v2 = vsel %vm610_vm5, %v4066_v27, 0.0  ;;  %v705_v32 = vmul.f32 1.442695, %v674_v36  ;;  %v4093_v60 = vpop.eup %3038 }
 0x30f   : > { %v4062_v43 = vpop.xlane.xlu1 %1162  ;;  %v4099_v33 = vpop.eup %3040  ;;  %v1230_v36 = vsel %vm610_vm5, %v4093_v60, 0.0 }
 0x310   : > { %3046 = vpow2.f32 %v705_v32  ;;  %v4117_v56 = vpop.eup %3042 }
 0x311   : > { %v4068_v28 = vpop.xlane.xlu0 %1639  ;;  %v4070_v51 = vpop.xlane.xlu2 %1165  ;;  %3048 = vpow2.f32 %v695_v44 }
 0x312   : > { %v4119_v46 = vpop.eup %3044  ;;  %3050 = vpow2.f32 %v697_v9 }
 0x314   : > { %1219 = vadd.xlane.f32.xlu1 %v1218_v29  ;;  %v1178_v29 = vsub.f32 %v3744_v53, %v4017_v39 }
 0x316   : > { %1222 = vadd.xlane.f32.xlu2 %v1221_v2  ;;  %735 = vadd.xlane.f32.xlu0 %v734_v38  ;;  %v743_v2 = vsel %vm610_vm5, %v4099_v33, 0.0  ;;  %v1202_v20 = vmul.f32 1.442695, %v1178_v29  ;;  %v4125_v32 = vpop.eup %3046  ;;  %v1181_v29 = vsub.f32 %v1103_v5, %v4043_v45 }
 0x317   : > { %v4089_v49 = vpop.xlane.xlu1 %1633  ;;  %v752_v50 = vsel %vm610_vm5, %v4125_v32, 0.0  ;;  %v4144_v54 = vpop.eup %3048 }
 0x318   : > { %3052 = vpow2.f32 %v1202_v20  ;;  %v4146_v44 = vpop.eup %3050  ;;  %v1179_v20 = vsub.f32 %v1101_v57, %v3989_v8  ;;  %v737_v52 = vsel %vm610_vm5, %v4144_v54, 0.0 }
 0x319   : > { %v4095_v24 = vpop.xlane.xlu0 %1648  ;;  %v4097_v58 = vpop.xlane.xlu2 %1636  ;;  %6140 = vst [vmem:[#allocation17_spill] sm:$0xff] %v4146_v44  ;;  %3054 = vpow2.f32 %v701_v25 }
 0x31a   : > { %3056 = vpow2.f32 %v703_v31  ;;  %v1204_v8 = vmul.f32 1.442695, %v1179_v20  ;;  %v1183_v20 = vsub.f32 %v1105_v10, %v4062_v43 }
 0x31c   : > { %1228 = vadd.xlane.f32.xlu1 %v1227_v19  ;;  %v1236_v19 = vsel %vm610_vm5, %v4117_v56, 0.0 }
 0x31e   : > { %1231 = vadd.xlane.f32.xlu2 %v1230_v36  ;;  %744 = vadd.xlane.f32.xlu0 %v743_v2  ;;  %v1239_v36 = vsel %vm610_vm5, %v4119_v46, 0.0  ;;  %v1208_v2 = vmul.f32 1.442695, %v1181_v29  ;;  %v4152_v45 = vpop.eup %3052  ;;  %v740_v29 = vsel %vm610_vm5, %v4146_v44, 0.0 }
 0x31f   : > { %v4115_v38 = vpop.xlane.xlu1 %1642  ;;  %6141 = vst [vmem:[#allocation18_spill] sm:$0xff] %v4152_v45  ;;  %v1242_v57 = vsel %vm610_vm5, %v4152_v45, 0.0  ;;  %v4171_v37 = vpop.eup %3054 }
 0x320   : > { %3058 = vpow2.f32 %v1208_v2  ;;  %6142 = vst [vmem:[#allocation19_spill] sm:$0xff] %v4171_v37  ;;  %v4173_v25 = vpop.eup %3056  ;;  %v1182_v2 = vsub.f32 %v1104_v63, %v4015_v15 }
 0x321   : > { %v4121_v26 = vpop.xlane.xlu0 %1657  ;;  %v4123_v39 = vpop.xlane.xlu2 %1645  ;;  %6143 = vst [vmem:[#allocation20_spill] sm:$0xff] %v4173_v25  ;;  %3060 = vpow2.f32 %v1204_v8 }
 0x322   : > { %v1210_v15 = vmul.f32 1.442695, %v1182_v2  ;;  %v1680_v2 = vsub.f32 %v3780_v7, %v4089_v49 }
 0x324   : > { %1237 = vadd.xlane.f32.xlu1 %v1236_v19  ;;  %v1184_v19 = vsub.f32 %v1106_v12, %v4070_v51 }
 0x326   : > { %1240 = vadd.xlane.f32.xlu2 %v1239_v36  ;;  %753 = vadd.xlane.f32.xlu0 %v752_v50  ;;  %v1206_v36 = vmul.f32 1.442695, %v1180_v13  ;;  %v1214_v50 = vmul.f32 1.442695, %v1184_v19  ;;  %v4179_v51 = vpop.eup %3058  ;;  %v746_v13 = vsel %vm610_vm5, %v4171_v37, 0.0  ;;  %v749_v19 = vsel %vm610_vm5, %v4173_v25, 0.0 }
 0x327   : > { %v4142_v62 = vpop.xlane.xlu1 %1651  ;;  %6144 = vst [vmem:[#allocation21_spill] sm:$0xff] %v4179_v51  ;;  %v1251_v63 = vsel %vm610_vm5, %v4179_v51, 0.0  ;;  %v4198_v43 = vpop.eup %3060 }
 0x328   : > { %3062 = vpow2.f32 %v1206_v36  ;;  %6145 = vst [vmem:[#allocation22_spill] sm:$0xff] %v4198_v43 }
 0x329   : > { %v4148_v9 = vpop.xlane.xlu0 %2146  ;;  %v4150_v5 = vpop.xlane.xlu2 %1654  ;;  %3064 = vpow2.f32 %v1214_v50  ;;  %v1185_v50 = vsub.f32 %v1107_v4, %v4041_v47  ;;  %v1696_v47 = vmul.f32 1.442695, %v1680_v2  ;;  %v6152_v2 = vrot.slane %v3780_v7, 3 }
 0x32a   : > { %3066 = vpow2.f32 %v1210_v15 }
 0x32b   : > { %v1216_v4 = vmul.f32 1.442695, %v1185_v50 }
 0x32c   : > { %738 = vadd.xlane.f32.xlu1 %v737_v52  ;;  %v1681_v52 = vsub.f32 %v1604_v23, %v4097_v58 }
 0x32e   : > { %741 = vadd.xlane.f32.xlu2 %v740_v29  ;;  %1243 = vadd.xlane.f32.xlu0 %v1242_v57  ;;  %v1212_v29 = vmul.f32 1.442695, %v1183_v20  ;;  %v1698_v57 = vmul.f32 1.442695, %v1681_v52  ;;  %v4200_v8 = vpop.eup %3062  ;;  %v1245_v20 = vsel %vm610_vm5, %v4198_v43, 0.0 }
 0x32f   : > { %v4169_v3 = vpop.xlane.xlu1 %2149  ;;  %6146 = vst [vmem:[#allocation23_spill] sm:$0xff] %v4200_v8  ;;  %v4206_v58 = vpop.eup %3064  ;;  %v1248_v52 = vsel %vm610_vm5, %v4200_v8, 0.0 }
 0x330   : > { %6147 = vst [vmem:[#allocation24_spill] sm:$0xff] %v4206_v58  ;;  %3068 = vpow2.f32 %v1212_v29  ;;  %v1260_v53 = vsel %vm610_vm5, %v4206_v58, 0.0 }
 0x331   : > { %v4175_v31 = vpop.xlane.xlu0 %2155  ;;  %v4177_v12 = vpop.xlane.xlu2 %2143  ;;  %3070 = vpow2.f32 %v1698_v57  ;;  %v6151_v57 = vrot.slane %v3780_v7, 2 }
 0x332   : > { %3072 = vpow2.f32 %v1216_v4 }
 0x333   : > { %v1682_v50 = vsub.f32 %v6151_v57, %v4068_v28  ;;  %3074 = vpow2.f32 %v1696_v47 }
 0x334   : > { %747 = vadd.xlane.f32.xlu1 %v746_v13  ;;  %v1684_v13 = vsub.f32 %v1607_v35, %v4123_v39 }
 0x335   : > { %v1700_v47 = vmul.f32 1.442695, %v1682_v50  ;;  %v6157_v50 = vrot.slane %v3780_v7, 5 }
 0x336   : > { %750 = vadd.xlane.f32.xlu2 %v749_v19  ;;  %1252 = vadd.xlane.f32.xlu0 %v1251_v63  ;;  %v4224_v19 = vpop.eup %3066  ;;  %v1704_v63 = vmul.f32 1.442695, %v1684_v13 }
 0x337   : > { %v4196_v10 = vpop.xlane.xlu1 %2158  ;;  %6148 = vst [vmem:[#allocation25_spill] sm:$0xff] %v4224_v19  ;;  %v4226_v15 = vpop.eup %3068  ;;  %v1254_v13 = vsel %vm610_vm5, %v4224_v19, 0.0 }
 0x338   : > { %6149 = vst [vmem:[#allocation26_spill] sm:$0xff] %v4226_v15  ;;  %v4232_v39 = vpop.eup %3070  ;;  %3076 = vpow2.f32 %v1704_v63  ;;  %v1257_v4 = vsel %vm610_vm5, %v4226_v15, 0.0 }
 0x339   : > { %v4202_v36 = vpop.xlane.xlu0 %2164  ;;  %v4204_v23 = vpop.xlane.xlu2 %2152  ;;  %6150 = vst [vmem:[#allocation27_spill] sm:$0xff] %v4232_v39  ;;  %v1731_v28 = vsel %vm610_vm5, %v4232_v39, 0.0  ;;  %3078 = vpow2.f32 %v1700_v47 }
 0x33c   : > { %1246 = vadd.xlane.f32.xlu1 %v1245_v20  ;;  %v1683_v20 = vsub.f32 %v6152_v2, %v4115_v38  ;;  %v4251_v2 = vpop.eup %3072 }
 0x33d   : > { %6154 = vst [vmem:[#allocation28_spill] sm:$0xff] %v4251_v2  ;;  %v4253_v59 = vpop.eup %3074 }
 0x33e   : > { %1249 = vadd.xlane.f32.xlu2 %v1248_v52  ;;  %1261 = vadd.xlane.f32.xlu0 %v1260_v53  ;;  %v6153_v52 = vrot.slane %v3780_v7, 7  ;;  %v1702_v57 = vmul.f32 1.442695, %v1683_v20  ;;  %6155 = vst [vmem:[#allocation29_spill] sm:$0xff] %v4253_v59  ;;  %v6158_v20 = vrot.slane %v3780_v7, 6  ;;  %v1728_v47 = vsel %vm610_vm5, %v4253_v59, 0.0 }
 0x33f   : > { %v4222_v49 = vpop.xlane.xlu1 %1660 }
 0x340   : > { %v1687_v53 = vsub.f32 %v6153_v52, %v4150_v5  ;;  %v1685_v52 = vsub.f32 %v6157_v50, %v4095_v24  ;;  %3080 = vpow2.f32 %v1702_v57 }
 0x341   : > { %v4228_v29 = vpop.xlane.xlu0 %1666  ;;  %v4230_v35 = vpop.xlane.xlu2 %2161 }
 0x342   : > { %v1710_v63 = vmul.f32 1.442695, %v1687_v53  ;;  %v1263_v53 = vsel %vm610_vm5, %v4251_v2, 0.0  ;;  %v1706_v24 = vmul.f32 1.442695, %v1685_v52  ;;  %v6162_v52 = vrot.slane %v3819_v41, 1 }
 0x344   : > { %1255 = vadd.xlane.f32.xlu1 %v1254_v13  ;;  %v4259_v13 = vpop.eup %3076  ;;  %3082 = vpow2.f32 %v1710_v63 }
 0x345   : > { %6156 = vst [vmem:[#allocation30_spill] sm:$0xff] %v4259_v13  ;;  %v1740_v15 = vsel %vm610_vm5, %v4259_v13, 0.0  ;;  %3084 = vpow2.f32 %v1706_v24  ;;  %v6165_v24 = vrot.slane %v3819_v41, 4 }
 0x346   : > { %1258 = vadd.xlane.f32.xlu2 %v1257_v4  ;;  %1732 = vadd.xlane.f32.xlu0 %v1731_v28  ;;  %v1686_v4 = vsub.f32 %v6158_v20, %v4142_v62  ;;  %v2190_v28 = vsub.f32 %v3819_v41, %v4177_v12  ;;  %v4275_v62 = vpop.eup %3078  ;;  %v1688_v12 = vsub.f32 %v3811_v34, %v4121_v26  ;;  %v6164_v26 = vrot.slane %v3819_v41, 3 }
 0x347   : > { %v4249_v38 = vpop.xlane.xlu1 %1669  ;;  %6159 = vst [vmem:[#allocation31_spill] sm:$0xff] %v4275_v62  ;;  %v4277_v20 = vpop.eup %3080  ;;  %v2194_v39 = vsub.f32 %v6165_v24, %v4175_v31  ;;  %v6169_v24 = vrot.slane %v3811_v34, 1 }
 0x348   : > { %v1708_v57 = vmul.f32 1.442695, %v1686_v4  ;;  %v2206_v50 = vmul.f32 1.442695, %v2190_v28  ;;  %6160 = vst [vmem:[#allocation32_spill] sm:$0xff] %v4277_v20  ;;  %v6163_v4 = vrot.slane %v3819_v41, 2  ;;  %v2193_v13 = vsub.f32 %v6164_v26, %v4204_v23 }
 0x349   : > { %v4255_v0 = vpop.xlane.xlu0 %1675  ;;  %v4257_v5 = vpop.xlane.xlu2 %1663  ;;  %v1712_v2 = vmul.f32 1.442695, %v1688_v12  ;;  %v6167_v12 = vrot.slane %v3819_v41, 7 }
 0x34a   : > { %v4283_v59 = vpop.eup %3082  ;;  %3086 = vpow2.f32 %v1708_v57  ;;  %v2192_v28 = vsub.f32 %v6163_v4, %v4169_v3  ;;  %v2212_v26 = vmul.f32 1.442695, %v2193_v13  ;;  %v6173_v13 = vrot.slane %v3819_v41, 6 }
 0x34b   : > { %6161 = vst [vmem:[#allocation33_spill] sm:$0xff] %v4283_v59  ;;  %3088 = vpow2.f32 %v2206_v50  ;;  %v1749_v3 = vsel %vm610_vm5, %v4283_v59, 0.0  ;;  %v6166_v50 = vrot.slane %v3819_v41, 5  ;;  %v2197_v4 = vsub.f32 %v6167_v12, %v4202_v36  ;;  %v4309_v31 = vpop.eup %3084 }
 0x34c   : > { %1264 = vadd.xlane.f32.xlu1 %v1263_v53  ;;  %v2210_v23 = vmul.f32 1.442695, %v2192_v28  ;;  %6168 = vst [vmem:[#allocation34_spill] sm:$0xff] %v4309_v31  ;;  %3090 = vpow2.f32 %v1712_v2  ;;  %v2214_v59 = vmul.f32 1.442695, %v2194_v39  ;;  %v2196_v12 = vsub.f32 %v6173_v13, %v4230_v35 }
 0x34d   : > { %v6174_v2 = vrot.slane %v3811_v34, 4 }
 0x34e   : > { %1729 = vadd.xlane.f32.xlu2 %v1728_v47  ;;  %1741 = vadd.xlane.f32.xlu0 %v1740_v15  ;;  %v2191_v15 = vsub.f32 %v6162_v52, %v4148_v9  ;;  %v1734_v47 = vsel %vm610_vm5, %v4275_v62, 0.0  ;;  %v1737_v9 = vsel %vm610_vm5, %v4277_v20, 0.0  ;;  %v2195_v52 = vsub.f32 %v6166_v50, %v4196_v10 }
 0x34f   : > { %v1679_v7 = vpop.xlane.xlu1 %1678  ;;  %v1689_v20 = vsub.f32 %v6169_v24, %v4222_v49  ;;  %v6171_v10 = vrot.slane %v3811_v34, 3  ;;  %v2220_v49 = vmul.f32 1.442695, %v2197_v4  ;;  %v1692_v39 = vsub.f32 %v6174_v2, %v4249_v38 }
 0x350   : > { %v2208_v57 = vmul.f32 1.442695, %v2191_v15  ;;  %v4314_v15 = vpop.eup %3086  ;;  %v2216_v36 = vmul.f32 1.442695, %v2195_v52  ;;  %v1743_v24 = vsel %vm610_vm5, %v4309_v31, 0.0  ;;  %v6176_v52 = vrot.slane %v3811_v34, 2 }
 0x351   : > { %v4281_v63 = vpop.xlane.xlu0 %2167  ;;  %v1673_v53 = vpop.xlane.xlu2 %1672  ;;  %6170 = vst [vmem:[#allocation35_spill] sm:$0xff] %v4314_v15  ;;  %v1691_v28 = vsub.f32 %v6171_v10, %v4228_v29  ;;  %v1714_v29 = vmul.f32 1.442695, %v1689_v20  ;;  %v6175_v10 = vrot.slane %v3811_v34, 6  ;;  %v1746_v41 = vsel %vm610_vm5, %v4314_v15, 0.0 }
 0x352   : > { %v4319_v50 = vpop.eup %3088  ;;  %3092 = vpow2.f32 %v2208_v57  ;;  %v2218_v4 = vmul.f32 1.442695, %v2196_v12  ;;  %v6177_v20 = vrot.slane %v3811_v34, 7  ;;  %v1720_v13 = vmul.f32 1.442695, %v1692_v39 }
 0x353   : > { %6172 = vst [vmem:[#allocation36_spill] sm:$0xff] %v4319_v50  ;;  %3094 = vpow2.f32 %v2210_v23  ;;  %v1694_v57 = vsub.f32 %v6175_v10, %v4255_v0  ;;  %v1718_v35 = vmul.f32 1.442695, %v1691_v28  ;;  %v1690_v23 = vsub.f32 %v6176_v52, %v4257_v5  ;;  %v4341_v0 = vpop.eup %3090 }
 0x354   : > { %1735 = vadd.xlane.f32.xlu1 %v1734_v47  ;;  %3096 = vpow2.f32 %v2212_v26  ;;  %v2238_v38 = vsel %vm610_vm5, %v4319_v50, 0.0  ;;  %v1695_v26 = vsub.f32 %v6177_v20, %v1679_v7  ;;  %6178 = vst [vmem:[#allocation37_spill] sm:$0xff] %v4341_v0  ;;  %v6182_v10 = vrot.slane %v3897_v6, 1 }
 0x355   : > { %3098 = vpow2.f32 %v2214_v59  ;;  %v6179_v59 = vrot.slane %v3811_v34, 5  ;;  %v1724_v5 = vmul.f32 1.442695, %v1694_v57  ;;  %v1716_v7 = vmul.f32 1.442695, %v1690_v23 }
 0x356   : > { %1738 = vadd.xlane.f32.xlu2 %v1737_v9  ;;  %1750 = vadd.xlane.f32.xlu0 %v1749_v3  ;;  %3100 = vpow2.f32 %v2216_v36  ;;  %v2198_v36 = vsub.f32 %v3897_v6, %v4281_v63  ;;  %v1726_v34 = vmul.f32 1.442695, %v1695_v26  ;;  %v1752_v63 = vsel %vm610_vm5, %v4341_v0, 0.0 }
 0x357   : > { %v2171_v47 = vpop.xlane.xlu1 %2170  ;;  %3102 = vpow2.f32 %v2220_v49  ;;  %v1693_v28 = vsub.f32 %v6179_v59, %v1673_v53  ;;  %v6186_v23 = vrot.slane %v3897_v6, 3  ;;  %v6188_v26 = vrot.slane %v3897_v6, 2 }
 0x358   : > { %3104 = vpow2.f32 %v1714_v29 }
 0x359   : > { %v2177_v9 = vpop.xlane.xlu0 %2176  ;;  %v2174_v3 = vpop.xlane.xlu2 %2173  ;;  %3106 = vpow2.f32 %v1718_v35  ;;  %v1722_v29 = vmul.f32 1.442695, %v1693_v28  ;;  %v2222_v35 = vmul.f32 1.442695, %v2198_v36 }
 0x35a   : > { %3108 = vpow2.f32 %v2218_v4 }
 0x35b   : > { %3110 = vpow2.f32 %v1720_v13  ;;  %v2200_v13 = vsub.f32 %v6188_v26, %v2174_v3  ;;  %v6195_v26 = vrot.slane %v3897_v6, 5 }
 0x35c   : > { %1744 = vadd.xlane.f32.xlu1 %v1743_v24  ;;  %v4345_v24 = vpop.eup %3092  ;;  %3112 = vpow2.f32 %v1724_v5  ;;  %v6190_v5 = vrot.slane %v3897_v6, 4 }
 0x35d   : > { %6180 = vst [vmem:[#allocation38_spill] sm:$0xff] %v4345_v24  ;;  %v4349_v12 = vpop.eup %3094  ;;  %3114 = vpow2.f32 %v1716_v7  ;;  %v6192_v7 = vrot.slane %v3897_v6, 6 }
 0x35e   : > { %1747 = vadd.xlane.f32.xlu2 %v1746_v41  ;;  %2239 = vadd.xlane.f32.xlu0 %v2238_v38  ;;  %6181 = vst [vmem:[#allocation39_spill] sm:$0xff] %v4349_v12  ;;  %v2199_v41 = vsub.f32 %v6182_v10, %v2171_v47  ;;  %v4353_v52 = vpop.eup %3096  ;;  %v2201_v47 = vsub.f32 %v6186_v23, %v2177_v9  ;;  %v2244_v38 = vsel %vm610_vm5, %v4349_v12, 0.0  ;;  %3116 = vpow2.f32 %v1726_v34 }
 0x35f   : > { %v2180_v2 = vpop.xlane.xlu1 %2179  ;;  %6183 = vst [vmem:[#allocation40_spill] sm:$0xff] %v4353_v52  ;;  %v4355_v53 = vpop.eup %3098  ;;  %v2247_v59 = vsel %vm610_vm5, %v4353_v52, 0.0  ;;  %3118 = vpow2.f32 %v1722_v29  ;;  %v2226_v34 = vmul.f32 1.442695, %v2200_v13 }
 0x360   : > { %6184 = vst [vmem:[#allocation41_spill] sm:$0xff] %v4355_v53  ;;  %v4359_v57 = vpop.eup %3100  ;;  %v2224_v20 = vmul.f32 1.442695, %v2199_v41  ;;  %v2202_v9 = vsub.f32 %v6190_v5, %v2180_v2  ;;  %3120 = vpow2.f32 %v2222_v35  ;;  %v2228_v3 = vmul.f32 1.442695, %v2201_v47 }
 0x361   : > { %v2186_v49 = vpop.xlane.xlu0 %2185  ;;  %v2183_v39 = vpop.xlane.xlu2 %2182  ;;  %6185 = vst [vmem:[#allocation42_spill] sm:$0xff] %v4359_v57 }
 0x362   : > { %v4365_v4 = vpop.eup %3102  ;;  %v2204_v10 = vsub.f32 %v6192_v7, %v2186_v49  ;;  %3122 = vpow2.f32 %v2224_v20  ;;  %v2203_v2 = vsub.f32 %v6195_v26, %v2183_v39  ;;  %v2230_v5 = vmul.f32 1.442695, %v2202_v9 }
 0x363   : > { %6187 = vst [vmem:[#allocation43_spill] sm:$0xff] %v4365_v4  ;;  %v4371_v28 = vpop.eup %3104  ;;  %v6196_v49 = vrot.slane %v3897_v6, 7  ;;  %v2241_v39 = vsel %vm610_vm5, %v4345_v24, 0.0  ;;  %v2253_v6 = vsel %vm610_vm5, %v4359_v57, 0.0 }
 0x364   : > { %1753 = vadd.xlane.f32.xlu1 %v1752_v63  ;;  %6189 = vst [vmem:[#allocation44_spill] sm:$0xff] %v4371_v28  ;;  %v4375_v36 = vpop.eup %3106  ;;  %v2234_v47 = vmul.f32 1.442695, %v2204_v10  ;;  %v2232_v9 = vmul.f32 1.442695, %v2203_v2  ;;  %v1755_v2 = vsel %vm610_vm5, %v4371_v28, 0.0 }
 0x365   : > { %6191 = vst [vmem:[#allocation45_spill] sm:$0xff] %v4375_v36  ;;  %v4379_v63 = vpop.eup %3108 }
 0x366   : > { %2245 = vadd.xlane.f32.xlu2 %v2244_v38  ;;  %2248 = vadd.xlane.f32.xlu0 %v2247_v59  ;;  %6193 = vst [vmem:[#allocation46_spill] sm:$0xff] %v4379_v63  ;;  %v4381_v23 = vpop.eup %3110 }
 0x367   : > { %v2189_v41 = vpop.xlane.xlu1 %2188  ;;  %6194 = vst [vmem:[#allocation47_spill] sm:$0xff] %v4381_v23  ;;  %v4389_v29 = vpop.eup %3112 }
 0x368   : > { %v2205_v7 = vsub.f32 %v6196_v49, %v2189_v41  ;;  %v4394_v35 = vpop.eup %3114  ;;  %v2256_v41 = vsel %vm610_vm5, %v4379_v63, 0.0 }
 0x369   : > { %v4385_v38 = vpop.xlane.xlu0 %714  ;;  %v4387_v59 = vpop.xlane.xlu2 %711  ;;  %6197 = vst [vmem:[#allocation48_spill] sm:$0xff] %v4394_v35 }
 0x36a   : > { %3124 = vrcp.f32 %v4385_v38  ;;  %v4399_v20 = vpop.eup %3116  ;;  %v2236_v26 = vmul.f32 1.442695, %v2205_v7  ;;  %v794_v57 = vand.u32 2147483647, %v4385_v38  ;;  %v796_v63 = vand.u32 2147483648, %v4385_v38 }
 0x36b   : > { %3126 = vrcp.f32 %v4387_v59  ;;  %v4401_v13 = vpop.eup %3118  ;;  %v781_v28 = vand.u32 2147483648, %v4387_v59  ;;  %vm790_vm6 = vweird.f32 %v4385_v38  ;;  %vm775_vm7 = vweird.f32 %v4387_v59 }
 0x36c   : > { %3128 = vpow2.f32 %v2228_v3  ;;  %2242 = vadd.xlane.f32.xlu1 %v2241_v39  ;;  %6198 = vst [vmem:[#allocation49_spill] sm:$0xff] %v4401_v13  ;;  %v4407_v10 = vpop.eup %3120  ;;  %v2250_v3 = vsel %vm610_vm5, %v4355_v53, 0.0  ;;  %v4419_v39 = vsel %vm610_vm5, %v4365_v4, 0.0  ;;  %vm4460_vm9 = vcmp.eq.f32.partialorder %v794_v57, 8.507059e+37 }
 0x36d   : > { %3130 = vpow2.f32 %v2226_v34  ;;  %v4411_v49 = vpop.eup %3122  ;;  %v797_v62 = vor.u32 1.1754944e-38, %v796_v63  ;;  %v782_v58 = vor.u32 1.1754944e-38, %v781_v28 }
 0x36e   : > { %3132 = vpow2.f32 %v2230_v5  ;;  %2254 = vadd.xlane.f32.xlu2 %v2253_v6  ;;  %2257 = vadd.xlane.f32.xlu0 %v2256_v41  ;;  %v4423_v5 = vsel %vm610_vm5, %v4375_v36, 0.0  ;;  %v1758_v6 = vsel %vm610_vm5, %v4394_v35, 0.0  ;;  %v4434_v41 = vsel %vm610_vm5, %v4401_v13, 0.0 }
 0x36f   : > { %3134 = vpow2.f32 %v2234_v47  ;;  %v4413_v34 = vpop.xlane.xlu1 %708  ;;  %v4430_v47 = vsel %vm610_vm5, %v4381_v23, 0.0  ;;  %v779_v13 = vand.u32 2147483647, %v4387_v59 }
 0x370   : > { %v3125_v7 = vpop.eup %3124  ;;  %3136 = vrcp.f32 %v4413_v34  ;;  %v764_v52 = vand.u32 2147483647, %v4413_v34  ;;  %vm760_vm12 = vweird.f32 %v4413_v34 }
 0x371   : > { %v3127_v4 = vpop.eup %3126  ;;  %3138 = vpow2.f32 %v2232_v9  ;;  %v786_v53 = vmul.f32 %v3125_v7, %v4385_v38  ;;  %v4439_v24 = vpop.xlane.xlu0 %723  ;;  %vm791_vm8 = vweird.f32 %v3125_v7  ;;  %vm4464_vm11 = vcmp.eq.f32.partialorder %v779_v13, 8.507059e+37 }
 0x372   : > { %v4441_v12 = vpop.xlane.xlu2 %720  ;;  %v4443_v36 = vpop.eup %3128  ;;  %3140 = vpow2.f32 %v2236_v26  ;;  %v771_v23 = vmul.f32 %v3127_v4, %v4387_v59  ;;  %v766_v26 = vand.u32 2147483648, %v4413_v34  ;;  %vm776_vm10 = vweird.f32 %v3127_v4  ;;  %vm792_vm14 = vmor %vm790_vm6, %vm791_vm8 }
 0x373   : > { %v4448_v9 = vpop.eup %3130  ;;  %v787_v35 = vsub.f32 1.0, %v786_v53  ;;  %3142 = vrcp.f32 %v4439_v24  ;;  %vm4472_vm13 = vcmp.eq.f32.partialorder %v764_v52, 8.507059e+37  ;;  %vm835_vm15 = vweird.f32 %v4439_v24  ;;  %vm777_vm0 = vmor %vm775_vm7, %vm776_vm10 }
 0x374   : > { %v4453_v50 = vpop.eup %3132  ;;  %v772_v0 = vsub.f32 1.0, %v771_v23  ;;  %3144 = vrcp.f32 %v4441_v12  ;;  %2251 = vadd.xlane.f32.xlu1 %v2250_v3  ;;  %v767_v13 = vor.u32 1.1754944e-38, %v766_v26  ;;  %v841_v51 = vand.u32 2147483648, %v4439_v24 }
 0x375   : > { %v4458_v15 = vpop.eup %3134  ;;  %v788_v31 = vmul.f32 %v3125_v7, %v787_v35  ;;  %v824_v53 = vand.u32 2147483647, %v4441_v12  ;;  %vm820_vm2 = vweird.f32 %v4441_v12 }
 0x376   : > { %v3137_v19 = vpop.eup %3136  ;;  %v773_v8 = vmul.f32 %v3127_v4, %v772_v0  ;;  %1756 = vadd.xlane.f32.xlu2 %v1755_v2  ;;  %1759 = vadd.xlane.f32.xlu0 %v1758_v6  ;;  %v839_v6 = vand.u32 2147483647, %v4439_v24 }
 0x377   : > { %v4468_v3 = vpop.eup %3138  ;;  %v789_v43 = vadd.f32 %v3125_v7, %v788_v31  ;;  %v756_v35 = vmul.f32 %v3137_v19, %v4413_v34  ;;  %v4476_v0 = vpop.xlane.xlu1 %717  ;;  %vm761_vm1 = vweird.f32 %v3137_v19  ;;  %vm4519_vm8 = vcmp.eq.f32.partialorder %v824_v53, 8.507059e+37 }
 0x378   : > { %v4478_v63 = vpop.eup %3140  ;;  %v774_v28 = vadd.f32 %v3127_v4, %v773_v8  ;;  %3146 = vrcp.f32 %v4476_v0  ;;  %vm762_vm3 = vmor %vm760_vm12, %vm761_vm1  ;;  %vm4508_vm6 = vcmp.eq.f32.partialorder %v839_v6, 8.507059e+37  ;;  %vm805_vm12 = vweird.f32 %v4476_v0 }
 0x379   : > { %v3143_v31 = vpop.eup %3142  ;;  %v793_v2 = vsel %vm792_vm14, %v3125_v7, %v789_v43  ;;  %v757_v52 = vsub.f32 1.0, %v756_v35  ;;  %v4493_v45 = vpop.xlane.xlu0 %1225  ;;  %v4579_v6 = vsel %vm610_vm5, %v4458_v15, 0.0 }
 0x37a   : > { %v3145_v25 = vpop.eup %3144  ;;  %v798_v8 = vsel %vm4460_vm9, %v797_v62, %v793_v2  ;;  %v778_v38 = vsel %vm777_vm0, %v3127_v4, %v774_v28  ;;  %v831_v26 = vmul.f32 %v3143_v31, %v4439_v24  ;;  %v826_v62 = vand.u32 2147483648, %v4441_v12  ;;  %v4512_v23 = vpop.xlane.xlu2 %729 }
 0x37b   : > { %v799_v43 = vmul.f32 %v3960_v16, %v798_v8  ;;  %v783_v59 = vsel %vm4464_vm11, %v782_v58, %v778_v38  ;;  %v758_v7 = vmul.f32 %v3137_v19, %v757_v52  ;;  %v816_v35 = vmul.f32 %v3145_v25, %v4441_v12 }
 0x37c   : > { %v784_v37 = vmul.f32 %v3966_v22, %v783_v59  ;;  %v832_v44 = vsub.f32 1.0, %v831_v26  ;;  %2260 = vadd.xlane.f32.xlu1 %v4419_v39  ;;  %3148 = vrcp.f32 %v4493_v45  ;;  %vm836_vm4 = vweird.f32 %v3143_v31 }
 0x37d   : > { %1015 = vst [vmem:[#allocation1 + $0x2] ss:$9 sm:$0xff] %v799_v43  ;;  %v759_v4 = vadd.f32 %v3137_v19, %v758_v7  ;;  %v817_v28 = vsub.f32 1.0, %v816_v35  ;;  %v842_v39 = vor.u32 1.1754944e-38, %v841_v51  ;;  %vm821_vm7 = vweird.f32 %v3145_v25  ;;  %vm837_vm9 = vmor %vm835_vm15, %vm836_vm4 }
 0x37e   : > { %v3147_v16 = vpop.eup %3146  ;;  %1013 = vst [vmem:[#allocation1 + $0x1] ss:$9 sm:$0xff] %v784_v37  ;;  %v833_v22 = vmul.f32 %v3143_v31, %v832_v44  ;;  %1765 = vadd.xlane.f32.xlu2 %v4430_v47  ;;  %1768 = vadd.xlane.f32.xlu0 %v4434_v41  ;;  %v827_v51 = vor.u32 1.1754944e-38, %v826_v62  ;;  %3150 = vrcp.f32 %v4512_v23  ;;  %vm822_vm10 = vmor %vm820_vm2, %vm821_vm7  ;;  %v811_v38 = vand.u32 2147483648, %v4476_v0 }
 0x37f   : > { %v763_v2 = vsel %vm762_vm3, %v3137_v19, %v759_v4  ;;  %v818_v52 = vmul.f32 %v3145_v25, %v817_v28  ;;  %v801_v37 = vmul.f32 %v3147_v16, %v4476_v0  ;;  %v4523_v8 = vpop.xlane.xlu1 %726  ;;  %vm806_vm11 = vweird.f32 %v3147_v16 }
 0x380   : > { %v768_v44 = vsel %vm4472_vm13, %v767_v13, %v763_v2  ;;  %v834_v34 = vadd.f32 %v3143_v31, %v833_v22  ;;  %v809_v13 = vand.u32 2147483647, %v4476_v0  ;;  %3152 = vrcp.f32 %v4523_v8  ;;  %vm807_vm13 = vmor %vm805_vm12, %vm806_vm11 }
 0x381   : > { %v769_v47 = vmul.f32 %v3985_v40, %v768_v44  ;;  %v819_v19 = vadd.f32 %v3145_v25, %v818_v52  ;;  %v802_v41 = vsub.f32 1.0, %v801_v37  ;;  %v4544_v7 = vpop.xlane.xlu0 %1234  ;;  %v1773_v35 = vsel %vm610_vm5, %v4399_v20, 0.0 }
 0x382   : > { %v838_v57 = vsel %vm837_vm9, %v3143_v31, %v834_v34  ;;  %v4534_v26 = vpop.eup %3148  ;;  %v812_v62 = vor.u32 1.1754944e-38, %v811_v38  ;;  %v2262_v4 = vsel %vm610_vm5, %v4407_v10, 0.0  ;;  %vm810_vm14 = vcmp.eq.f32.partialorder %v809_v13, 8.507059e+37  ;;  %v4564_v2 = vpop.xlane.xlu2 %732 }
 0x383   : > { %1011 = vst [vmem:[#allocation1] ss:$9 sm:$0xff] %v769_v47  ;;  %v843_v40 = vsel %vm4508_vm6, %v842_v39, %v838_v57  ;;  %v823_v24 = vsel %vm822_vm10, %v3145_v25, %v819_v19  ;;  %v803_v43 = vmul.f32 %v3147_v16, %v802_v41  ;;  %v1297_v59 = vmul.f32 %v4534_v26, %v4493_v45 }
 0x384   : > { %v844_v31 = vmul.f32 %v3993_v18, %v843_v40  ;;  %v828_v12 = vsel %vm4519_vm8, %v827_v51, %v823_v24  ;;  %1762 = vadd.xlane.f32.xlu1 %v4423_v5  ;;  %v2265_v18 = vsel %vm610_vm5, %v4411_v49, 0.0  ;;  %v1770_v5 = vsel %vm610_vm5, %v4389_v29, 0.0  ;;  %v3151_v28 = vpop.eup %3150 }
 0x385   : > { %v829_v25 = vmul.f32 %v3987_v61, %v828_v12  ;;  %v804_v53 = vadd.f32 %v3147_v16, %v803_v43  ;;  %3154 = vrcp.f32 %v4544_v7  ;;  %v4561_v0 = vsel %vm610_vm5, %v4443_v36, 0.0 }
 0x386   : > { %1021 = vst [vmem:[#allocation1 + $0x5] ss:$9 sm:$0xff] %v844_v31  ;;  %1774 = vadd.xlane.f32.xlu2 %v1773_v35  ;;  %2266 = vadd.xlane.f32.xlu0 %v2265_v18  ;;  %v1298_v58 = vsub.f32 1.0, %v1297_v59  ;;  %v861_v39 = vmul.f32 %v3151_v28, %v4512_v23  ;;  %v4568_v52 = vsel %vm610_vm5, %v4448_v9, 0.0  ;;  %v3153_v37 = vpop.eup %3152  ;;  %v2274_v44 = vsel %vm610_vm5, %v4453_v50, 0.0 }
 0x387   : > { %1019 = vst [vmem:[#allocation1 + $0x4] ss:$9 sm:$0xff] %v829_v25  ;;  %v808_v61 = vsel %vm807_vm13, %v3147_v16, %v804_v53  ;;  %v4575_v34 = vsel %vm610_vm5, %v4468_v3, 0.0  ;;  %v1305_v51 = vand.u32 2147483647, %v4493_v45  ;;  %v846_v19 = vmul.f32 %v3153_v37, %v4523_v8  ;;  %v4583_v41 = vpop.xlane.xlu1 %1219 }
 0x388   : > { %v813_v22 = vsel %vm810_vm14, %v812_v62, %v808_v61  ;;  %v862_v47 = vsub.f32 1.0, %v861_v39  ;;  %vm1301_vm15 = vweird.f32 %v4493_v45  ;;  %v869_v57 = vand.u32 2147483647, %v4512_v23 }
 0x389   : > { %v814_v16 = vmul.f32 %v4011_v21, %v813_v22  ;;  %v4587_v21 = vsel %vm610_vm5, %v4478_v63, 0.0  ;;  %v871_v13 = vand.u32 2147483648, %v4512_v23  ;;  %3156 = vrcp.f32 %v4564_v2  ;;  %v4602_v53 = vpop.xlane.xlu0 %735 }
 0x38a   : > { %v1299_v38 = vmul.f32 %v4534_v26, %v1298_v58  ;;  %v863_v40 = vmul.f32 %v3151_v28, %v862_v47  ;;  %vm866_vm0 = vweird.f32 %v3151_v28  ;;  %v847_v24 = vsub.f32 1.0, %v846_v19  ;;  %v4613_v19 = vpop.xlane.xlu2 %1222 }
 0x38b   : > { %1017 = vst [vmem:[#allocation1 + $0x3] ss:$9 sm:$0xff] %v814_v16  ;;  %v4594_v43 = vpop.eup %3154  ;;  %vm865_vm5 = vweird.f32 %v4512_v23  ;;  %v854_v31 = vand.u32 2147483647, %v4523_v8  ;;  %v856_v12 = vand.u32 2147483648, %v4523_v8  ;;  %3158 = vrcp.f32 %v4583_v41 }
 0x38c   : > { %1771 = vadd.xlane.f32.xlu1 %v1770_v5  ;;  %v864_v59 = vadd.f32 %v3151_v28, %v863_v40  ;;  %v848_v35 = vmul.f32 %v3153_v37, %v847_v24  ;;  %vm851_vm1 = vweird.f32 %v3153_v37  ;;  %v1342_v25 = vmul.f32 %v4594_v43, %v4544_v7  ;;  %vm867_vm3 = vmor %vm865_vm5, %vm866_vm0 }
 0x38d   : > { %vm1302_vm2 = vweird.f32 %v4534_v26  ;;  %v1307_v18 = vand.u32 2147483648, %v4493_v45  ;;  %vm870_vm4 = vcmp.eq.f32.partialorder %v869_v57, 8.507059e+37  ;;  %v872_v23 = vor.u32 1.1754944e-38, %v871_v13 }
 0x38e   : > { %2263 = vadd.xlane.f32.xlu2 %v2262_v4  ;;  %2275 = vadd.xlane.f32.xlu0 %v2274_v44  ;;  %v1300_v62 = vadd.f32 %v4534_v26, %v1299_v38  ;;  %v868_v5 = vsel %vm867_vm3, %v3151_v28, %v864_v59  ;;  %v849_v61 = vadd.f32 %v3153_v37, %v848_v35  ;;  %vm850_vm6 = vweird.f32 %v4523_v8  ;;  %vm4621_vm9 = vmor %vm1301_vm15, %vm1302_vm2 }
 0x38f   : > { %v3157_v22 = vpop.eup %3156  ;;  %v873_v58 = vsel %vm870_vm4, %v872_v23, %v868_v5  ;;  %vm852_vm7 = vmor %vm850_vm6, %vm851_vm1  ;;  %v857_v4 = vor.u32 1.1754944e-38, %v856_v12  ;;  %v1343_v39 = vsub.f32 1.0, %v1342_v25  ;;  %3160 = vrcp.f32 %v4602_v53  ;;  %v4638_v25 = vpop.xlane.xlu1 %1228 }
 0x390   : > { %v874_v16 = vmul.f32 %v4013_v55, %v873_v58  ;;  %v853_v47 = vsel %vm852_vm7, %v3153_v37, %v849_v61  ;;  %vm855_vm8 = vcmp.eq.f32.partialorder %v854_v31, 8.507059e+37  ;;  %v876_v44 = vmul.f32 %v3157_v22, %v4564_v2 }
 0x391   : > { %v4615_v28 = vpop.eup %3158  ;;  %v858_v57 = vsel %vm855_vm8, %v857_v4, %v853_v47  ;;  %v1350_v13 = vand.u32 2147483647, %v4544_v7  ;;  %v1352_v55 = vand.u32 2147483648, %v4544_v7  ;;  %v884_v37 = vand.u32 2147483647, %v4564_v2  ;;  %v4649_v5 = vpop.xlane.xlu0 %744 }
 0x392   : > { %v1304_v38 = vsel %vm4621_vm9, %v4534_v26, %v1300_v62  ;;  %1025 = vst [vmem:[#allocation1 + $0x7] ss:$9 sm:$0xff] %v874_v16  ;;  %v859_v40 = vmul.f32 %v4037_v17, %v858_v57  ;;  %v877_v24 = vsub.f32 1.0, %v876_v44  ;;  %v1267_v45 = vmul.f32 %v4615_v28, %v4583_v41 }
 0x393   : > { %v1308_v31 = vor.u32 1.1754944e-38, %v1307_v18  ;;  %v1344_v12 = vmul.f32 %v4594_v43, %v1343_v39  ;;  %v886_v59 = vand.u32 2147483648, %v4564_v2  ;;  %3162 = vrcp.f32 %v4613_v19 }
 0x394   : > { %2269 = vadd.xlane.f32.xlu1 %v4568_v52  ;;  %vm1306_vm10 = vcmp.eq.f32.partialorder %v1305_v51, 8.507059e+37  ;;  %1023 = vst [vmem:[#allocation1 + $0x6] ss:$9 sm:$0xff] %v859_v40  ;;  %v878_v35 = vmul.f32 %v3157_v22, %v877_v24  ;;  %vm881_vm11 = vweird.f32 %v3157_v22  ;;  %v1268_v26 = vsub.f32 1.0, %v1267_v45 }
 0x395   : > { %v3161_v17 = vpop.eup %3160  ;;  %v1309_v23 = vsel %vm1306_vm10, %v1308_v31, %v1304_v38  ;;  %vm1346_vm12 = vweird.f32 %v4544_v7  ;;  %vm4642_vm13 = vcmp.eq.f32.partialorder %v1350_v13, 8.507059e+37  ;;  %vm880_vm14 = vweird.f32 %v4564_v2  ;;  %v4673_v13 = vpop.xlane.xlu2 %1231 }
 0x396   : > { %2272 = vadd.xlane.f32.xlu2 %v4561_v0  ;;  %2284 = vadd.xlane.f32.xlu0 %v4587_v21  ;;  %v1353_v51 = vor.u32 1.1754944e-38, %v1352_v55  ;;  %v879_v18 = vadd.f32 %v3157_v22, %v878_v35  ;;  %vm885_vm15 = vcmp.eq.f32.partialorder %v884_v37, 8.507059e+37  ;;  %v891_v62 = vmul.f32 %v3161_v17, %v4602_v53  ;;  %vm882_vm5 = vmor %vm880_vm14, %vm881_vm11 }
 0x397   : > { %v1345_v0 = vadd.f32 %v4594_v43, %v1344_v12  ;;  %vm1347_vm0 = vweird.f32 %v4594_v43  ;;  %v887_v61 = vor.u32 1.1754944e-38, %v886_v59  ;;  %3164 = vrcp.f32 %v4638_v25  ;;  %v4697_v59 = vpop.xlane.xlu1 %1237 }
 0x398   : > { %v4656_v2 = vmul.f32 %v4019_v14, %v1309_v23  ;;  %v883_v21 = vsel %vm882_vm5, %v3157_v22, %v879_v18  ;;  %v1269_v58 = vmul.f32 %v4615_v28, %v1268_v26  ;;  %v892_v4 = vsub.f32 1.0, %v891_v62  ;;  %vm4666_vm1 = vmor %vm1346_vm12, %vm1347_vm0 }
 0x399   : > { %v4659_v39 = vpop.eup %3162  ;;  %v888_v16 = vsel %vm885_vm15, %v887_v61, %v883_v21  ;;  %v899_v47 = vand.u32 2147483647, %v4602_v53  ;;  %v901_v44 = vand.u32 2147483648, %v4602_v53  ;;  %3166 = vrcp.f32 %v4649_v5 }
 0x39a   : > { %v889_v14 = vmul.f32 %v4039_v42, %v888_v16  ;;  %v893_v22 = vmul.f32 %v3161_v17, %v892_v4  ;;  %vm896_vm2 = vweird.f32 %v3161_v17  ;;  %v1282_v57 = vmul.f32 %v4659_v39, %v4613_v19 }
 0x39b   : > { %v4676_v55 = vld [vmem:[#allocation1] sm:$0xff]  ;;  %v1349_v7 = vsel %vm4666_vm1, %v4594_v43, %v1345_v0  ;;  %vm1271_vm3 = vweird.f32 %v4583_v41  ;;  %v1275_v37 = vand.u32 2147483647, %v4583_v41  ;;  %v1277_v42 = vand.u32 2147483648, %v4583_v41 }
 0x39c   : > { %2278 = vadd.xlane.f32.xlu1 %v4575_v34  ;;  %1027 = vst [vmem:[#allocation1] ss:$9 sm:$0xff] %v889_v14  ;;  %v1270_v38 = vadd.f32 %v4615_v28, %v1269_v58  ;;  %vm1272_vm4 = vweird.f32 %v4615_v28  ;;  %v894_v40 = vadd.f32 %v3161_v17, %v893_v22  ;;  %vm895_vm6 = vweird.f32 %v4602_v53 }
 0x39d   : > { %v4688_v34 = vpop.eup %3164  ;;  %vm897_vm7 = vmor %vm895_vm6, %vm896_vm2  ;;  %vm900_vm8 = vcmp.eq.f32.partialorder %v899_v47, 8.507059e+37  ;;  %v902_v43 = vor.u32 1.1754944e-38, %v901_v44  ;;  %v1283_v24 = vsub.f32 1.0, %v1282_v57  ;;  %3168 = vrcp.f32 %v4673_v13 }
 0x39e   : > { %2281 = vadd.xlane.f32.xlu2 %v4579_v6  ;;  %v1354_v45 = vsel %vm4642_vm13, %v1353_v51, %v1349_v7  ;;  %v898_v31 = vsel %vm897_vm7, %v3161_v17, %v894_v40  ;;  %v1292_v12 = vand.u32 2147483648, %v4613_v19  ;;  %v1312_v53 = vmul.f32 %v4688_v34, %v4638_v25  ;;  %vm4703_vm9 = vmor %vm1271_vm3, %vm1272_vm4  ;;  %v4741_v7 = vpop.xlane.xlu2 %1240 }
 0x39f   : > { %v3167_v6 = vpop.eup %3166  ;;  %vm4707_vm10 = vcmp.eq.f32.partialorder %v1275_v37, 8.507059e+37  ;;  %v1278_v17 = vor.u32 1.1754944e-38, %v1277_v42  ;;  %v903_v23 = vsel %vm900_vm8, %v902_v43, %v898_v31  ;;  %v1290_v52 = vand.u32 2147483647, %v4613_v19  ;;  %v4765_v26 = vpop.xlane.xlu1 %738 }
 0x3a0   : > { %v1274_v51 = vsel %vm4703_vm9, %v4615_v28, %v1270_v38  ;;  %v904_v18 = vmul.f32 %v4072_v1, %v903_v23  ;;  %v1313_v62 = vsub.f32 1.0, %v1312_v53  ;;  %v936_v41 = vmul.f32 %v3167_v6, %v4649_v5  ;;  %v4725_v1 = vpop.xlane.xlu0 %753 }
 0x3a1   : > { %v4718_v0 = vmul.f32 %v4045_v11, %v1354_v45  ;;  %v1284_v61 = vmul.f32 %v4659_v39, %v1283_v24  ;;  %vm1286_vm11 = vweird.f32 %v4613_v19  ;;  %3170 = vrcp.f32 %v4697_v59 }
 0x3a2   : > { %1028 = vst [vmem:[#allocation1 + $0x1] ss:$9 sm:$0xff] %v904_v18  ;;  %v1293_v21 = vor.u32 1.1754944e-38, %v1292_v12  ;;  %v1314_v58 = vmul.f32 %v4688_v34, %v1313_v62  ;;  %vm1316_vm12 = vweird.f32 %v4638_v25  ;;  %v937_v28 = vsub.f32 1.0, %v936_v41 }
 0x3a3   : > { %v4727_v4 = vpop.eup %3168  ;;  %v1279_v11 = vsel %vm4707_vm10, %v1278_v17, %v1274_v51  ;;  %vm4731_vm13 = vcmp.eq.f32.partialorder %v1290_v52, 8.507059e+37  ;;  %v1320_v47 = vand.u32 2147483647, %v4638_v25  ;;  %v1322_v44 = vand.u32 2147483648, %v4638_v25 }
 0x3a4   : > { %v946_v8 = vand.u32 2147483648, %v4649_v5  ;;  %v938_v14 = vmul.f32 %v3167_v6, %v937_v28  ;;  %vm941_vm14 = vweird.f32 %v3167_v6  ;;  %v944_v22 = vand.u32 2147483647, %v4649_v5 }
 0x3a5   : > { %v1327_v57 = vmul.f32 %v4727_v4, %v4673_v13  ;;  %v1285_v37 = vadd.f32 %v4659_v39, %v1284_v61  ;;  %vm1287_vm15 = vweird.f32 %v4659_v39  ;;  %vm940_vm0 = vweird.f32 %v4649_v5 }
 0x3a6   : > { %3172 = vrcp.f32 %v4725_v1  ;;  %v1315_v42 = vadd.f32 %v4688_v34, %v1314_v58  ;;  %vm1317_vm5 = vweird.f32 %v4688_v34  ;;  %v939_v38 = vadd.f32 %v3167_v6, %v938_v14  ;;  %vm942_vm2 = vmor %vm940_vm0, %vm941_vm14 }
 0x3a7   : > { %v1328_v40 = vsub.f32 1.0, %v1327_v57  ;;  %v4749_v43 = vpop.eup %3170  ;;  %vm4751_vm1 = vcmp.eq.f32.partialorder %v1320_v47, 8.507059e+37  ;;  %v947_v45 = vor.u32 1.1754944e-38, %v946_v8  ;;  %v1335_v31 = vand.u32 2147483647, %v4673_v13  ;;  %vm4759_vm3 = vmor %vm1286_vm11, %vm1287_vm15 }
 0x3a8   : > { %3174 = vrcp.f32 %v4741_v7  ;;  %v1323_v12 = vor.u32 1.1754944e-38, %v1322_v44  ;;  %v943_v53 = vsel %vm942_vm2, %v3167_v6, %v939_v38  ;;  %vm945_vm4 = vcmp.eq.f32.partialorder %v944_v22, 8.507059e+37  ;;  %vm4777_vm6 = vmor %vm1316_vm12, %vm1317_vm5  ;;  %v4801_v58 = vpop.xlane.xlu0 %1243 }
 0x3a9   : > { %v1357_v35 = vmul.f32 %v4749_v43, %v4697_v59  ;;  %v4768_v17 = vmul.f32 %v4064_v30, %v1279_v11  ;;  %v1289_v23 = vsel %vm4759_vm3, %v4659_v39, %v1285_v37  ;;  %v948_v6 = vsel %vm945_vm4, %v947_v45, %v943_v53 }
 0x3aa   : > { %v1329_v52 = vmul.f32 %v4727_v4, %v1328_v40  ;;  %v1319_v30 = vsel %vm4777_vm6, %v4688_v34, %v1315_v42  ;;  %v949_v51 = vmul.f32 %v4099_v33, %v948_v6  ;;  %vm1331_vm7 = vweird.f32 %v4673_v13  ;;  %v4829_v40 = vpop.xlane.xlu2 %741 }
 0x3ab   : > { %v1358_v39 = vsub.f32 1.0, %v1357_v35  ;;  %vm4787_vm8 = vcmp.eq.f32.partialorder %v1335_v31, 8.507059e+37  ;;  %v1337_v25 = vand.u32 2147483648, %v4673_v13  ;;  %v1367_v41 = vand.u32 2147483648, %v4697_v59 }
 0x3ac   : > { %v3173_v18 = vpop.eup %3172  ;;  %vm1036_vm9 = vcmask 64512   ;;  %3176 = vrcp.f32 %v4765_v26  ;;  %v1294_v34 = vsel %vm4731_vm13, %v1293_v21, %v1289_v23  ;;  %1031 = vst [vmem:[#allocation1 + $0x4] ss:$9 sm:$0xff] %v949_v51  ;;  %vm1361_vm10 = vweird.f32 %v4697_v59 }
 0x3ad   : > { %v1365_v33 = vand.u32 2147483647, %v4697_v59  ;;  %v981_v61 = vmul.f32 %v3173_v18, %v4725_v1  ;;  %2904 = vmatmul.msk.f32.vlgmr.msra.gmra.mxu1 %vm1036_vm9, %v4676_v55  ;;  %v1324_v11 = vsel %vm4751_vm1, %v1323_v12, %v1319_v30  ;;  %v1330_v16 = vadd.f32 %v4727_v4, %v1329_v52  ;;  %v4857_v30 = vpop.xlane.xlu1 %747 }
 0x3ae   : > { %v4803_v28 = vpop.eup %3174  ;;  %vm1332_vm11 = vweird.f32 %v4727_v4  ;;  %v1359_v21 = vmul.f32 %v4749_v43, %v1358_v39  ;;  %v989_v44 = vand.u32 2147483647, %v4725_v1  ;;  %v991_v8 = vand.u32 2147483648, %v4725_v1 }
 0x3af   : > { %v982_v47 = vsub.f32 1.0, %v981_v61  ;;  %v1372_v55 = vmul.f32 %v4803_v28, %v4741_v7  ;;  %v4815_v14 = vmul.f32 %v4066_v27, %v1294_v34  ;;  %v1338_v22 = vor.u32 1.1754944e-38, %v1337_v25  ;;  %vm4820_vm12 = vmor %vm1331_vm7, %vm1332_vm11 }
 0x3b0   : > { %v1368_v57 = vor.u32 1.1754944e-38, %v1367_v41  ;;  %3178 = vrcp.f32 %v4801_v58  ;;  %vm4824_vm13 = vcmp.eq.f32.partialorder %v1365_v33, 8.507059e+37  ;;  %vm985_vm14 = vweird.f32 %v4725_v1  ;;  %v4871_v33 = vpop.xlane.xlu0 %1252 }
 0x3b1   : > { %v983_v38 = vmul.f32 %v3173_v18, %v982_v47  ;;  %vm986_vm15 = vweird.f32 %v3173_v18  ;;  %v1373_v27 = vsub.f32 1.0, %v1372_v55  ;;  %v4832_v45 = vmul.f32 %v4091_v48, %v1324_v11 }
 0x3b2   : > { %v3177_v24 = vpop.eup %3176  ;;  %v1334_v13 = vsel %vm4820_vm12, %v4727_v4, %v1330_v16  ;;  %v1360_v31 = vadd.f32 %v4749_v43, %v1359_v21  ;;  %vm1362_vm0 = vweird.f32 %v4749_v43  ;;  %vm4839_vm5 = vcmp.eq.f32.partialorder %v989_v44, 8.507059e+37  ;;  %vm987_vm1 = vmor %vm985_vm14, %vm986_vm15  ;;  %v4896_v37 = vpop.xlane.xlu2 %750 }
 0x3b3   : > { %v984_v5 = vadd.f32 %v3173_v18, %v983_v38  ;;  %v992_v1 = vor.u32 1.1754944e-38, %v991_v8  ;;  %v906_v53 = vmul.f32 %v3177_v24, %v4765_v26  ;;  %v1374_v48 = vmul.f32 %v4803_v28, %v1373_v27  ;;  %vm4852_vm2 = vmor %vm1361_vm10, %vm1362_vm0 }
 0x3b4   : > { %v1380_v35 = vand.u32 2147483647, %v4741_v7  ;;  %v1382_v23 = vand.u32 2147483648, %v4741_v7  ;;  %3180 = vrcp.f32 %v4829_v40  ;;  %v1339_v4 = vsel %vm4787_vm8, %v1338_v22, %v1334_v13 }
 0x3b5   : > { %v988_v6 = vsel %vm987_vm1, %v3173_v18, %v984_v5  ;;  %vm1376_vm3 = vweird.f32 %v4741_v7  ;;  %v907_v52 = vsub.f32 1.0, %v906_v53  ;;  %v1364_v39 = vsel %vm4852_vm2, %v4749_v43, %v1360_v31  ;;  %v4919_v53 = vpop.xlane.xlu1 %1246 }
 0x3b6   : > { %v4859_v51 = vpop.eup %3178  ;;  %v993_v62 = vsel %vm4839_vm5, %v992_v1, %v988_v6  ;;  %v914_v59 = vand.u32 2147483647, %v4765_v26  ;;  %v916_v25 = vand.u32 2147483648, %v4765_v26  ;;  %vm911_vm4 = vweird.f32 %v3177_v24 }
 0x3b7   : > { %v994_v18 = vmul.f32 %v4125_v32, %v993_v62  ;;  %v908_v41 = vmul.f32 %v3177_v24, %v907_v52  ;;  %v1387_v34 = vmul.f32 %v4859_v51, %v4801_v58  ;;  %v1375_v61 = vadd.f32 %v4803_v28, %v1374_v48 }
 0x3b8   : > { %vm1377_vm6 = vweird.f32 %v4803_v28  ;;  %vm4875_vm7 = vcmp.eq.f32.partialorder %v1380_v35, 8.507059e+37  ;;  %v1383_v11 = vor.u32 1.1754944e-38, %v1382_v23  ;;  %vm910_vm8 = vweird.f32 %v4765_v26  ;;  %v4933_v62 = vpop.xlane.xlu0 %1261 }
 0x3b9   : > { %1034 = vst [vmem:[#allocation1 + $0x7] ss:$9 sm:$0xff] %v994_v18  ;;  %v909_v16 = vadd.f32 %v3177_v24, %v908_v41  ;;  %v1388_v32 = vsub.f32 1.0, %v1387_v34  ;;  %3182 = vrcp.f32 %v4857_v30  ;;  %v4882_v47 = vmul.f32 %v4093_v60, %v1339_v4  ;;  %vm912_vm10 = vmor %vm910_vm8, %vm911_vm4 }
 0x3ba   : > { %v3181_v21 = vpop.eup %3180  ;;  %v1369_v44 = vsel %vm4824_vm13, %v1368_v57, %v1364_v39  ;;  %v917_v8 = vor.u32 1.1754944e-38, %v916_v25  ;;  %3184 = vrcp.f32 %v4871_v33  ;;  %vm4890_vm11 = vmor %vm1376_vm3, %vm1377_vm6  ;;  %vm915_vm12 = vcmp.eq.f32.partialorder %v914_v59, 8.507059e+37 }
 0x3bb   : > { %v913_v26 = vsel %vm912_vm10, %v3177_v24, %v909_v16  ;;  %v1395_v22 = vand.u32 2147483647, %v4801_v58  ;;  %v921_v60 = vmul.f32 %v3181_v21, %v4829_v40  ;;  %v1379_v57 = vsel %vm4890_vm11, %v4803_v28, %v1375_v61 }
 0x3bc   : > { %v918_v42 = vsel %vm915_vm12, %v917_v8, %v913_v26  ;;  %v1397_v38 = vand.u32 2147483648, %v4801_v58  ;;  %v929_v7 = vand.u32 2147483647, %v4829_v40  ;;  %v1389_v24 = vmul.f32 %v4859_v51, %v1388_v32  ;;  %v6249_v32 = vld [vmem:[#allocation17_spill] sm:$0xff]  ;;  %v4962_v8 = vpop.xlane.xlu2 %1249 }
 0x3bd   : > { %v919_v27 = vmul.f32 %v4144_v54, %v918_v42  ;;  %vm1391_vm13 = vweird.f32 %v4801_v58  ;;  %v922_v13 = vsub.f32 1.0, %v921_v60  ;;  %v4907_v31 = vmul.f32 %v4117_v56, %v1369_v44 }
 0x3be   : > { %vm925_vm14 = vweird.f32 %v4829_v40  ;;  %v931_v5 = vand.u32 2147483648, %v4829_v40  ;;  %3186 = vrcp.f32 %v4896_v37  ;;  %v1384_v12 = vsel %vm4875_vm7, %v1383_v11, %v1379_v57 }
 0x3bf   : > { %v3183_v28 = vpop.eup %3182  ;;  %1029 = vst [vmem:[#allocation1 + $0x2] ss:$9 sm:$0xff] %v919_v27  ;;  %vm4914_vm15 = vcmp.eq.f32.partialorder %v1395_v22, 8.507059e+37  ;;  %v923_v1 = vmul.f32 %v3181_v21, %v922_v13  ;;  %vm926_vm0 = vweird.f32 %v3181_v21  ;;  %v959_v56 = vand.u32 2147483647, %v4857_v30 }
 0x3c0   : > { %v4921_v48 = vpop.eup %3184  ;;  %vm1392_vm5 = vweird.f32 %v4859_v51  ;;  %v1398_v35 = vor.u32 1.1754944e-38, %v1397_v38  ;;  %vm4924_vm1 = vcmp.eq.f32.partialorder %v929_v7, 8.507059e+37  ;;  %v951_v4 = vmul.f32 %v3183_v28, %v4857_v30  ;;  %vm927_vm2 = vmor %vm925_vm14, %vm926_vm0 }
 0x3c1   : > { %v1390_v19 = vadd.f32 %v4859_v51, %v1389_v24  ;;  %v924_v6 = vadd.f32 %v3181_v21, %v923_v1  ;;  %v961_v52 = vand.u32 2147483648, %v4857_v30  ;;  %v1432_v39 = vmul.f32 %v4921_v48, %v4871_v33  ;;  %vm4950_vm6 = vmor %vm1391_vm13, %vm1392_vm5  ;;  %v6250_v1 = vld [vmem:[#allocation19_spill] sm:$0xff] }
 0x3c2   : > { %v4936_v59 = vmul.f32 %v4119_v46, %v1384_v12  ;;  %v932_v25 = vor.u32 1.1754944e-38, %v931_v5  ;;  %v952_v18 = vsub.f32 1.0, %v951_v4  ;;  %3188 = vrcp.f32 %v4919_v53  ;;  %v4982_v5 = vpop.xlane.xlu1 %1255 }
 0x3c3   : > { %v928_v41 = vsel %vm927_vm2, %v3181_v21, %v924_v6  ;;  %vm955_vm3 = vweird.f32 %v4857_v30  ;;  %vm4942_vm4 = vcmp.eq.f32.partialorder %v959_v56, 8.507059e+37  ;;  %v1433_v61 = vsub.f32 1.0, %v1432_v39  ;;  %v6253_v6 = vld [vmem:[#allocation18_spill] sm:$0xff] }
 0x3c4   : > { %v3187_v43 = vpop.eup %3186  ;;  %v933_v40 = vsel %vm4924_vm1, %v932_v25, %v928_v41  ;;  %v953_v11 = vmul.f32 %v3183_v28, %v952_v18  ;;  %vm956_vm7 = vweird.f32 %v3183_v28  ;;  %3190 = vrcp.f32 %v4933_v62 }
 0x3c5   : > { %v1394_v16 = vsel %vm4950_vm6, %v4859_v51, %v1390_v19  ;;  %v934_v21 = vmul.f32 %v6249_v32, %v933_v40  ;;  %v962_v44 = vor.u32 1.1754944e-38, %v961_v52  ;;  %v966_v58 = vmul.f32 %v3187_v43, %v4896_v37  ;;  %vm957_vm10 = vmor %vm955_vm3, %vm956_vm7 }
 0x3c6   : > { %v954_v55 = vadd.f32 %v3183_v28, %v953_v11  ;;  %v1434_v26 = vmul.f32 %v4921_v48, %v1433_v61  ;;  %vm1436_vm8 = vweird.f32 %v4871_v33  ;;  %v1440_v22 = vand.u32 2147483647, %v4871_v33  ;;  %v5009_v61 = vpop.xlane.xlu0 %1732 }
 0x3c7   : > { %1030 = vst [vmem:[#allocation1 + $0x3] ss:$9 sm:$0xff] %v934_v21  ;;  %v1442_v51 = vand.u32 2147483648, %v4871_v33  ;;  %v967_v60 = vsub.f32 1.0, %v966_v58  ;;  %vm970_vm11 = vweird.f32 %v4896_v37  ;;  %v974_v57 = vand.u32 2147483647, %v4896_v37 }
 0x3c8   : > { %v4972_v42 = vpop.eup %3188  ;;  %v1399_v38 = vsel %vm4914_vm15, %v1398_v35, %v1394_v16  ;;  %v958_v7 = vsel %vm957_vm10, %v3183_v28, %v954_v55  ;;  %v976_v27 = vand.u32 2147483648, %v4896_v37  ;;  %3192 = vrcp.f32 %v4962_v8  ;;  %v6256_v16 = vld [vmem:[#allocation20_spill] sm:$0xff]  ;;  %v5027_v55 = vpop.xlane.xlu2 %1258 }
 0x3c9   : > { %v963_v30 = vsel %vm4942_vm4, %v962_v44, %v958_v7  ;;  %v968_v24 = vmul.f32 %v3187_v43, %v967_v60  ;;  %vm971_vm12 = vweird.f32 %v3187_v43  ;;  %v1402_v13 = vmul.f32 %v4972_v42, %v4919_v53 }
 0x3ca   : > { %v4984_v12 = vpop.eup %3190  ;;  %v964_v54 = vmul.f32 %v6250_v1, %v963_v30  ;;  %v1435_v28 = vadd.f32 %v4921_v48, %v1434_v26  ;;  %vm1437_vm13 = vweird.f32 %v4921_v48  ;;  %vm4989_vm14 = vcmp.eq.f32.partialorder %v1440_v22, 8.507059e+37  ;;  %vm972_vm15 = vmor %vm970_vm11, %vm971_vm12  ;;  %v6261_v1 = vld [vmem:[#allocation21_spill] sm:$0xff] }
 0x3cb   : > { %v1443_v35 = vor.u32 1.1754944e-38, %v1442_v51  ;;  %v969_v23 = vadd.f32 %v3187_v43, %v968_v24  ;;  %v1403_v4 = vsub.f32 1.0, %v1402_v13  ;;  %v1477_v19 = vmul.f32 %v4984_v12, %v4933_v62  ;;  %vm5003_vm1 = vmor %vm1436_vm8, %vm1437_vm13  ;;  %v5051_v13 = vpop.xlane.xlu1 %1264 }
 0x3cc   : > { %v4996_v52 = vmul.f32 %v6253_v6, %v1399_v38  ;;  %1032 = vst [vmem:[#allocation1 + $0x5] ss:$9 sm:$0xff] %v964_v54  ;;  %vm975_vm0 = vcmp.eq.f32.partialorder %v974_v57, 8.507059e+37  ;;  %v977_v39 = vor.u32 1.1754944e-38, %v976_v27  ;;  %vm1406_vm5 = vweird.f32 %v4919_v53 }
 0x3cd   : > { %v973_v18 = vsel %vm972_vm15, %v3187_v43, %v969_v23  ;;  %v1404_v41 = vmul.f32 %v4972_v42, %v1403_v4  ;;  %v1478_v34 = vsub.f32 1.0, %v1477_v19  ;;  %3194 = vrcp.f32 %v4982_v5 }
 0x3ce   : > { %v5011_v37 = vpop.eup %3192  ;;  %v1439_v46 = vsel %vm5003_vm1, %v4921_v48, %v1435_v28  ;;  %v978_v40 = vsel %vm975_vm0, %v977_v39, %v973_v18  ;;  %v1410_v33 = vand.u32 2147483647, %v4919_v53  ;;  %v1412_v11 = vand.u32 2147483648, %v4919_v53 }
 0x3cf   : > { %v979_v43 = vmul.f32 %v6256_v16, %v978_v40  ;;  %v1479_v32 = vmul.f32 %v4984_v12, %v1478_v34  ;;  %v1485_v21 = vand.u32 2147483647, %v4933_v62  ;;  %v1417_v44 = vmul.f32 %v5011_v37, %v4962_v8 }
 0x3d0   : > { %v1405_v58 = vadd.f32 %v4972_v42, %v1404_v41  ;;  %vm1407_vm2 = vweird.f32 %v4972_v42  ;;  %v1487_v48 = vand.u32 2147483648, %v4933_v62  ;;  %3196 = vrcp.f32 %v5009_v61 }
 0x3d1   : > { %v1444_v26 = vsel %vm4989_vm14, %v1443_v35, %v1439_v46  ;;  %1033 = vst [vmem:[#allocation1 + $0x6] ss:$9 sm:$0xff] %v979_v43  ;;  %v1418_v22 = vsub.f32 1.0, %v1417_v44  ;;  %v1425_v51 = vand.u32 2147483647, %v4962_v8  ;;  %v1427_v60 = vand.u32 2147483648, %v4962_v8  ;;  %vm5043_vm6 = vmor %vm1406_vm5, %vm1407_vm2  ;;  %v5087_v46 = vpop.xlane.xlu0 %1741 }
 0x3d2   : > { %vm5033_vm3 = vcmp.eq.f32.partialorder %v1410_v33, 8.507059e+37  ;;  %v1413_v38 = vor.u32 1.1754944e-38, %v1412_v11  ;;  %v1480_v7 = vadd.f32 %v4984_v12, %v1479_v32  ;;  %vm1482_vm4 = vweird.f32 %v4984_v12  ;;  %v6268_v44 = vld [vmem:[#allocation22_spill] sm:$0xff] }
 0x3d3   : > { %v5039_v27 = vpop.eup %3194  ;;  %vm1481_vm7 = vweird.f32 %v4933_v62  ;;  %v1419_v24 = vmul.f32 %v5011_v37, %v1418_v22  ;;  %vm1421_vm8 = vweird.f32 %v4962_v8  ;;  %3198 = vrcp.f32 %v5027_v55 }
 0x3d4   : > { %v5054_v54 = vmul.f32 %v6261_v1, %v1444_v26  ;;  %v1409_v53 = vsel %vm5043_vm6, %v4972_v42, %v1405_v58  ;;  %vm5059_vm10 = vcmp.eq.f32.partialorder %v1485_v21, 8.507059e+37  ;;  %v1447_v62 = vmul.f32 %v5039_v27, %v4982_v5  ;;  %vm5065_vm11 = vmor %vm1481_vm7, %vm1482_vm4 }
 0x3d5   : > { %v1488_v35 = vor.u32 1.1754944e-38, %v1487_v48  ;;  %vm5069_vm12 = vcmp.eq.f32.partialorder %v1425_v51, 8.507059e+37  ;;  %v1428_v4 = vor.u32 1.1754944e-38, %v1427_v60  ;;  %v1457_v19 = vand.u32 2147483648, %v4982_v5  ;;  %v5127_v60 = vpop.xlane.xlu2 %1729 }
 0x3d6   : > { %v5074_v42 = vpop.eup %3196  ;;  %v1484_v6 = vsel %vm5065_vm11, %v4984_v12, %v1480_v7  ;;  %v1448_v39 = vsub.f32 1.0, %v1447_v62  ;;  %v1455_v25 = vand.u32 2147483647, %v4982_v5  ;;  %3200 = vrcp.f32 %v5051_v13 }
 0x3d7   : > { %v1414_v18 = vsel %vm5033_vm3, %v1413_v38, %v1409_v53  ;;  %v1420_v41 = vadd.f32 %v5011_v37, %v1419_v24  ;;  %vm1422_vm13 = vweird.f32 %v5011_v37  ;;  %v1792_v34 = vmul.f32 %v5074_v42, %v5009_v61  ;;  %v6273_v38 = vld [vmem:[#allocation24_spill] sm:$0xff] }
 0x3d8   : > { %v1035_v40 = vld [vmem:[#allocation1] sm:$0xff]  ;;  %v1449_v12 = vmul.f32 %v5039_v27, %v1448_v39  ;;  %vm1451_vm14 = vweird.f32 %v4982_v5  ;;  %vm1796_vm15 = vweird.f32 %v5009_v61  ;;  %v1800_v33 = vand.u32 2147483647, %v5009_v61  ;;  %vm5108_vm0 = vmor %vm1421_vm8, %vm1422_vm13  ;;  %v6282_v39 = vld [vmem:[#allocation23_spill] sm:$0xff] }
 0x3d9   : > { %v5093_v11 = vpop.eup %3198  ;;  %1522 = vst [vmem:[#allocation1] ss:$9 sm:$0xff] %v4768_v17  ;;  %v1489_v16 = vsel %vm5059_vm10, %v1488_v35, %v1484_v6  ;;  %v1458_v43 = vor.u32 1.1754944e-38, %v1457_v19  ;;  %v1793_v32 = vsub.f32 1.0, %v1792_v34  ;;  %v1802_v21 = vand.u32 2147483648, %v5009_v61  ;;  %2905 = vmatmul.msk.f32.gmra.mxu1 %vm1036_vm9, %v1035_v40  ;;  %v5165_v35 = vpop.xlane.xlu1 %1735 }
 0x3da   : > { %1524 = vst [vmem:[#allocation1 + $0x1] ss:$9 sm:$0xff] %v4815_v14  ;;  %v5102_v58 = vmul.f32 %v6268_v44, %v1414_v18  ;;  %vm1452_vm5 = vweird.f32 %v5039_v27  ;;  %vm5113_vm1 = vcmp.eq.f32.partialorder %v1455_v25, 8.507059e+37  ;;  %v1462_v14 = vmul.f32 %v5093_v11, %v5027_v55  ;;  %v5191_v6 = vpop.xlane.xlu0 %1750 }
 0x3db   : > { %3202 = vrcp.f32 %v5087_v46  ;;  %1526 = vst [vmem:[#allocation1 + $0x2] ss:$9 sm:$0xff] %v4656_v2  ;;  %v1424_v8 = vsel %vm5108_vm0, %v5011_v37, %v1420_v41  ;;  %v1794_v26 = vmul.f32 %v5074_v42, %v1793_v32  ;;  %v1470_v22 = vand.u32 2147483647, %v5027_v55  ;;  %vm5156_vm7 = vmor %vm1451_vm14, %vm1452_vm5 }
 0x3dc   : > { %v1472_v51 = vand.u32 2147483648, %v5027_v55  ;;  %v5129_v57 = vpop.eup %3200  ;;  %1528 = vst [vmem:[#allocation1 + $0x3] ss:$9 sm:$0xff] %v4832_v45  ;;  %v5133_v7 = vmul.f32 %v6273_v38, %v1489_v16  ;;  %v1450_v2 = vadd.f32 %v5039_v27, %v1449_v12  ;;  %vm5136_vm2 = vcmp.eq.f32.partialorder %v1800_v33, 8.507059e+37  ;;  %v6290_v38 = vld [vmem:[#allocation27_spill] sm:$0xff] }
 0x3dd   : > { %v1463_v37 = vsub.f32 1.0, %v1462_v14  ;;  %1530 = vst [vmem:[#allocation1 + $0x4] ss:$9 sm:$0xff] %v4882_v47  ;;  %v1795_v24 = vadd.f32 %v5074_v42, %v1794_v26  ;;  %vm1797_vm3 = vweird.f32 %v5074_v42  ;;  %v1803_v1 = vor.u32 1.1754944e-38, %v1802_v21  ;;  %v5231_v48 = vpop.xlane.xlu2 %1738  ;;  %v6289_v14 = vld [vmem:[#allocation25_spill] sm:$0xff] }
 0x3de   : > { %v1492_v45 = vmul.f32 %v5129_v57, %v5051_v13  ;;  %1532 = vst [vmem:[#allocation1 + $0x5] ss:$9 sm:$0xff] %v4718_v0  ;;  %v1429_v53 = vsel %vm5069_vm12, %v1428_v4, %v1424_v8  ;;  %vm1466_vm4 = vweird.f32 %v5027_v55  ;;  %vm1496_vm6 = vweird.f32 %v5051_v13  ;;  %vm5177_vm10 = vmor %vm1796_vm15, %vm1797_vm3 }
 0x3df   : > { %v1464_v28 = vmul.f32 %v5093_v11, %v1463_v37  ;;  %1534 = vst [vmem:[#allocation1 + $0x6] ss:$9 sm:$0xff] %v4907_v31  ;;  %vm5160_vm8 = vcmp.eq.f32.partialorder %v1470_v22, 8.507059e+37  ;;  %v1473_v62 = vor.u32 1.1754944e-38, %v1472_v51  ;;  %3204 = vrcp.f32 %v5127_v60 }
 0x3e0   : > { %v1493_v56 = vsub.f32 1.0, %v1492_v45  ;;  %1536 = vst [vmem:[#allocation1 + $0x7] ss:$9 sm:$0xff] %v4936_v59  ;;  %v1454_v31 = vsel %vm5156_vm7, %v5039_v27, %v1450_v2  ;;  %vm1467_vm11 = vweird.f32 %v5093_v11  ;;  %v1500_v19 = vand.u32 2147483647, %v5051_v13 }
 0x3e1   : > { %v5167_v23 = vpop.eup %3202  ;;  %v1465_v4 = vadd.f32 %v5093_v11, %v1464_v28  ;;  %v1799_v59 = vsel %vm5177_vm10, %v5074_v42, %v1795_v24  ;;  %vm1497_vm12 = vweird.f32 %v5129_v57  ;;  %v1430_v25 = vmul.f32 %v6282_v39, %v1429_v53  ;;  %vm5201_vm13 = vmor %vm1466_vm4, %vm1467_vm11  ;;  %v5264_v0 = vpop.xlane.xlu1 %1744 }
 0x3e2   : > { %v1494_v27 = vmul.f32 %v5129_v57, %v1493_v56  ;;  %v1837_v61 = vmul.f32 %v5167_v23, %v5087_v46  ;;  %v1502_v18 = vand.u32 2147483648, %v5051_v13  ;;  %v1845_v41 = vand.u32 2147483647, %v5087_v46  ;;  %vm5214_vm14 = vmor %vm1496_vm6, %vm1497_vm12  ;;  %v6295_v56 = vld [vmem:[#allocation26_spill] sm:$0xff] }
 0x3e3   : > { %3206 = vrcp.f32 %v5165_v35  ;;  %v1459_v42 = vsel %vm5113_vm1, %v1458_v43, %v1454_v31  ;;  %v1847_v33 = vand.u32 2147483648, %v5087_v46  ;;  %v1804_v16 = vsel %vm5136_vm2, %v1803_v1, %v1799_v59 }
 0x3e4   : > { %v1495_v40 = vadd.f32 %v5129_v57, %v1494_v27  ;;  %v1838_v12 = vsub.f32 1.0, %v1837_v61  ;;  %v1469_v32 = vsel %vm5201_vm13, %v5093_v11, %v1465_v4  ;;  %vm5218_vm15 = vcmp.eq.f32.partialorder %v1500_v19, 8.507059e+37  ;;  %v6296_v19 = vld [vmem:[#allocation28_spill] sm:$0xff] }
 0x3e5   : > { %3208 = vrcp.f32 %v5191_v6  ;;  %v5223_v21 = vpop.eup %3204  ;;  %v1785_v13 = vand.u32 2147483647, %v5127_v60  ;;  %v1787_v17 = vand.u32 2147483648, %v5127_v60  ;;  %v1460_v8 = vmul.f32 %v6289_v14, %v1459_v42  ;;  %v5312_v55 = vpop.xlane.xlu2 %1747 }
 0x3e6   : > { %v1499_v44 = vsel %vm5214_vm14, %v5129_v57, %v1495_v40  ;;  %v1839_v11 = vmul.f32 %v5167_v23, %v1838_v12  ;;  %v1503_v26 = vor.u32 1.1754944e-38, %v1502_v18  ;;  %vm1841_vm0 = vweird.f32 %v5087_v46 }
 0x3e7   : > { %v1777_v22 = vmul.f32 %v5223_v21, %v5127_v60  ;;  %v1537_v51 = vld [vmem:[#allocation1] sm:$0xff]  ;;  %v5238_v2 = vmul.f32 %v6290_v38, %v1804_v16  ;;  %v1474_v57 = vsel %vm5160_vm8, %v1473_v62, %v1469_v32  ;;  %vm5242_vm5 = vcmp.eq.f32.partialorder %v1845_v41, 8.507059e+37  ;;  %v5292_v41 = vpop.xlane.xlu0 %2239 }
 0x3e8   : > { %v1848_v37 = vor.u32 1.1754944e-38, %v1847_v33  ;;  %vm1781_vm1 = vweird.f32 %v5127_v60  ;;  %1538 = vst [vmem:[#allocation1] ss:$9 sm:$0xff] %v4996_v52  ;;  %v1504_v1 = vsel %vm5218_vm15, %v1503_v26, %v1499_v44  ;;  %vm1842_vm2 = vweird.f32 %v5167_v23  ;;  %2906 = vmatmul.msk.f32.vlgmr.msra.gmra.mxu3 %vm1036_vm9, %v1537_v51 }
 0x3e9   : > { %v5247_v24 = vpop.eup %3206  ;;  %v1778_v45 = vsub.f32 1.0, %v1777_v22  ;;  %3210 = vrcp.f32 %v5231_v48  ;;  %1541 = vst [vmem:[#allocation1 + $0x3] ss:$9 sm:$0xff] %v5054_v54  ;;  %v1840_v53 = vadd.f32 %v5167_v23, %v1839_v11  ;;  %vm5257_vm3 = vcmp.eq.f32.partialorder %v1785_v13, 8.507059e+37  ;;  %vm5279_vm7 = vmor %vm1841_vm0, %vm1842_vm2  ;;  %v5337_v30 = vpop.xlane.xlu1 %1753 }
 0x3ea   : > { %v1788_v47 = vor.u32 1.1754944e-38, %v1787_v17  ;;  %v1807_v52 = vmul.f32 %v5247_v24, %v5165_v35  ;;  %vm1811_vm4 = vweird.f32 %v5165_v35  ;;  %1539 = vst [vmem:[#allocation1 + $0x1] ss:$9 sm:$0xff] %v5102_v58  ;;  %v1475_v31 = vmul.f32 %v6295_v56, %v1474_v57 }
 0x3eb   : > { %v3209_v62 = vpop.eup %3208  ;;  %v1779_v54 = vmul.f32 %v5223_v21, %v1778_v45  ;;  %v1815_v5 = vand.u32 2147483647, %v5165_v35  ;;  %v1817_v4 = vand.u32 2147483648, %v5165_v35  ;;  %1544 = vst [vmem:[#allocation1 + $0x6] ss:$9 sm:$0xff] %v5133_v7  ;;  %v1505_v59 = vmul.f32 %v6296_v19, %v1504_v1 }
 0x3ec   : > { %vm1782_vm6 = vweird.f32 %v5223_v21  ;;  %v1808_v27 = vsub.f32 1.0, %v1807_v52  ;;  %v1882_v61 = vmul.f32 %v3209_v62, %v5191_v6  ;;  %1540 = vst [vmem:[#allocation1 + $0x2] ss:$9 sm:$0xff] %v1430_v25  ;;  %vm1886_vm8 = vweird.f32 %v5191_v6 }
 0x3ed   : > { %v1780_v39 = vadd.f32 %v5223_v21, %v1779_v54  ;;  %v1890_v7 = vand.u32 2147483647, %v5191_v6  ;;  %3212 = vrcp.f32 %v5264_v0  ;;  %1542 = vst [vmem:[#allocation1 + $0x4] ss:$9 sm:$0xff] %v1460_v8  ;;  %v1844_v25 = vsel %vm5279_vm7, %v5167_v23, %v1840_v53  ;;  %vm5298_vm11 = vmor %vm1781_vm1, %vm1782_vm6  ;;  %v5366_v40 = vpop.xlane.xlu2 %2245 }
 0x3ee   : > { %v1809_v18 = vmul.f32 %v5247_v24, %v1808_v27  ;;  %vm1812_vm10 = vweird.f32 %v5247_v24  ;;  %v1883_v46 = vsub.f32 1.0, %v1882_v61  ;;  %1543 = vst [vmem:[#allocation1 + $0x5] ss:$9 sm:$0xff] %v1475_v31  ;;  %vm5302_vm12 = vcmp.eq.f32.partialorder %v1815_v5, 8.507059e+37  ;;  %v6309_v31 = vld [vmem:[#allocation31_spill] sm:$0xff] }
 0x3ef   : > { %v3211_v42 = vpop.eup %3210  ;;  %v1818_v23 = vor.u32 1.1754944e-38, %v1817_v4  ;;  %vm1887_vm13 = vweird.f32 %v3209_v62  ;;  %v1892_v12 = vand.u32 2147483648, %v5191_v6  ;;  %1545 = vst [vmem:[#allocation1 + $0x7] ss:$9 sm:$0xff] %v1505_v59  ;;  %v1784_v33 = vsel %vm5298_vm11, %v5223_v21, %v1780_v39  ;;  %vm1813_vm14 = vmor %vm1811_vm4, %vm1812_vm10  ;;  %v6310_v4 = vld [vmem:[#allocation33_spill] sm:$0xff]  ;;  %v5357_v61 = vpop.xlane.xlu0 %2248 }
 0x3f0   : > { %v1810_v16 = vadd.f32 %v5247_v24, %v1809_v18  ;;  %v1884_v60 = vmul.f32 %v3209_v62, %v1883_v46  ;;  %v1822_v32 = vmul.f32 %v3211_v42, %v5231_v48  ;;  %v1849_v43 = vsel %vm5242_vm5, %v1848_v37, %v1844_v25  ;;  %vm1888_vm0 = vmor %vm1886_vm8, %vm1887_vm13  ;;  %v6305_v37 = vld [vmem:[#allocation30_spill] sm:$0xff] }
 0x3f1   : > { %vm5320_vm15 = vcmp.eq.f32.partialorder %v1890_v7, 8.507059e+37  ;;  %v1830_v21 = vand.u32 2147483647, %v5231_v48  ;;  %v1832_v11 = vand.u32 2147483648, %v5231_v48  ;;  %3214 = vrcp.f32 %v5292_v41  ;;  %v6311_v7 = vld [vmem:[#allocation32_spill] sm:$0xff] }
 0x3f2   : > { %v1814_v13 = vsel %vm1813_vm14, %v5247_v24, %v1810_v16  ;;  %v1885_v17 = vadd.f32 %v3209_v62, %v1884_v60  ;;  %v1823_v14 = vsub.f32 1.0, %v1822_v32  ;;  %v1789_v26 = vsel %vm5257_vm3, %v1788_v47, %v1784_v33  ;;  %v6312_v60 = vld [vmem:[#allocation34_spill] sm:$0xff] }
 0x3f3   : > { %v3213_v8 = vpop.eup %3212  ;;  %v1893_v35 = vor.u32 1.1754944e-38, %v1892_v12  ;;  %vm1827_vm5 = vweird.f32 %v3211_v42  ;;  %3216 = vrcp.f32 %v5312_v55  ;;  %v1819_v22 = vsel %vm5302_vm12, %v1818_v23, %v1814_v13  ;;  %v5375_v13 = vpop.xlane.xlu1 %2242 }
 0x3f4   : > { %v1889_v51 = vsel %vm1888_vm0, %v3209_v62, %v1885_v17  ;;  %v1824_v38 = vmul.f32 %v3211_v42, %v1823_v14  ;;  %v1852_v57 = vmul.f32 %v3213_v8, %v5264_v0  ;;  %v1850_v24 = vmul.f32 %v6305_v37, %v1849_v43  ;;  %v6308_v62 = vld [vmem:[#allocation29_spill] sm:$0xff] }
 0x3f5   : > { %v1894_v1 = vsel %vm5320_vm15, %v1893_v35, %v1889_v51  ;;  %vm1826_vm1 = vweird.f32 %v5231_v48  ;;  %vm5343_vm2 = vcmp.eq.f32.partialorder %v1830_v21, 8.507059e+37  ;;  %v1833_v53 = vor.u32 1.1754944e-38, %v1832_v11 }
 0x3f6   : > { %v1825_v45 = vadd.f32 %v3211_v42, %v1824_v38  ;;  %v1853_v28 = vsub.f32 1.0, %v1852_v57  ;;  %v1860_v47 = vand.u32 2147483647, %v5264_v0  ;;  %v1546_v52 = vld [vmem:[#allocation1] sm:$0xff]  ;;  %v1790_v56 = vmul.f32 %v6308_v62, %v1789_v26  ;;  %vm1828_vm3 = vmor %vm1826_vm1, %vm1827_vm5  ;;  %v6313_v57 = vld [vmem:[#allocation35_spill] sm:$0xff] }
 0x3f7   : > { %v1820_v54 = vmul.f32 %v6309_v31, %v1819_v22  ;;  %v1862_v5 = vand.u32 2147483648, %v5264_v0  ;;  %3218 = vrcp.f32 %v5337_v30  ;;  %v5353_v48 = vpop.eup %3214  ;;  %2034 = vst [vmem:[#allocation1 + $0x1] ss:$9 sm:$0xff] %v5238_v2  ;;  %v1895_v19 = vmul.f32 %v6310_v4, %v1894_v1  ;;  %2907 = vmatmul.msk.f32.gmra.mxu3 %vm1036_vm9, %v1546_v52  ;;  %v5379_v22 = vpop.xlane.xlu0 %2257 }
 0x3f8   : > { %v1829_v59 = vsel %vm1828_vm3, %v3211_v42, %v1825_v45  ;;  %v1854_v27 = vmul.f32 %v3213_v8, %v1853_v28  ;;  %vm1857_vm4 = vweird.f32 %v3213_v8  ;;  %2040 = vst [vmem:[#allocation1 + $0x4] ss:$9 sm:$0xff] %v1850_v24  ;;  %vm1856_vm6 = vweird.f32 %v5264_v0 }
 0x3f9   : > { %v3217_v58 = vpop.eup %3216  ;;  %v1834_v39 = vsel %vm5343_vm2, %v1833_v53, %v1829_v59  ;;  %2032 = vst [vmem:[#allocation1] ss:$9 sm:$0xff] %v1790_v56  ;;  %vm1858_vm7 = vmor %vm1856_vm6, %vm1857_vm4  ;;  %v1863_v46 = vor.u32 1.1754944e-38, %v1862_v5  ;;  %3220 = vrcp.f32 %v5357_v61  ;;  %vm1861_vm8 = vcmp.eq.f32.partialorder %v1860_v47, 8.507059e+37  ;;  %v5390_v53 = vpop.xlane.xlu2 %2254  ;;  %v2619_v5 = vld [vmem:[#allocation9 + $0x78] sm:$0xff]  ;;  %v6314_v59 = vld [vmem:[#allocation37_spill] sm:$0xff] }
 0x3fa   : > { %v1835_v25 = vmul.f32 %v6311_v7, %v1834_v39  ;;  %v1855_v18 = vadd.f32 %v3213_v8, %v1854_v27  ;;  %v1867_v2 = vmul.f32 %v3217_v58, %v5312_v55  ;;  %2036 = vst [vmem:[#allocation1 + $0x2] ss:$9 sm:$0xff] %v1820_v54  ;;  %v2287_v33 = vmul.f32 %v5353_v48, %v5292_v41 }
 0x3fb   : > { %2046 = vst [vmem:[#allocation1 + $0x7] ss:$9 sm:$0xff] %v1895_v19  ;;  %v1875_v0 = vand.u32 2147483647, %v5312_v55  ;;  %v1877_v16 = vand.u32 2147483648, %v5312_v55  ;;  %vm1872_vm10 = vweird.f32 %v3217_v58  ;;  %vm1871_vm11 = vweird.f32 %v5312_v55  ;;  %v5398_v31 = vpop.xlane.xlu1 %2251  ;;  %2668 = vmatpush.msra.mxu0 %v2619_v5 }
 0x3fc   : > { %v1859_v42 = vsel %vm1858_vm7, %v3213_v8, %v1855_v18  ;;  %v1868_v34 = vsub.f32 1.0, %v1867_v2  ;;  %2038 = vst [vmem:[#allocation1 + $0x3] ss:$9 sm:$0xff] %v1835_v25  ;;  %v2288_v14 = vsub.f32 1.0, %v2287_v33  ;;  %vm1873_vm12 = vmor %vm1871_vm11, %vm1872_vm10  ;;  %v1907_v38 = vand.u32 2147483648, %v5337_v30  ;;  %v2618_v2 = vld [vmem:[#allocation9 + $0x70] sm:$0xff] }
 0x3fd   : > { %v3219_v23 = vpop.eup %3218  ;;  %v1864_v12 = vsel %vm1861_vm8, %v1863_v46, %v1859_v42  ;;  %v1878_v8 = vor.u32 1.1754944e-38, %v1877_v16  ;;  %vm1876_vm13 = vcmp.eq.f32.partialorder %v1875_v0, 8.507059e+37  ;;  %3222 = vrcp.f32 %v5366_v40  ;;  %2669 = vmatpush.msra.mxu0 %v2618_v2  ;;  %v2617_v33 = vld [vmem:[#allocation9 + $0x68] sm:$0xff]  ;;  %v6324_v2 = vld [vmem:[#allocation40_spill] sm:$0xff] }
 0x3fe   : > { %v1865_v32 = vmul.f32 %v6312_v60, %v1864_v12  ;;  %v1869_v43 = vmul.f32 %v3217_v58, %v1868_v34  ;;  %v1897_v44 = vmul.f32 %v3219_v23, %v5337_v30  ;;  %vm1902_vm14 = vweird.f32 %v3219_v23 }
 0x3ff   : > { %v5377_v17 = vpop.eup %3220  ;;  %vm1901_vm15 = vweird.f32 %v5337_v30  ;;  %v1905_v1 = vand.u32 2147483647, %v5337_v30  ;;  %v2289_v6 = vmul.f32 %v5353_v48, %v2288_v14  ;;  %3224 = vrcp.f32 %v5375_v13  ;;  %v5408_v39 = vpop.xlane.xlu0 %1759  ;;  %2670 = vmatpush.msra.mxu0 %v2617_v33 }
 0x400   : > { %2042 = vst [vmem:[#allocation1 + $0x5] ss:$9 sm:$0xff] %v1865_v32  ;;  %v1870_v21 = vadd.f32 %v3217_v58, %v1869_v43  ;;  %v1898_v11 = vsub.f32 1.0, %v1897_v44  ;;  %v2332_v55 = vmul.f32 %v5377_v17, %v5357_v61  ;;  %vm1903_vm0 = vmor %vm1901_vm15, %vm1902_vm14  ;;  %v1908_v28 = vor.u32 1.1754944e-38, %v1907_v38  ;;  %v2616_v43 = vld [vmem:[#allocation9 + $0x60] sm:$0xff] }
 0x401   : > { %vm1906_vm5 = vcmp.eq.f32.partialorder %v1905_v1, 8.507059e+37  ;;  %3226 = vrcp.f32 %v5379_v22  ;;  %v2290_v56 = vadd.f32 %v5353_v48, %v2289_v6  ;;  %vm2292_vm1 = vweird.f32 %v5353_v48  ;;  %v5427_v0 = vpop.xlane.xlu2 %1756  ;;  %2671 = vmatpush.msra.mxu0 %v2616_v43 }
 0x402   : > { %v1874_v26 = vsel %vm1873_vm12, %v3217_v58, %v1870_v21  ;;  %v1899_v35 = vmul.f32 %v3219_v23, %v1898_v11  ;;  %v2333_v47 = vsub.f32 1.0, %v2332_v55  ;;  %v2297_v30 = vand.u32 2147483648, %v5292_v41 }
 0x403   : > { %v1879_v51 = vsel %vm1876_vm13, %v1878_v8, %v1874_v26  ;;  %v5392_v52 = vpop.eup %3222  ;;  %vm2291_vm2 = vweird.f32 %v5292_v41  ;;  %v2295_v19 = vand.u32 2147483647, %v5292_v41  ;;  %v2340_v18 = vand.u32 2147483647, %v5357_v61 }
 0x404   : > { %v1880_v37 = vmul.f32 %v6313_v57, %v1879_v51  ;;  %v1900_v24 = vadd.f32 %v3219_v23, %v1899_v35  ;;  %v2334_v54 = vmul.f32 %v5377_v17, %v2333_v47  ;;  %v2317_v58 = vmul.f32 %v5392_v52, %v5366_v40  ;;  %vm5410_vm3 = vmor %vm2291_vm2, %vm2292_vm1  ;;  %v6321_v51 = vld [vmem:[#allocation36_spill] sm:$0xff]  ;;  %v5454_v57 = vpop.xlane.xlu1 %2260 }
 0x405   : > { %v5401_v4 = vpop.eup %3224  ;;  %v2294_v41 = vsel %vm5410_vm3, %v5353_v48, %v2290_v56  ;;  %v2298_v46 = vor.u32 1.1754944e-38, %v2297_v30  ;;  %v2342_v42 = vand.u32 2147483648, %v5357_v61  ;;  %vm2337_vm4 = vweird.f32 %v5377_v17  ;;  %v2614_v56 = vld [vmem:[#allocation9 + $0x50] sm:$0xff] }
 0x406   : > { %2044 = vst [vmem:[#allocation1 + $0x6] ss:$9 sm:$0xff] %v1880_v37  ;;  %v1904_v45 = vsel %vm1903_vm0, %v3219_v23, %v1900_v24  ;;  %v2335_v23 = vadd.f32 %v5377_v17, %v2334_v54  ;;  %v2302_v12 = vmul.f32 %v5401_v4, %v5375_v13  ;;  %3228 = vrcp.f32 %v5408_v39  ;;  %v2615_v37 = vld [vmem:[#allocation9 + $0x58] sm:$0xff] }
 0x407   : > { %v1909_v62 = vsel %vm1906_vm5, %v1908_v28, %v1904_v45  ;;  %v5420_v34 = vpop.eup %3226  ;;  %vm2296_vm6 = vcmp.eq.f32.partialorder %v2295_v19, 8.507059e+37  ;;  %v2318_v48 = vsub.f32 1.0, %v2317_v58  ;;  %vm2336_vm7 = vweird.f32 %v5357_v61  ;;  %2672 = vmatpush.msra.mxu0 %v2615_v37 }
 0x408   : > { %v1910_v27 = vmul.f32 %v6314_v59, %v1909_v62  ;;  %v2299_v16 = vsel %vm2296_vm6, %v2298_v46, %v2294_v41  ;;  %vm5430_vm8 = vcmp.eq.f32.partialorder %v2340_v18, 8.507059e+37  ;;  %v2327_v32 = vand.u32 2147483648, %v5366_v40  ;;  %vm5435_vm10 = vmor %vm2336_vm7, %vm2337_vm4  ;;  %v5476_v59 = vpop.xlane.xlu0 %1768 }
 0x409   : > { %v2343_v21 = vor.u32 1.1754944e-38, %v2342_v42  ;;  %v2325_v11 = vand.u32 2147483647, %v5366_v40  ;;  %v2312_v14 = vand.u32 2147483648, %v5375_v13  ;;  %v2377_v8 = vmul.f32 %v5420_v34, %v5379_v22  ;;  %2673 = vmatpush.msra.mxu0 %v2614_v56 }
 0x40a   : > { %v2339_v61 = vsel %vm5435_vm10, %v5377_v17, %v2335_v23  ;;  %v2303_v26 = vsub.f32 1.0, %v2302_v12  ;;  %v2387_v35 = vand.u32 2147483648, %v5379_v22  ;;  %3230 = vrcp.f32 %v5390_v53 }
 0x40b   : > { %v5449_v38 = vmul.f32 %v6321_v51, %v2299_v16  ;;  %v2319_v55 = vmul.f32 %v5392_v52, %v2318_v48  ;;  %vm2321_vm11 = vweird.f32 %v5366_v40  ;;  %3232 = vrcp.f32 %v5427_v0  ;;  %v5492_v48 = vpop.xlane.xlu2 %1765  ;;  %v2612_v16 = vld [vmem:[#allocation9 + $0x40] sm:$0xff] }
 0x40c   : > { %v3229_v24 = vpop.eup %3228  ;;  %vm2322_vm12 = vweird.f32 %v5392_v52  ;;  %v5457_v17 = vor.u32 1.1754944e-38, %v2327_v32  ;;  %v2310_v1 = vand.u32 2147483647, %v5375_v13  ;;  %v2385_v6 = vand.u32 2147483647, %v5379_v22 }
 0x40d   : > { %v2047_v25 = vld [vmem:[#allocation1] sm:$0xff]  ;;  %v2344_v45 = vsel %vm5430_vm8, %v2343_v21, %v2339_v61  ;;  %vm2306_vm13 = vweird.f32 %v5375_v13  ;;  %v5464_v28 = vor.u32 1.1754944e-38, %v2312_v14  ;;  %v2378_v47 = vsub.f32 1.0, %v2377_v8  ;;  %vm5498_vm2 = vmor %vm2321_vm11, %vm2322_vm12 }
 0x40e   : > { %2048 = vst [vmem:[#allocation1] ss:$9 sm:$0xff] %v1910_v27  ;;  %2908 = vmatmul.msk.f32.vlgmr.msrb.gmra.mxu1 %vm1036_vm9, %v2047_v25  ;;  %v1927_v62 = vmul.f32 %v3229_v24, %v5408_v39  ;;  %vm5467_vm14 = vcmp.eq.f32.partialorder %v2325_v11, 8.507059e+37  ;;  %v2304_v54 = vmul.f32 %v5401_v4, %v2303_v26  ;;  %vm2307_vm15 = vweird.f32 %v5401_v4  ;;  %v2613_v25 = vld [vmem:[#allocation9 + $0x48] sm:$0xff] }
 0x40f   : > { %v5473_v5 = vor.u32 1.1754944e-38, %v2387_v35  ;;  %v2372_v19 = vand.u32 2147483648, %v5390_v53  ;;  %v2320_v27 = vadd.f32 %v5392_v52, %v2319_v55  ;;  %vm2381_vm0 = vweird.f32 %v5379_v22  ;;  %2674 = vmatpush.msra.mxu0 %v2613_v25  ;;  %v5524_v55 = vpop.xlane.xlu1 %1762  ;;  %vm5530_vm7 = vmor %vm2306_vm13, %vm2307_vm15 }
 0x410   : > { %v2370_v58 = vand.u32 2147483647, %v5390_v53  ;;  %3234 = vrcp.f32 %v5398_v31  ;;  %v1928_v7 = vsub.f32 1.0, %v1927_v62  ;;  %v5482_v18 = vpop.eup %3230  ;;  %v5485_v41 = vmul.f32 %v6324_v2, %v2344_v45 }
 0x411   : > { %vm2382_vm5 = vweird.f32 %v5420_v34  ;;  %v1935_v46 = vand.u32 2147483647, %v5408_v39  ;;  %v1937_v42 = vand.u32 2147483648, %v5408_v39  ;;  %v3233_v23 = vpop.eup %3232  ;;  %v2379_v12 = vmul.f32 %v5420_v34, %v2378_v47  ;;  %2675 = vmatpush.msra.mxu0 %v2612_v16 }
 0x412   : > { %v1929_v33 = vmul.f32 %v3229_v24, %v1928_v7  ;;  %vm1932_vm1 = vweird.f32 %v3229_v24  ;;  %3236 = vrcp.f32 %v5476_v59  ;;  %v5503_v32 = vadd.f32 %v5401_v4, %v2304_v54  ;;  %v2611_v7 = vld [vmem:[#allocation9 + $0x38] sm:$0xff]  ;;  %vm5554_vm10 = vmor %vm2381_vm0, %vm2382_vm5 }
 0x413   : > { %v5505_v43 = vor.u32 1.1754944e-38, %v2372_v19  ;;  %v1912_v44 = vmul.f32 %v3233_v23, %v5427_v0  ;;  %3238 = vrcp.f32 %v5454_v57  ;;  %v2324_v21 = vsel %vm5498_vm2, %v5392_v52, %v2320_v27  ;;  %v6329_v19 = vld [vmem:[#allocation48_spill] sm:$0xff]  ;;  %2676 = vmatpush.msra.mxu0 %v2611_v7 }
 0x414   : > { %v2355_v40 = vand.u32 2147483647, %v5398_v31  ;;  %v1930_v11 = vadd.f32 %v3229_v24, %v1929_v33  ;;  %vm1931_vm3 = vweird.f32 %v5408_v39  ;;  %v2362_v14 = vmul.f32 %v5482_v18, %v5390_v53  ;;  %v2610_v33 = vld [vmem:[#allocation9 + $0x30] sm:$0xff] }
 0x415   : > { %vm1933_vm4 = vmor %vm1931_vm3, %vm1932_vm1  ;;  %v1938_v8 = vor.u32 1.1754944e-38, %v1937_v42  ;;  %v1913_v61 = vsub.f32 1.0, %v1912_v44  ;;  %3240 = vrcp.f32 %v5492_v48  ;;  %v5521_v35 = vadd.f32 %v5420_v34, %v2379_v12  ;;  %2677 = vmatpush.msra.mxu0 %v2610_v33 }
 0x416   : > { %v5518_v26 = vpop.eup %3234  ;;  %v1934_v52 = vsel %vm1933_vm4, %v3229_v24, %v1930_v11  ;;  %vm1936_vm6 = vcmp.eq.f32.partialorder %v1935_v46, 8.507059e+37  ;;  %v1922_v51 = vand.u32 2147483648, %v5427_v0  ;;  %vm1917_vm8 = vweird.f32 %v3233_v23 }
 0x417   : > { %v1939_v37 = vsel %vm1936_vm6, %v1938_v8, %v1934_v52  ;;  %v1914_v45 = vmul.f32 %v3233_v23, %v1913_v61  ;;  %v1920_v47 = vand.u32 2147483647, %v5427_v0  ;;  %v5540_v24 = vsel %vm5467_vm14, %v5457_v17, %v2324_v21  ;;  %v5581_v52 = vpop.xlane.xlu0 %2266 }
 0x418   : > { %v5535_v62 = vpop.eup %3236  ;;  %v2309_v56 = vsel %vm5530_vm7, %v5401_v4, %v5503_v32  ;;  %v2357_v54 = vand.u32 2147483648, %v5398_v31  ;;  %v1940_v27 = vmul.f32 %v6329_v19, %v1939_v37  ;;  %vm1916_vm11 = vweird.f32 %v5427_v0  ;;  %v6334_v37 = vld [vmem:[#allocation44_spill] sm:$0xff] }
 0x419   : > { %v5548_v25 = vpop.eup %3238  ;;  %v1915_v17 = vadd.f32 %v3233_v23, %v1914_v45  ;;  %v1972_v2 = vmul.f32 %v5535_v62, %v5476_v59  ;;  %3242 = vrcp.f32 %v5524_v55  ;;  %v2384_v46 = vsel %vm5554_vm10, %v5420_v34, %v5521_v35  ;;  %vm1918_vm12 = vmor %vm1916_vm11, %vm1917_vm8 }
 0x41a   : > { %v2363_v42 = vsub.f32 1.0, %v2362_v14  ;;  %v5568_v12 = vmul.f32 %v5518_v26, %v5398_v31  ;;  %2050 = vst [vmem:[#allocation1 + $0x2] ss:$9 sm:$0xff] %v1940_v27  ;;  %v1923_v0 = vor.u32 1.1754944e-38, %v1922_v51  ;;  %vm1921_vm13 = vcmp.eq.f32.partialorder %v1920_v47, 8.507059e+37  ;;  %v2609_v51 = vld [vmem:[#allocation9 + $0x28] sm:$0xff]  ;;  %v5593_v27 = vpop.xlane.xlu2 %1774 }
 0x41b   : > { %v5571_v16 = vpop.eup %3240  ;;  %v1919_v60 = vsel %vm1918_vm12, %v3233_v23, %v1915_v17  ;;  %v1973_v44 = vsub.f32 1.0, %v1972_v2  ;;  %v1980_v21 = vand.u32 2147483647, %v5476_v59  ;;  %v5576_v14 = vmul.f32 %v5548_v25, %v5454_v57  ;;  %2678 = vmatpush.msra.mxu0 %v2609_v51  ;;  %v2608_v2 = vld [vmem:[#allocation9 + $0x20] sm:$0xff] }
 0x41c   : > { %v1924_v11 = vsel %vm1921_vm13, %v1923_v0, %v1919_v60  ;;  %v1982_v8 = vand.u32 2147483648, %v5476_v59  ;;  %v1957_v61 = vmul.f32 %v5571_v16, %v5492_v48  ;;  %vm5585_vm14 = vcmp.eq.f32.partialorder %v2310_v1, 8.507059e+37 }
 0x41d   : > { %v1925_v45 = vmul.f32 %v6334_v37, %v1924_v11  ;;  %v1974_v47 = vmul.f32 %v5535_v62, %v1973_v44  ;;  %vm1977_vm15 = vweird.f32 %v5535_v62  ;;  %v1965_v19 = vand.u32 2147483647, %v5492_v48  ;;  %2679 = vmatpush.msra.mxu0 %v2608_v2  ;;  %v2607_v44 = vld [vmem:[#allocation9 + $0x18] sm:$0xff] }
 0x41e   : > { %v2364_v7 = vmul.f32 %v5482_v18, %v2363_v42  ;;  %v2348_v17 = vsub.f32 1.0, %v5568_v12  ;;  %v1958_v13 = vsub.f32 1.0, %v1957_v61  ;;  %v1967_v1 = vand.u32 2147483648, %v5492_v48  ;;  %v5616_v12 = vpop.xlane.xlu1 %1771 }
 0x41f   : > { %v5598_v0 = vpop.eup %3242  ;;  %vm5602_vm0 = vcmp.eq.f32.partialorder %v2385_v6, 8.507059e+37  ;;  %vm2366_vm5 = vweird.f32 %v5390_v53  ;;  %2049 = vst [vmem:[#allocation1 + $0x1] ss:$9 sm:$0xff] %v1925_v45  ;;  %v1975_v60 = vadd.f32 %v5535_v62, %v1974_v47  ;;  %vm1976_vm1 = vweird.f32 %v5476_v59  ;;  %2680 = vmatpush.msra.mxu0 %v2607_v44  ;;  %v2606_v45 = vld [vmem:[#allocation9 + $0x10] sm:$0xff]  ;;  %v6339_v47 = vld [vmem:[#allocation49_spill] sm:$0xff]  ;;  %v5665_v44 = vpop.xlane.xlu0 %2275 }
 0x420   : > { %vm1981_vm2 = vcmp.eq.f32.partialorder %v1980_v21, 8.507059e+37  ;;  %vm1961_vm3 = vweird.f32 %v5492_v48  ;;  %vm1978_vm4 = vmor %vm1976_vm1, %vm1977_vm15  ;;  %v1983_v42 = vor.u32 1.1754944e-38, %v1982_v8  ;;  %v1959_v22 = vmul.f32 %v5571_v16, %v1958_v13  ;;  %v2605_v48 = vld [vmem:[#allocation9 + $0x8] sm:$0xff] }
 0x421   : > { %vm1962_vm6 = vweird.f32 %v5571_v16  ;;  %v1942_v6 = vmul.f32 %v5598_v0, %v5524_v55  ;;  %v2393_v59 = vsub.f32 1.0, %v5576_v14  ;;  %v1979_v21 = vsel %vm1978_vm4, %v5535_v62, %v1975_v60  ;;  %2681 = vmatpush.msra.mxu0 %v2606_v45 }
 0x422   : > { %vm5620_vm8 = vcmp.eq.f32.partialorder %v1965_v19, 8.507059e+37  ;;  %3244 = vrcp.f32 %v5593_v27  ;;  %v1984_v8 = vsel %vm1981_vm2, %v1983_v42, %v1979_v21  ;;  %v1960_v61 = vadd.f32 %v5571_v16, %v1959_v22  ;;  %vm5631_vm11 = vmor %vm1961_vm3, %vm1962_vm6  ;;  %v6342_v22 = vld [vmem:[#allocation47_spill] sm:$0xff]  ;;  %v2604_v21 = vld [vmem:[#allocation9] sm:$0xff]  ;;  %v5681_v39 = vpop.xlane.xlu2 %2263 }
 0x423   : > { %v1968_v51 = vor.u32 1.1754944e-38, %v1967_v1  ;;  %v1943_v37 = vsub.f32 1.0, %v1942_v6  ;;  %v1985_v13 = vmul.f32 %v6339_v47, %v1984_v8  ;;  %v1950_v14 = vand.u32 2147483647, %v5524_v55  ;;  %2682 = vmatpush.msra.mxu0 %v2605_v48 }
 0x424   : > { %v1952_v19 = vand.u32 2147483648, %v5524_v55  ;;  %3246 = vrcp.f32 %v5616_v12  ;;  %v1964_v1 = vsel %vm5631_vm11, %v5571_v16, %v1960_v61  ;;  %vm1947_vm12 = vweird.f32 %v5598_v0 }
 0x425   : > { %v1944_v2 = vmul.f32 %v5598_v0, %v1943_v37  ;;  %3248 = vrcp.f32 %v5581_v52  ;;  %v5645_v60 = vadd.f32 %v5482_v18, %v2364_v7  ;;  %vm2367_vm13 = vweird.f32 %v5482_v18  ;;  %2053 = vst [vmem:[#allocation1 + $0x5] ss:$9 sm:$0xff] %v1985_v13  ;;  %2683 = vmatpush.msra.mxu0 %v2604_v21 }
 0x426   : > { %v2349_v42 = vmul.f32 %v5518_v26, %v2348_v17  ;;  %vm2351_vm15 = vweird.f32 %v5398_v31  ;;  %v1969_v16 = vsel %vm5620_vm8, %v1968_v51, %v1964_v1  ;;  %v5660_v7 = vsel %vm5585_vm14, %v5464_v28, %v2309_v56  ;;  %vm5697_vm14 = vmor %vm2366_vm5, %vm2367_vm13  ;;  %v5733_v13 = vpop.xlane.xlu1 %2269 }
 0x427   : > { %v1970_v6 = vmul.f32 %v6342_v22, %v1969_v16  ;;  %v1945_v17 = vadd.f32 %v5598_v0, %v1944_v2  ;;  %vm1946_vm1 = vweird.f32 %v5524_v55  ;;  %vm2352_vm2 = vweird.f32 %v5518_v26 }
 0x428   : > { %v5667_v11 = vpop.eup %3244  ;;  %v5672_v4 = vor.u32 1.1754944e-38, %v2357_v54  ;;  %v2394_v28 = vmul.f32 %v5548_v25, %v2393_v59  ;;  %vm5677_vm7 = vmor %vm1946_vm1, %vm1947_vm12  ;;  %v1953_v55 = vor.u32 1.1754944e-38, %v1952_v19  ;;  %v5691_v54 = vsel %vm5602_vm0, %v5473_v5, %v2384_v46 }
 0x429   : > { %2052 = vst [vmem:[#allocation1 + $0x4] ss:$9 sm:$0xff] %v1970_v6  ;;  %v1949_v30 = vsel %vm5677_vm7, %v5598_v0, %v1945_v17  ;;  %vm1951_vm3 = vcmp.eq.f32.partialorder %v1950_v14, 8.507059e+37  ;;  %v2002_v34 = vmul.f32 %v5667_v11, %v5593_v27  ;;  %v2369_v35 = vsel %vm5697_vm14, %v5482_v18, %v5645_v60  ;;  %v6347_v0 = vld [vmem:[#allocation45_spill] sm:$0xff]  ;;  %vm5747_vm11 = vmor %vm2351_vm15, %vm2352_vm2  ;;  %v5772_v17 = vpop.xlane.xlu0 %2284 }
 0x42a   : > { %v1058_v56 = vpop.f32.mrf.mxu1  ;;  %v3247_v5 = vpop.eup %3246  ;;  %v2350_v46 = vadd.f32 %v5518_v26, %v2349_v42  ;;  %v1954_v33 = vsel %vm1951_vm3, %v1953_v55, %v1949_v30  ;;  %3250 = vrcp.f32 %v5665_v44  ;;  %vm2396_vm10 = vweird.f32 %v5454_v57 }
 0x42b   : > { %2684 = vmatmul.f32.vlgmr.msra.gmra.mxu0 %v1058_v56  ;;  %v5712_v59 = vpop.eup %3248  ;;  %v1955_v8 = vmul.f32 %v6347_v0, %v1954_v33  ;;  %v2003_v61 = vsub.f32 1.0, %v2002_v34  ;;  %v1987_v51 = vmul.f32 %v3247_v5, %v5616_v12  ;;  %vm5719_vm0 = vcmp.eq.f32.partialorder %v2370_v58, 8.507059e+37  ;;  %v5780_v56 = vpop.xlane.xlu2 %2272 }
 0x42c   : > { %vm5725_vm5 = vcmp.eq.f32.partialorder %v2355_v40, 8.507059e+37  ;;  %v2395_v45 = vadd.f32 %v5548_v25, %v2394_v28  ;;  %vm2397_vm4 = vweird.f32 %v5548_v25  ;;  %v2012_v47 = vand.u32 2147483648, %v5593_v27 }
 0x42d   : > { %3252 = vrcp.f32 %v5681_v39  ;;  %2051 = vst [vmem:[#allocation1 + $0x3] ss:$9 sm:$0xff] %v1955_v8  ;;  %v2004_v53 = vmul.f32 %v5667_v11, %v2003_v61  ;;  %vm2007_vm6 = vweird.f32 %v5667_v11  ;;  %v2010_v58 = vand.u32 2147483647, %v5593_v27  ;;  %vm5766_vm15 = vmor %vm2396_vm10, %vm2397_vm4 }
 0x42e   : > { %v1988_v40 = vsub.f32 1.0, %v1987_v51  ;;  %v2422_v62 = vmul.f32 %v5712_v59, %v5581_v52  ;;  %vm2006_vm8 = vweird.f32 %v5593_v27  ;;  %v1995_v14 = vand.u32 2147483647, %v5616_v12  ;;  %v6356_v51 = vld [vmem:[#allocation39_spill] sm:$0xff]  ;;  %v5805_v18 = vpop.xlane.xlu1 %2278 }
 0x42f   : > { %v1997_v19 = vand.u32 2147483648, %v5616_v12  ;;  %v2005_v2 = vadd.f32 %v5667_v11, %v2004_v53  ;;  %vm1992_vm12 = vweird.f32 %v3247_v5  ;;  %3254 = vrcp.f32 %v5733_v13  ;;  %vm2008_vm13 = vmor %vm2006_vm8, %vm2007_vm6 }
 0x430   : > { %v1989_v48 = vmul.f32 %v3247_v5, %v1988_v40  ;;  %v5753_v60 = vpop.eup %3250  ;;  %v2354_v27 = vsel %vm5747_vm11, %v5518_v26, %v2350_v46  ;;  %v2400_v42 = vand.u32 2147483647, %v5454_v57  ;;  %v2402_v31 = vand.u32 2147483648, %v5454_v57 }
 0x431   : > { %v2013_v16 = vor.u32 1.1754944e-38, %v2012_v47  ;;  %v2009_v6 = vsel %vm2008_vm13, %v5667_v11, %v2005_v2  ;;  %vm2011_vm1 = vcmp.eq.f32.partialorder %v2010_v58, 8.507059e+37  ;;  %vm1991_vm2 = vweird.f32 %v5616_v12 }
 0x432   : > { %v1990_v26 = vadd.f32 %v3247_v5, %v1989_v48  ;;  %v2399_v28 = vsel %vm5766_vm15, %v5548_v25, %v2395_v45  ;;  %v2423_v32 = vsub.f32 1.0, %v2422_v62  ;;  %vm1993_vm7 = vmor %vm1991_vm2, %vm1992_vm12  ;;  %v1998_v55 = vor.u32 1.1754944e-38, %v1997_v19  ;;  %v6361_v19 = vld [vmem:[#allocation43_spill] sm:$0xff] }
 0x433   : > { %v5774_v21 = vpop.eup %3252  ;;  %v2014_v57 = vsel %vm2011_vm1, %v2013_v16, %v2009_v6  ;;  %vm1996_vm14 = vcmp.eq.f32.partialorder %v1995_v14, 8.507059e+37  ;;  %v2467_v12 = vmul.f32 %v5753_v60, %v5665_v44  ;;  %v2403_v30 = vor.u32 1.1754944e-38, %v2402_v31 }
 0x434   : > { %v2015_v11 = vmul.f32 %v4399_v20, %v2014_v57  ;;  %v1994_v23 = vsel %vm1993_vm7, %v3247_v5, %v1990_v26  ;;  %v2407_v46 = vmul.f32 %v5774_v21, %v5681_v39  ;;  %3256 = vrcp.f32 %v5772_v17  ;;  %v2649_v57 = vld [vmem:[#allocation9 + $0x168] sm:$0xff] }
 0x435   : > { %v1999_v34 = vsel %vm1996_vm14, %v1998_v55, %v1994_v23  ;;  %v5788_v25 = vpop.eup %3254  ;;  %v2374_v33 = vsel %vm5719_vm0, %v5505_v43, %v2369_v35  ;;  %v2359_v20 = vsel %vm5725_vm5, %v5672_v4, %v2354_v27  ;;  %vm2401_vm3 = vcmp.eq.f32.partialorder %v2400_v42, 8.507059e+37  ;;  %v6357_v43 = vld [vmem:[#allocation38_spill] sm:$0xff] }
 0x436   : > { %2055 = vst [vmem:[#allocation1 + $0x7] ss:$9 sm:$0xff] %v2015_v11  ;;  %v2000_v5 = vmul.f32 %v4389_v29, %v1999_v34  ;;  %v2404_v0 = vsel %vm2401_vm3, %v2403_v30, %v2399_v28  ;;  %v2424_v8 = vmul.f32 %v5712_v59, %v2423_v32  ;;  %v2430_v61 = vand.u32 2147483647, %v5581_v52  ;;  %v6358_v29 = vld [vmem:[#allocation46_spill] sm:$0xff]  ;;  %v5842_v32 = vpop.xlane.xlu2 %2281  ;;  %v2634_v30 = vld [vmem:[#allocation9 + $0xf0] sm:$0xff] }
 0x437   : > { %3258 = vrcp.f32 %v5780_v56  ;;  %v2330_v45 = vmul.f32 %v6356_v51, %v5540_v24  ;;  %v2315_v35 = vmul.f32 %v6357_v43, %v5660_v7  ;;  %v2432_v37 = vand.u32 2147483648, %v5581_v52  ;;  %v6359_v24 = vld [vmem:[#allocation42_spill] sm:$0xff]  ;;  %v6360_v7 = vld [vmem:[#allocation41_spill] sm:$0xff] }
 0x438   : > { %2054 = vst [vmem:[#allocation1 + $0x6] ss:$9 sm:$0xff] %v2000_v5  ;;  %v2468_v4 = vsub.f32 1.0, %v2467_v12  ;;  %v5809_v47 = vmul.f32 %v6358_v29, %v5691_v54  ;;  %v2477_v53 = vand.u32 2147483648, %v5665_v44  ;;  %v2408_v58 = vsub.f32 1.0, %v2407_v46  ;;  %v2635_v12 = vld [vmem:[#allocation9 + $0xf8] sm:$0xff] }
 0x439   : > { %v2437_v40 = vmul.f32 %v5788_v25, %v5733_v13  ;;  %v5815_v62 = vmul.f32 %v6359_v24, %v2374_v33  ;;  %v5818_v14 = vmul.f32 %v6360_v7, %v2359_v20  ;;  %v5821_v1 = vmul.f32 %v6361_v19, %v2404_v0  ;;  %2691 = vmatpush.msra.mxu1 %v2635_v12  ;;  %v2632_v29 = vld [vmem:[#allocation9 + $0xe0] sm:$0xff]  ;;  %v2631_v19 = vld [vmem:[#allocation9 + $0xd8] sm:$0xff]  ;;  %v2629_v12 = vld [vmem:[#allocation9 + $0xc8] sm:$0xff] }
 0x43a   : > { %vm2426_vm10 = vweird.f32 %v5581_v52  ;;  %v5824_v2 = vpop.eup %3256  ;;  %v2425_v54 = vadd.f32 %v5712_v59, %v2424_v8  ;;  %vm2427_vm0 = vweird.f32 %v5712_v59  ;;  %vm5828_vm5 = vcmp.eq.f32.partialorder %v2430_v61, 8.507059e+37  ;;  %v2647_v61 = vld [vmem:[#allocation9 + $0x158] sm:$0xff] }
 0x43b   : > { %3260 = vrcp.f32 %v5805_v18  ;;  %v2433_v27 = vor.u32 1.1754944e-38, %v2432_v37  ;;  %v2469_v42 = vmul.f32 %v5753_v60, %v2468_v4  ;;  %vm2471_vm4 = vweird.f32 %v5665_v44  ;;  %vm5846_vm6 = vmor %vm2426_vm10, %vm2427_vm0  ;;  %2692 = vmatpush.msra.mxu1 %v2634_v30  ;;  %v2648_v30 = vld [vmem:[#allocation9 + $0x160] sm:$0xff] }
 0x43c   : > { %v2475_v31 = vand.u32 2147483647, %v5665_v44  ;;  %v5838_v22 = vor.u32 1.1754944e-38, %v2477_v53  ;;  %v2409_v6 = vmul.f32 %v5774_v21, %v2408_v58  ;;  %v2415_v26 = vand.u32 2147483647, %v5681_v39 }
 0x43d   : > { %v5836_v16 = vpop.eup %3258  ;;  %v2438_v28 = vsub.f32 1.0, %v2437_v40  ;;  %vm2411_vm8 = vweird.f32 %v5681_v39  ;;  %v2417_v55 = vand.u32 2147483648, %v5681_v39  ;;  %v2512_v11 = vmul.f32 %v5824_v2, %v5772_v17 }
 0x43e   : > { %v2452_v23 = vmul.f32 %v5836_v16, %v5780_v56  ;;  %v2429_v52 = vsel %vm5846_vm6, %v5712_v59, %v2425_v54  ;;  %vm2441_vm11 = vweird.f32 %v5733_v13  ;;  %v2445_v34 = vand.u32 2147483647, %v5733_v13  ;;  %v2633_v59 = vld [vmem:[#allocation9 + $0xe8] sm:$0xff]  ;;  %v2651_v54 = vld [vmem:[#allocation9 + $0x178] sm:$0xff] }
 0x43f   : > { %v2447_v46 = vand.u32 2147483648, %v5733_v13  ;;  %v2056_v33 = vld [vmem:[#allocation1] sm:$0xff]  ;;  %v5863_v20 = vadd.f32 %v5753_v60, %v2469_v42  ;;  %vm2472_vm12 = vweird.f32 %v5753_v60  ;;  %3262 = vrcp.f32 %v5842_v32  ;;  %2693 = vmatpush.msra.mxu1 %v2633_v59  ;;  %2714 = vmatpush.msra.mxu2 %v2651_v54  ;;  %v2666_v13 = vld [vmem:[#allocation9 + $0x1f0] sm:$0xff] }
 0x440   : > { %v2453_v5 = vsub.f32 1.0, %v2452_v23  ;;  %2909 = vmatmul.msk.f32.gmra.mxu1 %vm1036_vm9, %v2056_v33  ;;  %2542 = vst [vmem:[#allocation1] ss:$9 sm:$0xff] %v5449_v38  ;;  %v2410_v8 = vadd.f32 %v5774_v21, %v2409_v6  ;;  %vm2412_vm13 = vweird.f32 %v5774_v21  ;;  %vm5873_vm15 = vcmp.eq.f32.partialorder %v2415_v26, 8.507059e+37  ;;  %vm5889_vm1 = vmor %vm2471_vm4, %vm2472_vm12 }
 0x441   : > { %v5869_v0 = vpop.eup %3260  ;;  %v2439_v51 = vmul.f32 %v5788_v25, %v2438_v28  ;;  %2544 = vst [vmem:[#allocation1 + $0x1] ss:$9 sm:$0xff] %v2315_v35  ;;  %v2418_v43 = vor.u32 1.1754944e-38, %v2417_v55  ;;  %v2513_v37 = vsub.f32 1.0, %v2512_v11  ;;  %v5883_v53 = vsel %vm5828_vm5, %v2433_v27, %v2429_v52  ;;  %vm5909_vm7 = vmor %vm2411_vm8, %vm2412_vm13  ;;  %2694 = vmatpush.msra.mxu1 %v2632_v29  ;;  %v2626_v35 = vld [vmem:[#allocation9 + $0xb0] sm:$0xff] }
 0x442   : > { %v2454_v4 = vmul.f32 %v5836_v16, %v2453_v5  ;;  %v2482_v38 = vmul.f32 %v5869_v0, %v5805_v18  ;;  %2546 = vst [vmem:[#allocation1 + $0x2] ss:$9 sm:$0xff] %v2330_v45  ;;  %vm5893_vm2 = vcmp.eq.f32.partialorder %v2445_v34, 8.507059e+37  ;;  %v5897_v40 = vor.u32 1.1754944e-38, %v2447_v46  ;;  %v2660_v46 = vld [vmem:[#allocation9 + $0x1c0] sm:$0xff] }
 0x443   : > { %v2520_v45 = vand.u32 2147483647, %v5772_v17  ;;  %2548 = vst [vmem:[#allocation1 + $0x3] ss:$9 sm:$0xff] %v5485_v41  ;;  %v2474_v44 = vsel %vm5889_vm1, %v5753_v60, %v5863_v20  ;;  %vm2442_vm14 = vweird.f32 %v5788_v25  ;;  %vm2516_vm3 = vweird.f32 %v5772_v17  ;;  %2695 = vmatpush.msra.mxu1 %v2631_v19 }
 0x444   : > { %v2522_v41 = vand.u32 2147483648, %v5772_v17  ;;  %v2483_v7 = vsub.f32 1.0, %v2482_v38  ;;  %2550 = vst [vmem:[#allocation1 + $0x4] ss:$9 sm:$0xff] %v5818_v14  ;;  %vm5917_vm10 = vcmp.eq.f32.partialorder %v2475_v31, 8.507059e+37  ;;  %v2414_v39 = vsel %vm5909_vm7, %v5774_v21, %v2410_v8  ;;  %v2650_v14 = vld [vmem:[#allocation9 + $0x170] sm:$0xff]  ;;  %vm5939_vm4 = vmor %vm2441_vm11, %vm2442_vm14 }
 0x445   : > { %v2440_v27 = vadd.f32 %v5788_v25, %v2439_v51  ;;  %vm2457_vm0 = vweird.f32 %v5836_v16  ;;  %v2462_v42 = vand.u32 2147483648, %v5780_v56  ;;  %2552 = vst [vmem:[#allocation1 + $0x5] ss:$9 sm:$0xff] %v5815_v62  ;;  %v5928_v6 = vpop.eup %3262  ;;  %v2514_v31 = vmul.f32 %v5824_v2, %v2513_v37  ;;  %v2630_v21 = vld [vmem:[#allocation9 + $0xd0] sm:$0xff]  ;;  %2715 = vmatpush.msra.mxu2 %v2650_v14  ;;  %v2628_v8 = vld [vmem:[#allocation9 + $0xc0] sm:$0xff]  ;;  %v2637_v62 = vld [vmem:[#allocation9 + $0x108] sm:$0xff] }
 0x446   : > { %v2455_v26 = vadd.f32 %v5836_v16, %v2454_v4  ;;  %v2484_v28 = vmul.f32 %v5869_v0, %v2483_v7  ;;  %vm2487_vm5 = vweird.f32 %v5869_v0  ;;  %2554 = vst [vmem:[#allocation1 + $0x6] ss:$9 sm:$0xff] %v5809_v47  ;;  %vm2456_vm6 = vweird.f32 %v5780_v56  ;;  %2696 = vmatpush.msra.mxu1 %v2630_v21  ;;  %v2644_v14 = vld [vmem:[#allocation9 + $0x140] sm:$0xff]  ;;  %v2639_v21 = vld [vmem:[#allocation9 + $0x118] sm:$0xff] }
 0x447   : > { %v2460_v55 = vand.u32 2147483647, %v5780_v56  ;;  %v2492_v11 = vand.u32 2147483648, %v5805_v18  ;;  %v2497_v23 = vmul.f32 %v5928_v6, %v5842_v32  ;;  %2556 = vst [vmem:[#allocation1 + $0x7] ss:$9 sm:$0xff] %v5821_v1  ;;  %vm2517_vm8 = vweird.f32 %v5824_v2  ;;  %vm5952_vm11 = vmor %vm2456_vm6, %vm2457_vm0  ;;  %2716 = vmatpush.msra.mxu2 %v2649_v57  ;;  %v2624_v17 = vld [vmem:[#allocation9 + $0xa0] sm:$0xff] }
 0x448   : > { %v2485_v47 = vadd.f32 %v5869_v0, %v2484_v28  ;;  %vm2486_vm12 = vweird.f32 %v5805_v18  ;;  %v2490_v56 = vand.u32 2147483647, %v5805_v18  ;;  %v2419_v1 = vsel %vm5873_vm15, %v2418_v43, %v2414_v39  ;;  %2697 = vmatpush.msra.mxu1 %v2629_v12  ;;  %vm5989_vm0 = vmor %vm2516_vm3, %vm2517_vm8  ;;  %v2620_v28 = vld [vmem:[#allocation9 + $0x80] sm:$0xff]  ;;  %v2638_v57 = vld [vmem:[#allocation9 + $0x110] sm:$0xff] }
 0x449   : > { %v2444_v52 = vsel %vm5939_vm4, %v5788_v25, %v2440_v27  ;;  %v2463_v34 = vor.u32 1.1754944e-38, %v2462_v42  ;;  %vm5966_vm13 = vmor %vm2486_vm12, %vm2487_vm5  ;;  %v2498_v33 = vsub.f32 1.0, %v2497_v23  ;;  %v2515_v18 = vadd.f32 %v5824_v2, %v2514_v31  ;;  %2717 = vmatpush.msra.mxu2 %v2648_v30  ;;  %v2621_v31 = vld [vmem:[#allocation9 + $0x88] sm:$0xff]  ;;  %v2667_v23 = vld [vmem:[#allocation9 + $0x1f8] sm:$0xff] }
 0x44a   : > { %v2459_v5 = vsel %vm5952_vm11, %v5836_v16, %v2455_v26  ;;  %v2489_v25 = vsel %vm5966_vm13, %v5869_v0, %v2485_v47  ;;  %v2507_v59 = vand.u32 2147483648, %v5842_v32  ;;  %v2493_v51 = vor.u32 1.1754944e-38, %v2492_v11  ;;  %v2627_v0 = vld [vmem:[#allocation9 + $0xb8] sm:$0xff]  ;;  %2698 = vmatpush.msra.mxu1 %v2628_v8  ;;  %v2640_v26 = vld [vmem:[#allocation9 + $0x120] sm:$0xff]  ;;  %2737 = vmatpush.msra.mxu3 %v2667_v23  ;;  %v2665_v47 = vld [vmem:[#allocation9 + $0x1e8] sm:$0xff] }
 0x44b   : > { %v2499_v43 = vmul.f32 %v5928_v6, %v2498_v33  ;;  %vm2502_vm15 = vweird.f32 %v5928_v6  ;;  %v2505_v37 = vand.u32 2147483647, %v5842_v32  ;;  %v2420_v4 = vmul.f32 %v4407_v10, %v2419_v1  ;;  %2718 = vmatpush.msra.mxu2 %v2647_v61  ;;  %v2646_v10 = vld [vmem:[#allocation9 + $0x150] sm:$0xff]  ;;  %v2663_v12 = vld [vmem:[#allocation9 + $0x1d8] sm:$0xff]  ;;  %v2661_v1 = vld [vmem:[#allocation9 + $0x1c8] sm:$0xff] }
 0x44c   : > { %v2449_v16 = vsel %vm5893_vm2, %v5897_v40, %v2444_v52  ;;  %vm2461_vm7 = vcmp.eq.f32.partialorder %v2460_v55, 8.507059e+37  ;;  %vm2491_vm14 = vcmp.eq.f32.partialorder %v2490_v56, 8.507059e+37  ;;  %vm2501_vm5 = vweird.f32 %v5842_v32  ;;  %2699 = vmatpush.msra.mxu1 %v2627_v0  ;;  %v2636_v55 = vld [vmem:[#allocation9 + $0x100] sm:$0xff]  ;;  %2738 = vmatpush.msra.mxu3 %v2666_v13  ;;  %v2662_v30 = vld [vmem:[#allocation9 + $0x1d0] sm:$0xff]  ;;  %v2659_v33 = vld [vmem:[#allocation9 + $0x1b8] sm:$0xff] }
 0x44d   : > { %v2464_v29 = vsel %vm2461_vm7, %v2463_v34, %v2459_v5  ;;  %v2494_v24 = vsel %vm2491_vm14, %v2493_v51, %v2489_v25  ;;  %v2500_v7 = vadd.f32 %v5928_v6, %v2499_v43  ;;  %v2435_v58 = vmul.f32 %v4411_v49, %v5883_v53  ;;  %vm6010_vm2 = vmor %vm2501_vm5, %vm2502_vm15  ;;  %2719 = vmatpush.msra.mxu2 %v2646_v10  ;;  %v2664_v56 = vld [vmem:[#allocation9 + $0x1e0] sm:$0xff]  ;;  %v2657_v5 = vld [vmem:[#allocation9 + $0x1a8] sm:$0xff] }
 0x44e   : > { %v2479_v40 = vsel %vm5917_vm10, %v5838_v22, %v2474_v44  ;;  %v2519_v19 = vsel %vm5989_vm0, %v5824_v2, %v2515_v18  ;;  %v2508_v49 = vor.u32 1.1754944e-38, %v2507_v59  ;;  %v2557_v53 = vld [vmem:[#allocation1] sm:$0xff]  ;;  %v2450_v54 = vmul.f32 %v4448_v9, %v2449_v16  ;;  %2700 = vmatpush.msra.mxu1 %v2626_v35  ;;  %2739 = vmatpush.msra.mxu3 %v2665_v47  ;;  %v2658_v18 = vld [vmem:[#allocation9 + $0x1b0] sm:$0xff]  ;;  %v2656_v25 = vld [vmem:[#allocation9 + $0x1a0] sm:$0xff] }
 0x44f   : > { %v2523_v60 = vor.u32 1.1754944e-38, %v2522_v41  ;;  %v2504_v22 = vsel %vm6010_vm2, %v5928_v6, %v2500_v7  ;;  %vm2506_vm1 = vcmp.eq.f32.partialorder %v2505_v37, 8.507059e+37  ;;  %2910 = vmatmul.msk.f32.vlgmr.msrb.gmra.mxu3 %vm1036_vm9, %v2557_v53  ;;  %2558 = vst [vmem:[#allocation1] ss:$9 sm:$0xff] %v2420_v4  ;;  %v2645_v2 = vld [vmem:[#allocation9 + $0x148] sm:$0xff]  ;;  %vm2521_vm3 = vcmp.eq.f32.partialorder %v2520_v45, 8.507059e+37 }
 0x450   : > { %v2465_v20 = vmul.f32 %v4443_v36, %v2464_v29  ;;  %v2495_v9 = vmul.f32 %v4468_v3, %v2494_v24  ;;  %v2509_v44 = vsel %vm2506_vm1, %v2508_v49, %v2504_v22  ;;  %2559 = vst [vmem:[#allocation1 + $0x1] ss:$9 sm:$0xff] %v2435_v58  ;;  %v2625_v41 = vld [vmem:[#allocation9 + $0xa8] sm:$0xff]  ;;  %v2480_v48 = vmul.f32 %v4453_v50, %v2479_v40  ;;  %v2643_v36 = vld [vmem:[#allocation9 + $0x138] sm:$0xff]  ;;  %v2642_v50 = vld [vmem:[#allocation9 + $0x130] sm:$0xff] }
 0x451   : > { %v2524_v39 = vsel %vm2521_vm3, %v2523_v60, %v2519_v19  ;;  %v2510_v27 = vmul.f32 %v4458_v15, %v2509_v44  ;;  %2560 = vst [vmem:[#allocation1 + $0x2] ss:$9 sm:$0xff] %v2450_v54  ;;  %2720 = vmatpush.msra.mxu2 %v2645_v2  ;;  %2701 = vmatpush.msra.mxu1 %v2625_v41  ;;  %v2623_v45 = vld [vmem:[#allocation9 + $0x98] sm:$0xff]  ;;  %v2622_v15 = vld [vmem:[#allocation9 + $0x90] sm:$0xff]  ;;  %v2641_v6 = vld [vmem:[#allocation9 + $0x128] sm:$0xff] }
 0x452   : > { %2561 = vst [vmem:[#allocation1 + $0x3] ss:$9 sm:$0xff] %v2465_v20  ;;  %v2525_v3 = vmul.f32 %v4478_v63, %v2524_v39  ;;  %2740 = vmatpush.msra.mxu3 %v2664_v56  ;;  %v2655_v59 = vld [vmem:[#allocation9 + $0x198] sm:$0xff]  ;;  %v2654_v8 = vld [vmem:[#allocation9 + $0x190] sm:$0xff]  ;;  %v2653_v61 = vld [vmem:[#allocation9 + $0x188] sm:$0xff] }
 0x453   : > { %2562 = vst [vmem:[#allocation1 + $0x4] ss:$9 sm:$0xff] %v2480_v48  ;;  %2721 = vmatpush.msra.mxu2 %v2644_v14  ;;  %2702 = vmatpush.msra.mxu1 %v2624_v17  ;;  %v2652_v51 = vld [vmem:[#allocation9 + $0x180] sm:$0xff] }
 0x454   : > { %2563 = vst [vmem:[#allocation1 + $0x5] ss:$9 sm:$0xff] %v2495_v9  ;;  %2741 = vmatpush.msra.mxu3 %v2663_v12 }
 0x455   : > { %2564 = vst [vmem:[#allocation1 + $0x6] ss:$9 sm:$0xff] %v2510_v27  ;;  %2722 = vmatpush.msra.mxu2 %v2643_v36  ;;  %2703 = vmatpush.msra.mxu1 %v2623_v45 }
 0x456   : > { %v1061_v42 = vpop.f32.mrf.mxu1  ;;  %2565 = vst [vmem:[#allocation1 + $0x7] ss:$9 sm:$0xff] %v2525_v3  ;;  %2742 = vmatpush.msra.mxu3 %v2662_v30 }
 0x457   : > { %2687 = vmatmul.f32.gmra.mxu0 %v1061_v42  ;;  %2723 = vmatpush.msra.mxu2 %v2642_v50 }
 0x458   : > { %2704 = vmatpush.msra.mxu1 %v2622_v15  ;;  %2743 = vmatpush.msra.mxu3 %v2661_v1 }
 0x459   : > { %2724 = vmatpush.msra.mxu2 %v2641_v6 }
 0x45a   : > { %2705 = vmatpush.msra.mxu1 %v2621_v31  ;;  %2744 = vmatpush.msra.mxu3 %v2660_v46 }
 0x45b   : > { %2725 = vmatpush.msra.mxu2 %v2640_v26 }
 0x45c   : > { %2706 = vmatpush.msra.mxu1 %v2620_v28  ;;  %2745 = vmatpush.msra.mxu3 %v2659_v33 }
 0x45d   : > { %v2566_v63 = vld [vmem:[#allocation1] sm:$0xff]  ;;  %2726 = vmatpush.msra.mxu2 %v2639_v21 }
 0x45e   : > { %2911 = vmatmul.msk.f32.gmra.mxu3 %vm1036_vm9, %v2566_v63 }
 0x45f   : > { %2727 = vmatpush.msra.mxu2 %v2638_v57  ;;  %2746 = vmatpush.msra.mxu3 %v2658_v18 }
 0x461   : > { %2728 = vmatpush.msra.mxu2 %v2637_v62  ;;  %2747 = vmatpush.msra.mxu3 %v2657_v5 }
 0x463   : > { %2729 = vmatpush.msra.mxu2 %v2636_v55  ;;  %2748 = vmatpush.msra.mxu3 %v2656_v25 }
 0x465   : > { %2749 = vmatpush.msra.mxu3 %v2655_v59 }
 0x467   : > { %2750 = vmatpush.msra.mxu3 %v2654_v8 }
 0x469   : > { %2751 = vmatpush.msra.mxu3 %v2653_v61 }
 0x46b   : > { %v1568_v11 = vpop.f32.mrf.mxu3  ;;  %2752 = vmatpush.msra.mxu3 %v2652_v51 }
 0x46c   : > { %2707 = vmatmul.f32.vlgmr.msra.gmra.mxu1 %v1568_v11 }
 0x47a   : > { %v1571_v52 = vpop.f32.mrf.mxu3 }
 0x47b   : > { %2710 = vmatmul.f32.gmra.mxu1 %v1571_v52 }
 0x48b   : > { %v2078_v34 = vpop.f32.mrf.mxu1 }
 0x48c   : > { %2730 = vmatmul.f32.vlgmr.msra.gmra.mxu2 %v2078_v34 }
 0x4a8   : > { %v2685_v0 = vpop.f32.mrf.mxu0 }
 0x4bd   : > { %v2081_v43 = vpop.f32.mrf.mxu1 }
 0x4be   : > { %2733 = vmatmul.f32.gmra.mxu2 %v2081_v43 }
 0x4d2   : > { %v2588_v37 = vpop.f32.mrf.mxu3 }
 0x4d3   : > { %2753 = vmatmul.f32.vlgmr.msra.gmra.mxu3 %v2588_v37 }
 0x4d4   : > { %v2688_v40 = vpop.f32.mrf.mxu0 }
 0x4e1   : > { %v2591_v4 = vpop.f32.mrf.mxu3 }
 0x4e2   : > { %2756 = vmatmul.f32.gmra.mxu3 %v2591_v4 }
 0x4e9   : > { %v2708_v16 = vpop.f32.mrf.mxu1 }
 0x4ea   : > { %v2709_v29 = vadd.f32 %v2708_v16, %v2685_v0 }
 0x4f8   : > { %v2711_v58 = vpop.f32.mrf.mxu1 }
 0x4f9   : > { %v2712_v32 = vadd.f32 %v2711_v58, %v2688_v40 }
 0x50f   : > { %v2731_v38 = vpop.f32.mrf.mxu2 }
 0x510   : > { %v2732_v24 = vadd.f32 %v2731_v38, %v2709_v29 }
 0x541   : > { %v2734_v19 = vpop.f32.mrf.mxu2 }
 0x542   : > { %v2735_v49 = vadd.f32 %v2734_v19, %v2712_v32 }
 0x556   : > { %v2754_v7 = vpop.f32.mrf.mxu3 }
 0x557   : > { %v2755_v10 = vadd.f32 %v2754_v7, %v2732_v24 }
 0x559   : > { %2760 = vst [vmem:[%s318_s27] sm:$0xff] %v2755_v10 }
 0x565   : > { %v2757_v53 = vpop.f32.mrf.mxu3 }
 0x566   : > { %v2758_v35 = vadd.f32 %v2757_v53, %v2735_v49 }
 0x568   : > { %2761 = vst [vmem:[%s318_s27 + $0x8] sm:$0xff] %v2758_v35 }
 0x569   : > { %3411 = shalt.err (!%p3408_p9)
}
 0x56a   : > { %s3472_s4 = smov 128   ;;  %s3473_s26 = smov 8  }
 0x56b   : > { %2932 = dma.vmem_to_hbm [thread:$0]  (%p3591_p0), %s2776_s18, 256, %s2778_s10, %s2763_s0, %s3472_s4, %s3472_s4, %s3473_s26  }
 0x56c PF: > { %s2792_s7 = sand.u32 1, %s3450_s21   ;;  %p6386_p10 = scmp.ge.s32.totalorder %s3462_s24, 2 }
 0x56d   : > { %s2793_s27 = scalar_lea.sflag [#allocation5], %s2792_s7 }
 0x56e   : > { %p2949_p11 = pnand %p6386_p10, %p3597_p7 }
 0x570   : > { %p2950_p12 = pneg %p2949_p11 }
 0x572   : > { %3445 = dma.done.wait (%p2950_p12), %s2793_s27, 256  }
 0x573   : > { %3447 = vsyncadd (%p2950_p12), %s2793_s27, 4294967040  ;;  %p21_p3 = scmp.ge.s32.totalorder %s3566_s30, 4   ;;  %s6387_s21 = smov %s3454_s22 }
 0x574   : > { %s6388_s22 = smov %s3458_s23  ;;  %s6389_s23 = smov %s3577_s9 }
 0x575   : > { %s6390_s24 = smov %s3566_s30  ;;  %23 = sbr.rel (!%p21_p3) target bundleno = 10 (0xa), region = 133 }
 0x57a   :  { %2799 = vsyncpa [#allocation4], 1 }
 0x57b   :  { %2801 = vsyncpa [#allocation4 + $0x1], 1 }
 0x57c   :  { %2802 = vsyncpa [#allocation7], 1 }
 0x57d   :  { %2804 = vsyncpa [#allocation7 + $0x1], 1 }
 0x57e   :  { %2805 = vsyncpa [#allocation10], 1 }
 0x57f   :  { %2806 = vsyncpa [#allocation5], 1 }
 0x580   :  { %2808 = vsyncpa [#allocation5 + $0x1], 1 }

</bundles_post_ra>
